<compile_context>
chip_gen: v6e
topology: v6e:2x2x1
jax: 0.10.0
libtpu: 0.0.40
codegen_flags: <defaults>
</compile_context>

<pallas_src>
import jax
import jax.numpy as jnp
from jax.experimental import pallas as pl
from jax.experimental.pallas import tpu as pltpu

_BN_EPS = 1e-5
_LANE = 128
_SUBLANE = 8
_ACC_ELEMS = 32 * 1024          # per-strip f32 accumulator budget (~32 vregs)


def _round_up(x, m):
    return (x + m - 1) // m * m


# ---------------------------------------------------------------------------
# Fused kernel factory.  Frame geometry (all static Python ints):
#   Wp = round_up(W + 2, 8), frame rows = H + 4, NF = (H + 4) * Wp
#   image pixel (i, j)  <->  flat frame index (i + 2) * Wp + (j + 1)
# Refs:
#   xp_ref : (NF, C) bf16   zero-padded input frame (flattened)
#   w1_ref : (9, C, C) bf16 conv1 weights, BN1 scale folded, taps (dy, dx)
#   b1_ref : (1, C) f32     folded BN1 bias
#   w2_ref : (9, C, C) bf16 conv2 weights, BN2 scale folded
#   b2_ref : (1, C) f32     folded BN2 bias
#   o_ref  : (H, W, C)      block output
#   y1_ref : (NF, C) bf16   VMEM scratch: conv1 output frame (zero halo/ring)
# ---------------------------------------------------------------------------
def _make_kernel(H, W, C, Wp, R, compute_dtype):

    def kernel(xp_ref, w1_ref, b1_ref, w2_ref, b2_ref, o_ref, y1_ref):
        # Column-interior mask (frame cols 1..W are real image columns).
        col = jax.lax.broadcasted_iota(jnp.int32, (Wp, C), 0)
        col_ok = (col >= 1) & (col <= W)

        # Zero the 4 top/bottom halo(+slack) rows of the y1 frame -- this IS
        # conv2's zero padding.  Done every grid step (megacore-safe).
        zero_rows = jnp.zeros((2 * Wp, C), compute_dtype)
        y1_ref[0:2 * Wp, :] = zero_rows
        y1_ref[(H + 2) * Wp:(H + 4) * Wp, :] = zero_rows

        def conv9(src_ref, w_ref, base, rows):
            # 3x3 conv over a row strip as 9 accumulated MXU matmuls whose
            # LHS are contiguous flat slices (no strided im2col copies).
            acc = jnp.zeros((rows * Wp, C), jnp.float32)
            for dy in range(3):
                for dx in range(3):
                    off = (dy - 1) * Wp + (dx - 1)
                    tap = src_ref[pl.ds(base + off, rows * Wp), :]
                    acc = acc + jnp.dot(tap, w_ref[dy * 3 + dx],
                                        preferred_element_type=jnp.float32)
            return acc

        # ---- conv1 (BN1 folded) + ReLU, strip by strip, into the y1 frame ----
        r0 = 0
        while r0 < H:                       # static Python loop (unrolled)
            rows = min(R, H - r0)
            base = (r0 + 2) * Wp            # frame row = image row + 2
            acc = conv9(xp_ref, w1_ref, base, rows)
            y1 = jnp.maximum(acc + b1_ref[...], 0.0)
            # Zero the ring columns (cols 0 and >= W+1): conv2's side padding.
            y1 = jnp.where(col_ok, y1.reshape(rows, Wp, C), 0.0)
            y1_ref[pl.ds(base, rows * Wp), :] = (
                y1.reshape(rows * Wp, C).astype(compute_dtype))
            r0 += rows

        # ---- conv2 (BN2 folded) + residual + ReLU, strip by strip ----------
        r0 = 0
        while r0 < H:
            rows = min(R, H - r0)
            base = (r0 + 2) * Wp
            acc = conv9(y1_ref, w2_ref, base, rows)
            # Residual = same flat positions of the input frame (aligned slice).
            resid = xp_ref[pl.ds(base, rows * Wp), :].astype(jnp.float32)
            out = jnp.maximum(acc + b2_ref[...] + resid, 0.0)
            out = out.reshape(rows, Wp, C)[:, 1:1 + W, :]   # drop padded cols
            o_ref[r0:r0 + rows, :, :] = out.astype(o_ref.dtype)
            r0 += rows

    return kernel


# ---------------------------------------------------------------------------
# NHWC wrapper (preferred entry point; avoids layout transposes).
# ---------------------------------------------------------------------------
def basic_block_forward_nhwc(x_nhwc, params, *, stride=1, downsample=None,
                             compute_dtype=jnp.bfloat16, out_dtype=None):
    if stride != 1 or downsample is not None:
        # TODO(synk): stride>1 / downsample path of BasicBlock not implemented.
        raise NotImplementedError("only stride=1, downsample=None is supported")

    N, H, W, Cin = x_nhwc.shape
    w1, w2 = params["w1_hwio"], params["w2_hwio"]
    Cout = w1.shape[-1]
    if Cin != w1.shape[2] or Cin != Cout or w2.shape[2] != Cout or w2.shape[3] != Cout:
        raise NotImplementedError(
            "stride=1 / downsample=None BasicBlock requires inplanes == planes")
    out_dtype = x_nhwc.dtype if out_dtype is None else out_dtype

    C = _round_up(Cout, _LANE)              # lane-dense channel dim
    Wp = _round_up(W + 2, _SUBLANE)         # padded frame width (mult of 8)
    Hf = H + 4                              # 1 halo + 1 slack row each side
    NF = Hf * Wp
    R = max(1, min(H, _ACC_ELEMS // (Wp * C)))   # rows per strip

    # Build the zero-padded frame and flatten its spatial dims (layout-free
    # reshape since Wp % 8 == 0 and C % 128 == 0).
    xp = jnp.pad(x_nhwc, ((0, 0), (2, 2), (1, Wp - W - 1), (0, C - Cin)))
    xp = xp.astype(compute_dtype).reshape(N, NF, C)

    def fold(w_hwio, scale, bias, cin):
        wf = w_hwio * scale[None, None, None, :]     # fold BN scale into weights
        wf = jnp.pad(wf, ((0, 0), (0, 0), (0, C - cin), (0, C - Cout)))
        wf = wf.reshape(9, C, C).astype(compute_dtype)
        bf = jnp.pad(bias, (0, C - Cout)).reshape(1, C).astype(jnp.float32)
        return wf, bf

    w1f, b1f = fold(w1, params["scale1"], params["bias1"], Cin)
    w2f, b2f = fold(w2, params["scale2"], params["bias2"], Cout)

    # VMEM budget: double-buffered in/out, resident weights, y1 scratch, and
    # the strip working set.  Cap at ~80% of physical VMEM (v7x: 64 MiB/core).
    bpe = jnp.dtype(compute_dtype).itemsize
    est = (2 * NF * C * bpe                                   # input frame x2
           + 2 * H * W * C * jnp.dtype(out_dtype).itemsize    # output tile x2
           + 2 * (2 * 9 * C * C * bpe + 2 * C * 4)            # weights + biases
           + NF * C * bpe                                     # y1 scratch
           + 4 * R * Wp * C * 4)                              # strip temporaries
    try:
        cap = int(pltpu.get_tpu_info().vmem_capacity_bytes)
    except Exception:
        cap = 64 * 2 ** 20
    vmem_limit = int(min(max(2 * est, 32 * 2 ** 20), int(0.8 * cap)))
    vmem_limit = max(vmem_limit, int(1.25 * est))

    kernel = _make_kernel(H, W, C, Wp, R, compute_dtype)

    out = pl.pallas_call(
        kernel,
        out_shape=jax.ShapeDtypeStruct((N, H, W, C), out_dtype),
        grid=(N,),
        in_specs=[
            pl.BlockSpec((None, NF, C), lambda n: (n, 0, 0)),
            pl.BlockSpec((9, C, C), lambda n: (0, 0, 0)),
            pl.BlockSpec((1, C), lambda n: (0, 0)),
            pl.BlockSpec((9, C, C), lambda n: (0, 0, 0)),
            pl.BlockSpec((1, C), lambda n: (0, 0)),
        ],
        out_specs=pl.BlockSpec((None, H, W, C), lambda n: (n, 0, 0, 0)),
        scratch_shapes=[pltpu.VMEM((NF, C), compute_dtype)],
        compiler_params=pltpu.CompilerParams(
            dimension_semantics=("parallel",),
            vmem_limit_bytes=vmem_limit,
        ),
    )(xp, w1f, b1f, w2f, b2f)

    # Strip channel padding (no-op for Cout % 128 == 0 stages).
    return out if C == Cout else out[..., :Cout]


# ---------------------------------------------------------------------------
# PyTorch-layout (NCHW) wrapper matching the original module signature.
# (Production callers should prefer the NHWC entry point to avoid transposes.)
# ---------------------------------------------------------------------------
def basic_block_forward(x_nchw, params, *, compute_dtype=jnp.bfloat16):
    x = jnp.transpose(x_nchw, (0, 2, 3, 1))          # NCHW -> NHWC
    out = basic_block_forward_nhwc(x, params, compute_dtype=compute_dtype)
    return jnp.transpose(out, (0, 3, 1, 2))          # NHWC -> NCHW


# ---------------------------------------------------------------------------
# Deterministic parameter construction (synthetic, BN in eval mode folded).
# ---------------------------------------------------------------------------
def make_params(key, inplanes, planes):
    ks = jax.random.split(key, 10)

    def conv_w(k, cin, cout):
        w_oihw = jax.random.normal(k, (cout, cin, 3, 3), jnp.float32) * 0.1
        return jnp.transpose(w_oihw, (2, 3, 1, 0))   # OIHW -> HWIO

    def bn(kg, kb, km, kv, c):
        gamma = 1.0 + 0.1 * jax.random.normal(kg, (c,), jnp.float32)
        beta = 0.1 * jax.random.normal(kb, (c,), jnp.float32)
        mean = 0.1 * jax.random.normal(km, (c,), jnp.float32)
        var = jax.random.uniform(kv, (c,), jnp.float32, 0.5, 1.5)
        scale = gamma / jnp.sqrt(var + _BN_EPS)
        bias = beta - mean * scale
        return scale, bias

    w1 = conv_w(ks[0], inplanes, planes)
    w2 = conv_w(ks[1], planes, planes)
    s1, b1 = bn(ks[2], ks[3], ks[4], ks[5], planes)
    s2, b2 = bn(ks[6], ks[7], ks[8], ks[9], planes)
    return dict(w1_hwio=w1, scale1=s1, bias1=b1,
                w2_hwio=w2, scale2=s2, bias2=b2)


# ---------------------------------------------------------------------------
# Pure-JAX reference (lax.conv) for correctness checking.
# ---------------------------------------------------------------------------
def reference_basic_block(x_nchw, params):
    x = jnp.transpose(x_nchw, (0, 2, 3, 1))

    def conv(v, w):
        return jax.lax.conv_general_dilated(
            v, w, window_strides=(1, 1), padding=((1, 1), (1, 1)),
            dimension_numbers=("NHWC", "HWIO", "NHWC"))

    out = conv(x, params["w1_hwio"]) * params["scale1"] + params["bias1"]
    out = jnp.maximum(out, 0.0)
    out = conv(out, params["w2_hwio"]) * params["scale2"] + params["bias2"]
    out = jnp.maximum(out + x, 0.0)
    return jnp.transpose(out, (0, 3, 1, 2))


if __name__ == "__main__":
    key = jax.random.PRNGKey(0)
    k_x, k_p = jax.random.split(key)

    N, C, H, W = 2, 4, 16, 16            # inplanes = planes = 4, stride = 1
    x = jax.random.normal(k_x, (N, C, H, W), jnp.float32)
    params = make_params(k_p, inplanes=C, planes=C)

    fwd = jax.jit(basic_block_forward)
    out = jax.block_until_ready(fwd(x, params))

    ref = reference_basic_block(x, params)
    assert out.shape == (N, C, H, W)
    # bf16 matmul inputs (f32 accumulation) + bf16 residual -> loose tolerance.
    assert jnp.allclose(out, ref, rtol=5e-2, atol=5e-2), (
        float(jnp.max(jnp.abs(out - ref))))

    print("KERNEL_OK")
</pallas_src>

<mosaic_0001>
module attributes {stable_mosaic.version = 11 : i64} {
  func.func @kernel(%arg0: i32, %arg1: memref<1x480x128xbf16, #tpu.memory_space<vmem>>, %arg2: memref<9x128x128xbf16, #tpu.memory_space<vmem>>, %arg3: memref<1x128xf32, #tpu.memory_space<vmem>>, %arg4: memref<9x128x128xbf16, #tpu.memory_space<vmem>>, %arg5: memref<1x128xf32, #tpu.memory_space<vmem>>, %arg6: memref<1x16x16x128xf32, #tpu.memory_space<vmem>>, %arg7: memref<480x128xbf16, #tpu.memory_space<vmem>>) attributes {dimension_semantics = [#tpu.dimension_semantics<parallel>], iteration_bounds = array<i64: 2>, scalar_prefetch = 0 : i64, scratch_operands = 1 : i64, tpu.core_type = #tpu.core_type<tc>, window_params = [{transform_indices = @transform_0, window_bounds = array<i64: 1, 480, 128>}, {pipeline_mode = #tpu.pipeline_mode<synchronous>, transform_indices = @transform_1, window_bounds = array<i64: 9, 128, 128>}, {pipeline_mode = #tpu.pipeline_mode<synchronous>, transform_indices = @transform_2, window_bounds = array<i64: 1, 128>}, {pipeline_mode = #tpu.pipeline_mode<synchronous>, transform_indices = @transform_3, window_bounds = array<i64: 9, 128, 128>}, {pipeline_mode = #tpu.pipeline_mode<synchronous>, transform_indices = @transform_4, window_bounds = array<i64: 1, 128>}, {transform_indices = @transform_5, window_bounds = array<i64: 1, 16, 16, 128>}]} {
    %0 = tpu.iota {dimensions = array<i32: 0>} : vector<24x128xi32>
    %c1_i32 = arith.constant 1 : i32
    %1 = vector.broadcast %c1_i32 : i32 to vector<24x128xi32>
    %2 = arith.cmpi sge, %0, %1 : vector<24x128xi32>
    %c16_i32 = arith.constant 16 : i32
    %3 = vector.broadcast %c16_i32 : i32 to vector<24x128xi32>
    %4 = arith.cmpi sle, %0, %3 : vector<24x128xi32>
    %5 = arith.andi %2, %4 : vector<24x128xi1>
    %cst = arith.constant 0.000000e+00 : bf16
    %6 = vector.broadcast %cst : bf16 to vector<48x128xbf16>
    %c0 = arith.constant 0 : index
    %c0_0 = arith.constant 0 : index
    %7 = vector.load %arg7[%c0, %c0_0] : memref<480x128xbf16, #tpu.memory_space<vmem>>, vector<48x128xbf16>
    tpu.vector_store %arg7[%c0, %c0_0], %6 {strides = array<i32>} : memref<480x128xbf16, #tpu.memory_space<vmem>>, vector<48x128xbf16>,
    %c432 = arith.constant 432 : index
    %c0_1 = arith.constant 0 : index
    %8 = vector.load %arg7[%c432, %c0_1] : memref<480x128xbf16, #tpu.memory_space<vmem>>, vector<48x128xbf16>
    tpu.vector_store %arg7[%c432, %c0_1], %6 {strides = array<i32>} : memref<480x128xbf16, #tpu.memory_space<vmem>>, vector<48x128xbf16>,
    %cst_2 = arith.constant 0.000000e+00 : f32
    %9 = vector.broadcast %cst_2 : f32 to vector<240x128xf32>
    %c0_3 = arith.constant 0 : index
    %c23 = arith.constant 23 : index
    %c0_4 = arith.constant 0 : index
    %10 = vector.load %arg1[%c0_3, %c23, %c0_4] : memref<1x480x128xbf16, #tpu.memory_space<vmem>>, vector<1x240x128xbf16>
    %11 = vector.shape_cast %10 : vector<1x240x128xbf16> to vector<240x128xbf16>
    %c0_5 = arith.constant 0 : index
    %c0_6 = arith.constant 0 : index
    %c0_7 = arith.constant 0 : index
    %12 = vector.load %arg2[%c0_5, %c0_6, %c0_7] : memref<9x128x128xbf16, #tpu.memory_space<vmem>>, vector<1x128x128xbf16>
    %13 = vector.shape_cast %12 : vector<1x128x128xbf16> to vector<128x128xbf16>
    %cst_8 = arith.constant dense<0.000000e+00> : vector<240x128xf32>
    %14 = tpu.matmul %11, %13, %cst_8 {dimension_numbers = #tpu.dot_dimension_numbers<[1], [0], [0], [1], [0, 0, 1, 1], [], []>} : vector<240x128xbf16>, vector<128x128xbf16>, vector<240x128xf32> -> vector<240x128xf32>
    %15 = arith.addf %9, %14 : vector<240x128xf32>
    %c0_9 = arith.constant 0 : index
    %c24 = arith.constant 24 : index
    %c0_10 = arith.constant 0 : index
    %16 = vector.load %arg1[%c0_9, %c24, %c0_10] : memref<1x480x128xbf16, #tpu.memory_space<vmem>>, vector<1x240x128xbf16>
    %17 = vector.shape_cast %16 : vector<1x240x128xbf16> to vector<240x128xbf16>
    %c1 = arith.constant 1 : index
    %c0_11 = arith.constant 0 : index
    %c0_12 = arith.constant 0 : index
    %18 = vector.load %arg2[%c1, %c0_11, %c0_12] : memref<9x128x128xbf16, #tpu.memory_space<vmem>>, vector<1x128x128xbf16>
    %19 = vector.shape_cast %18 : vector<1x128x128xbf16> to vector<128x128xbf16>
    %cst_13 = arith.constant dense<0.000000e+00> : vector<240x128xf32>
    %20 = tpu.matmul %17, %19, %cst_13 {dimension_numbers = #tpu.dot_dimension_numbers<[1], [0], [0], [1], [0, 0, 1, 1], [], []>} : vector<240x128xbf16>, vector<128x128xbf16>, vector<240x128xf32> -> vector<240x128xf32>
    %21 = arith.addf %15, %20 : vector<240x128xf32>
    %c0_14 = arith.constant 0 : index
    %c25 = arith.constant 25 : index
    %c0_15 = arith.constant 0 : index
    %22 = vector.load %arg1[%c0_14, %c25, %c0_15] : memref<1x480x128xbf16, #tpu.memory_space<vmem>>, vector<1x240x128xbf16>
    %23 = vector.shape_cast %22 : vector<1x240x128xbf16> to vector<240x128xbf16>
    %c2 = arith.constant 2 : index
    %c0_16 = arith.constant 0 : index
    %c0_17 = arith.constant 0 : index
    %24 = vector.load %arg2[%c2, %c0_16, %c0_17] : memref<9x128x128xbf16, #tpu.memory_space<vmem>>, vector<1x128x128xbf16>
    %25 = vector.shape_cast %24 : vector<1x128x128xbf16> to vector<128x128xbf16>
    %cst_18 = arith.constant dense<0.000000e+00> : vector<240x128xf32>
    %26 = tpu.matmul %23, %25, %cst_18 {dimension_numbers = #tpu.dot_dimension_numbers<[1], [0], [0], [1], [0, 0, 1, 1], [], []>} : vector<240x128xbf16>, vector<128x128xbf16>, vector<240x128xf32> -> vector<240x128xf32>
    %27 = arith.addf %21, %26 : vector<240x128xf32>
    %c0_19 = arith.constant 0 : index
    %c47 = arith.constant 47 : index
    %c0_20 = arith.constant 0 : index
    %28 = vector.load %arg1[%c0_19, %c47, %c0_20] : memref<1x480x128xbf16, #tpu.memory_space<vmem>>, vector<1x240x128xbf16>
    %29 = vector.shape_cast %28 : vector<1x240x128xbf16> to vector<240x128xbf16>
    %c3 = arith.constant 3 : index
    %c0_21 = arith.constant 0 : index
    %c0_22 = arith.constant 0 : index
    %30 = vector.load %arg2[%c3, %c0_21, %c0_22] : memref<9x128x128xbf16, #tpu.memory_space<vmem>>, vector<1x128x128xbf16>
    %31 = vector.shape_cast %30 : vector<1x128x128xbf16> to vector<128x128xbf16>
    %cst_23 = arith.constant dense<0.000000e+00> : vector<240x128xf32>
    %32 = tpu.matmul %29, %31, %cst_23 {dimension_numbers = #tpu.dot_dimension_numbers<[1], [0], [0], [1], [0, 0, 1, 1], [], []>} : vector<240x128xbf16>, vector<128x128xbf16>, vector<240x128xf32> -> vector<240x128xf32>
    %33 = arith.addf %27, %32 : vector<240x128xf32>
    %c0_24 = arith.constant 0 : index
    %c48 = arith.constant 48 : index
    %c0_25 = arith.constant 0 : index
    %34 = vector.load %arg1[%c0_24, %c48, %c0_25] : memref<1x480x128xbf16, #tpu.memory_space<vmem>>, vector<1x240x128xbf16>
    %35 = vector.shape_cast %34 : vector<1x240x128xbf16> to vector<240x128xbf16>
    %c4 = arith.constant 4 : index
    %c0_26 = arith.constant 0 : index
    %c0_27 = arith.constant 0 : index
    %36 = vector.load %arg2[%c4, %c0_26, %c0_27] : memref<9x128x128xbf16, #tpu.memory_space<vmem>>, vector<1x128x128xbf16>
    %37 = vector.shape_cast %36 : vector<1x128x128xbf16> to vector<128x128xbf16>
    %cst_28 = arith.constant dense<0.000000e+00> : vector<240x128xf32>
    %38 = tpu.matmul %35, %37, %cst_28 {dimension_numbers = #tpu.dot_dimension_numbers<[1], [0], [0], [1], [0, 0, 1, 1], [], []>} : vector<240x128xbf16>, vector<128x128xbf16>, vector<240x128xf32> -> vector<240x128xf32>
    %39 = arith.addf %33, %38 : vector<240x128xf32>
    %c0_29 = arith.constant 0 : index
    %c49 = arith.constant 49 : index
    %c0_30 = arith.constant 0 : index
    %40 = vector.load %arg1[%c0_29, %c49, %c0_30] : memref<1x480x128xbf16, #tpu.memory_space<vmem>>, vector<1x240x128xbf16>
    %41 = vector.shape_cast %40 : vector<1x240x128xbf16> to vector<240x128xbf16>
    %c5 = arith.constant 5 : index
    %c0_31 = arith.constant 0 : index
    %c0_32 = arith.constant 0 : index
    %42 = vector.load %arg2[%c5, %c0_31, %c0_32] : memref<9x128x128xbf16, #tpu.memory_space<vmem>>, vector<1x128x128xbf16>
    %43 = vector.shape_cast %42 : vector<1x128x128xbf16> to vector<128x128xbf16>
    %cst_33 = arith.constant dense<0.000000e+00> : vector<240x128xf32>
    %44 = tpu.matmul %41, %43, %cst_33 {dimension_numbers = #tpu.dot_dimension_numbers<[1], [0], [0], [1], [0, 0, 1, 1], [], []>} : vector<240x128xbf16>, vector<128x128xbf16>, vector<240x128xf32> -> vector<240x128xf32>
    %45 = arith.addf %39, %44 : vector<240x128xf32>
    %c0_34 = arith.constant 0 : index
    %c71 = arith.constant 71 : index
    %c0_35 = arith.constant 0 : index
    %46 = vector.load %arg1[%c0_34, %c71, %c0_35] : memref<1x480x128xbf16, #tpu.memory_space<vmem>>, vector<1x240x128xbf16>
    %47 = vector.shape_cast %46 : vector<1x240x128xbf16> to vector<240x128xbf16>
    %c6 = arith.constant 6 : index
    %c0_36 = arith.constant 0 : index
    %c0_37 = arith.constant 0 : index
    %48 = vector.load %arg2[%c6, %c0_36, %c0_37] : memref<9x128x128xbf16, #tpu.memory_space<vmem>>, vector<1x128x128xbf16>
    %49 = vector.shape_cast %48 : vector<1x128x128xbf16> to vector<128x128xbf16>
    %cst_38 = arith.constant dense<0.000000e+00> : vector<240x128xf32>
    %50 = tpu.matmul %47, %49, %cst_38 {dimension_numbers = #tpu.dot_dimension_numbers<[1], [0], [0], [1], [0, 0, 1, 1], [], []>} : vector<240x128xbf16>, vector<128x128xbf16>, vector<240x128xf32> -> vector<240x128xf32>
    %51 = arith.addf %45, %50 : vector<240x128xf32>
    %c0_39 = arith.constant 0 : index
    %c72 = arith.constant 72 : index
    %c0_40 = arith.constant 0 : index
    %52 = vector.load %arg1[%c0_39, %c72, %c0_40] : memref<1x480x128xbf16, #tpu.memory_space<vmem>>, vector<1x240x128xbf16>
    %53 = vector.shape_cast %52 : vector<1x240x128xbf16> to vector<240x128xbf16>
    %c7 = arith.constant 7 : index
    %c0_41 = arith.constant 0 : index
    %c0_42 = arith.constant 0 : index
    %54 = vector.load %arg2[%c7, %c0_41, %c0_42] : memref<9x128x128xbf16, #tpu.memory_space<vmem>>, vector<1x128x128xbf16>
    %55 = vector.shape_cast %54 : vector<1x128x128xbf16> to vector<128x128xbf16>
    %cst_43 = arith.constant dense<0.000000e+00> : vector<240x128xf32>
    %56 = tpu.matmul %53, %55, %cst_43 {dimension_numbers = #tpu.dot_dimension_numbers<[1], [0], [0], [1], [0, 0, 1, 1], [], []>} : vector<240x128xbf16>, vector<128x128xbf16>, vector<240x128xf32> -> vector<240x128xf32>
    %57 = arith.addf %51, %56 : vector<240x128xf32>
    %c0_44 = arith.constant 0 : index
    %c73 = arith.constant 73 : index
    %c0_45 = arith.constant 0 : index
    %58 = vector.load %arg1[%c0_44, %c73, %c0_45] : memref<1x480x128xbf16, #tpu.memory_space<vmem>>, vector<1x240x128xbf16>
    %59 = vector.shape_cast %58 : vector<1x240x128xbf16> to vector<240x128xbf16>
    %c8 = arith.constant 8 : index
    %c0_46 = arith.constant 0 : index
    %c0_47 = arith.constant 0 : index
    %60 = vector.load %arg2[%c8, %c0_46, %c0_47] : memref<9x128x128xbf16, #tpu.memory_space<vmem>>, vector<1x128x128xbf16>
    %61 = vector.shape_cast %60 : vector<1x128x128xbf16> to vector<128x128xbf16>
    %cst_48 = arith.constant dense<0.000000e+00> : vector<240x128xf32>
    %62 = tpu.matmul %59, %61, %cst_48 {dimension_numbers = #tpu.dot_dimension_numbers<[1], [0], [0], [1], [0, 0, 1, 1], [], []>} : vector<240x128xbf16>, vector<128x128xbf16>, vector<240x128xf32> -> vector<240x128xf32>
    %63 = arith.addf %57, %62 : vector<240x128xf32>
    %c0_49 = arith.constant 0 : index
    %c0_50 = arith.constant 0 : index
    %64 = vector.load %arg3[%c0_49, %c0_50] : memref<1x128xf32, #tpu.memory_space<vmem>>, vector<1x128xf32>
    %65 = vector.broadcast %64 : vector<1x128xf32> to vector<240x128xf32>
    %66 = arith.addf %63, %65 : vector<240x128xf32>
    %cst_51 = arith.constant 0.000000e+00 : f32
    %67 = vector.broadcast %cst_51 : f32 to vector<240x128xf32>
    %68 = arith.maximumf %66, %67 : vector<240x128xf32>
    %69 = vector.shape_cast %68 : vector<240x128xf32> to vector<10x24x128xf32>
    %cst_52 = arith.constant 0.000000e+00 : f32
    %70 = vector.shape_cast %5 : vector<24x128xi1> to vector<1x24x128xi1>
    %71 = vector.broadcast %70 : vector<1x24x128xi1> to vector<10x24x128xi1>
    %72 = vector.broadcast %cst_52 : f32 to vector<10x24x128xf32>
    %73 = arith.select %71, %69, %72 : vector<10x24x128xi1>, vector<10x24x128xf32>
    %74 = vector.shape_cast %73 : vector<10x24x128xf32> to vector<240x128xf32>
    %75 = arith.truncf %74 : vector<240x128xf32> to vector<240x128xbf16>
    %c48_53 = arith.constant 48 : index
    %c0_54 = arith.constant 0 : index
    %76 = vector.load %arg7[%c48_53, %c0_54] : memref<480x128xbf16, #tpu.memory_space<vmem>>, vector<240x128xbf16>
    tpu.vector_store %arg7[%c48_53, %c0_54], %75 {strides = array<i32>} : memref<480x128xbf16, #tpu.memory_space<vmem>>, vector<240x128xbf16>,
    %cst_55 = arith.constant 0.000000e+00 : f32
    %77 = vector.broadcast %cst_55 : f32 to vector<144x128xf32>
    %c0_56 = arith.constant 0 : index
    %c263 = arith.constant 263 : index
    %c0_57 = arith.constant 0 : index
    %78 = vector.load %arg1[%c0_56, %c263, %c0_57] : memref<1x480x128xbf16, #tpu.memory_space<vmem>>, vector<1x144x128xbf16>
    %79 = vector.shape_cast %78 : vector<1x144x128xbf16> to vector<144x128xbf16>
    %c0_58 = arith.constant 0 : index
    %c0_59 = arith.constant 0 : index
    %c0_60 = arith.constant 0 : index
    %80 = vector.load %arg2[%c0_58, %c0_59, %c0_60] : memref<9x128x128xbf16, #tpu.memory_space<vmem>>, vector<1x128x128xbf16>
    %81 = vector.shape_cast %80 : vector<1x128x128xbf16> to vector<128x128xbf16>
    %cst_61 = arith.constant dense<0.000000e+00> : vector<144x128xf32>
    %82 = tpu.matmul %79, %81, %cst_61 {dimension_numbers = #tpu.dot_dimension_numbers<[1], [0], [0], [1], [0, 0, 1, 1], [], []>} : vector<144x128xbf16>, vector<128x128xbf16>, vector<144x128xf32> -> vector<144x128xf32>
    %83 = arith.addf %77, %82 : vector<144x128xf32>
    %c0_62 = arith.constant 0 : index
    %c264 = arith.constant 264 : index
    %c0_63 = arith.constant 0 : index
    %84 = vector.load %arg1[%c0_62, %c264, %c0_63] : memref<1x480x128xbf16, #tpu.memory_space<vmem>>, vector<1x144x128xbf16>
    %85 = vector.shape_cast %84 : vector<1x144x128xbf16> to vector<144x128xbf16>
    %c1_64 = arith.constant 1 : index
    %c0_65 = arith.constant 0 : index
    %c0_66 = arith.constant 0 : index
    %86 = vector.load %arg2[%c1_64, %c0_65, %c0_66] : memref<9x128x128xbf16, #tpu.memory_space<vmem>>, vector<1x128x128xbf16>
    %87 = vector.shape_cast %86 : vector<1x128x128xbf16> to vector<128x128xbf16>
    %cst_67 = arith.constant dense<0.000000e+00> : vector<144x128xf32>
    %88 = tpu.matmul %85, %87, %cst_67 {dimension_numbers = #tpu.dot_dimension_numbers<[1], [0], [0], [1], [0, 0, 1, 1], [], []>} : vector<144x128xbf16>, vector<128x128xbf16>, vector<144x128xf32> -> vector<144x128xf32>
    %89 = arith.addf %83, %88 : vector<144x128xf32>
    %c0_68 = arith.constant 0 : index
    %c265 = arith.constant 265 : index
    %c0_69 = arith.constant 0 : index
    %90 = vector.load %arg1[%c0_68, %c265, %c0_69] : memref<1x480x128xbf16, #tpu.memory_space<vmem>>, vector<1x144x128xbf16>
    %91 = vector.shape_cast %90 : vector<1x144x128xbf16> to vector<144x128xbf16>
    %c2_70 = arith.constant 2 : index
    %c0_71 = arith.constant 0 : index
    %c0_72 = arith.constant 0 : index
    %92 = vector.load %arg2[%c2_70, %c0_71, %c0_72] : memref<9x128x128xbf16, #tpu.memory_space<vmem>>, vector<1x128x128xbf16>
    %93 = vector.shape_cast %92 : vector<1x128x128xbf16> to vector<128x128xbf16>
    %cst_73 = arith.constant dense<0.000000e+00> : vector<144x128xf32>
    %94 = tpu.matmul %91, %93, %cst_73 {dimension_numbers = #tpu.dot_dimension_numbers<[1], [0], [0], [1], [0, 0, 1, 1], [], []>} : vector<144x128xbf16>, vector<128x128xbf16>, vector<144x128xf32> -> vector<144x128xf32>
    %95 = arith.addf %89, %94 : vector<144x128xf32>
    %c0_74 = arith.constant 0 : index
    %c287 = arith.constant 287 : index
    %c0_75 = arith.constant 0 : index
    %96 = vector.load %arg1[%c0_74, %c287, %c0_75] : memref<1x480x128xbf16, #tpu.memory_space<vmem>>, vector<1x144x128xbf16>
    %97 = vector.shape_cast %96 : vector<1x144x128xbf16> to vector<144x128xbf16>
    %c3_76 = arith.constant 3 : index
    %c0_77 = arith.constant 0 : index
    %c0_78 = arith.constant 0 : index
    %98 = vector.load %arg2[%c3_76, %c0_77, %c0_78] : memref<9x128x128xbf16, #tpu.memory_space<vmem>>, vector<1x128x128xbf16>
    %99 = vector.shape_cast %98 : vector<1x128x128xbf16> to vector<128x128xbf16>
    %cst_79 = arith.constant dense<0.000000e+00> : vector<144x128xf32>
    %100 = tpu.matmul %97, %99, %cst_79 {dimension_numbers = #tpu.dot_dimension_numbers<[1], [0], [0], [1], [0, 0, 1, 1], [], []>} : vector<144x128xbf16>, vector<128x128xbf16>, vector<144x128xf32> -> vector<144x128xf32>
    %101 = arith.addf %95, %100 : vector<144x128xf32>
    %c0_80 = arith.constant 0 : index
    %c288 = arith.constant 288 : index
    %c0_81 = arith.constant 0 : index
    %102 = vector.load %arg1[%c0_80, %c288, %c0_81] : memref<1x480x128xbf16, #tpu.memory_space<vmem>>, vector<1x144x128xbf16>
    %103 = vector.shape_cast %102 : vector<1x144x128xbf16> to vector<144x128xbf16>
    %c4_82 = arith.constant 4 : index
    %c0_83 = arith.constant 0 : index
    %c0_84 = arith.constant 0 : index
    %104 = vector.load %arg2[%c4_82, %c0_83, %c0_84] : memref<9x128x128xbf16, #tpu.memory_space<vmem>>, vector<1x128x128xbf16>
    %105 = vector.shape_cast %104 : vector<1x128x128xbf16> to vector<128x128xbf16>
    %cst_85 = arith.constant dense<0.000000e+00> : vector<144x128xf32>
    %106 = tpu.matmul %103, %105, %cst_85 {dimension_numbers = #tpu.dot_dimension_numbers<[1], [0], [0], [1], [0, 0, 1, 1], [], []>} : vector<144x128xbf16>, vector<128x128xbf16>, vector<144x128xf32> -> vector<144x128xf32>
    %107 = arith.addf %101, %106 : vector<144x128xf32>
    %c0_86 = arith.constant 0 : index
    %c289 = arith.constant 289 : index
    %c0_87 = arith.constant 0 : index
    %108 = vector.load %arg1[%c0_86, %c289, %c0_87] : memref<1x480x128xbf16, #tpu.memory_space<vmem>>, vector<1x144x128xbf16>
    %109 = vector.shape_cast %108 : vector<1x144x128xbf16> to vector<144x128xbf16>
    %c5_88 = arith.constant 5 : index
    %c0_89 = arith.constant 0 : index
    %c0_90 = arith.constant 0 : index
    %110 = vector.load %arg2[%c5_88, %c0_89, %c0_90] : memref<9x128x128xbf16, #tpu.memory_space<vmem>>, vector<1x128x128xbf16>
    %111 = vector.shape_cast %110 : vector<1x128x128xbf16> to vector<128x128xbf16>
    %cst_91 = arith.constant dense<0.000000e+00> : vector<144x128xf32>
    %112 = tpu.matmul %109, %111, %cst_91 {dimension_numbers = #tpu.dot_dimension_numbers<[1], [0], [0], [1], [0, 0, 1, 1], [], []>} : vector<144x128xbf16>, vector<128x128xbf16>, vector<144x128xf32> -> vector<144x128xf32>
    %113 = arith.addf %107, %112 : vector<144x128xf32>
    %c0_92 = arith.constant 0 : index
    %c311 = arith.constant 311 : index
    %c0_93 = arith.constant 0 : index
    %114 = vector.load %arg1[%c0_92, %c311, %c0_93] : memref<1x480x128xbf16, #tpu.memory_space<vmem>>, vector<1x144x128xbf16>
    %115 = vector.shape_cast %114 : vector<1x144x128xbf16> to vector<144x128xbf16>
    %c6_94 = arith.constant 6 : index
    %c0_95 = arith.constant 0 : index
    %c0_96 = arith.constant 0 : index
    %116 = vector.load %arg2[%c6_94, %c0_95, %c0_96] : memref<9x128x128xbf16, #tpu.memory_space<vmem>>, vector<1x128x128xbf16>
    %117 = vector.shape_cast %116 : vector<1x128x128xbf16> to vector<128x128xbf16>
    %cst_97 = arith.constant dense<0.000000e+00> : vector<144x128xf32>
    %118 = tpu.matmul %115, %117, %cst_97 {dimension_numbers = #tpu.dot_dimension_numbers<[1], [0], [0], [1], [0, 0, 1, 1], [], []>} : vector<144x128xbf16>, vector<128x128xbf16>, vector<144x128xf32> -> vector<144x128xf32>
    %119 = arith.addf %113, %118 : vector<144x128xf32>
    %c0_98 = arith.constant 0 : index
    %c312 = arith.constant 312 : index
    %c0_99 = arith.constant 0 : index
    %120 = vector.load %arg1[%c0_98, %c312, %c0_99] : memref<1x480x128xbf16, #tpu.memory_space<vmem>>, vector<1x144x128xbf16>
    %121 = vector.shape_cast %120 : vector<1x144x128xbf16> to vector<144x128xbf16>
    %c7_100 = arith.constant 7 : index
    %c0_101 = arith.constant 0 : index
    %c0_102 = arith.constant 0 : index
    %122 = vector.load %arg2[%c7_100, %c0_101, %c0_102] : memref<9x128x128xbf16, #tpu.memory_space<vmem>>, vector<1x128x128xbf16>
    %123 = vector.shape_cast %122 : vector<1x128x128xbf16> to vector<128x128xbf16>
    %cst_103 = arith.constant dense<0.000000e+00> : vector<144x128xf32>
    %124 = tpu.matmul %121, %123, %cst_103 {dimension_numbers = #tpu.dot_dimension_numbers<[1], [0], [0], [1], [0, 0, 1, 1], [], []>} : vector<144x128xbf16>, vector<128x128xbf16>, vector<144x128xf32> -> vector<144x128xf32>
    %125 = arith.addf %119, %124 : vector<144x128xf32>
    %c0_104 = arith.constant 0 : index
    %c313 = arith.constant 313 : index
    %c0_105 = arith.constant 0 : index
    %126 = vector.load %arg1[%c0_104, %c313, %c0_105] : memref<1x480x128xbf16, #tpu.memory_space<vmem>>, vector<1x144x128xbf16>
    %127 = vector.shape_cast %126 : vector<1x144x128xbf16> to vector<144x128xbf16>
    %c8_106 = arith.constant 8 : index
    %c0_107 = arith.constant 0 : index
    %c0_108 = arith.constant 0 : index
    %128 = vector.load %arg2[%c8_106, %c0_107, %c0_108] : memref<9x128x128xbf16, #tpu.memory_space<vmem>>, vector<1x128x128xbf16>
    %129 = vector.shape_cast %128 : vector<1x128x128xbf16> to vector<128x128xbf16>
    %cst_109 = arith.constant dense<0.000000e+00> : vector<144x128xf32>
    %130 = tpu.matmul %127, %129, %cst_109 {dimension_numbers = #tpu.dot_dimension_numbers<[1], [0], [0], [1], [0, 0, 1, 1], [], []>} : vector<144x128xbf16>, vector<128x128xbf16>, vector<144x128xf32> -> vector<144x128xf32>
    %131 = arith.addf %125, %130 : vector<144x128xf32>
    %c0_110 = arith.constant 0 : index
    %c0_111 = arith.constant 0 : index
    %132 = vector.load %arg3[%c0_110, %c0_111] : memref<1x128xf32, #tpu.memory_space<vmem>>, vector<1x128xf32>
    %133 = vector.broadcast %132 : vector<1x128xf32> to vector<144x128xf32>
    %134 = arith.addf %131, %133 : vector<144x128xf32>
    %cst_112 = arith.constant 0.000000e+00 : f32
    %135 = vector.broadcast %cst_112 : f32 to vector<144x128xf32>
    %136 = arith.maximumf %134, %135 : vector<144x128xf32>
    %137 = vector.shape_cast %136 : vector<144x128xf32> to vector<6x24x128xf32>
    %cst_113 = arith.constant 0.000000e+00 : f32
    %138 = vector.shape_cast %5 : vector<24x128xi1> to vector<1x24x128xi1>
    %139 = vector.broadcast %138 : vector<1x24x128xi1> to vector<6x24x128xi1>
    %140 = vector.broadcast %cst_113 : f32 to vector<6x24x128xf32>
    %141 = arith.select %139, %137, %140 : vector<6x24x128xi1>, vector<6x24x128xf32>
    %142 = vector.shape_cast %141 : vector<6x24x128xf32> to vector<144x128xf32>
    %143 = arith.truncf %142 : vector<144x128xf32> to vector<144x128xbf16>
    %c288_114 = arith.constant 288 : index
    %c0_115 = arith.constant 0 : index
    %144 = vector.load %arg7[%c288_114, %c0_115] : memref<480x128xbf16, #tpu.memory_space<vmem>>, vector<144x128xbf16>
    tpu.vector_store %arg7[%c288_114, %c0_115], %143 {strides = array<i32>} : memref<480x128xbf16, #tpu.memory_space<vmem>>, vector<144x128xbf16>,
    %cst_116 = arith.constant 0.000000e+00 : f32
    %145 = vector.broadcast %cst_116 : f32 to vector<240x128xf32>
    %c23_117 = arith.constant 23 : index
    %c0_118 = arith.constant 0 : index
    %146 = vector.load %arg7[%c23_117, %c0_118] : memref<480x128xbf16, #tpu.memory_space<vmem>>, vector<240x128xbf16>
    %c0_119 = arith.constant 0 : index
    %c0_120 = arith.constant 0 : index
    %c0_121 = arith.constant 0 : index
    %147 = vector.load %arg4[%c0_119, %c0_120, %c0_121] : memref<9x128x128xbf16, #tpu.memory_space<vmem>>, vector<1x128x128xbf16>
    %148 = vector.shape_cast %147 : vector<1x128x128xbf16> to vector<128x128xbf16>
    %cst_122 = arith.constant dense<0.000000e+00> : vector<240x128xf32>
    %149 = tpu.matmul %146, %148, %cst_122 {dimension_numbers = #tpu.dot_dimension_numbers<[1], [0], [0], [1], [0, 0, 1, 1], [], []>} : vector<240x128xbf16>, vector<128x128xbf16>, vector<240x128xf32> -> vector<240x128xf32>
    %150 = arith.addf %145, %149 : vector<240x128xf32>
    %c24_123 = arith.constant 24 : index
    %c0_124 = arith.constant 0 : index
    %151 = vector.load %arg7[%c24_123, %c0_124] : memref<480x128xbf16, #tpu.memory_space<vmem>>, vector<240x128xbf16>
    %c1_125 = arith.constant 1 : index
    %c0_126 = arith.constant 0 : index
    %c0_127 = arith.constant 0 : index
    %152 = vector.load %arg4[%c1_125, %c0_126, %c0_127] : memref<9x128x128xbf16, #tpu.memory_space<vmem>>, vector<1x128x128xbf16>
    %153 = vector.shape_cast %152 : vector<1x128x128xbf16> to vector<128x128xbf16>
    %cst_128 = arith.constant dense<0.000000e+00> : vector<240x128xf32>
    %154 = tpu.matmul %151, %153, %cst_128 {dimension_numbers = #tpu.dot_dimension_numbers<[1], [0], [0], [1], [0, 0, 1, 1], [], []>} : vector<240x128xbf16>, vector<128x128xbf16>, vector<240x128xf32> -> vector<240x128xf32>
    %155 = arith.addf %150, %154 : vector<240x128xf32>
    %c25_129 = arith.constant 25 : index
    %c0_130 = arith.constant 0 : index
    %156 = vector.load %arg7[%c25_129, %c0_130] : memref<480x128xbf16, #tpu.memory_space<vmem>>, vector<240x128xbf16>
    %c2_131 = arith.constant 2 : index
    %c0_132 = arith.constant 0 : index
    %c0_133 = arith.constant 0 : index
    %157 = vector.load %arg4[%c2_131, %c0_132, %c0_133] : memref<9x128x128xbf16, #tpu.memory_space<vmem>>, vector<1x128x128xbf16>
    %158 = vector.shape_cast %157 : vector<1x128x128xbf16> to vector<128x128xbf16>
    %cst_134 = arith.constant dense<0.000000e+00> : vector<240x128xf32>
    %159 = tpu.matmul %156, %158, %cst_134 {dimension_numbers = #tpu.dot_dimension_numbers<[1], [0], [0], [1], [0, 0, 1, 1], [], []>} : vector<240x128xbf16>, vector<128x128xbf16>, vector<240x128xf32> -> vector<240x128xf32>
    %160 = arith.addf %155, %159 : vector<240x128xf32>
    %c47_135 = arith.constant 47 : index
    %c0_136 = arith.constant 0 : index
    %161 = vector.load %arg7[%c47_135, %c0_136] : memref<480x128xbf16, #tpu.memory_space<vmem>>, vector<240x128xbf16>
    %c3_137 = arith.constant 3 : index
    %c0_138 = arith.constant 0 : index
    %c0_139 = arith.constant 0 : index
    %162 = vector.load %arg4[%c3_137, %c0_138, %c0_139] : memref<9x128x128xbf16, #tpu.memory_space<vmem>>, vector<1x128x128xbf16>
    %163 = vector.shape_cast %162 : vector<1x128x128xbf16> to vector<128x128xbf16>
    %cst_140 = arith.constant dense<0.000000e+00> : vector<240x128xf32>
    %164 = tpu.matmul %161, %163, %cst_140 {dimension_numbers = #tpu.dot_dimension_numbers<[1], [0], [0], [1], [0, 0, 1, 1], [], []>} : vector<240x128xbf16>, vector<128x128xbf16>, vector<240x128xf32> -> vector<240x128xf32>
    %165 = arith.addf %160, %164 : vector<240x128xf32>
    %c48_141 = arith.constant 48 : index
    %c0_142 = arith.constant 0 : index
    %166 = vector.load %arg7[%c48_141, %c0_142] : memref<480x128xbf16, #tpu.memory_space<vmem>>, vector<240x128xbf16>
    %c4_143 = arith.constant 4 : index
    %c0_144 = arith.constant 0 : index
    %c0_145 = arith.constant 0 : index
    %167 = vector.load %arg4[%c4_143, %c0_144, %c0_145] : memref<9x128x128xbf16, #tpu.memory_space<vmem>>, vector<1x128x128xbf16>
    %168 = vector.shape_cast %167 : vector<1x128x128xbf16> to vector<128x128xbf16>
    %cst_146 = arith.constant dense<0.000000e+00> : vector<240x128xf32>
    %169 = tpu.matmul %166, %168, %cst_146 {dimension_numbers = #tpu.dot_dimension_numbers<[1], [0], [0], [1], [0, 0, 1, 1], [], []>} : vector<240x128xbf16>, vector<128x128xbf16>, vector<240x128xf32> -> vector<240x128xf32>
    %170 = arith.addf %165, %169 : vector<240x128xf32>
    %c49_147 = arith.constant 49 : index
    %c0_148 = arith.constant 0 : index
    %171 = vector.load %arg7[%c49_147, %c0_148] : memref<480x128xbf16, #tpu.memory_space<vmem>>, vector<240x128xbf16>
    %c5_149 = arith.constant 5 : index
    %c0_150 = arith.constant 0 : index
    %c0_151 = arith.constant 0 : index
    %172 = vector.load %arg4[%c5_149, %c0_150, %c0_151] : memref<9x128x128xbf16, #tpu.memory_space<vmem>>, vector<1x128x128xbf16>
    %173 = vector.shape_cast %172 : vector<1x128x128xbf16> to vector<128x128xbf16>
    %cst_152 = arith.constant dense<0.000000e+00> : vector<240x128xf32>
    %174 = tpu.matmul %171, %173, %cst_152 {dimension_numbers = #tpu.dot_dimension_numbers<[1], [0], [0], [1], [0, 0, 1, 1], [], []>} : vector<240x128xbf16>, vector<128x128xbf16>, vector<240x128xf32> -> vector<240x128xf32>
    %175 = arith.addf %170, %174 : vector<240x128xf32>
    %c71_153 = arith.constant 71 : index
    %c0_154 = arith.constant 0 : index
    %176 = vector.load %arg7[%c71_153, %c0_154] : memref<480x128xbf16, #tpu.memory_space<vmem>>, vector<240x128xbf16>
    %c6_155 = arith.constant 6 : index
    %c0_156 = arith.constant 0 : index
    %c0_157 = arith.constant 0 : index
    %177 = vector.load %arg4[%c6_155, %c0_156, %c0_157] : memref<9x128x128xbf16, #tpu.memory_space<vmem>>, vector<1x128x128xbf16>
    %178 = vector.shape_cast %177 : vector<1x128x128xbf16> to vector<128x128xbf16>
    %cst_158 = arith.constant dense<0.000000e+00> : vector<240x128xf32>
    %179 = tpu.matmul %176, %178, %cst_158 {dimension_numbers = #tpu.dot_dimension_numbers<[1], [0], [0], [1], [0, 0, 1, 1], [], []>} : vector<240x128xbf16>, vector<128x128xbf16>, vector<240x128xf32> -> vector<240x128xf32>
    %180 = arith.addf %175, %179 : vector<240x128xf32>
    %c72_159 = arith.constant 72 : index
    %c0_160 = arith.constant 0 : index
    %181 = vector.load %arg7[%c72_159, %c0_160] : memref<480x128xbf16, #tpu.memory_space<vmem>>, vector<240x128xbf16>
    %c7_161 = arith.constant 7 : index
    %c0_162 = arith.constant 0 : index
    %c0_163 = arith.constant 0 : index
    %182 = vector.load %arg4[%c7_161, %c0_162, %c0_163] : memref<9x128x128xbf16, #tpu.memory_space<vmem>>, vector<1x128x128xbf16>
    %183 = vector.shape_cast %182 : vector<1x128x128xbf16> to vector<128x128xbf16>
    %cst_164 = arith.constant dense<0.000000e+00> : vector<240x128xf32>
    %184 = tpu.matmul %181, %183, %cst_164 {dimension_numbers = #tpu.dot_dimension_numbers<[1], [0], [0], [1], [0, 0, 1, 1], [], []>} : vector<240x128xbf16>, vector<128x128xbf16>, vector<240x128xf32> -> vector<240x128xf32>
    %185 = arith.addf %180, %184 : vector<240x128xf32>
    %c73_165 = arith.constant 73 : index
    %c0_166 = arith.constant 0 : index
    %186 = vector.load %arg7[%c73_165, %c0_166] : memref<480x128xbf16, #tpu.memory_space<vmem>>, vector<240x128xbf16>
    %c8_167 = arith.constant 8 : index
    %c0_168 = arith.constant 0 : index
    %c0_169 = arith.constant 0 : index
    %187 = vector.load %arg4[%c8_167, %c0_168, %c0_169] : memref<9x128x128xbf16, #tpu.memory_space<vmem>>, vector<1x128x128xbf16>
    %188 = vector.shape_cast %187 : vector<1x128x128xbf16> to vector<128x128xbf16>
    %cst_170 = arith.constant dense<0.000000e+00> : vector<240x128xf32>
    %189 = tpu.matmul %186, %188, %cst_170 {dimension_numbers = #tpu.dot_dimension_numbers<[1], [0], [0], [1], [0, 0, 1, 1], [], []>} : vector<240x128xbf16>, vector<128x128xbf16>, vector<240x128xf32> -> vector<240x128xf32>
    %190 = arith.addf %185, %189 : vector<240x128xf32>
    %c0_171 = arith.constant 0 : index
    %c48_172 = arith.constant 48 : index
    %c0_173 = arith.constant 0 : index
    %191 = vector.load %arg1[%c0_171, %c48_172, %c0_173] : memref<1x480x128xbf16, #tpu.memory_space<vmem>>, vector<1x240x128xbf16>
    %192 = vector.shape_cast %191 : vector<1x240x128xbf16> to vector<240x128xbf16>
    %193 = arith.extf %192 : vector<240x128xbf16> to vector<240x128xf32>
    %c0_174 = arith.constant 0 : index
    %c0_175 = arith.constant 0 : index
    %194 = vector.load %arg5[%c0_174, %c0_175] : memref<1x128xf32, #tpu.memory_space<vmem>>, vector<1x128xf32>
    %195 = vector.broadcast %194 : vector<1x128xf32> to vector<240x128xf32>
    %196 = arith.addf %190, %195 : vector<240x128xf32>
    %197 = arith.addf %196, %193 : vector<240x128xf32>
    %cst_176 = arith.constant 0.000000e+00 : f32
    %198 = vector.broadcast %cst_176 : f32 to vector<240x128xf32>
    %199 = arith.maximumf %197, %198 : vector<240x128xf32>
    %200 = vector.shape_cast %199 : vector<240x128xf32> to vector<10x24x128xf32>
    %201 = vector.extract_strided_slice %200 {offsets = [0, 1, 0], sizes = [10, 16, 128], strides = [1, 1, 1]} : vector<10x24x128xf32> to vector<10x16x128xf32>
    %c0_177 = arith.constant 0 : index
    %c0_178 = arith.constant 0 : index
    %c0_179 = arith.constant 0 : index
    %c0_180 = arith.constant 0 : index
    %202 = vector.load %arg6[%c0_177, %c0_178, %c0_179, %c0_180] : memref<1x16x16x128xf32, #tpu.memory_space<vmem>>, vector<1x10x16x128xf32>
    %203 = vector.shape_cast %202 : vector<1x10x16x128xf32> to vector<10x16x128xf32>
    %204 = vector.shape_cast %201 : vector<10x16x128xf32> to vector<1x10x16x128xf32>
    tpu.vector_store %arg6[%c0_177, %c0_178, %c0_179, %c0_180], %204 {strides = array<i32>} : memref<1x16x16x128xf32, #tpu.memory_space<vmem>>, vector<1x10x16x128xf32>,
    %cst_181 = arith.constant 0.000000e+00 : f32
    %205 = vector.broadcast %cst_181 : f32 to vector<144x128xf32>
    %c263_182 = arith.constant 263 : index
    %c0_183 = arith.constant 0 : index
    %206 = vector.load %arg7[%c263_182, %c0_183] : memref<480x128xbf16, #tpu.memory_space<vmem>>, vector<144x128xbf16>
    %c0_184 = arith.constant 0 : index
    %c0_185 = arith.constant 0 : index
    %c0_186 = arith.constant 0 : index
    %207 = vector.load %arg4[%c0_184, %c0_185, %c0_186] : memref<9x128x128xbf16, #tpu.memory_space<vmem>>, vector<1x128x128xbf16>
    %208 = vector.shape_cast %207 : vector<1x128x128xbf16> to vector<128x128xbf16>
    %cst_187 = arith.constant dense<0.000000e+00> : vector<144x128xf32>
    %209 = tpu.matmul %206, %208, %cst_187 {dimension_numbers = #tpu.dot_dimension_numbers<[1], [0], [0], [1], [0, 0, 1, 1], [], []>} : vector<144x128xbf16>, vector<128x128xbf16>, vector<144x128xf32> -> vector<144x128xf32>
    %210 = arith.addf %205, %209 : vector<144x128xf32>
    %c264_188 = arith.constant 264 : index
    %c0_189 = arith.constant 0 : index
    %211 = vector.load %arg7[%c264_188, %c0_189] : memref<480x128xbf16, #tpu.memory_space<vmem>>, vector<144x128xbf16>
    %c1_190 = arith.constant 1 : index
    %c0_191 = arith.constant 0 : index
    %c0_192 = arith.constant 0 : index
    %212 = vector.load %arg4[%c1_190, %c0_191, %c0_192] : memref<9x128x128xbf16, #tpu.memory_space<vmem>>, vector<1x128x128xbf16>
    %213 = vector.shape_cast %212 : vector<1x128x128xbf16> to vector<128x128xbf16>
    %cst_193 = arith.constant dense<0.000000e+00> : vector<144x128xf32>
    %214 = tpu.matmul %211, %213, %cst_193 {dimension_numbers = #tpu.dot_dimension_numbers<[1], [0], [0], [1], [0, 0, 1, 1], [], []>} : vector<144x128xbf16>, vector<128x128xbf16>, vector<144x128xf32> -> vector<144x128xf32>
    %215 = arith.addf %210, %214 : vector<144x128xf32>
    %c265_194 = arith.constant 265 : index
    %c0_195 = arith.constant 0 : index
    %216 = vector.load %arg7[%c265_194, %c0_195] : memref<480x128xbf16, #tpu.memory_space<vmem>>, vector<144x128xbf16>
    %c2_196 = arith.constant 2 : index
    %c0_197 = arith.constant 0 : index
    %c0_198 = arith.constant 0 : index
    %217 = vector.load %arg4[%c2_196, %c0_197, %c0_198] : memref<9x128x128xbf16, #tpu.memory_space<vmem>>, vector<1x128x128xbf16>
    %218 = vector.shape_cast %217 : vector<1x128x128xbf16> to vector<128x128xbf16>
    %cst_199 = arith.constant dense<0.000000e+00> : vector<144x128xf32>
    %219 = tpu.matmul %216, %218, %cst_199 {dimension_numbers = #tpu.dot_dimension_numbers<[1], [0], [0], [1], [0, 0, 1, 1], [], []>} : vector<144x128xbf16>, vector<128x128xbf16>, vector<144x128xf32> -> vector<144x128xf32>
    %220 = arith.addf %215, %219 : vector<144x128xf32>
    %c287_200 = arith.constant 287 : index
    %c0_201 = arith.constant 0 : index
    %221 = vector.load %arg7[%c287_200, %c0_201] : memref<480x128xbf16, #tpu.memory_space<vmem>>, vector<144x128xbf16>
    %c3_202 = arith.constant 3 : index
    %c0_203 = arith.constant 0 : index
    %c0_204 = arith.constant 0 : index
    %222 = vector.load %arg4[%c3_202, %c0_203, %c0_204] : memref<9x128x128xbf16, #tpu.memory_space<vmem>>, vector<1x128x128xbf16>
    %223 = vector.shape_cast %222 : vector<1x128x128xbf16> to vector<128x128xbf16>
    %cst_205 = arith.constant dense<0.000000e+00> : vector<144x128xf32>
    %224 = tpu.matmul %221, %223, %cst_205 {dimension_numbers = #tpu.dot_dimension_numbers<[1], [0], [0], [1], [0, 0, 1, 1], [], []>} : vector<144x128xbf16>, vector<128x128xbf16>, vector<144x128xf32> -> vector<144x128xf32>
    %225 = arith.addf %220, %224 : vector<144x128xf32>
    %c288_206 = arith.constant 288 : index
    %c0_207 = arith.constant 0 : index
    %226 = vector.load %arg7[%c288_206, %c0_207] : memref<480x128xbf16, #tpu.memory_space<vmem>>, vector<144x128xbf16>
    %c4_208 = arith.constant 4 : index
    %c0_209 = arith.constant 0 : index
    %c0_210 = arith.constant 0 : index
    %227 = vector.load %arg4[%c4_208, %c0_209, %c0_210] : memref<9x128x128xbf16, #tpu.memory_space<vmem>>, vector<1x128x128xbf16>
    %228 = vector.shape_cast %227 : vector<1x128x128xbf16> to vector<128x128xbf16>
    %cst_211 = arith.constant dense<0.000000e+00> : vector<144x128xf32>
    %229 = tpu.matmul %226, %228, %cst_211 {dimension_numbers = #tpu.dot_dimension_numbers<[1], [0], [0], [1], [0, 0, 1, 1], [], []>} : vector<144x128xbf16>, vector<128x128xbf16>, vector<144x128xf32> -> vector<144x128xf32>
    %230 = arith.addf %225, %229 : vector<144x128xf32>
    %c289_212 = arith.constant 289 : index
    %c0_213 = arith.constant 0 : index
    %231 = vector.load %arg7[%c289_212, %c0_213] : memref<480x128xbf16, #tpu.memory_space<vmem>>, vector<144x128xbf16>
    %c5_214 = arith.constant 5 : index
    %c0_215 = arith.constant 0 : index
    %c0_216 = arith.constant 0 : index
    %232 = vector.load %arg4[%c5_214, %c0_215, %c0_216] : memref<9x128x128xbf16, #tpu.memory_space<vmem>>, vector<1x128x128xbf16>
    %233 = vector.shape_cast %232 : vector<1x128x128xbf16> to vector<128x128xbf16>
    %cst_217 = arith.constant dense<0.000000e+00> : vector<144x128xf32>
    %234 = tpu.matmul %231, %233, %cst_217 {dimension_numbers = #tpu.dot_dimension_numbers<[1], [0], [0], [1], [0, 0, 1, 1], [], []>} : vector<144x128xbf16>, vector<128x128xbf16>, vector<144x128xf32> -> vector<144x128xf32>
    %235 = arith.addf %230, %234 : vector<144x128xf32>
    %c311_218 = arith.constant 311 : index
    %c0_219 = arith.constant 0 : index
    %236 = vector.load %arg7[%c311_218, %c0_219] : memref<480x128xbf16, #tpu.memory_space<vmem>>, vector<144x128xbf16>
    %c6_220 = arith.constant 6 : index
    %c0_221 = arith.constant 0 : index
    %c0_222 = arith.constant 0 : index
    %237 = vector.load %arg4[%c6_220, %c0_221, %c0_222] : memref<9x128x128xbf16, #tpu.memory_space<vmem>>, vector<1x128x128xbf16>
    %238 = vector.shape_cast %237 : vector<1x128x128xbf16> to vector<128x128xbf16>
    %cst_223 = arith.constant dense<0.000000e+00> : vector<144x128xf32>
    %239 = tpu.matmul %236, %238, %cst_223 {dimension_numbers = #tpu.dot_dimension_numbers<[1], [0], [0], [1], [0, 0, 1, 1], [], []>} : vector<144x128xbf16>, vector<128x128xbf16>, vector<144x128xf32> -> vector<144x128xf32>
    %240 = arith.addf %235, %239 : vector<144x128xf32>
    %c312_224 = arith.constant 312 : index
    %c0_225 = arith.constant 0 : index
    %241 = vector.load %arg7[%c312_224, %c0_225] : memref<480x128xbf16, #tpu.memory_space<vmem>>, vector<144x128xbf16>
    %c7_226 = arith.constant 7 : index
    %c0_227 = arith.constant 0 : index
    %c0_228 = arith.constant 0 : index
    %242 = vector.load %arg4[%c7_226, %c0_227, %c0_228] : memref<9x128x128xbf16, #tpu.memory_space<vmem>>, vector<1x128x128xbf16>
    %243 = vector.shape_cast %242 : vector<1x128x128xbf16> to vector<128x128xbf16>
    %cst_229 = arith.constant dense<0.000000e+00> : vector<144x128xf32>
    %244 = tpu.matmul %241, %243, %cst_229 {dimension_numbers = #tpu.dot_dimension_numbers<[1], [0], [0], [1], [0, 0, 1, 1], [], []>} : vector<144x128xbf16>, vector<128x128xbf16>, vector<144x128xf32> -> vector<144x128xf32>
    %245 = arith.addf %240, %244 : vector<144x128xf32>
    %c313_230 = arith.constant 313 : index
    %c0_231 = arith.constant 0 : index
    %246 = vector.load %arg7[%c313_230, %c0_231] : memref<480x128xbf16, #tpu.memory_space<vmem>>, vector<144x128xbf16>
    %c8_232 = arith.constant 8 : index
    %c0_233 = arith.constant 0 : index
    %c0_234 = arith.constant 0 : index
    %247 = vector.load %arg4[%c8_232, %c0_233, %c0_234] : memref<9x128x128xbf16, #tpu.memory_space<vmem>>, vector<1x128x128xbf16>
    %248 = vector.shape_cast %247 : vector<1x128x128xbf16> to vector<128x128xbf16>
    %cst_235 = arith.constant dense<0.000000e+00> : vector<144x128xf32>
    %249 = tpu.matmul %246, %248, %cst_235 {dimension_numbers = #tpu.dot_dimension_numbers<[1], [0], [0], [1], [0, 0, 1, 1], [], []>} : vector<144x128xbf16>, vector<128x128xbf16>, vector<144x128xf32> -> vector<144x128xf32>
    %250 = arith.addf %245, %249 : vector<144x128xf32>
    %c0_236 = arith.constant 0 : index
    %c288_237 = arith.constant 288 : index
    %c0_238 = arith.constant 0 : index
    %251 = vector.load %arg1[%c0_236, %c288_237, %c0_238] : memref<1x480x128xbf16, #tpu.memory_space<vmem>>, vector<1x144x128xbf16>
    %252 = vector.shape_cast %251 : vector<1x144x128xbf16> to vector<144x128xbf16>
    %253 = arith.extf %252 : vector<144x128xbf16> to vector<144x128xf32>
    %c0_239 = arith.constant 0 : index
    %c0_240 = arith.constant 0 : index
    %254 = vector.load %arg5[%c0_239, %c0_240] : memref<1x128xf32, #tpu.memory_space<vmem>>, vector<1x128xf32>
    %255 = vector.broadcast %254 : vector<1x128xf32> to vector<144x128xf32>
    %256 = arith.addf %250, %255 : vector<144x128xf32>
    %257 = arith.addf %256, %253 : vector<144x128xf32>
    %cst_241 = arith.constant 0.000000e+00 : f32
    %258 = vector.broadcast %cst_241 : f32 to vector<144x128xf32>
    %259 = arith.maximumf %257, %258 : vector<144x128xf32>
    %260 = vector.shape_cast %259 : vector<144x128xf32> to vector<6x24x128xf32>
    %261 = vector.extract_strided_slice %260 {offsets = [0, 1, 0], sizes = [6, 16, 128], strides = [1, 1, 1]} : vector<6x24x128xf32> to vector<6x16x128xf32>
    %c0_242 = arith.constant 0 : index
    %c10 = arith.constant 10 : index
    %c0_243 = arith.constant 0 : index
    %c0_244 = arith.constant 0 : index
    %262 = vector.load %arg6[%c0_242, %c10, %c0_243, %c0_244] : memref<1x16x16x128xf32, #tpu.memory_space<vmem>>, vector<1x6x16x128xf32>
    %263 = vector.shape_cast %262 : vector<1x6x16x128xf32> to vector<6x16x128xf32>
    %264 = vector.shape_cast %261 : vector<6x16x128xf32> to vector<1x6x16x128xf32>
    tpu.vector_store %arg6[%c0_242, %c10, %c0_243, %c0_244], %264 {strides = array<i32>} : memref<1x16x16x128xf32, #tpu.memory_space<vmem>>, vector<1x6x16x128xf32>,
    return
  }
  func.func @transform_0(%arg0: i32) -> (i32, i32, i32) {
    %c0_i32 = arith.constant 0 : i32
    %c0_i32_0 = arith.constant 0 : i32
    %c0_i32_1 = arith.constant 0 : i32
    return %arg0, %c0_i32, %c0_i32_0 : i32, i32, i32
  }
  func.func @transform_1(%arg0: i32) -> (i32, i32, i32) {
    %c0_i32 = arith.constant 0 : i32
    %c0_i32_0 = arith.constant 0 : i32
    %c0_i32_1 = arith.constant 0 : i32
    %c0_i32_2 = arith.constant 0 : i32
    return %c0_i32, %c0_i32_0, %c0_i32_1 : i32, i32, i32
  }
  func.func @transform_2(%arg0: i32) -> (i32, i32) {
    %c0_i32 = arith.constant 0 : i32
    %c0_i32_0 = arith.constant 0 : i32
    %c0_i32_1 = arith.constant 0 : i32
    return %c0_i32, %c0_i32_0 : i32, i32
  }
  func.func @transform_3(%arg0: i32) -> (i32, i32, i32) {
    %c0_i32 = arith.constant 0 : i32
    %c0_i32_0 = arith.constant 0 : i32
    %c0_i32_1 = arith.constant 0 : i32
    %c0_i32_2 = arith.constant 0 : i32
    return %c0_i32, %c0_i32_0, %c0_i32_1 : i32, i32, i32
  }
  func.func @transform_4(%arg0: i32) -> (i32, i32) {
    %c0_i32 = arith.constant 0 : i32
    %c0_i32_0 = arith.constant 0 : i32
    %c0_i32_1 = arith.constant 0 : i32
    return %c0_i32, %c0_i32_0 : i32, i32
  }
  func.func @transform_5(%arg0: i32) -> (i32, i32, i32, i32) {
    %c0_i32 = arith.constant 0 : i32
    %c0_i32_0 = arith.constant 0 : i32
    %c0_i32_1 = arith.constant 0 : i32
    %c0_i32_2 = arith.constant 0 : i32
    return %arg0, %c0_i32, %c0_i32_0, %c0_i32_1 : i32, i32, i32, i32
  }
}

</mosaic_0001>

<bundles_post_ra>
// kernel: basic_block_forward.1
= control target key start
LH: loop header
LB: loop body
LE: loop exit
PB: predicated region body
PF: predicated region fallthrough
CT: control target
= control target key end

     0   :  { %s19491_s18 = smov 0   ;;  %s25674_s0 = inlined_call_operand.vmem [shape: bf16[2,480,128], index: 0, kind: input, shape index: {}]   ;;  %s25675_s1 = inlined_call_operand.vmem [shape: bf16[9,128,128], index: 1, kind: input, shape index: {}]   ;;  %s25676_s2 = inlined_call_operand.vmem [shape: f32[1,128], index: 2, kind: input, shape index: {}]   ;;  %s25677_s3 = inlined_call_operand.vmem [shape: bf16[9,128,128], index: 3, kind: input, shape index: {}]   ;;  %s25678_s4 = inlined_call_operand.vmem [shape: f32[1,128], index: 4, kind: input, shape index: {}]   ;;  %s25679_s5 = inlined_call_operand.vmem [shape: f32[2,16,16,128], index: 5, kind: output, shape index: {}]  }
   0x1 LB: > { %s13931_s19 = sadd.s32 4294967295, %s19456_s18   ;;  %p13935_p0 = scmp.ge.s32.totalorder %s19456_s18, 1  ;;  %s19456_s18 = sphi %s19491_s18, %s15_s18  }
   0x2   : > { %p187_p1 = scmp.lt.s32.totalorder %s19456_s18, 3 }
   0x4   : > { %p188_p2 = pnand %p13935_p0, %p187_p1 }
   0x6   : > { %191 = sbr.rel (%p188_p2) target bundleno = 1973 (0x7b5), region = 40 }
   0xb   : > { %v18616_v0 = vld [vmem:[%s25675_s1 + $0x78] sm:$0xff]   ;;  %v25680_v1 = vmov 0.0   ;;  %v18618_v3 = vld [vmem:[%s25675_s1 + $0x70] sm:$0xff]   ;;  %vm19459_vm0 = vmmov 0   ;;  %p215_p3 = scmp.lt.s32.totalorder %s13931_s19, 1  ;;  %v18620_v5 = vld [vmem:[%s25675_s1 + $0x68] sm:$0xff]  }
   0xc   : > { %16300 = vmatprep.subr.bf16.mxu0 %v25680_v1  ;;  %16376 = vmatprep.subr.bf16.mxu1 %v25680_v1  ;;  %v18617_v2 = vld [vmem:[%s25675_s1 + $0x38] sm:$0xff]   ;;  %v18619_v4 = vld [vmem:[%s25675_s1 + $0x30] sm:$0xff]   ;;  %v18621_v6 = vld [vmem:[%s25675_s1 + $0x28] sm:$0xff]   ;;  %vm624_vm1 = vsmask.f32 4352 }
   0xd   : > { %16301 = vmatpush3.bf16.msra.mxu0 %v18616_v0  ;;  %16316 = vmatprep.mubr.msk.bf16.mxu0 %vm19459_vm0, %v25680_v1  ;;  %s25877_s19 = smov (!%p215_p3, %s13931_s19), 1  ;;  %v18622_v7 = vld [vmem:[%s25675_s1 + $0x60] sm:$0xff]   ;;  %v18624_v9 = vld [vmem:[%s25675_s1 + $0x58] sm:$0xff]   ;;  %v18626_v16 = vld [vmem:[%s25675_s1 + $0x50] sm:$0xff]   ;;  %vm1110_vm2 = vsmask.f32 7424 }
   0xe   : > { %16377 = vmatpush3.bf16.msra.mxu1 %v18617_v2  ;;  %16302 = vmatprep.subr.bf16.mxu0 %v25680_v1  ;;  %s18604_s7 = smul.u32 240, %s25877_s19  ;;  %v18623_v8 = vld [vmem:[%s25675_s1 + $0x20] sm:$0xff]   ;;  %v18625_v10 = vld [vmem:[%s25675_s1 + $0x18] sm:$0xff]   ;;  %v18627_v18 = vld [vmem:[%s25675_s1 + $0x10] sm:$0xff]   ;;  %s15267_s23 = sshll.u32 %s25877_s19, 8 }
   0xf   : > { %16378 = vmatprep.subr.bf16.mxu1 %v25680_v1  ;;  %16392 = vmatprep.mubr.msk.bf16.mxu1 %vm19459_vm0, %v25680_v1  ;;  %v18628_v25 = vld [vmem:[%s25675_s1 + $0x48] sm:$0xff]   ;;  %v18630_v32 = vld [vmem:[%s25675_s1 + $0x40] sm:$0xff]   ;;  %v18635_v42 = vld [vmem:[%s25675_s1 + $0xb8] sm:$0xff]   ;;  %s24833_s27 = scalar_lea.vmem %s25679_s5, %s15267_s23 }
  0x10   : > { %s19541_s14 = scalar_lea.vmem %s25674_s0, %s18604_s7  ;;  %v18629_v26 = vld [vmem:[%s25675_s1 + $0x8] sm:$0xff]   ;;  %v18631_v33 = vld [vmem:[%s25675_s1] sm:$0xff]   ;;  %v18636_v44 = vld [vmem:[%s25675_s1 + $0xf8] sm:$0xff]  }
  0x11   : > { %16303 = vmatpush3.bf16.msra.mxu0 %v18618_v3  ;;  %v251_v11 = vld [vmem:[%s19541_s14 + $0x8] sm:$0x8]  ;;  %v252_v12 = vld [vmem:[%s19541_s14 + $0xc] sm:$0xf]  ;;  %v253_v13 = vld [vmem:[%s19541_s14 + $0x10] sm:$0xf] }
  0x12   : > { %16379 = vmatpush3.bf16.msra.mxu1 %v18619_v4  ;;  %16304 = vmatprep.subr.bf16.mxu0 %v25680_v1  ;;  %v19555_v14 = vld [vmem:[%s19541_s14 + $0x14] sm:$0xf]  ;;  %v13978_v15 = vcombine.low %v251_v11, %v252_v12  ;;  %v19567_v23 = vld [vmem:[%s19541_s14 + $0x18] sm:$0xf]  ;;  %v19570_v24 = vld [vmem:[%s19541_s14 + $0x1c] sm:$0xf]  ;;  %v13955_v40 = vcombine.low %v252_v12, %v253_v13 }
  0x13   : > { %16380 = vmatprep.subr.bf16.mxu1 %v25680_v1  ;;  %v13979_v17 = vcombine.low %v253_v13, %v19555_v14  ;;  %v13980_v31 = vcombine.low %v19567_v23, %v19570_v24  ;;  %v19589_v34 = vld [vmem:[%s19541_s14 + $0x20] sm:$0xf]  ;;  %v19592_v35 = vld [vmem:[%s19541_s14 + $0x24] sm:$0xf]  ;;  %v18641_v49 = vld [vmem:[%s25675_s1 + $0xb0] sm:$0xff]   ;;  %v13956_v54 = vcombine.low %v19555_v14, %v19567_v23 }
  0x14   : > { %v626_v19 = vshrl.u32 %v13978_v15, 16  ;;  %v629_v20 = vshll.u32 %v13978_v15, 16  ;;  %v13981_v41 = vcombine.low %v19589_v34, %v19592_v35  ;;  %v18642_v50 = vld [vmem:[%s25675_s1 + $0xf0] sm:$0xff]   ;;  %v19614_v51 = vld [vmem:[%s19541_s14 + $0x28] sm:$0xf]  ;;  %v18651_v3 = vld [vmem:[%s25675_s1 + $0xa0] sm:$0xff]  }
  0x15   : > { %16305 = vmatpush3.bf16.msra.mxu0 %v18620_v5  ;;  %v634_v21 = vshrl.u32 %v13979_v17, 16  ;;  %v637_v22 = vshll.u32 %v13979_v17, 16  ;;  %v643_v38 = vshrl.u32 %v13980_v31, 16  ;;  %v646_v39 = vshll.u32 %v13980_v31, 16  ;;  %v19619_v53 = vld [vmem:[%s19541_s14 + $0x2c] sm:$0xf] }
  0x16   : > { %16381 = vmatpush3.bf16.msra.mxu1 %v18621_v6  ;;  %16306 = vmatprep.subr.bf16.mxu0 %v25680_v1  ;;  %v628_v27 = vrot.slane %v626_v19, 3  ;;  %v631_v28 = vrot.slane %v629_v20, 4  ;;  %v652_v47 = vshrl.u32 %v13981_v41, 16  ;;  %v655_v48 = vshll.u32 %v13981_v41, 16  ;;  %v18645_v56 = vld [vmem:[%s25675_s1 + $0xa8] sm:$0xff]   ;;  %v18654_v4 = vld [vmem:[%s25675_s1 + $0xe0] sm:$0xff]  }
  0x17   : > { %16382 = vmatprep.subr.bf16.mxu1 %v25680_v1  ;;  %v636_v29 = vrot.slane %v634_v21, 3  ;;  %v639_v30 = vrot.slane %v637_v22, 4  ;;  %v645_v45 = vrot.slane %v643_v38, 3  ;;  %v648_v46 = vrot.slane %v646_v39, 4  ;;  %v18648_v60 = vld [vmem:[%s25675_s1 + $0xe8] sm:$0xff]   ;;  %v18658_v11 = vld [vmem:[%s25675_s1 + $0xd8] sm:$0xff]  }
  0x18   : > { %v632_v36 = vor.u32 %v631_v28, %v628_v27  ;;  %v13982_v55 = vcombine.low %v19614_v51, %v19619_v53  ;;  %v654_v58 = vrot.slane %v652_v47, 3  ;;  %v657_v59 = vrot.slane %v655_v48, 4  ;;  %v19643_v0 = vld [vmem:[%s19541_s14 + $0x30] sm:$0xf]  ;;  %v19646_v2 = vld [vmem:[%s19541_s14 + $0x34] sm:$0xf] }
  0x19   : > { %16307 = vmatpush3.bf16.msra.mxu0 %v18622_v7  ;;  %v640_v37 = vor.u32 %v639_v30, %v636_v29  ;;  %v649_v52 = vor.u32 %v648_v46, %v645_v45  ;;  %v13957_v5 = vcombine.low %v19570_v24, %v19589_v34  ;;  %v13983_v7 = vcombine.low %v19643_v0, %v19646_v2  ;;  %v18663_v15 = vld [vmem:[%s25675_s1 + $0x90] sm:$0xff]   ;;  %v19678_v17 = vld [vmem:[%s19541_s14 + $0x3c] sm:$0xf]  ;;  %v18669_v24 = vld [vmem:[%s25675_s1 + $0x88] sm:$0xff]  }
  0x1a   : > { %16383 = vmatpush3.bf16.msra.mxu1 %v18623_v8  ;;  %16308 = vmatprep.subr.bf16.mxu0 %v25680_v1  ;;  %v661_v61 = vshrl.u32 %v13982_v55, 16  ;;  %v658_v62 = vor.u32 %v657_v59, %v654_v58  ;;  %v664_v63 = vshll.u32 %v13982_v55, 16  ;;  %v13958_v19 = vcombine.low %v19592_v35, %v19614_v51  ;;  %v19700_v27 = vld [vmem:[%s19541_s14 + $0x1c] sm:$0xf]  ;;  %v265_v29 = vld [vmem:[%s19541_s14 + $0x40] sm:$0xf] }
  0x1b   : > { %16384 = vmatprep.subr.bf16.mxu1 %v25680_v1  ;;  %v641_v43 = vsel %vm624_vm1, %v632_v36, %v640_v37  ;;  %v650_v57 = vsel %vm624_vm1, %v640_v37, %v649_v52  ;;  %v670_v12 = vshrl.u32 %v13983_v7, 16  ;;  %v673_v14 = vshll.u32 %v13983_v7, 16  ;;  %v18675_v34 = vld [vmem:[%s25675_s1 + $0x80] sm:$0xff]   ;;  %v268_v45 = vld [vmem:[%s19541_s14 + $0x4c] sm:$0xf] }
  0x1c   : > { %v663_v6 = vrot.slane %v661_v61, 3  ;;  %v659_v8 = vsel %vm624_vm1, %v649_v52, %v658_v62  ;;  %v18676_v35 = vld [vmem:[%s25675_s1 + $0xc0] sm:$0xff]   ;;  %v13959_v36 = vcombine.low %v19619_v53, %v19643_v0  ;;  %v19741_v55 = vld [vmem:[%s19541_s14 + $0x54] sm:$0xf]  ;;  %v271_v61 = vld [vmem:[%s19541_s14 + $0x58] sm:$0xf] }
  0x1d   : > { %16309 = vmatpush3.bf16.msra.mxu0 %v18624_v9  ;;  %v666_v9 = vrot.slane %v664_v63, 4  ;;  %v672_v21 = vrot.slane %v670_v12, 3  ;;  %v675_v22 = vrot.slane %v673_v14, 4  ;;  %v19764_v12 = vld [vmem:[%s19541_s14 + $0x68] sm:$0xf] }
  0x1e   : > { %16385 = vmatpush3.bf16.msra.mxu1 %v18625_v10  ;;  %16310 = vmatprep.subr.bf16.mxu0 %v25680_v1  ;;  %v18657_v10 = vld [vmem:[%s25675_s1 + $0x98] sm:$0xff]   ;;  %v19769_v14 = vld [vmem:[%s19541_s14 + $0x6c] sm:$0xf] }
  0x1f   : > { %16386 = vmatprep.subr.bf16.mxu1 %v25680_v1  ;;  %v667_v13 = vor.u32 %v666_v9, %v663_v6  ;;  %v676_v30 = vor.u32 %v675_v22, %v672_v21  ;;  %v19760_v6 = vld [vmem:[%s19541_s14 + $0x64] sm:$0xf]  ;;  %v19778_v21 = vld [vmem:[%s19541_s14 + $0x70] sm:$0xf]  ;;  %v19781_v22 = vld [vmem:[%s19541_s14 + $0x74] sm:$0xf] }
  0x21   : > { %16311 = vmatpush3.bf16.msra.mxu0 %v18626_v16  ;;  %v263_v16 = vld [vmem:[%s19541_s14 + $0x38] sm:$0xf]  ;;  %v668_v20 = vsel %vm624_vm1, %v658_v62, %v667_v13  ;;  %v677_v38 = vsel %vm624_vm1, %v667_v13, %v676_v30  ;;  %v19748_v62 = vld [vmem:[%s19541_s14 + $0x5c] sm:$0xf] }
  0x22   : > { %16387 = vmatpush3.bf16.msra.mxu1 %v18627_v18  ;;  %16312 = vmatprep.subr.bf16.mxu0 %v25680_v1  ;;  %v18664_v18 = vld [vmem:[%s25675_s1 + $0xd0] sm:$0xff]   ;;  %v13984_v23 = vcombine.low %v263_v16, %v19678_v17  ;;  %v13960_v46 = vcombine.low %v19646_v2, %v263_v16 }
  0x23   : > { %16388 = vmatprep.subr.bf16.mxu1 %v25680_v1 }
  0x24   : > { %v679_v31 = vshrl.u32 %v13984_v23, 16 }
  0x25   : > { %16313 = vmatpush3.bf16.msra.mxu0 %v18628_v25  ;;  %v18670_v25 = vld [vmem:[%s25675_s1 + $0xc8] sm:$0xff]  }
  0x26   : > { %16389 = vmatpush3.bf16.msra.mxu1 %v18629_v26  ;;  %16314 = vmatprep.subr.bf16.mxu0 %v25680_v1  ;;  %v19697_v26 = vld [vmem:[%s19541_s14 + $0x18] sm:$0xf]  ;;  %v681_v39 = vrot.slane %v679_v31, 3 }
  0x27   : > { %16390 = vmatprep.subr.bf16.mxu1 %v25680_v1  ;;  %v14098_v28 = vcombine.low %v19697_v26, %v19700_v27 }
  0x29   : > { %16315 = vmatpush3.bf16.msra.mxu0 %v18630_v32  ;;  %v682_v32 = vshll.u32 %v13984_v23, 16 }
  0x2a   : > { %16391 = vmatpush3.bf16.msra.mxu1 %v18631_v33  ;;  %16452 = vmatprep.subr.bf16.mxu0 %v25680_v1  ;;  %v19711_v33 = vld [vmem:[%s19541_s14 + $0x44] sm:$0xf] }
  0x2b   : > { %16528 = vmatprep.subr.bf16.mxu1 %v25680_v1  ;;  %v13985_v37 = vcombine.low %v265_v29, %v19711_v33 }
  0x2c   : > { %16317 = vmatmul.mubr.bf16.vlgmr.msra.gmra.mxu0 %v13955_v40  ;;  %v684_v40 = vrot.slane %v682_v32, 4 }
  0x2d   : > { %16393 = vmatmul.mubr.bf16.vlgmr.msra.gmra.mxu1 %v641_v43  ;;  %16453 = vmatpush3.bf16.msra.mxu0 %v18635_v42  ;;  %v688_v41 = vshrl.u32 %v13985_v37, 16  ;;  %v691_v42 = vshll.u32 %v13985_v37, 16 }
  0x2e   : > { %16529 = vmatpush3.bf16.msra.mxu1 %v18636_v44  ;;  %16320 = vmatprep.mubr.msk.bf16.mxu0 %vm19459_vm0, %v25680_v1  ;;  %v685_v43 = vor.u32 %v684_v40, %v681_v39  ;;  %v267_v44 = vld [vmem:[%s19541_s14 + $0x48] sm:$0xf] }
  0x2f   : > { %16396 = vmatprep.mubr.msk.bf16.mxu1 %vm19459_vm0, %v25680_v1  ;;  %16454 = vmatprep.subr.bf16.mxu0 %v25680_v1  ;;  %v690_v47 = vrot.slane %v688_v41, 3  ;;  %v693_v48 = vrot.slane %v691_v42, 4 }
  0x30   : > { %16530 = vmatprep.subr.bf16.mxu1 %v25680_v1 }
  0x31   : > { %16455 = vmatpush3.bf16.msra.mxu0 %v18641_v49  ;;  %v686_v49 = vsel %vm624_vm1, %v676_v30, %v685_v43  ;;  %v694_v51 = vor.u32 %v693_v48, %v690_v47  ;;  %v19788_v30 = vld [vmem:[%s19541_s14 + $0x7c] sm:$0xf] }
  0x32   : > { %16531 = vmatpush3.bf16.msra.mxu1 %v18642_v50  ;;  %16456 = vmatprep.subr.bf16.mxu0 %v25680_v1  ;;  %v13986_v50 = vcombine.low %v267_v44, %v268_v45 }
  0x33   : > { %16532 = vmatprep.subr.bf16.mxu1 %v25680_v1 }
  0x34   : > { %16321 = vmatmul.mubr.bf16.gmra.mxu0 %v13956_v54  ;;  %v697_v52 = vshrl.u32 %v13986_v50, 16  ;;  %v700_v53 = vshll.u32 %v13986_v50, 16  ;;  %v269_v54 = vld [vmem:[%s19541_s14 + $0x50] sm:$0xf] }
  0x35   : > { %16397 = vmatmul.mubr.bf16.gmra.mxu1 %v650_v57  ;;  %16324 = vmatprep.mubr.msk.bf16.mxu0 %vm19459_vm0, %v25680_v1  ;;  %v695_v57 = vsel %vm624_vm1, %v685_v43, %v694_v51  ;;  %v19811_v50 = vld [vmem:[%s19541_s14 + $0xc] sm:$0xff]  }
  0x36   : > { %16400 = vmatprep.mubr.msk.bf16.mxu1 %vm19459_vm0, %v25680_v1  ;;  %16457 = vmatpush3.bf16.msra.mxu0 %v18645_v56  ;;  %v13961_v56 = vcombine.low %v19678_v17, %v265_v29  ;;  %v699_v58 = vrot.slane %v697_v52, 3  ;;  %v702_v59 = vrot.slane %v700_v53, 4  ;;  %v13990_v17 = vcombine.low %v19764_v12, %v19769_v14 }
  0x37   : > { %16533 = vmatpush3.bf16.msra.mxu1 %v18648_v60  ;;  %16458 = vmatprep.subr.bf16.mxu0 %v25680_v1  ;;  %v13987_v60 = vcombine.low %v269_v54, %v19741_v55 }
  0x38   : > { %16534 = vmatprep.subr.bf16.mxu1 %v25680_v1  ;;  %v703_v63 = vor.u32 %v702_v59, %v699_v58  ;;  %v733_v29 = vshrl.u32 %v13990_v17, 16  ;;  %v736_v32 = vshll.u32 %v13990_v17, 16 }
  0x39   : > { %v706_v0 = vshrl.u32 %v13987_v60, 16  ;;  %v709_v2 = vshll.u32 %v13987_v60, 16  ;;  %v1114_v60 = vshll.u32 %v19811_v50, 16 }
  0x3a   : > { %16459 = vmatpush3.bf16.msra.mxu0 %v18651_v3  ;;  %v13988_v3 = vcombine.low %v271_v61, %v19748_v62  ;;  %v704_v7 = vsel %vm624_vm1, %v694_v51, %v703_v63  ;;  %v738_v40 = vrot.slane %v736_v32, 4  ;;  %v19814_v51 = vld [vmem:[%s19541_s14 + $0x14] sm:$0xff]   ;;  %v13967_v32 = vcombine.low %v19769_v14, %v19778_v21 }
  0x3b   : > { %16535 = vmatpush3.bf16.msra.mxu1 %v18654_v4  ;;  %16460 = vmatprep.subr.bf16.mxu0 %v25680_v1  ;;  %v13962_v4 = vcombine.low %v19711_v33, %v267_v44  ;;  %v711_v9 = vrot.slane %v709_v2, 4  ;;  %v13991_v33 = vcombine.low %v19778_v21, %v19781_v22  ;;  %v19801_v44 = vld [vmem:[%s19541_s14 + $0x80] sm:$0xf] }
  0x3c   : > { %16325 = vmatmul.mubr.bf16.gmra.mxu0 %v13957_v5  ;;  %16536 = vmatprep.subr.bf16.mxu1 %v25680_v1  ;;  %v19757_v5 = vld [vmem:[%s19541_s14 + $0x60] sm:$0xf] }
  0x3d   : > { %16401 = vmatmul.mubr.bf16.gmra.mxu1 %v659_v8  ;;  %16328 = vmatprep.mubr.msk.bf16.mxu0 %vm19459_vm0, %v25680_v1  ;;  %v708_v8 = vrot.slane %v706_v0, 3  ;;  %v13989_v13 = vcombine.low %v19757_v5, %v19760_v6  ;;  %v742_v41 = vshrl.u32 %v13991_v33, 16  ;;  %v745_v42 = vshll.u32 %v13991_v33, 16 }
  0x3e   : > { %16404 = vmatprep.mubr.msk.bf16.mxu1 %vm19459_vm0, %v25680_v1  ;;  %16461 = vmatpush3.bf16.msra.mxu0 %v18657_v10  ;;  %v715_v10 = vshrl.u32 %v13988_v3, 16  ;;  %v13965_v53 = vcombine.low %v19748_v62, %v19757_v5  ;;  %v1112_v5 = vshrl.u32 %v19811_v50, 16  ;;  %v18684_v50 = vld [vmem:[%s25675_s1 + $0x138] sm:$0xff]  }
  0x3f   : > { %16537 = vmatpush3.bf16.msra.mxu1 %v18658_v11  ;;  %16462 = vmatprep.subr.bf16.mxu0 %v25680_v1  ;;  %v718_v11 = vshll.u32 %v13988_v3, 16  ;;  %v744_v47 = vrot.slane %v742_v41, 3 }
  0x40   : > { %16538 = vmatprep.subr.bf16.mxu1 %v25680_v1  ;;  %v717_v16 = vrot.slane %v715_v10, 3  ;;  %v19838_v10 = vrot.slane %v1114_v60, 1  ;;  %v1492_v60 = vld [vmem:[%s19541_s14 + $0x40] sm:$0xf] }
  0x42   : > { %16463 = vmatpush3.bf16.msra.mxu0 %v18663_v15  ;;  %v712_v15 = vor.u32 %v711_v9, %v708_v8  ;;  %v13966_v8 = vcombine.low %v19760_v6, %v19764_v12  ;;  %v1485_v6 = vld [vmem:[%s19541_s14 + $0x24] sm:$0xf]  ;;  %v1486_v12 = vld [vmem:[%s19541_s14 + $0x28] sm:$0xf] }
  0x43   : > { %16539 = vmatpush3.bf16.msra.mxu1 %v18664_v18  ;;  %16464 = vmatprep.subr.bf16.mxu0 %v25680_v1  ;;  %v13963_v18 = vcombine.low %v268_v45, %v269_v54  ;;  %v1481_v45 = vld [vmem:[%s19541_s14 + $0x14] sm:$0x8]  ;;  %v747_v54 = vrot.slane %v745_v42, 4 }
  0x44   : > { %16329 = vmatmul.mubr.bf16.gmra.mxu0 %v13958_v19  ;;  %16540 = vmatprep.subr.bf16.mxu1 %v25680_v1  ;;  %v720_v19 = vrot.slane %v718_v11, 4  ;;  %v713_v23 = vsel %vm624_vm1, %v703_v63, %v712_v15  ;;  %v14058_v52 = vcombine.low %v1481_v45, %v19697_v26  ;;  %v18737_v26 = vld [vmem:[%s25675_s1 + $0x1f0] sm:$0xff]  }
  0x45   : > { %16405 = vmatmul.mubr.bf16.gmra.mxu1 %v668_v20  ;;  %16332 = vmatprep.mubr.msk.bf16.mxu0 %vm19459_vm0, %v25680_v1  ;;  %v724_v20 = vshrl.u32 %v13989_v13, 16 }
  0x46   : > { %16408 = vmatprep.mubr.msk.bf16.mxu1 %vm19459_vm0, %v25680_v1  ;;  %16465 = vmatpush3.bf16.msra.mxu0 %v18669_v24  ;;  %v19785_v24 = vld [vmem:[%s19541_s14 + $0x78] sm:$0xf]  ;;  %v721_v31 = vor.u32 %v720_v19, %v717_v16  ;;  %v1608_v63 = vshrl.u32 %v14058_v52, 16  ;;  %v1611_v0 = vshll.u32 %v14058_v52, 16  ;;  %v1489_v52 = vld [vmem:[%s19541_s14 + $0x34] sm:$0xf] }
  0x47   : > { %16541 = vmatpush3.bf16.msra.mxu1 %v18670_v25  ;;  %16466 = vmatprep.subr.bf16.mxu0 %v25680_v1  ;;  %v727_v25 = vshll.u32 %v13989_v13, 16 }
  0x48   : > { %16542 = vmatprep.subr.bf16.mxu1 %v25680_v1  ;;  %v722_v39 = vsel %vm624_vm1, %v712_v15, %v721_v31  ;;  %v19842_v13 = vrot.slane %v1608_v63, 3  ;;  %v19844_v15 = vrot.slane %v1611_v0, 4 }
  0x49   : > { %v729_v37 = vrot.slane %v727_v25, 4  ;;  %v14060_v25 = vcombine.low %v1485_v6, %v1486_v12 }
  0x4a   : > { %16467 = vmatpush3.bf16.msra.mxu0 %v18675_v34  ;;  %v13992_v34 = vcombine.low %v19785_v24, %v19788_v30 }
  0x4b   : > { %16543 = vmatpush3.bf16.msra.mxu1 %v18676_v35  ;;  %16604 = vmatprep.subr.bf16.mxu0 %v25680_v1  ;;  %v13964_v35 = vcombine.low %v19741_v55, %v271_v61  ;;  %v1119_v61 = vshll.u32 %v19814_v51, 16 }
  0x4c   : > { %16333 = vmatmul.mubr.bf16.gmra.mxu0 %v13959_v36  ;;  %16680 = vmatprep.subr.bf16.mxu1 %v25680_v1  ;;  %v726_v36 = vrot.slane %v724_v20, 3  ;;  %v751_v43 = vshrl.u32 %v13992_v34, 16  ;;  %v754_v48 = vshll.u32 %v13992_v34, 16  ;;  %v19849_v20 = vld [vmem:[%s19541_s14 + $0x24] sm:$0xff]  }
  0x4d   : > { %16409 = vmatmul.mubr.bf16.gmra.mxu1 %v677_v38  ;;  %16336 = vmatprep.mubr.msk.bf16.mxu0 %vm19459_vm0, %v25680_v1  ;;  %v735_v38 = vrot.slane %v733_v29, 3  ;;  %v19840_v11 = vrot.slane %v1119_v61, 1  ;;  %v1487_v29 = vld [vmem:[%s19541_s14 + $0x2c] sm:$0xf]  ;;  %v13969_v61 = vcombine.low %v19788_v30, %v19801_v44  ;;  %v1117_v30 = vor.u32 %v19838_v10, %v1112_v5 }
  0x4e   : > { %16412 = vmatprep.mubr.msk.bf16.mxu1 %vm19459_vm0, %v25680_v1  ;;  %v753_v55 = vrot.slane %v751_v43, 3  ;;  %v756_v3 = vrot.slane %v754_v48, 4  ;;  %v19878_v48 = vld [vmem:[%s19541_s14 + $0x2c] sm:$0xff]  }
  0x4f   : > { %v739_v62 = vor.u32 %v738_v40, %v735_v38  ;;  %v1625_v38 = vshrl.u32 %v14060_v25, 16 }
  0x50   : > { %v757_v14 = vor.u32 %v756_v3, %v753_v55 }
  0x51   : > { %v19871_v21 = vrot.slane %v1625_v38, 3 }
  0x54   : > { %16337 = vmatmul.mubr.bf16.gmra.mxu0 %v13960_v46  ;;  %v730_v46 = vor.u32 %v729_v37, %v726_v36  ;;  %v1135_v36 = vshll.u32 %v19849_v20, 16 }
  0x55   : > { %16413 = vmatmul.mubr.bf16.gmra.mxu1 %v686_v49  ;;  %16340 = vmatprep.mubr.msk.bf16.mxu0 %vm19459_vm0, %v25680_v1  ;;  %v13993_v49 = vcombine.low %v19801_v44, %v19801_v44  ;;  %v1614_v44 = vor.u32 %v19844_v15, %v19842_v13  ;;  %v1493_v13 = vld [vmem:[%s19541_s14 + $0x44] sm:$0xf]  ;;  %v18685_v15 = vld [vmem:[%s25675_s1 + $0x178] sm:$0xff]  }
  0x56   : > { %16416 = vmatprep.mubr.msk.bf16.mxu1 %vm19459_vm0, %v25680_v1  ;;  %v740_v17 = vsel %vm624_vm1, %v730_v46, %v739_v62  ;;  %v19875_v45 = vrot.slane %v1135_v36, 1 }
  0x57   : > { %v760_v58 = vshrl.u32 %v13993_v49, 16  ;;  %v763_v59 = vshll.u32 %v13993_v49, 16  ;;  %v13968_v49 = vcombine.low %v19781_v22, %v19785_v24  ;;  %v1491_v22 = vld [vmem:[%s19541_s14 + $0x3c] sm:$0xf] }
  0x59   : > { %v19836_v9 = vrot.slane %v763_v59, 4  ;;  %v19890_v59 = vld [vmem:[%s19541_s14 + $0x34] sm:$0xff]  }
  0x5a   : > { %v1155_v10 = vshrl.u32 %v19890_v59, 16 }
  0x5c   : > { %16341 = vmatmul.mubr.bf16.gmra.mxu0 %v13961_v56  ;;  %v1484_v56 = vld [vmem:[%s19541_s14 + $0x20] sm:$0xf] }
  0x5d   : > { %16417 = vmatmul.mubr.bf16.gmra.mxu1 %v695_v57  ;;  %16344 = vmatprep.mubr.msk.bf16.mxu0 %vm19459_vm0, %v25680_v1  ;;  %v731_v57 = vsel %vm624_vm1, %v721_v31, %v730_v46  ;;  %v14059_v2 = vcombine.low %v19700_v27, %v1484_v56  ;;  %v1488_v31 = vld [vmem:[%s19541_s14 + $0x30] sm:$0xf]  ;;  %v1139_v56 = vshrl.u32 %v19849_v20, 16 }
  0x5e   : > { %16420 = vmatprep.mubr.msk.bf16.mxu1 %vm19459_vm0, %v25680_v1  ;;  %v14061_v40 = vcombine.low %v1487_v29, %v1488_v31 }
  0x5f   : > { %v1616_v16 = vshrl.u32 %v14059_v2, 16 }
  0x60   : > { %v1634_v46 = vshrl.u32 %v14061_v40, 16 }
  0x61   : > { %v1618_v33 = vrot.slane %v1616_v16, 3  ;;  %v1151_v16 = vshll.u32 %v19890_v59, 16 }
  0x62   : > { %v19885_v55 = vrot.slane %v1634_v46, 3 }
  0x63   : > { %v19925_v6 = vrot.slane %v1151_v16, 1  ;;  %v18712_v16 = vld [vmem:[%s25675_s1 + $0x110] sm:$0xff]  }
  0x64   : > { %16345 = vmatmul.mubr.bf16.gmra.mxu0 %v13962_v4  ;;  %v19828_v4 = vrot.slane %v760_v58, 3 }
  0x65   : > { %16421 = vmatmul.mubr.bf16.gmra.mxu1 %v704_v7  ;;  %16348 = vmatprep.mubr.msk.bf16.mxu0 %vm19459_vm0, %v25680_v1  ;;  %v19832_v7 = vld [vmem:[%s19541_s14 + $0x1c] sm:$0xff]  }
  0x66   : > { %16424 = vmatprep.mubr.msk.bf16.mxu1 %vm19459_vm0, %v25680_v1  ;;  %v1127_v19 = vshll.u32 %v19832_v7, 16  ;;  %v1131_v42 = vshrl.u32 %v19832_v7, 16  ;;  %v766_v24 = vor.u32 %v19836_v9, %v19828_v4  ;;  %v19910_v4 = vld [vmem:[%s19541_s14 + $0x3c] sm:$0xff]  }
  0x68   : > { %v19864_v41 = vrot.slane %v1127_v19, 1  ;;  %v767_v3 = vsel %vm624_vm1, %v757_v14, %v766_v24  ;;  %v1496_v24 = vld [vmem:[%s19541_s14 + $0x50] sm:$0xf] }
  0x6c   : > { %16349 = vmatmul.mubr.bf16.gmra.mxu0 %v13963_v18  ;;  %v1619_v18 = vshll.u32 %v14059_v2, 16 }
  0x6d   : > { %16425 = vmatmul.mubr.bf16.gmra.mxu1 %v713_v23  ;;  %16352 = vmatprep.mubr.msk.bf16.mxu0 %vm19459_vm0, %v25680_v1  ;;  %v748_v23 = vor.u32 %v747_v54, %v744_v47  ;;  %v1637_v47 = vshll.u32 %v14061_v40, 16 }
  0x6e   : > { %16428 = vmatprep.mubr.msk.bf16.mxu1 %vm19459_vm0, %v25680_v1  ;;  %v1621_v34 = vrot.slane %v1619_v18, 4 }
  0x6f   : > { %v749_v37 = vsel %vm624_vm1, %v739_v62, %v748_v23  ;;  %v758_v54 = vsel %vm624_vm1, %v748_v23, %v757_v14  ;;  %v19902_v63 = vrot.slane %v1637_v47, 4  ;;  %v1147_v62 = vshrl.u32 %v19878_v48, 16  ;;  %v1494_v23 = vld [vmem:[%s19541_s14 + $0x48] sm:$0xf] }
  0x70   : > { %v1622_v9 = vor.u32 %v1621_v34, %v1618_v33  ;;  %v18690_v33 = vld [vmem:[%s25675_s1 + $0x130] sm:$0xff]   ;;  %v14064_v36 = vcombine.low %v1493_v13, %v1494_v23  ;;  %v1163_v47 = vshrl.u32 %v19910_v4, 16 }
  0x71   : > { %v18691_v34 = vld [vmem:[%s25675_s1 + $0x170] sm:$0xff]  }
  0x72   : > { %v1623_v29 = vsel %vm624_vm1, %v1614_v44, %v1622_v9 }
  0x74   : > { %16353 = vmatmul.mubr.bf16.gmra.mxu0 %v13964_v35  ;;  %v1123_v35 = vshrl.u32 %v19814_v51, 16  ;;  %v18694_v51 = vld [vmem:[%s25675_s1 + $0x128] sm:$0xff]  }
  0x75   : > { %16429 = vmatmul.mubr.bf16.gmra.mxu1 %v722_v39  ;;  %16356 = vmatprep.mubr.msk.bf16.mxu0 %vm19459_vm0, %v25680_v1  ;;  %v1628_v39 = vshll.u32 %v14060_v25, 16  ;;  %v1122_v25 = vsel %vm1110_vm2, %v1117_v30, %v19840_v11 }
  0x76   : > { %16432 = vmatprep.mubr.msk.bf16.mxu1 %vm19459_vm0, %v25680_v1  ;;  %v1125_v38 = vor.u32 %v1123_v35, %v19840_v11  ;;  %v1661_v11 = vshrl.u32 %v14064_v36, 16  ;;  %v1664_v35 = vshll.u32 %v14064_v36, 16  ;;  %v1500_v36 = vld [vmem:[%s19541_s14 + $0x60] sm:$0xf] }
  0x77   : > { %v19873_v43 = vrot.slane %v1628_v39, 4 }
  0x78   : > { %v20001_v7 = vrot.slane %v1664_v35, 4  ;;  %v1501_v35 = vld [vmem:[%s19541_s14 + $0x64] sm:$0xf] }
  0x79   : > { %v1631_v39 = vor.u32 %v19873_v43, %v19871_v21  ;;  %v1130_v21 = vsel %vm1110_vm2, %v1125_v38, %v19864_v41  ;;  %v18697_v43 = vld [vmem:[%s25675_s1 + $0x168] sm:$0xff]   ;;  %v1157_v38 = vor.u32 %v1155_v10, %v19925_v6 }
  0x7b   : > { %v1632_v46 = vsel %vm624_vm1, %v1622_v9, %v1631_v39  ;;  %v18713_v9 = vld [vmem:[%s25675_s1 + $0x150] sm:$0xff]  }
  0x7c   : > { %16357 = vmatmul.mubr.bf16.gmra.mxu0 %v13965_v53  ;;  %v1490_v53 = vld [vmem:[%s19541_s14 + $0x38] sm:$0xf] }
  0x7d   : > { %16433 = vmatmul.mubr.bf16.gmra.mxu1 %v731_v57  ;;  %16360 = vmatprep.mubr.msk.bf16.mxu0 %vm19459_vm0, %v25680_v1  ;;  %v1143_v57 = vshll.u32 %v19878_v48, 16  ;;  %v14062_v58 = vcombine.low %v1489_v52, %v1490_v53  ;;  %v18700_v52 = vld [vmem:[%s25675_s1 + $0x120] sm:$0xff]   ;;  %v1133_v53 = vor.u32 %v1131_v42, %v19864_v41 }
  0x7e   : > { %16436 = vmatprep.mubr.msk.bf16.mxu1 %vm19459_vm0, %v25680_v1 }
  0x7f   : > { %v19904_v0 = vrot.slane %v1143_v57, 1  ;;  %v1643_v2 = vshrl.u32 %v14062_v58, 16  ;;  %v18703_v57 = vld [vmem:[%s25675_s1 + $0x160] sm:$0xff]  }
  0x81   : > { %v19921_v18 = vrot.slane %v1643_v2, 3 }
  0x84   : > { %16361 = vmatmul.mubr.bf16.gmra.mxu0 %v13966_v8  ;;  %v1646_v8 = vshll.u32 %v14062_v58, 16  ;;  %v1640_v58 = vor.u32 %v19902_v63, %v19885_v55  ;;  %v18706_v55 = vld [vmem:[%s25675_s1 + $0x118] sm:$0xff]  }
  0x85   : > { %16437 = vmatmul.mubr.bf16.gmra.mxu1 %v740_v17  ;;  %16364 = vmatprep.mubr.msk.bf16.mxu0 %vm19459_vm0, %v25680_v1  ;;  %v14063_v17 = vcombine.low %v1491_v22, %v1492_v60  ;;  %v19995_v22 = vrot.slane %v1661_v11, 3  ;;  %v19999_v60 = vld [vmem:[%s19541_s14 + $0x4c] sm:$0xff]  }
  0x86   : > { %16440 = vmatprep.mubr.msk.bf16.mxu1 %vm19459_vm0, %v25680_v1  ;;  %v19923_v19 = vrot.slane %v1646_v8, 4  ;;  %v1641_v63 = vsel %vm624_vm1, %v1631_v39, %v1640_v58  ;;  %v18707_v8 = vld [vmem:[%s25675_s1 + $0x158] sm:$0xff]  }
  0x87   : > { %v1652_v12 = vshrl.u32 %v14063_v17, 16  ;;  %v1655_v5 = vshll.u32 %v14063_v17, 16  ;;  %v1141_v17 = vor.u32 %v1139_v56, %v19875_v45  ;;  %v1667_v39 = vor.u32 %v20001_v7, %v19995_v22 }
  0x88   : > { %v1649_v30 = vor.u32 %v19923_v19, %v19921_v18  ;;  %v18718_v18 = vld [vmem:[%s25675_s1 + $0x108] sm:$0xff]  }
  0x89   : > { %v19939_v31 = vrot.slane %v1652_v12, 3  ;;  %v19958_v40 = vrot.slane %v1655_v5, 4  ;;  %v1497_v12 = vld [vmem:[%s19541_s14 + $0x54] sm:$0xf]  ;;  %v1146_v20 = vsel %vm1110_vm2, %v1141_v17, %v19904_v0  ;;  %v18719_v5 = vld [vmem:[%s25675_s1 + $0x148] sm:$0xff]  }
  0x8b   : > { %v1658_v23 = vor.u32 %v19958_v40, %v19939_v31  ;;  %v1499_v31 = vld [vmem:[%s19541_s14 + $0x5c] sm:$0xf] }
  0x8c   : > { %16365 = vmatmul.mubr.bf16.gmra.mxu0 %v13967_v32  ;;  %v1159_v32 = vshll.u32 %v19910_v4, 16  ;;  %v14067_v11 = vcombine.low %v1499_v31, %v1500_v36  ;;  %v1504_v4 = vld [vmem:[%s19541_s14 + $0x70] sm:$0xf] }
  0x8d   : > { %16441 = vmatmul.mubr.bf16.gmra.mxu1 %v749_v37  ;;  %16368 = vmatprep.mubr.msk.bf16.mxu0 %vm19459_vm0, %v25680_v1  ;;  %v19949_v37 = vld [vmem:[%s19541_s14 + $0x44] sm:$0xff]  }
  0x8e   : > { %16444 = vmatprep.mubr.msk.bf16.mxu1 %vm19459_vm0, %v25680_v1  ;;  %v19960_v14 = vrot.slane %v1159_v32, 1  ;;  %v1171_v42 = vshrl.u32 %v19949_v37, 16  ;;  %v18724_v32 = vld [vmem:[%s25675_s1 + $0x100] sm:$0xff]   ;;  %v1688_v59 = vshrl.u32 %v14067_v11, 16 }
  0x90   : > { %v1690_v22 = vrot.slane %v1688_v59, 3 }
  0x94   : > { %16369 = vmatmul.mubr.bf16.gmra.mxu0 %v13968_v49  ;;  %v1167_v49 = vshll.u32 %v19949_v37, 16 }
  0x95   : > { %16445 = vmatmul.mubr.bf16.gmra.mxu1 %v758_v54  ;;  %16372 = vmatprep.mubr.msk.bf16.mxu0 %vm19459_vm0, %v25680_v1  ;;  %v1495_v54 = vld [vmem:[%s19541_s14 + $0x4c] sm:$0xf] }
  0x96   : > { %16448 = vmatprep.mubr.msk.bf16.mxu1 %vm19459_vm0, %v25680_v1  ;;  %v20004_v41 = vrot.slane %v1167_v49, 1  ;;  %v14065_v2 = vcombine.low %v1495_v54, %v1496_v24  ;;  %v1179_v49 = vshrl.u32 %v19999_v60, 16 }
  0x98   : > { %v1670_v44 = vshrl.u32 %v14065_v2, 16  ;;  %v1673_v56 = vshll.u32 %v14065_v2, 16  ;;  %v1503_v2 = vld [vmem:[%s19541_s14 + $0x6c] sm:$0xf] }
  0x9c   : > { %16373 = vmatmul.mubr.bf16.gmra.mxu0 %v13969_v61  ;;  %v1138_v61 = vsel %vm1110_vm2, %v1133_v53, %v19875_v45  ;;  %v1650_v45 = vsel %vm624_vm1, %v1640_v58, %v1649_v30  ;;  %v1165_v53 = vor.u32 %v1163_v47, %v19960_v14 }
  0x9d   : > { %16449 = vmatmul.mubr.bf16.gmra.mxu1 %v767_v3  ;;  %16468 = vmatprep.mubr.msk.bf16.mxu0 %vm19459_vm0, %v25680_v1  ;;  %v1175_v3 = vshll.u32 %v19999_v60, 16  ;;  %v20103_v60 = vld [vmem:[%s19541_s14 + $0x5c] sm:$0xff]  }
  0x9e   : > { %16544 = vmatprep.mubr.msk.bf16.mxu1 %vm19459_vm0, %v25680_v1 }
  0x9f   : > { %v20045_v19 = vrot.slane %v1175_v3, 1 }
  0xa4   : > { %16469 = vmatmul.mubr.bf16.vlgmr.msra.gmra.mxu0 %v1122_v25  ;;  %v1672_v25 = vrot.slane %v1670_v44, 3 }
  0xa5   : > { %16545 = vmatmul.mubr.bf16.vlgmr.msra.gmra.mxu1 %v1623_v29  ;;  %16605 = vmatpush3.bf16.msra.mxu0 %v18684_v50  ;;  %v1498_v50 = vld [vmem:[%s19541_s14 + $0x58] sm:$0xf]  ;;  %v1675_v29 = vrot.slane %v1673_v56, 4 }
  0xa6   : > { %16681 = vmatpush3.bf16.msra.mxu1 %v18685_v15  ;;  %16472 = vmatprep.mubr.msk.bf16.mxu0 %vm19459_vm0, %v25680_v1  ;;  %v14066_v13 = vcombine.low %v1497_v12, %v1498_v50  ;;  %v1149_v15 = vor.u32 %v1147_v62, %v19904_v0  ;;  %v20069_v0 = vld [vmem:[%s19541_s14 + $0x54] sm:$0xff]   ;;  %v1181_v50 = vor.u32 %v1179_v49, %v20045_v19 }
  0xa7   : > { %16548 = vmatprep.mubr.msk.bf16.mxu1 %vm19459_vm0, %v25680_v1  ;;  %16606 = vmatprep.subr.bf16.mxu0 %v25680_v1  ;;  %v1676_v54 = vor.u32 %v1675_v29, %v1672_v25  ;;  %v1187_v3 = vshrl.u32 %v20069_v0, 16  ;;  %v1506_v56 = vld [vmem:[%s19541_s14 + $0x78] sm:$0xf] }
  0xa8   : > { %16682 = vmatprep.subr.bf16.mxu1 %v25680_v1  ;;  %v1679_v48 = vshrl.u32 %v14066_v13, 16  ;;  %v1154_v62 = vsel %vm1110_vm2, %v1149_v15, %v19925_v6  ;;  %v1682_v40 = vshll.u32 %v14066_v13, 16  ;;  %v1691_v6 = vshll.u32 %v14067_v11, 16 }
  0xa9   : > { %16607 = vmatpush3.bf16.msra.mxu0 %v18690_v33  ;;  %v18725_v33 = vld [vmem:[%s25675_s1 + $0x140] sm:$0xff]  }
  0xaa   : > { %16683 = vmatpush3.bf16.msra.mxu1 %v18691_v34  ;;  %16608 = vmatprep.subr.bf16.mxu0 %v25680_v1  ;;  %v1659_v34 = vsel %vm624_vm1, %v1649_v30, %v1658_v23  ;;  %v1681_v10 = vrot.slane %v1679_v48, 3  ;;  %v1693_v24 = vrot.slane %v1691_v6, 4 }
  0xab   : > { %16684 = vmatprep.subr.bf16.mxu1 %v25680_v1 }
  0xac   : > { %16473 = vmatmul.mubr.bf16.gmra.mxu0 %v1130_v21  ;;  %v1502_v21 = vld [vmem:[%s19541_s14 + $0x68] sm:$0xf] }
  0xad   : > { %16549 = vmatmul.mubr.bf16.gmra.mxu1 %v1632_v46  ;;  %16476 = vmatprep.mubr.msk.bf16.mxu0 %vm19459_vm0, %v25680_v1  ;;  %v1668_v46 = vsel %vm624_vm1, %v1658_v23, %v1667_v39 }
  0xae   : > { %16552 = vmatprep.mubr.msk.bf16.mxu1 %vm19459_vm0, %v25680_v1  ;;  %16609 = vmatpush3.bf16.msra.mxu0 %v18694_v51  ;;  %v1183_v51 = vshll.u32 %v20069_v0, 16  ;;  %v1507_v0 = vld [vmem:[%s19541_s14 + $0x7c] sm:$0xf] }
  0xaf   : > { %16685 = vmatpush3.bf16.msra.mxu1 %v18697_v43  ;;  %16610 = vmatprep.subr.bf16.mxu0 %v25680_v1  ;;  %v1162_v43 = vsel %vm1110_vm2, %v1157_v38, %v19960_v14  ;;  %v1173_v14 = vor.u32 %v1171_v42, %v20004_v41 }
  0xb0   : > { %16686 = vmatprep.subr.bf16.mxu1 %v25680_v1  ;;  %v1185_v58 = vrot.slane %v1183_v51, 1 }
  0xb1   : > { %v1178_v44 = vsel %vm1110_vm2, %v1173_v14, %v20045_v19 }
  0xb2   : > { %16611 = vmatpush3.bf16.msra.mxu0 %v18700_v52  ;;  %v14068_v52 = vcombine.low %v1501_v35, %v1502_v21  ;;  %v1186_v13 = vsel %vm1110_vm2, %v1181_v50, %v1185_v58  ;;  %v1189_v29 = vor.u32 %v1187_v3, %v1185_v58 }
  0xb3   : > { %16687 = vmatpush3.bf16.msra.mxu1 %v18703_v57  ;;  %16612 = vmatprep.subr.bf16.mxu0 %v25680_v1  ;;  %v1684_v57 = vrot.slane %v1682_v40, 4 }
  0xb4   : > { %16477 = vmatmul.mubr.bf16.gmra.mxu0 %v1138_v61  ;;  %16688 = vmatprep.subr.bf16.mxu1 %v25680_v1  ;;  %v1697_v7 = vshrl.u32 %v14068_v52, 16  ;;  %v1170_v61 = vsel %vm1110_vm2, %v1165_v53, %v20004_v41  ;;  %v20123_v41 = vld [vmem:[%s19541_s14 + $0x64] sm:$0xff]  }
  0xb5   : > { %16553 = vmatmul.mubr.bf16.gmra.mxu1 %v1641_v63  ;;  %16480 = vmatprep.mubr.msk.bf16.mxu0 %vm19459_vm0, %v25680_v1  ;;  %v1677_v63 = vsel %vm624_vm1, %v1667_v39, %v1676_v54  ;;  %v1685_v47 = vor.u32 %v1684_v57, %v1681_v10  ;;  %v1203_v40 = vshrl.u32 %v20123_v41, 16 }
  0xb6   : > { %16556 = vmatprep.mubr.msk.bf16.mxu1 %vm19459_vm0, %v25680_v1  ;;  %16613 = vmatpush3.bf16.msra.mxu0 %v18706_v55  ;;  %v1700_v55 = vshll.u32 %v14068_v52, 16  ;;  %v1699_v17 = vrot.slane %v1697_v7, 3 }
  0xb7   : > { %16689 = vmatpush3.bf16.msra.mxu1 %v18707_v8  ;;  %16614 = vmatprep.subr.bf16.mxu0 %v25680_v1  ;;  %v1191_v8 = vshll.u32 %v20103_v60, 16 }
  0xb8   : > { %16690 = vmatprep.subr.bf16.mxu1 %v25680_v1  ;;  %v1702_v30 = vrot.slane %v1700_v55, 4 }
  0xb9   : > { %v1193_v37 = vrot.slane %v1191_v8, 1 }
  0xba   : > { %16615 = vmatpush3.bf16.msra.mxu0 %v18712_v16  ;;  %v14069_v16 = vcombine.low %v1503_v2, %v1504_v4 }
  0xbb   : > { %16691 = vmatpush3.bf16.msra.mxu1 %v18713_v9  ;;  %16616 = vmatprep.subr.bf16.mxu0 %v25680_v1  ;;  %v1686_v9 = vsel %vm624_vm1, %v1676_v54, %v1685_v47  ;;  %v1194_v31 = vsel %vm1110_vm2, %v1189_v29, %v1193_v37  ;;  %v20156_v54 = vld [vmem:[%s19541_s14 + $0x74] sm:$0xff]  }
  0xbc   : > { %16481 = vmatmul.mubr.bf16.gmra.mxu0 %v1146_v20  ;;  %16692 = vmatprep.subr.bf16.mxu1 %v25680_v1  ;;  %v1706_v42 = vshrl.u32 %v14069_v16, 16  ;;  %v1709_v12 = vshll.u32 %v14069_v16, 16  ;;  %v1505_v20 = vld [vmem:[%s19541_s14 + $0x74] sm:$0xf] }
  0xbd   : > { %16557 = vmatmul.mubr.bf16.gmra.mxu1 %v1650_v45  ;;  %16484 = vmatprep.mubr.msk.bf16.mxu0 %vm19459_vm0, %v25680_v1  ;;  %v1694_v45 = vor.u32 %v1693_v24, %v1690_v22  ;;  %v14070_v19 = vcombine.low %v1505_v20, %v1506_v56 }
  0xbe   : > { %16560 = vmatprep.mubr.msk.bf16.mxu1 %vm19459_vm0, %v25680_v1  ;;  %16617 = vmatpush3.bf16.msra.mxu0 %v18718_v18  ;;  %v1195_v18 = vshrl.u32 %v20103_v60, 16  ;;  %v1708_v23 = vrot.slane %v1706_v42, 3  ;;  %v1711_v25 = vrot.slane %v1709_v12, 4  ;;  %v1509_v60 = vld [vmem:[%s19541_s14 + $0x84] sm:$0xf] }
  0xbf   : > { %16693 = vmatpush3.bf16.msra.mxu1 %v18719_v5  ;;  %16618 = vmatprep.subr.bf16.mxu0 %v25680_v1  ;;  %v1199_v5 = vshll.u32 %v20123_v41, 16  ;;  %v1695_v15 = vsel %vm624_vm1, %v1685_v47, %v1694_v45  ;;  %v1715_v48 = vshrl.u32 %v14070_v19, 16  ;;  %v1718_v38 = vshll.u32 %v14070_v19, 16 }
  0xc0   : > { %16694 = vmatprep.subr.bf16.mxu1 %v25680_v1  ;;  %v1712_v6 = vor.u32 %v1711_v25, %v1708_v23 }
  0xc1   : > { %v1201_v39 = vrot.slane %v1199_v5, 1  ;;  %v1717_v51 = vrot.slane %v1715_v48, 3  ;;  %v1720_v49 = vrot.slane %v1718_v38, 4 }
  0xc2   : > { %16619 = vmatpush3.bf16.msra.mxu0 %v18724_v32  ;;  %v1703_v32 = vor.u32 %v1702_v30, %v1699_v17  ;;  %v1215_v17 = vshll.u32 %v20156_v54, 16 }
  0xc3   : > { %16695 = vmatpush3.bf16.msra.mxu1 %v18725_v33  ;;  %16756 = vmatprep.subr.bf16.mxu0 %v25680_v1  ;;  %v20141_v33 = vld [vmem:[%s19541_s14 + $0x6c] sm:$0xff]   ;;  %v1205_v47 = vor.u32 %v1203_v40, %v1201_v39  ;;  %v1721_v16 = vor.u32 %v1720_v49, %v1717_v51 }
  0xc4   : > { %16485 = vmatmul.mubr.bf16.gmra.mxu0 %v1154_v62  ;;  %16832 = vmatprep.subr.bf16.mxu1 %v25680_v1  ;;  %v1508_v62 = vld [vmem:[%s19541_s14 + $0x80] sm:$0xf]  ;;  %v1207_v36 = vshll.u32 %v20141_v33, 16  ;;  %v1217_v5 = vrot.slane %v1215_v17, 1 }
  0xc5   : > { %16561 = vmatmul.mubr.bf16.gmra.mxu1 %v1659_v34  ;;  %16488 = vmatprep.mubr.msk.bf16.mxu0 %vm19459_vm0, %v25680_v1  ;;  %v1704_v34 = vsel %vm624_vm1, %v1694_v45, %v1703_v32  ;;  %v14071_v35 = vcombine.low %v1507_v0, %v1508_v62  ;;  %v1511_v62 = vld [vmem:[%s19541_s14 + $0x8c] sm:$0xf] }
  0xc6   : > { %16564 = vmatprep.mubr.msk.bf16.mxu1 %vm19459_vm0, %v25680_v1  ;;  %v1209_v10 = vrot.slane %v1207_v36, 1  ;;  %v1219_v36 = vshrl.u32 %v20156_v54, 16 }
  0xc7   : > { %v1724_v57 = vshrl.u32 %v14071_v35, 16  ;;  %v1727_v58 = vshll.u32 %v14071_v35, 16 }
  0xc8   : > { %v1210_v20 = vsel %vm1110_vm2, %v1205_v47, %v1209_v10 }
  0xc9   : > { %v1726_v42 = vrot.slane %v1724_v57, 3  ;;  %v1729_v12 = vrot.slane %v1727_v58, 4 }
  0xcc   : > { %16489 = vmatmul.mubr.bf16.gmra.mxu0 %v1162_v43  ;;  %v1197_v43 = vor.u32 %v1195_v18, %v1193_v37  ;;  %v20173_v37 = vld [vmem:[%s19541_s14 + $0x7c] sm:$0xff]   ;;  %v1722_v18 = vsel %vm624_vm1, %v1712_v6, %v1721_v16 }
  0xcd   : > { %16565 = vmatmul.mubr.bf16.gmra.mxu1 %v1668_v46  ;;  %16492 = vmatprep.mubr.msk.bf16.mxu0 %vm19459_vm0, %v25680_v1  ;;  %v1223_v23 = vshll.u32 %v20173_v37, 16 }
  0xce   : > { %16568 = vmatprep.mubr.msk.bf16.mxu1 %vm19459_vm0, %v25680_v1  ;;  %v1202_v24 = vsel %vm1110_vm2, %v1197_v43, %v1201_v39 }
  0xd4   : > { %16493 = vmatmul.mubr.bf16.gmra.mxu0 %v1170_v61  ;;  %v1713_v61 = vsel %vm624_vm1, %v1703_v32, %v1712_v6  ;;  %v14073_v6 = vcombine.low %v1511_v62, %v1511_v62 }
  0xd5   : > { %16569 = vmatmul.mubr.bf16.gmra.mxu1 %v1677_v63  ;;  %16496 = vmatprep.mubr.msk.bf16.mxu0 %vm19459_vm0, %v25680_v1  ;;  %v1510_v63 = vld [vmem:[%s19541_s14 + $0x88] sm:$0xf] }
  0xd6   : > { %16572 = vmatprep.mubr.msk.bf16.mxu1 %vm19459_vm0, %v25680_v1  ;;  %v14072_v30 = vcombine.low %v1509_v60, %v1510_v63 }
  0xd8   : > { %v1736_v25 = vshll.u32 %v14072_v30, 16 }
  0xda   : > { %v1738_v43 = vrot.slane %v1736_v25, 4 }
  0xdc   : > { %16497 = vmatmul.mubr.bf16.gmra.mxu0 %v1178_v44 }
  0xdd   : > { %16573 = vmatmul.mubr.bf16.gmra.mxu1 %v1686_v9  ;;  %16500 = vmatprep.mubr.msk.bf16.mxu0 %vm19459_vm0, %v25680_v1  ;;  %v1211_v9 = vshrl.u32 %v20141_v33, 16  ;;  %v1730_v33 = vor.u32 %v1729_v12, %v1726_v42  ;;  %v18729_v42 = vld [vmem:[%s19541_s14 + $0x20] sm:$0xff]  }
  0xde   : > { %16576 = vmatprep.mubr.msk.bf16.mxu1 %vm19459_vm0, %v25680_v1 }
  0xdf   : > { %v1213_v32 = vor.u32 %v1211_v9, %v1209_v10  ;;  %v1731_v51 = vsel %vm624_vm1, %v1721_v16, %v1730_v33 }
  0xe1   : > { %v1218_v40 = vsel %vm1110_vm2, %v1213_v32, %v1217_v5 }
  0xe4   : > { %16501 = vmatmul.mubr.bf16.gmra.mxu0 %v1186_v13  ;;  %v1733_v13 = vshrl.u32 %v14072_v30, 16 }
  0xe5   : > { %16577 = vmatmul.mubr.bf16.gmra.mxu1 %v1695_v15  ;;  %16504 = vmatprep.mubr.msk.bf16.mxu0 %vm19459_vm0, %v25680_v1 }
  0xe6   : > { %16580 = vmatprep.mubr.msk.bf16.mxu1 %vm19459_vm0, %v25680_v1  ;;  %v1735_v38 = vrot.slane %v1733_v13, 3 }
  0xe8   : > { %v1739_v58 = vor.u32 %v1738_v43, %v1735_v38 }
  0xea   : > { %v1740_v16 = vsel %vm624_vm1, %v1730_v33, %v1739_v58 }
  0xec   : > { %v487_v11 = vpop.f32.mrf.mxu0  ;;  %16505 = vmatmul.mubr.bf16.gmra.mxu0 %v1194_v31 }
  0xed   : > { %v865_v21 = vpop.f32.mrf.mxu1  ;;  %16581 = vmatmul.mubr.bf16.gmra.mxu1 %v1704_v34  ;;  %16508 = vmatprep.mubr.msk.bf16.mxu0 %vm19459_vm0, %v25680_v1 }
  0xee   : > { %v20151_v46 = vadd.f32 %v865_v21, %v487_v11  ;;  %v16318_v59 = vpop.f32.mrf.mxu0  ;;  %16584 = vmatprep.mubr.msk.bf16.mxu1 %vm19459_vm0, %v25680_v1  ;;  %v1225_v21 = vrot.slane %v1223_v23, 1 }
  0xef   : > { %v16394_v52 = vpop.f32.mrf.mxu1  ;;  %v18726_v59 = vld [vmem:[%s19541_s14 + $0x84] ss:$0 sps:$4 sm:$0x11]  }
  0xf0   : > { %v490_v53 = vpop.f32.mrf.mxu0  ;;  %v1231_v63 = vshll.u32 %v18726_v59, 16 }
  0xf1   : > { %v868_v22 = vpop.f32.mrf.mxu1 }
  0xf2   : > { %v20160_v7 = vadd.f32 %v868_v22, %v490_v53  ;;  %v16319_v55 = vpop.f32.mrf.mxu0  ;;  %v1221_v53 = vor.u32 %v1219_v36, %v1217_v5  ;;  %v1742_v22 = vshrl.u32 %v14073_v6, 16 }
  0xf3   : > { %v16395_v2 = vpop.f32.mrf.mxu1  ;;  %v1227_v55 = vshrl.u32 %v20173_v37, 16 }
  0xf4   : > { %v495_v4 = vpop.f32.mrf.mxu0  ;;  %16509 = vmatmul.mubr.bf16.gmra.mxu0 %v1202_v24  ;;  %v1745_v24 = vshll.u32 %v14073_v6, 16  ;;  %v18728_v2 = vld [vmem:[%s19541_s14 + $0x18] sm:$0xff]   ;;  %v1744_v17 = vrot.slane %v1742_v22, 3 }
  0xf5   : > { %v873_v14 = vpop.f32.mrf.mxu1  ;;  %16585 = vmatmul.mubr.bf16.gmra.mxu1 %v1713_v61  ;;  %16512 = vmatprep.mubr.msk.bf16.mxu0 %vm19459_vm0, %v25680_v1  ;;  %v2403_v12 = vshll.u32 %v18728_v2, 16  ;;  %v18731_v6 = vld [vmem:[%s25675_s1 + $0x1f8] sm:$0xff]  }
  0xf6   : > { %v20166_v3 = vadd.f32 %v873_v14, %v495_v4  ;;  %v16322_v8 = vpop.f32.mrf.mxu0  ;;  %16588 = vmatprep.mubr.msk.bf16.mxu1 %vm19459_vm0, %v25680_v1  ;;  %v1226_v14 = vsel %vm1110_vm2, %v1221_v53, %v1225_v21  ;;  %v1747_v30 = vrot.slane %v1745_v24, 4  ;;  %v20236_v24 = vld [vmem:[%s19541_s14 + $0x30] sm:$0xff]  }
  0xf7   : > { %v16398_v44 = vpop.f32.mrf.mxu1 }
  0xf8   : > { %v498_v41 = vpop.f32.mrf.mxu0 }
  0xf9   : > { %v876_v50 = vpop.f32.mrf.mxu1 }
  0xfa   : > { %v20176_v45 = vadd.f32 %v876_v50, %v498_v41  ;;  %v16323_v56 = vpop.f32.mrf.mxu0  ;;  %v1233_v41 = vrot.slane %v1231_v63, 1  ;;  %v1229_v50 = vor.u32 %v1227_v55, %v1225_v21  ;;  %v18730_v21 = vld [vmem:[%s25675_s1 + $0x1b8] sm:$0xff]  }
  0xfb   : > { %v16399_v15 = vpop.f32.mrf.mxu1 }
  0xfc   : > { %v503_v19 = vpop.f32.mrf.mxu0  ;;  %16513 = vmatmul.mubr.bf16.gmra.mxu0 %v1210_v20  ;;  %v2401_v15 = vshrl.u32 %v18728_v2, 16  ;;  %v1234_v25 = vsel %vm1110_vm2, %v1229_v50, %v1233_v41  ;;  %v20267_v50 = vld [vmem:[%s19541_s14 + $0x38] sm:$0xff]  }
  0xfd   : > { %v881_v29 = vpop.f32.mrf.mxu1  ;;  %16589 = vmatmul.mubr.bf16.gmra.mxu1 %v1722_v18  ;;  %16516 = vmatprep.mubr.msk.bf16.mxu0 %vm19459_vm0, %v25680_v1  ;;  %v1748_v18 = vor.u32 %v1747_v30, %v1744_v17  ;;  %v2424_v30 = vshll.u32 %v20236_v24, 16 }
  0xfe   : > { %v20182_v48 = vadd.f32 %v881_v29, %v503_v19  ;;  %v16326_v0 = vpop.f32.mrf.mxu0  ;;  %16592 = vmatprep.mubr.msk.bf16.mxu1 %vm19459_vm0, %v25680_v1  ;;  %v2405_v19 = vrot.slane %v2403_v12, 1  ;;  %v2408_v29 = vshll.u32 %v18729_v42, 16 }
  0xff   : > { %v16402_v31 = vpop.f32.mrf.mxu1  ;;  %v1749_v0 = vsel %vm624_vm1, %v1739_v58, %v1748_v18 }
 0x100   : > { %v506_v34 = vpop.f32.mrf.mxu0  ;;  %v20217_v31 = vld [vmem:[%s19541_s14 + $0x28] sm:$0xff]  }
 0x101   : > { %v884_v39 = vpop.f32.mrf.mxu1  ;;  %v2416_v43 = vshll.u32 %v20217_v31, 16 }
 0x102   : > { %v20190_v11 = vadd.f32 %v884_v39, %v506_v34  ;;  %v16327_v35 = vpop.f32.mrf.mxu0 }
 0x103   : > { %v16403_v10 = vpop.f32.mrf.mxu1  ;;  %v2418_v22 = vrot.slane %v2416_v43, 1 }
 0x104   : > { %v511_v49 = vpop.f32.mrf.mxu0  ;;  %16517 = vmatmul.mubr.bf16.gmra.mxu0 %v1218_v40  ;;  %v2406_v40 = vor.u32 %v2405_v19, %v2401_v15  ;;  %v2412_v10 = vshrl.u32 %v18729_v42, 16  ;;  %v18746_v19 = vld [vmem:[%s25675_s1 + $0x1a0] sm:$0xff]  }
 0x105   : > { %v889_v52 = vpop.f32.mrf.mxu1  ;;  %16593 = vmatmul.mubr.bf16.gmra.mxu1 %v1731_v51  ;;  %16520 = vmatprep.mubr.msk.bf16.mxu0 %vm19459_vm0, %v25680_v1  ;;  %v2410_v51 = vrot.slane %v2408_v29, 1 }
 0x106   : > { %v20195_v54 = vadd.f32 %v889_v52, %v511_v49  ;;  %v16330_v57 = vpop.f32.mrf.mxu0  ;;  %16596 = vmatprep.mubr.msk.bf16.mxu1 %vm19459_vm0, %v25680_v1 }
 0x107   : > { %v16406_v60 = vpop.f32.mrf.mxu1  ;;  %v2411_v57 = vsel %vm1110_vm2, %v2406_v40, %v2410_v51  ;;  %v18752_v40 = vld [vmem:[%s25675_s1 + $0x198] sm:$0xff]  }
 0x108   : > { %v514_v61 = vpop.f32.mrf.mxu0  ;;  %v18736_v60 = vld [vmem:[%s25675_s1 + $0x1b0] sm:$0xff]  }
 0x109   : > { %v892_v4 = vpop.f32.mrf.mxu1 }
 0x10a   : > { %v20202_v47 = vadd.f32 %v892_v4, %v514_v61  ;;  %v16331_v8 = vpop.f32.mrf.mxu0  ;;  %v2414_v4 = vor.u32 %v2412_v10, %v2410_v51  ;;  %v20298_v10 = vld [vmem:[%s19541_s14 + $0x40] sm:$0xff]  }
 0x10b   : > { %v16407_v44 = vpop.f32.mrf.mxu1  ;;  %v19358_v8 = vld [vmem:[%s19541_s14 + $0x20] sm:$0xf] }
 0x10c   : > { %v519_v9 = vpop.f32.mrf.mxu0  ;;  %16521 = vmatmul.mubr.bf16.gmra.mxu0 %v1226_v14  ;;  %v2420_v14 = vshrl.u32 %v20217_v31, 16  ;;  %v18740_v44 = vld [vmem:[%s25675_s1 + $0x1a8] sm:$0xff]   ;;  %v2419_v12 = vsel %vm1110_vm2, %v2414_v4, %v2418_v22 }
 0x10d   : > { %v897_v37 = vpop.f32.mrf.mxu1  ;;  %16597 = vmatmul.mubr.bf16.gmra.mxu1 %v1740_v16  ;;  %16524 = vmatprep.mubr.msk.bf16.mxu0 %vm19459_vm0, %v25680_v1  ;;  %v19359_v16 = vld [vmem:[%s19541_s14 + $0x24] sm:$0xf]  ;;  %v19360_v31 = vld [vmem:[%s19541_s14 + $0x28] sm:$0xf] }
 0x10e   : > { %v20208_v20 = vadd.f32 %v897_v37, %v519_v9  ;;  %v16334_v56 = vpop.f32.mrf.mxu0  ;;  %16600 = vmatprep.mubr.msk.bf16.mxu1 %vm19459_vm0, %v25680_v1  ;;  %v14099_v17 = vcombine.low %v19358_v8, %v19359_v16  ;;  %v18764_v8 = vld [vmem:[%s25675_s1 + $0x188] sm:$0xff]  }
 0x10f   : > { %v16410_v5 = vpop.f32.mrf.mxu1  ;;  %v18743_v56 = vld [vmem:[%s25675_s1 + $0x1e8] sm:$0xff]  }
 0x110   : > { %v522_v13 = vpop.f32.mrf.mxu0 }
 0x111   : > { %v900_v23 = vpop.f32.mrf.mxu1 }
 0x112   : > { %v20213_v32 = vadd.f32 %v900_v23, %v522_v13  ;;  %v16335_v33 = vpop.f32.mrf.mxu0  ;;  %v2422_v23 = vor.u32 %v2420_v14, %v2418_v22  ;;  %v19362_v14 = vld [vmem:[%s19541_s14 + $0x30] sm:$0xf] }
 0x113   : > { %v16411_v62 = vpop.f32.mrf.mxu1  ;;  %v2432_v33 = vshll.u32 %v20267_v50, 16 }
 0x114   : > { %v527_v34 = vpop.f32.mrf.mxu0  ;;  %16525 = vmatmul.mubr.bf16.gmra.mxu0 %v1234_v25  ;;  %v2426_v25 = vrot.slane %v2424_v30, 1 }
 0x115   : > { %v905_v36 = vpop.f32.mrf.mxu1  ;;  %16601 = vmatmul.mubr.bf16.gmra.mxu1 %v1749_v0  ;;  %16620 = vmatprep.mubr.msk.bf16.mxu0 %vm19459_vm0, %v25680_v1  ;;  %v18749_v0 = vld [vmem:[%s25675_s1 + $0x1e0] sm:$0xff]  }
 0x116   : > { %v20221_v38 = vadd.f32 %v905_v36, %v527_v34  ;;  %v16338_v39 = vpop.f32.mrf.mxu0  ;;  %16696 = vmatprep.mubr.msk.bf16.mxu1 %vm19459_vm0, %v25680_v1  ;;  %v19361_v34 = vld [vmem:[%s19541_s14 + $0x2c] sm:$0xf]  ;;  %v2427_v43 = vsel %vm1110_vm2, %v2422_v23, %v2426_v25  ;;  %v18770_v23 = vld [vmem:[%s25675_s1 + $0x180] sm:$0xff]  }
 0x117   : > { %v16414_v35 = vpop.f32.mrf.mxu1  ;;  %v14100_v36 = vcombine.low %v19360_v31, %v19361_v34  ;;  %v2428_v39 = vshrl.u32 %v20236_v24, 16  ;;  %v2444_v31 = vshrl.u32 %v20298_v10, 16 }
 0x118   : > { %v530_v59 = vpop.f32.mrf.mxu0 }
 0x119   : > { %v908_v49 = vpop.f32.mrf.mxu1 }
 0x11a   : > { %v20232_v52 = vadd.f32 %v908_v49, %v530_v59  ;;  %v16339_v53 = vpop.f32.mrf.mxu0  ;;  %v18753_v49 = vld [vmem:[%s25675_s1 + $0x1d8] sm:$0xff]  }
 0x11b   : > { %v16415_v58 = vpop.f32.mrf.mxu1 }
 0x11c   : > { %v535_v55 = vpop.f32.mrf.mxu0  ;;  %16621 = vmatmul.mubr.bf16.vlgmr.msra.gmra.mxu0 %v14098_v28 }
 0x11d   : > { %v913_v61 = vpop.f32.mrf.mxu1  ;;  %16697 = vmatmul.mubr.bf16.vlgmr.msra.gmra.mxu1 %v2411_v57  ;;  %16757 = vmatpush3.bf16.msra.mxu0 %v18730_v21  ;;  %v18758_v57 = vld [vmem:[%s25675_s1 + $0x190] sm:$0xff]  }
 0x11e   : > { %v20244_v63 = vadd.f32 %v913_v61, %v535_v55  ;;  %v16342_v2 = vpop.f32.mrf.mxu0  ;;  %16833 = vmatpush3.bf16.msra.mxu1 %v18731_v6  ;;  %16624 = vmatprep.mubr.msk.bf16.mxu0 %vm19459_vm0, %v25680_v1  ;;  %v2434_v6 = vrot.slane %v2432_v33, 1  ;;  %v2436_v55 = vshrl.u32 %v20267_v50, 16  ;;  %v18759_v61 = vld [vmem:[%s25675_s1 + $0x1d0] sm:$0xff]   ;;  %v19364_v33 = vld [vmem:[%s19541_s14 + $0x38] sm:$0xf] }
 0x11f   : > { %v16418_v27 = vpop.f32.mrf.mxu1  ;;  %16700 = vmatprep.mubr.msk.bf16.mxu1 %vm19459_vm0, %v25680_v1  ;;  %16758 = vmatprep.subr.bf16.mxu0 %v25680_v1 }
 0x120   : > { %v538_v28 = vpop.f32.mrf.mxu0  ;;  %16834 = vmatprep.subr.bf16.mxu1 %v25680_v1 }
 0x121   : > { %v916_v9 = vpop.f32.mrf.mxu1  ;;  %16759 = vmatpush3.bf16.msra.mxu0 %v18736_v60  ;;  %v2430_v60 = vor.u32 %v2428_v39, %v2426_v25 }
 0x122   : > { %v20262_v41 = vadd.f32 %v916_v9, %v538_v28  ;;  %v16343_v42 = vpop.f32.mrf.mxu0  ;;  %16835 = vmatpush3.bf16.msra.mxu1 %v18737_v26  ;;  %16760 = vmatprep.subr.bf16.mxu0 %v25680_v1  ;;  %v19363_v26 = vld [vmem:[%s19541_s14 + $0x34] sm:$0xf]  ;;  %v2440_v28 = vshll.u32 %v20298_v10, 16 }
 0x123   : > { %v16419_v37 = vpop.f32.mrf.mxu1  ;;  %16836 = vmatprep.subr.bf16.mxu1 %v25680_v1  ;;  %v14101_v27 = vcombine.low %v19362_v14, %v19363_v26  ;;  %v20330_v42 = vld [vmem:[%s19541_s14 + $0x48] sm:$0xff]  }
 0x124   : > { %v543_v18 = vpop.f32.mrf.mxu0  ;;  %16625 = vmatmul.mubr.bf16.gmra.mxu0 %v14099_v17  ;;  %v2448_v34 = vshll.u32 %v20330_v42, 16 }
 0x125   : > { %v921_v5 = vpop.f32.mrf.mxu1  ;;  %16701 = vmatmul.mubr.bf16.gmra.mxu1 %v2419_v12  ;;  %16628 = vmatprep.mubr.msk.bf16.mxu0 %vm19459_vm0, %v25680_v1  ;;  %v18765_v12 = vld [vmem:[%s25675_s1 + $0x1c8] sm:$0xff]  }
 0x126   : > { %v20275_v13 = vadd.f32 %v921_v5, %v543_v18  ;;  %v16346_v15 = vpop.f32.mrf.mxu0  ;;  %16704 = vmatprep.mubr.msk.bf16.mxu1 %vm19459_vm0, %v25680_v1  ;;  %16761 = vmatpush3.bf16.msra.mxu0 %v18740_v44  ;;  %v2435_v44 = vsel %vm1110_vm2, %v2430_v60, %v2434_v6  ;;  %v2438_v5 = vor.u32 %v2436_v55, %v2434_v6  ;;  %v19366_v60 = vld [vmem:[%s19541_s14 + $0x40] sm:$0xf]  ;;  %v19367_v55 = vld [vmem:[%s19541_s14 + $0x44] sm:$0xf] }
 0x127   : > { %v16422_v29 = vpop.f32.mrf.mxu1  ;;  %16837 = vmatpush3.bf16.msra.mxu1 %v18743_v56  ;;  %16762 = vmatprep.subr.bf16.mxu0 %v25680_v1  ;;  %v2442_v15 = vrot.slane %v2440_v28, 1 }
 0x128   : > { %v546_v62 = vpop.f32.mrf.mxu0  ;;  %16838 = vmatprep.subr.bf16.mxu1 %v25680_v1 }
 0x129   : > { %v924_v51 = vpop.f32.mrf.mxu1 }
 0x12a   : > { %v20294_v35 = vadd.f32 %v924_v51, %v546_v62  ;;  %v16347_v21 = vpop.f32.mrf.mxu0  ;;  %16763 = vmatpush3.bf16.msra.mxu0 %v18746_v19  ;;  %v18771_v19 = vld [vmem:[%s25675_s1 + $0x1c0] sm:$0xff]   ;;  %v2443_v51 = vsel %vm1110_vm2, %v2438_v5, %v2442_v15  ;;  %v19368_v5 = vld [vmem:[%s19541_s14 + $0x48] sm:$0xf] }
 0x12b   : > { %v16423_v59 = vpop.f32.mrf.mxu1  ;;  %16839 = vmatpush3.bf16.msra.mxu1 %v18749_v0  ;;  %16764 = vmatprep.subr.bf16.mxu0 %v25680_v1  ;;  %v19365_v0 = vld [vmem:[%s19541_s14 + $0x3c] sm:$0xf] }
 0x12c   : > { %v551_v53 = vpop.f32.mrf.mxu0  ;;  %16629 = vmatmul.mubr.bf16.gmra.mxu0 %v14100_v36  ;;  %16840 = vmatprep.subr.bf16.mxu1 %v25680_v1  ;;  %v14102_v62 = vcombine.low %v19364_v33, %v19365_v0 }
 0x12d   : > { %v929_v58 = vpop.f32.mrf.mxu1  ;;  %16705 = vmatmul.mubr.bf16.gmra.mxu1 %v2427_v43  ;;  %16632 = vmatprep.mubr.msk.bf16.mxu0 %vm19459_vm0, %v25680_v1  ;;  %v18748_v43 = vld [vmem:[%s19541_s14 + $0x50] sm:$0xff]  }
 0x12e   : > { %v20310_v22 = vadd.f32 %v929_v58, %v551_v53  ;;  %v16350_v24 = vpop.f32.mrf.mxu0  ;;  %16708 = vmatprep.mubr.msk.bf16.mxu1 %vm19459_vm0, %v25680_v1  ;;  %16765 = vmatpush3.bf16.msra.mxu0 %v18752_v40  ;;  %v2446_v53 = vor.u32 %v2444_v31, %v2442_v15  ;;  %v19369_v15 = vld [vmem:[%s19541_s14 + $0x4c] sm:$0xf] }
 0x12f   : > { %v16426_v2 = vpop.f32.mrf.mxu1  ;;  %16841 = vmatpush3.bf16.msra.mxu1 %v18753_v49  ;;  %16766 = vmatprep.subr.bf16.mxu0 %v25680_v1 }
 0x130   : > { %v554_v4 = vpop.f32.mrf.mxu0  ;;  %16842 = vmatprep.subr.bf16.mxu1 %v25680_v1  ;;  %v2452_v2 = vshrl.u32 %v20330_v42, 16 }
 0x131   : > { %v932_v16 = vpop.f32.mrf.mxu1 }
 0x132   : > { %v20326_v17 = vadd.f32 %v932_v16, %v554_v4  ;;  %v16351_v30 = vpop.f32.mrf.mxu0  ;;  %16767 = vmatpush3.bf16.msra.mxu0 %v18758_v57  ;;  %v2450_v57 = vrot.slane %v2448_v34, 1  ;;  %v2456_v4 = vshll.u32 %v18748_v43, 16  ;;  %v18751_v16 = vld [vmem:[%s19541_s14 + $0x58] sm:$0xff]   ;;  %v18755_v34 = vld [vmem:[%s19541_s14 + $0x60] sm:$0xff]  }
 0x133   : > { %v16427_v9 = vpop.f32.mrf.mxu1  ;;  %16843 = vmatpush3.bf16.msra.mxu1 %v18759_v61  ;;  %16768 = vmatprep.subr.bf16.mxu0 %v25680_v1  ;;  %v14103_v61 = vcombine.low %v19366_v60, %v19367_v55  ;;  %v2472_v60 = vshll.u32 %v18755_v34, 16 }
 0x134   : > { %v559_v37 = vpop.f32.mrf.mxu0  ;;  %16633 = vmatmul.mubr.bf16.gmra.mxu0 %v14101_v27  ;;  %16844 = vmatprep.subr.bf16.mxu1 %v25680_v1  ;;  %v2451_v28 = vsel %vm1110_vm2, %v2446_v53, %v2450_v57  ;;  %v19370_v53 = vld [vmem:[%s19541_s14 + $0x50] sm:$0xf] }
 0x135   : > { %v937_v50 = vpop.f32.mrf.mxu1  ;;  %16709 = vmatmul.mubr.bf16.gmra.mxu1 %v2435_v44  ;;  %16636 = vmatprep.mubr.msk.bf16.mxu0 %vm19459_vm0, %v25680_v1 }
 0x136   : > { %v20339_v56 = vadd.f32 %v937_v50, %v559_v37  ;;  %v16354_v18 = vpop.f32.mrf.mxu0  ;;  %16712 = vmatprep.mubr.msk.bf16.mxu1 %vm19459_vm0, %v25680_v1  ;;  %16769 = vmatpush3.bf16.msra.mxu0 %v18764_v8  ;;  %v2458_v37 = vrot.slane %v2456_v4, 1 }
 0x137   : > { %v16430_v25 = vpop.f32.mrf.mxu1  ;;  %16845 = vmatpush3.bf16.msra.mxu1 %v18765_v12  ;;  %16770 = vmatprep.subr.bf16.mxu0 %v25680_v1  ;;  %v2454_v12 = vor.u32 %v2452_v2, %v2450_v57  ;;  %v19371_v57 = vld [vmem:[%s19541_s14 + $0x54] sm:$0xf] }
 0x138   : > { %v562_v29 = vpop.f32.mrf.mxu0  ;;  %16846 = vmatprep.subr.bf16.mxu1 %v25680_v1  ;;  %v2460_v25 = vshrl.u32 %v18748_v43, 16 }
 0x139   : > { %v940_v36 = vpop.f32.mrf.mxu1 }
 0x13a   : > { %v20355_v39 = vadd.f32 %v940_v36, %v562_v29  ;;  %v16355_v40 = vpop.f32.mrf.mxu0  ;;  %16771 = vmatpush3.bf16.msra.mxu0 %v18770_v23  ;;  %v14104_v23 = vcombine.low %v19368_v5, %v19369_v15  ;;  %v2462_v43 = vor.u32 %v2460_v25, %v2458_v37 }
 0x13b   : > { %v16431_v21 = vpop.f32.mrf.mxu1  ;;  %16847 = vmatpush3.bf16.msra.mxu1 %v18771_v19  ;;  %16908 = vmatprep.subr.bf16.mxu0 %v25680_v1  ;;  %v2464_v19 = vshll.u32 %v18751_v16, 16 }
 0x13c   : > { %v567_v59 = vpop.f32.mrf.mxu0  ;;  %16637 = vmatmul.mubr.bf16.gmra.mxu0 %v14102_v62  ;;  %16984 = vmatprep.subr.bf16.mxu1 %v25680_v1  ;;  %v2459_v62 = vsel %vm1110_vm2, %v2454_v12, %v2458_v37 }
 0x13d   : > { %v945_v6 = vpop.f32.mrf.mxu1  ;;  %16713 = vmatmul.mubr.bf16.gmra.mxu1 %v2443_v51  ;;  %16640 = vmatprep.mubr.msk.bf16.mxu0 %vm19459_vm0, %v25680_v1 }
 0x13e   : > { %v20363_v10 = vadd.f32 %v945_v6, %v567_v59  ;;  %v16358_v49 = vpop.f32.mrf.mxu0  ;;  %16716 = vmatprep.mubr.msk.bf16.mxu1 %vm19459_vm0, %v25680_v1  ;;  %v2466_v59 = vrot.slane %v2464_v19, 1 }
 0x13f   : > { %v16434_v58 = vpop.f32.mrf.mxu1 }
 0x140   : > { %v570_v24 = vpop.f32.mrf.mxu0  ;;  %v14105_v58 = vcombine.low %v19370_v53, %v19371_v57  ;;  %v2467_v4 = vsel %vm1110_vm2, %v2462_v43, %v2466_v59  ;;  %v19374_v53 = vld [vmem:[%s19541_s14 + $0x60] sm:$0xf]  ;;  %v19375_v57 = vld [vmem:[%s19541_s14 + $0x64] sm:$0xf] }
 0x141   : > { %v948_v14 = vpop.f32.mrf.mxu1 }
 0x142   : > { %v20370_v26 = vadd.f32 %v948_v14, %v570_v24  ;;  %v16359_v27 = vpop.f32.mrf.mxu0  ;;  %v2468_v24 = vshrl.u32 %v18751_v16, 16 }
 0x143   : > { %v16435_v8 = vpop.f32.mrf.mxu1 }
 0x144   : > { %v575_v30 = vpop.f32.mrf.mxu0  ;;  %16641 = vmatmul.mubr.bf16.gmra.mxu0 %v14103_v61  ;;  %v18757_v8 = vld [vmem:[%s19541_s14 + $0x68] sm:$0xff]  }
 0x145   : > { %v953_v44 = vpop.f32.mrf.mxu1  ;;  %16717 = vmatmul.mubr.bf16.gmra.mxu1 %v2451_v28  ;;  %16644 = vmatprep.mubr.msk.bf16.mxu0 %vm19459_vm0, %v25680_v1  ;;  %v2474_v28 = vrot.slane %v2472_v60, 1  ;;  %v2480_v25 = vshll.u32 %v18757_v8, 16 }
 0x146   : > { %v20376_v9 = vadd.f32 %v953_v44, %v575_v30  ;;  %v16362_v42 = vpop.f32.mrf.mxu0  ;;  %16720 = vmatprep.mubr.msk.bf16.mxu1 %vm19459_vm0, %v25680_v1 }
 0x147   : > { %v16438_v50 = vpop.f32.mrf.mxu1  ;;  %v2470_v42 = vor.u32 %v2468_v24, %v2466_v59  ;;  %v2482_v59 = vrot.slane %v2480_v25, 1  ;;  %v2484_v24 = vshrl.u32 %v18757_v8, 16 }
 0x148   : > { %v578_v18 = vpop.f32.mrf.mxu0  ;;  %v19372_v50 = vld [vmem:[%s19541_s14 + $0x58] sm:$0xf] }
 0x149   : > { %v956_v29 = vpop.f32.mrf.mxu1 }
 0x14a   : > { %v20382_v33 = vadd.f32 %v956_v29, %v578_v18  ;;  %v16363_v0 = vpop.f32.mrf.mxu0  ;;  %v19373_v18 = vld [vmem:[%s19541_s14 + $0x5c] sm:$0xf] }
 0x14b   : > { %v16439_v31 = vpop.f32.mrf.mxu1  ;;  %v14106_v5 = vcombine.low %v19372_v50, %v19373_v18  ;;  %v2475_v0 = vsel %vm1110_vm2, %v2470_v42, %v2474_v28 }
 0x14c   : > { %v583_v36 = vpop.f32.mrf.mxu0  ;;  %16645 = vmatmul.mubr.bf16.gmra.mxu0 %v14104_v23  ;;  %v2476_v23 = vshrl.u32 %v18755_v34, 16  ;;  %v18761_v31 = vld [vmem:[%s19541_s14 + $0x70] sm:$0xff]  }
 0x14d   : > { %v961_v40 = vpop.f32.mrf.mxu1  ;;  %16721 = vmatmul.mubr.bf16.gmra.mxu1 %v2459_v62  ;;  %16648 = vmatprep.mubr.msk.bf16.mxu0 %vm19459_vm0, %v25680_v1  ;;  %v2488_v60 = vshll.u32 %v18761_v31, 16 }
 0x14e   : > { %v20388_v51 = vadd.f32 %v961_v40, %v583_v36  ;;  %v16366_v21 = vpop.f32.mrf.mxu0  ;;  %16724 = vmatprep.mubr.msk.bf16.mxu1 %vm19459_vm0, %v25680_v1  ;;  %v2478_v43 = vor.u32 %v2476_v23, %v2474_v28  ;;  %v19377_v23 = vld [vmem:[%s19541_s14 + $0x6c] sm:$0xf] }
 0x14f   : > { %v16442_v6 = vpop.f32.mrf.mxu1  ;;  %v2490_v28 = vrot.slane %v2488_v60, 1 }
 0x150   : > { %v586_v49 = vpop.f32.mrf.mxu0 }
 0x151   : > { %v964_v55 = vpop.f32.mrf.mxu1 }
 0x152   : > { %v20394_v61 = vadd.f32 %v964_v55, %v586_v49  ;;  %v16367_v2 = vpop.f32.mrf.mxu0 }
 0x153   : > { %v16443_v14 = vpop.f32.mrf.mxu1 }
 0x154   : > { %v591_v27 = vpop.f32.mrf.mxu0  ;;  %16649 = vmatmul.mubr.bf16.gmra.mxu0 %v14105_v58  ;;  %v14107_v58 = vcombine.low %v19374_v53, %v19375_v57  ;;  %v2483_v14 = vsel %vm1110_vm2, %v2478_v43, %v2482_v59  ;;  %v18767_v57 = vld [vmem:[%s19541_s14 + $0x80] sm:$0xff]  }
 0x155   : > { %v969_v30 = vpop.f32.mrf.mxu1  ;;  %16725 = vmatmul.mubr.bf16.gmra.mxu1 %v2467_v4  ;;  %16652 = vmatprep.mubr.msk.bf16.mxu0 %vm19459_vm0, %v25680_v1 }
 0x156   : > { %v20400_v16 = vadd.f32 %v969_v30, %v591_v27  ;;  %v16370_v44 = vpop.f32.mrf.mxu0  ;;  %16728 = vmatprep.mubr.msk.bf16.mxu1 %vm19459_vm0, %v25680_v1 }
 0x157   : > { %v16446_v12 = vpop.f32.mrf.mxu1  ;;  %v18763_v44 = vld [vmem:[%s19541_s14 + $0x78] sm:$0xff]  }
 0x158   : > { %v594_v37 = vpop.f32.mrf.mxu0 }
 0x159   : > { %v972_v15 = vpop.f32.mrf.mxu1 }
 0x15a   : > { %v20406_v19 = vadd.f32 %v972_v15, %v594_v37  ;;  %v16371_v29 = vpop.f32.mrf.mxu0  ;;  %v2486_v37 = vor.u32 %v2484_v24, %v2482_v59  ;;  %v19376_v15 = vld [vmem:[%s19541_s14 + $0x68] sm:$0xf] }
 0x15b   : > { %v16447_v62 = vpop.f32.mrf.mxu1  ;;  %v14108_v25 = vcombine.low %v19376_v15, %v19377_v23 }
 0x15c   : > { %v599_v36 = vpop.f32.mrf.mxu0  ;;  %16653 = vmatmul.mubr.bf16.gmra.mxu0 %v14106_v5  ;;  %v2496_v62 = vshll.u32 %v18763_v44, 16 }
 0x15d   : > { %v977_v40 = vpop.f32.mrf.mxu1  ;;  %16729 = vmatmul.mubr.bf16.gmra.mxu1 %v2475_v0  ;;  %16656 = vmatprep.mubr.msk.bf16.mxu0 %vm19459_vm0, %v25680_v1  ;;  %v2492_v0 = vshrl.u32 %v18761_v31, 16 }
 0x15e   : > { %v20412_v21 = vadd.f32 %v977_v40, %v599_v36  ;;  %v16374_v34 = vpop.f32.mrf.mxu0  ;;  %16732 = vmatprep.mubr.msk.bf16.mxu1 %vm19459_vm0, %v25680_v1  ;;  %v2491_v40 = vsel %vm1110_vm2, %v2486_v37, %v2490_v28  ;;  %v2498_v53 = vrot.slane %v2496_v62, 1  ;;  %v19380_v62 = vld [vmem:[%s19541_s14 + $0x78] sm:$0xf] }
 0x15f   : > { %v16450_v6 = vpop.f32.mrf.mxu1  ;;  %v2494_v31 = vor.u32 %v2492_v0, %v2490_v28 }
 0x160   : > { %v602_v49 = vpop.f32.mrf.mxu0 }
 0x161   : > { %v980_v55 = vpop.f32.mrf.mxu1 }
 0x162   : > { %v20418_v2 = vadd.f32 %v980_v55, %v602_v49  ;;  %v16375_v4 = vpop.f32.mrf.mxu0  ;;  %v19378_v55 = vld [vmem:[%s19541_s14 + $0x70] sm:$0xf] }
 0x163   : > { %v16451_v27 = vpop.f32.mrf.mxu1  ;;  %v19379_v4 = vld [vmem:[%s19541_s14 + $0x74] sm:$0xf] }
 0x164   : > { %v1332_v30 = vpop.f32.mrf.mxu0  ;;  %16657 = vmatmul.mubr.bf16.gmra.mxu0 %v14107_v58 }
 0x165   : > { %v1451_v42 = vadd.f32 %v1332_v30, %v20151_v46  ;;  %v1847_v12 = vpop.f32.mrf.mxu1  ;;  %16733 = vmatmul.mubr.bf16.gmra.mxu1 %v2483_v14  ;;  %16660 = vmatprep.mubr.msk.bf16.mxu0 %vm19459_vm0, %v25680_v1  ;;  %v14109_v14 = vcombine.low %v19378_v55, %v19379_v4  ;;  %v2770_v4 = vld [vmem:[%s19541_s14 + $0x20] sm:$0x8] }
 0x166   : > { %v16470_v8 = vpop.f32.mrf.mxu0  ;;  %16736 = vmatprep.mubr.msk.bf16.mxu1 %vm19459_vm0, %v25680_v1 }
 0x167   : > { %v20427_v50 = vadd.f32 %v1847_v12, %v1451_v42  ;;  %v16546_v18 = vpop.f32.mrf.mxu1  ;;  %v2499_v42 = vsel %vm1110_vm2, %v2494_v31, %v2498_v53  ;;  %v2500_v12 = vshrl.u32 %v18763_v44, 16  ;;  %v2504_v8 = vshll.u32 %v18767_v57, 16 }
 0x168   : > { %v1335_v5 = vpop.f32.mrf.mxu0 }
 0x169   : > { %v1452_v29 = vadd.f32 %v1335_v5, %v20160_v7  ;;  %v1850_v46 = vpop.f32.mrf.mxu1  ;;  %v2502_v44 = vor.u32 %v2500_v12, %v2498_v53  ;;  %v2506_v23 = vrot.slane %v2504_v8, 1 }
 0x16a   : > { %v16471_v36 = vpop.f32.mrf.mxu0 }
 0x16b   : > { %v20433_v34 = vadd.f32 %v1850_v46, %v1452_v29  ;;  %v16547_v43 = vpop.f32.mrf.mxu1  ;;  %v19381_v36 = vld [vmem:[%s19541_s14 + $0x7c] sm:$0xf] }
 0x16c   : > { %v1340_v59 = vpop.f32.mrf.mxu0  ;;  %16661 = vmatmul.mubr.bf16.gmra.mxu0 %v14108_v25  ;;  %v18769_v25 = vld [vmem:[%s19541_s14 + $0x88] sm:$0xff]  }
 0x16d   : > { %v1453_v6 = vadd.f32 %v1340_v59, %v20166_v3  ;;  %v1855_v49 = vpop.f32.mrf.mxu1  ;;  %16737 = vmatmul.mubr.bf16.gmra.mxu1 %v2491_v40  ;;  %16664 = vmatprep.mubr.msk.bf16.mxu0 %vm19459_vm0, %v25680_v1 }
 0x16e   : > { %v16474_v7 = vpop.f32.mrf.mxu0  ;;  %16740 = vmatprep.mubr.msk.bf16.mxu1 %vm19459_vm0, %v25680_v1 }
 0x16f   : > { %v20441_v58 = vadd.f32 %v1855_v49, %v1453_v6  ;;  %v16550_v24 = vpop.f32.mrf.mxu1  ;;  %v2507_v6 = vsel %vm1110_vm2, %v2502_v44, %v2506_v23  ;;  %v2508_v49 = vshrl.u32 %v18767_v57, 16  ;;  %v2512_v7 = vshll.u32 %v18769_v25, 16  ;;  %v20469_v57 = vld [vmem:[%s19541_s14 + $0x24] sm:$0xf] }
 0x170   : > { %v1343_v60 = vpop.f32.mrf.mxu0 }
 0x171   : > { %v1454_v3 = vadd.f32 %v1343_v60, %v20176_v45  ;;  %v1858_v27 = vpop.f32.mrf.mxu1  ;;  %v18773_v60 = vld [vmem:[%s19541_s14 + $0x90] ss:$0 sps:$4 sm:$0x11]  }
 0x172   : > { %v16475_v30 = vpop.f32.mrf.mxu0 }
 0x173   : > { %v20447_v37 = vadd.f32 %v1858_v27, %v1454_v3  ;;  %v16551_v28 = vpop.f32.mrf.mxu1  ;;  %v2510_v3 = vor.u32 %v2508_v49, %v2506_v23  ;;  %v2514_v27 = vrot.slane %v2512_v7, 1  ;;  %v20474_v30 = vld [vmem:[%s19541_s14 + $0x28] sm:$0xf] }
 0x174   : > { %v1348_v18 = vpop.f32.mrf.mxu0  ;;  %16665 = vmatmul.mubr.bf16.gmra.mxu0 %v14109_v14  ;;  %v19382_v28 = vld [vmem:[%s19541_s14 + $0x80] sm:$0xf] }
 0x175   : > { %v1455_v5 = vadd.f32 %v1348_v18, %v20182_v48  ;;  %v1863_v15 = vpop.f32.mrf.mxu1  ;;  %16741 = vmatmul.mubr.bf16.gmra.mxu1 %v2499_v42  ;;  %16668 = vmatprep.mubr.msk.bf16.mxu0 %vm19459_vm0, %v25680_v1  ;;  %v14110_v48 = vcombine.low %v19380_v62, %v19381_v36  ;;  %v20477_v42 = vld [vmem:[%s19541_s14 + $0x2c] sm:$0xf]  ;;  %v19383_v18 = vld [vmem:[%s19541_s14 + $0x84] sm:$0xf]  ;;  %v2516_v62 = vshrl.u32 %v18769_v25, 16  ;;  %v2520_v36 = vshll.u32 %v18773_v60, 16 }
 0x176   : > { %v16478_v45 = vpop.f32.mrf.mxu0  ;;  %16744 = vmatprep.mubr.msk.bf16.mxu1 %vm19459_vm0, %v25680_v1  ;;  %v14178_v23 = vcombine.low %v20474_v30, %v20477_v42 }
 0x177   : > { %v20455_v29 = vadd.f32 %v1863_v15, %v1455_v5  ;;  %v16554_v46 = vpop.f32.mrf.mxu1  ;;  %v14111_v5 = vcombine.low %v19382_v28, %v19383_v18  ;;  %v14177_v15 = vcombine.low %v2770_v4, %v20469_v57  ;;  %v2522_v60 = vrot.slane %v2520_v36, 1 }
 0x178   : > { %v1351_v0 = vpop.f32.mrf.mxu0  ;;  %v2905_v25 = vshrl.u32 %v14178_v23, 16  ;;  %v2908_v7 = vshll.u32 %v14178_v23, 16 }
 0x179   : > { %v1456_v40 = vadd.f32 %v1351_v0, %v20190_v11  ;;  %v1866_v43 = vpop.f32.mrf.mxu1  ;;  %v2515_v0 = vsel %vm1110_vm2, %v2510_v3, %v2514_v27  ;;  %v19384_v3 = vld [vmem:[%s19541_s14 + $0x88] sm:$0xf] }
 0x17a   : > { %v16479_v59 = vpop.f32.mrf.mxu0 }
 0x17b   : > { %v20461_v31 = vadd.f32 %v1866_v43, %v1456_v40  ;;  %v16555_v53 = vpop.f32.mrf.mxu1  ;;  %v2897_v59 = vshrl.u32 %v14177_v15, 16 }
 0x17c   : > { %v1356_v24 = vpop.f32.mrf.mxu0  ;;  %16669 = vmatmul.mubr.bf16.gmra.mxu0 %v14110_v48 }
 0x17d   : > { %v1457_v55 = vadd.f32 %v1356_v24, %v20195_v54  ;;  %v1871_v11 = vpop.f32.mrf.mxu1  ;;  %16745 = vmatmul.mubr.bf16.gmra.mxu1 %v2507_v6  ;;  %16672 = vmatprep.mubr.msk.bf16.mxu0 %vm19459_vm0, %v25680_v1  ;;  %v2900_v6 = vshll.u32 %v14177_v15, 16  ;;  %v2518_v24 = vor.u32 %v2516_v62, %v2514_v27  ;;  %v2899_v28 = vrot.slane %v2897_v59, 3 }
 0x17e   : > { %v16482_v14 = vpop.f32.mrf.mxu0  ;;  %16748 = vmatprep.mubr.msk.bf16.mxu1 %vm19459_vm0, %v25680_v1 }
 0x17f   : > { %v20479_v54 = vadd.f32 %v1871_v11, %v1457_v55  ;;  %v16558_v12 = vpop.f32.mrf.mxu1  ;;  %v20496_v55 = vld [vmem:[%s19541_s14 + $0x30] sm:$0xf]  ;;  %v20499_v11 = vld [vmem:[%s19541_s14 + $0x34] sm:$0xf]  ;;  %v2902_v18 = vrot.slane %v2900_v6, 4 }
 0x180   : > { %v1359_v8 = vpop.f32.mrf.mxu0  ;;  %v19385_v12 = vld [vmem:[%s19541_s14 + $0x8c] sm:$0xf]  ;;  %v14179_v27 = vcombine.low %v20496_v55, %v20499_v11 }
 0x181   : > { %v1458_v45 = vadd.f32 %v1359_v8, %v20202_v47  ;;  %v1874_v44 = vpop.f32.mrf.mxu1  ;;  %v14112_v8 = vcombine.low %v19384_v3, %v19385_v12 }
 0x182   : > { %v16483_v46 = vpop.f32.mrf.mxu0  ;;  %v2914_v6 = vshrl.u32 %v14179_v27, 16 }
 0x183   : > { %v20488_v48 = vadd.f32 %v1874_v44, %v1458_v45  ;;  %v16559_v40 = vpop.f32.mrf.mxu1  ;;  %v2907_v45 = vrot.slane %v2905_v25, 3  ;;  %v2910_v44 = vrot.slane %v2908_v7, 4  ;;  %v2523_v46 = vsel %vm1110_vm2, %v2518_v24, %v2522_v60  ;;  %v20518_v25 = vld [vmem:[%s19541_s14 + $0x3c] sm:$0xf] }
 0x184   : > { %v1364_v43 = vpop.f32.mrf.mxu0  ;;  %16673 = vmatmul.mubr.bf16.gmra.mxu0 %v14111_v5  ;;  %v2903_v40 = vor.u32 %v2902_v18, %v2899_v28  ;;  %v14217_v60 = vcombine.low %v20469_v57, %v20474_v30  ;;  %v2916_v28 = vrot.slane %v2914_v6, 3 }
 0x185   : > { %v1459_v47 = vadd.f32 %v1364_v43, %v20208_v20  ;;  %v1879_v49 = vpop.f32.mrf.mxu1  ;;  %16749 = vmatmul.mubr.bf16.gmra.mxu1 %v2515_v0  ;;  %16676 = vmatprep.mubr.msk.bf16.mxu0 %vm19459_vm0, %v25680_v1  ;;  %v2911_v59 = vor.u32 %v2910_v44, %v2907_v45 }
 0x186   : > { %v16486_v53 = vpop.f32.mrf.mxu0  ;;  %16752 = vmatprep.mubr.msk.bf16.mxu1 %vm19459_vm0, %v25680_v1 }
 0x187   : > { %v20501_v4 = vadd.f32 %v1879_v49, %v1459_v47  ;;  %v16562_v20 = vpop.f32.mrf.mxu1  ;;  %v2917_v47 = vshll.u32 %v14179_v27, 16  ;;  %v20515_v49 = vld [vmem:[%s19541_s14 + $0x38] sm:$0xf]  ;;  %v2912_v12 = vsel %vm624_vm1, %v2903_v40, %v2911_v59  ;;  %v18784_v40 = vld [vmem:[%s25675_s1 + $0x70] sm:$0xff]  }
 0x188   : > { %v1367_v14 = vpop.f32.mrf.mxu0  ;;  %v14180_v20 = vcombine.low %v20515_v49, %v20518_v25 }
 0x189   : > { %v1460_v5 = vadd.f32 %v1367_v14, %v20213_v32  ;;  %v1882_v15 = vpop.f32.mrf.mxu1  ;;  %v2919_v18 = vrot.slane %v2917_v47, 4 }
 0x18a   : > { %v16487_v23 = vpop.f32.mrf.mxu0  ;;  %v2923_v45 = vshrl.u32 %v14180_v20, 16  ;;  %v2926_v44 = vshll.u32 %v14180_v20, 16 }
 0x18b   : > { %v20509_v0 = vadd.f32 %v1882_v15, %v1460_v5  ;;  %v16563_v62 = vpop.f32.mrf.mxu1  ;;  %v18778_v15 = vld [vmem:[%s25675_s1 + $0x78] sm:$0xff]  }
 0x18c   : > { %v1372_v36 = vpop.f32.mrf.mxu0  ;;  %16677 = vmatmul.mubr.bf16.gmra.mxu0 %v14112_v8  ;;  %v18777_v8 = vld [vmem:[%s25675_s1 + $0x238] sm:$0xff]   ;;  %v18783_v62 = vld [vmem:[%s25675_s1 + $0x230] sm:$0xff]  }
 0x18d   : > { %v1461_v43 = vadd.f32 %v1372_v36, %v20221_v38  ;;  %v1887_v32 = vpop.f32.mrf.mxu1  ;;  %16753 = vmatmul.mubr.bf16.gmra.mxu1 %v2523_v46  ;;  %16772 = vmatprep.mubr.msk.bf16.mxu0 %vm19459_vm0, %v25680_v1  ;;  %v2920_v46 = vor.u32 %v2919_v18, %v2916_v28 }
 0x18e   : > { %v16490_v7 = vpop.f32.mrf.mxu0  ;;  %16848 = vmatprep.mubr.msk.bf16.mxu1 %vm19459_vm0, %v25680_v1 }
 0x18f   : > { %v20522_v53 = vadd.f32 %v1887_v32, %v1461_v43  ;;  %v16566_v24 = vpop.f32.mrf.mxu1  ;;  %v20548_v43 = vld [vmem:[%s19541_s14 + $0x40] sm:$0xf]  ;;  %v2925_v7 = vrot.slane %v2923_v45, 3  ;;  %v2921_v20 = vsel %vm624_vm1, %v2911_v59, %v2920_v46  ;;  %v20583_v45 = vld [vmem:[%s19541_s14 + $0x48] sm:$0xf] }
 0x190   : > { %v1375_v38 = vpop.f32.mrf.mxu0  ;;  %v2928_v24 = vrot.slane %v2926_v44, 4  ;;  %v20586_v44 = vld [vmem:[%s19541_s14 + $0x4c] sm:$0xf] }
 0x191   : > { %v1462_v14 = vadd.f32 %v1375_v38, %v20232_v52  ;;  %v1890_v3 = vpop.f32.mrf.mxu1 }
 0x192   : > { %v16491_v5 = vpop.f32.mrf.mxu0  ;;  %v20575_v59 = vor.u32 %v2928_v24, %v2925_v7 }
 0x193   : > { %v20536_v57 = vadd.f32 %v1890_v3, %v1462_v14  ;;  %v16567_v30 = vpop.f32.mrf.mxu1  ;;  %v14218_v14 = vcombine.low %v20477_v42, %v20496_v55  ;;  %v18790_v42 = vld [vmem:[%s25675_s1 + $0x68] sm:$0xff]  }
 0x194   : > { %v1380_v52 = vpop.f32.mrf.mxu0  ;;  %16773 = vmatmul.mubr.bf16.vlgmr.msra.gmra.mxu0 %v2912_v12 }
 0x195   : > { %v1463_v27 = vadd.f32 %v1380_v52, %v20244_v63  ;;  %v1895_v23 = vpop.f32.mrf.mxu1  ;;  %16849 = vmatmul.mubr.bf16.vlgmr.msra.gmra.mxu1 %v14217_v60  ;;  %16909 = vmatpush3.bf16.msra.mxu0 %v18777_v8  ;;  %v20551_v63 = vld [vmem:[%s19541_s14 + $0x44] sm:$0xf]  ;;  %v18787_v8 = vld [vmem:[%s25675_s1 + $0x228] sm:$0xff]  }
 0x196   : > { %v16494_v36 = vpop.f32.mrf.mxu0  ;;  %16985 = vmatpush3.bf16.msra.mxu1 %v18778_v15  ;;  %16776 = vmatprep.mubr.msk.bf16.mxu0 %vm19459_vm0, %v25680_v1  ;;  %v14181_v3 = vcombine.low %v20548_v43, %v20551_v63 }
 0x197   : > { %v20553_v32 = vadd.f32 %v1895_v23, %v1463_v27  ;;  %v16570_v6 = vpop.f32.mrf.mxu1  ;;  %16852 = vmatprep.mubr.msk.bf16.mxu1 %vm19459_vm0, %v25680_v1  ;;  %16910 = vmatprep.subr.bf16.mxu0 %v25680_v1 }
 0x198   : > { %v1383_v47 = vpop.f32.mrf.mxu0  ;;  %16986 = vmatprep.subr.bf16.mxu1 %v25680_v1  ;;  %v2932_v15 = vshrl.u32 %v14181_v3, 16  ;;  %v2935_v30 = vshll.u32 %v14181_v3, 16  ;;  %v14219_v6 = vcombine.low %v20499_v11, %v20515_v49 }
 0x199   : > { %v1464_v38 = vadd.f32 %v1383_v47, %v20262_v41  ;;  %v1898_v60 = vpop.f32.mrf.mxu1  ;;  %16911 = vmatpush3.bf16.msra.mxu0 %v18783_v62  ;;  %v18796_v62 = vld [vmem:[%s25675_s1 + $0x60] sm:$0xff]  }
 0x19a   : > { %v16495_v12 = vpop.f32.mrf.mxu0  ;;  %16987 = vmatpush3.bf16.msra.mxu1 %v18784_v40  ;;  %16912 = vmatprep.subr.bf16.mxu0 %v25680_v1  ;;  %v2930_v40 = vsel %vm624_vm1, %v2920_v46, %v20575_v59  ;;  %v2934_v24 = vrot.slane %v2932_v15, 3 }
 0x19b   : > { %v20569_v28 = vadd.f32 %v1898_v60, %v1464_v38  ;;  %v16571_v41 = vpop.f32.mrf.mxu1  ;;  %16988 = vmatprep.subr.bf16.mxu1 %v25680_v1  ;;  %v2937_v38 = vrot.slane %v2935_v30, 4  ;;  %v14182_v60 = vcombine.low %v20583_v45, %v20586_v44 }
 0x19c   : > { %v1388_v55 = vpop.f32.mrf.mxu0  ;;  %16777 = vmatmul.mubr.bf16.gmra.mxu0 %v2921_v20 }
 0x19d   : > { %v1465_v18 = vadd.f32 %v1388_v55, %v20275_v13  ;;  %v1903_v5 = vpop.f32.mrf.mxu1  ;;  %16853 = vmatmul.mubr.bf16.gmra.mxu1 %v14218_v14  ;;  %16780 = vmatprep.mubr.msk.bf16.mxu0 %vm19459_vm0, %v25680_v1  ;;  %v18793_v13 = vld [vmem:[%s25675_s1 + $0x220] sm:$0xff]   ;;  %v18799_v14 = vld [vmem:[%s25675_s1 + $0x218] sm:$0xff]   ;;  %v2941_v41 = vshrl.u32 %v14182_v60, 16  ;;  %v20619_v55 = vld [vmem:[%s19541_s14 + $0x50] sm:$0xf] }
 0x19e   : > { %v16498_v52 = vpop.f32.mrf.mxu0  ;;  %16856 = vmatprep.mubr.msk.bf16.mxu1 %vm19459_vm0, %v25680_v1  ;;  %16913 = vmatpush3.bf16.msra.mxu0 %v18787_v8  ;;  %v2938_v8 = vor.u32 %v2937_v38, %v2934_v24  ;;  %v18811_v38 = vld [vmem:[%s25675_s1 + $0x208] sm:$0xff]  }
 0x19f   : > { %v20591_v27 = vadd.f32 %v1903_v5, %v1465_v18  ;;  %v16574_v23 = vpop.f32.mrf.mxu1  ;;  %16989 = vmatpush3.bf16.msra.mxu1 %v18790_v42  ;;  %16914 = vmatprep.subr.bf16.mxu0 %v25680_v1  ;;  %v2944_v42 = vshll.u32 %v14182_v60, 16  ;;  %v20622_v18 = vld [vmem:[%s19541_s14 + $0x54] sm:$0xf] }
 0x1a0   : > { %v1391_v36 = vpop.f32.mrf.mxu0  ;;  %16990 = vmatprep.subr.bf16.mxu1 %v25680_v1  ;;  %v18806_v52 = vld [vmem:[%s25675_s1 + $0x50] sm:$0xff]   ;;  %v14220_v23 = vcombine.low %v20518_v25, %v20548_v43 }
 0x1a1   : > { %v1466_v47 = vadd.f32 %v1391_v36, %v20294_v35  ;;  %v1906_v7 = vpop.f32.mrf.mxu1  ;;  %v18800_v35 = vld [vmem:[%s25675_s1 + $0x58] sm:$0xff]  }
 0x1a2   : > { %v16499_v20 = vpop.f32.mrf.mxu0  ;;  %16915 = vmatpush3.bf16.msra.mxu0 %v18793_v13 }
 0x1a3   : > { %v20608_v46 = vadd.f32 %v1906_v7, %v1466_v47  ;;  %v16575_v11 = vpop.f32.mrf.mxu1  ;;  %16991 = vmatpush3.bf16.msra.mxu1 %v18796_v62  ;;  %16916 = vmatprep.subr.bf16.mxu0 %v25680_v1  ;;  %v14183_v62 = vcombine.low %v20619_v55, %v20622_v18  ;;  %v2943_v47 = vrot.slane %v2941_v41, 3  ;;  %v2946_v7 = vrot.slane %v2944_v42, 4  ;;  %v18817_v41 = vld [vmem:[%s25675_s1 + $0x200] sm:$0xff]  }
 0x1a4   : > { %v1396_v49 = vpop.f32.mrf.mxu0  ;;  %16781 = vmatmul.mubr.bf16.gmra.mxu0 %v2930_v40  ;;  %16992 = vmatprep.subr.bf16.mxu1 %v25680_v1 }
 0x1a5   : > { %v1467_v3 = vadd.f32 %v1396_v49, %v20310_v22  ;;  %v1911_v12 = vpop.f32.mrf.mxu1  ;;  %16857 = vmatmul.mubr.bf16.gmra.mxu1 %v14219_v6  ;;  %16784 = vmatprep.mubr.msk.bf16.mxu0 %vm19459_vm0, %v25680_v1  ;;  %v18805_v22 = vld [vmem:[%s25675_s1 + $0x210] sm:$0xff]   ;;  %v2939_v6 = vsel %vm624_vm1, %v20575_v59, %v2938_v8  ;;  %v2950_v60 = vshrl.u32 %v14183_v62, 16  ;;  %v2953_v20 = vshll.u32 %v14183_v62, 16 }
 0x1a6   : > { %v16502_v5 = vpop.f32.mrf.mxu0  ;;  %16860 = vmatprep.mubr.msk.bf16.mxu1 %vm19459_vm0, %v25680_v1  ;;  %16917 = vmatpush3.bf16.msra.mxu0 %v18799_v14 }
 0x1a7   : > { %v20629_v15 = vadd.f32 %v1911_v12, %v1467_v3  ;;  %v16578_v30 = vpop.f32.mrf.mxu1  ;;  %16993 = vmatpush3.bf16.msra.mxu1 %v18800_v35  ;;  %16918 = vmatprep.subr.bf16.mxu0 %v25680_v1  ;;  %v2947_v35 = vor.u32 %v2946_v7, %v2943_v47  ;;  %v20659_v3 = vld [vmem:[%s19541_s14 + $0x58] sm:$0xf]  ;;  %v20662_v12 = vld [vmem:[%s19541_s14 + $0x5c] sm:$0xf]  ;;  %v18818_v5 = vld [vmem:[%s25675_s1 + $0x40] sm:$0xff]  }
 0x1a8   : > { %v1399_v13 = vpop.f32.mrf.mxu0  ;;  %16994 = vmatprep.subr.bf16.mxu1 %v25680_v1  ;;  %v2952_v30 = vrot.slane %v2950_v60, 3 }
 0x1a9   : > { %v1468_v36 = vadd.f32 %v1399_v13, %v20326_v17  ;;  %v1914_v40 = vpop.f32.mrf.mxu1  ;;  %v18812_v17 = vld [vmem:[%s25675_s1 + $0x48] sm:$0xff]   ;;  %v2948_v62 = vsel %vm624_vm1, %v2938_v8, %v2947_v35 }
 0x1aa   : > { %v16503_v24 = vpop.f32.mrf.mxu0  ;;  %16919 = vmatpush3.bf16.msra.mxu0 %v18805_v22 }
 0x1ab   : > { %v20646_v25 = vadd.f32 %v1914_v40, %v1468_v36  ;;  %v16579_v43 = vpop.f32.mrf.mxu1  ;;  %16995 = vmatpush3.bf16.msra.mxu1 %v18806_v52  ;;  %16920 = vmatprep.subr.bf16.mxu0 %v25680_v1  ;;  %v2955_v52 = vrot.slane %v2953_v20, 4  ;;  %v14221_v36 = vcombine.low %v20551_v63, %v20583_v45  ;;  %v14184_v40 = vcombine.low %v20659_v3, %v20662_v12 }
 0x1ac   : > { %v1404_v59 = vpop.f32.mrf.mxu0  ;;  %16785 = vmatmul.mubr.bf16.gmra.mxu0 %v2939_v6  ;;  %16996 = vmatprep.subr.bf16.mxu1 %v25680_v1 }
 0x1ad   : > { %v1469_v14 = vadd.f32 %v1404_v59, %v20339_v56  ;;  %v1919_v11 = vpop.f32.mrf.mxu1  ;;  %16861 = vmatmul.mubr.bf16.gmra.mxu1 %v14220_v23  ;;  %16788 = vmatprep.mubr.msk.bf16.mxu0 %vm19459_vm0, %v25680_v1  ;;  %v2956_v24 = vor.u32 %v2955_v52, %v2952_v30  ;;  %v2959_v8 = vshrl.u32 %v14184_v40, 16  ;;  %v20693_v59 = vld [vmem:[%s19541_s14 + $0x64] sm:$0xf] }
 0x1ae   : > { %v16506_v49 = vpop.f32.mrf.mxu0  ;;  %16864 = vmatprep.mubr.msk.bf16.mxu1 %vm19459_vm0, %v25680_v1  ;;  %16921 = vmatpush3.bf16.msra.mxu0 %v18811_v38  ;;  %v2962_v38 = vshll.u32 %v14184_v40, 16  ;;  %v20712_v40 = vld [vmem:[%s19541_s14 + $0x6c] sm:$0xf] }
 0x1af   : > { %v20667_v56 = vadd.f32 %v1919_v11, %v1469_v14  ;;  %v16582_v42 = vpop.f32.mrf.mxu1  ;;  %16997 = vmatpush3.bf16.msra.mxu1 %v18812_v17  ;;  %16922 = vmatprep.subr.bf16.mxu0 %v25680_v1  ;;  %v20690_v17 = vld [vmem:[%s19541_s14 + $0x60] sm:$0xf]  ;;  %v14222_v11 = vcombine.low %v20586_v44, %v20619_v55 }
 0x1b0   : > { %v1407_v22 = vpop.f32.mrf.mxu0  ;;  %16998 = vmatprep.subr.bf16.mxu1 %v25680_v1  ;;  %v2961_v42 = vrot.slane %v2959_v8, 3 }
 0x1b1   : > { %v1470_v13 = vadd.f32 %v1407_v22, %v20355_v39  ;;  %v1922_v23 = vpop.f32.mrf.mxu1  ;;  %v14185_v22 = vcombine.low %v20690_v17, %v20693_v59 }
 0x1b2   : > { %v16507_v6 = vpop.f32.mrf.mxu0  ;;  %16923 = vmatpush3.bf16.msra.mxu0 %v18817_v41 }
 0x1b3   : > { %v20680_v47 = vadd.f32 %v1922_v23, %v1470_v13  ;;  %v16583_v7 = vpop.f32.mrf.mxu1  ;;  %16999 = vmatpush3.bf16.msra.mxu1 %v18818_v5  ;;  %17088 = vmatprep.subr.bf16.mxu0 %v25680_v1  ;;  %v2964_v5 = vrot.slane %v2962_v38, 4  ;;  %v2968_v44 = vshrl.u32 %v14185_v22, 16  ;;  %v2971_v55 = vshll.u32 %v14185_v22, 16  ;;  %v20732_v22 = vld [vmem:[%s19541_s14 + $0x70] sm:$0xf] }
 0x1b4   : > { %v1412_v39 = vpop.f32.mrf.mxu0  ;;  %16789 = vmatmul.mubr.bf16.gmra.mxu0 %v2948_v62  ;;  %17036 = vmatprep.subr.bf16.mxu1 %v25680_v1 }
 0x1b5   : > { %v1471_v63 = vadd.f32 %v1412_v39, %v20363_v10  ;;  %v1927_v45 = vpop.f32.mrf.mxu1  ;;  %16865 = vmatmul.mubr.bf16.gmra.mxu1 %v14221_v36  ;;  %16792 = vmatprep.mubr.msk.bf16.mxu0 %vm19459_vm0, %v25680_v1  ;;  %v2957_v10 = vsel %vm624_vm1, %v2947_v35, %v2956_v24  ;;  %v20709_v36 = vld [vmem:[%s19541_s14 + $0x68] sm:$0xf] }
 0x1b6   : > { %v16510_v43 = vpop.f32.mrf.mxu0  ;;  %16868 = vmatprep.mubr.msk.bf16.mxu1 %vm19459_vm0, %v25680_v1 }
 0x1b7   : > { %v20695_v60 = vadd.f32 %v1927_v45, %v1471_v63  ;;  %v16586_v20 = vpop.f32.mrf.mxu1  ;;  %v14223_v63 = vcombine.low %v20622_v18, %v20659_v3  ;;  %v14186_v45 = vcombine.low %v20709_v36, %v20712_v40 }
 0x1b8   : > { %v1415_v14 = vpop.f32.mrf.mxu0  ;;  %v2970_v20 = vrot.slane %v2968_v44, 3 }
 0x1b9   : > { %v1472_v49 = vadd.f32 %v1415_v14, %v20370_v26  ;;  %v1930_v41 = vpop.f32.mrf.mxu1  ;;  %v2965_v26 = vor.u32 %v2964_v5, %v2961_v42  ;;  %v2973_v14 = vrot.slane %v2971_v55, 4  ;;  %v2977_v42 = vshrl.u32 %v14186_v45, 16 }
 0x1ba   : > { %v16511_v30 = vpop.f32.mrf.mxu0  ;;  %v2980_v18 = vshll.u32 %v14186_v45, 16 }
 0x1bb   : > { %v20703_v52 = vadd.f32 %v1930_v41, %v1472_v49  ;;  %v16587_v13 = vpop.f32.mrf.mxu1  ;;  %v2966_v43 = vsel %vm624_vm1, %v2956_v24, %v2965_v26  ;;  %v20735_v30 = vld [vmem:[%s19541_s14 + $0x74] sm:$0xf] }
 0x1bc   : > { %v1420_v23 = vpop.f32.mrf.mxu0  ;;  %16793 = vmatmul.mubr.bf16.gmra.mxu0 %v2957_v10 }
 0x1bd   : > { %v1473_v35 = vadd.f32 %v1420_v23, %v20376_v9  ;;  %v1935_v62 = vpop.f32.mrf.mxu1  ;;  %16869 = vmatmul.mubr.bf16.gmra.mxu1 %v14222_v11  ;;  %16796 = vmatprep.mubr.msk.bf16.mxu0 %vm19459_vm0, %v25680_v1 }
 0x1be   : > { %v16514_v6 = vpop.f32.mrf.mxu0  ;;  %16872 = vmatprep.mubr.msk.bf16.mxu1 %vm19459_vm0, %v25680_v1 }
 0x1bf   : > { %v20716_v7 = vadd.f32 %v1935_v62, %v1473_v35  ;;  %v16590_v39 = vpop.f32.mrf.mxu1  ;;  %v2979_v62 = vrot.slane %v2977_v42, 3 }
 0x1c0   : > { %v1423_v9 = vpop.f32.mrf.mxu0  ;;  %v14224_v39 = vcombine.low %v20662_v12, %v20690_v17 }
 0x1c1   : > { %v1474_v8 = vadd.f32 %v1423_v9, %v20382_v33  ;;  %v1938_v38 = vpop.f32.mrf.mxu1  ;;  %v2974_v33 = vor.u32 %v2973_v14, %v2970_v20  ;;  %v14187_v9 = vcombine.low %v20732_v22, %v20735_v30  ;;  %v20754_v14 = vld [vmem:[%s19541_s14 + $0x8c] sm:$0xf] }
 0x1c2   : > { %v16515_v10 = vpop.f32.mrf.mxu0 }
 0x1c3   : > { %v20724_v11 = vadd.f32 %v1938_v38, %v1474_v8  ;;  %v16591_v49 = vpop.f32.mrf.mxu1  ;;  %v2975_v6 = vsel %vm624_vm1, %v2965_v26, %v2974_v33  ;;  %v2986_v12 = vshrl.u32 %v14187_v9, 16  ;;  %v2989_v17 = vshll.u32 %v14187_v9, 16  ;;  %v20751_v26 = vld [vmem:[%s19541_s14 + $0x88] sm:$0xf] }
 0x1c4   : > { %v1428_v41 = vpop.f32.mrf.mxu0  ;;  %16797 = vmatmul.mubr.bf16.gmra.mxu0 %v2966_v43  ;;  %v20759_v49 = vld [vmem:[%s19541_s14 + $0x78] sm:$0xf] }
 0x1c5   : > { %v1475_v3 = vadd.f32 %v1428_v41, %v20388_v51  ;;  %v1943_v5 = vpop.f32.mrf.mxu1  ;;  %16873 = vmatmul.mubr.bf16.gmra.mxu1 %v14223_v63  ;;  %16800 = vmatprep.mubr.msk.bf16.mxu0 %vm19459_vm0, %v25680_v1  ;;  %v2982_v51 = vrot.slane %v2980_v18, 4  ;;  %v14345_v41 = vcombine.low %v20751_v26, %v20754_v14 }
 0x1c6   : > { %v16518_v24 = vpop.f32.mrf.mxu0  ;;  %16876 = vmatprep.mubr.msk.bf16.mxu1 %vm19459_vm0, %v25680_v1 }
 0x1c7   : > { %v20737_v13 = vadd.f32 %v1943_v5, %v1475_v3  ;;  %v16594_v23 = vpop.f32.mrf.mxu1  ;;  %v14225_v24 = vcombine.low %v20693_v59, %v20709_v36  ;;  %v4591_v9 = vshrl.u32 %v14345_v41, 16 }
 0x1c8   : > { %v1431_v35 = vpop.f32.mrf.mxu0 }
 0x1c9   : > { %v1476_v44 = vadd.f32 %v1431_v35, %v20394_v61  ;;  %v1946_v55 = vpop.f32.mrf.mxu1  ;;  %v2983_v61 = vor.u32 %v2982_v51, %v2979_v62  ;;  %v2988_v62 = vrot.slane %v2986_v12, 3  ;;  %v2991_v51 = vrot.slane %v2989_v17, 4  ;;  %v20788_v17 = vld [vmem:[%s19541_s14 + $0x80] sm:$0xf] }
 0x1ca   : > { %v16519_v63 = vpop.f32.mrf.mxu0 }
 0x1cb   : > { %v20745_v45 = vadd.f32 %v1946_v55, %v1476_v44  ;;  %v16595_v8 = vpop.f32.mrf.mxu1  ;;  %v2984_v5 = vsel %vm624_vm1, %v2974_v33, %v2983_v61  ;;  %v20775_v55 = vld [vmem:[%s19541_s14 + $0x90] sm:$0xf]  ;;  %v4594_v33 = vshll.u32 %v14345_v41, 16 }
 0x1cc   : > { %v1436_v38 = vpop.f32.mrf.mxu0  ;;  %16801 = vmatmul.mubr.bf16.gmra.mxu0 %v2975_v6  ;;  %v20778_v6 = vld [vmem:[%s19541_s14 + $0x94] sm:$0xf] }
 0x1cd   : > { %v1477_v43 = vadd.f32 %v1436_v38, %v20400_v16  ;;  %v1951_v20 = vpop.f32.mrf.mxu1  ;;  %16877 = vmatmul.mubr.bf16.gmra.mxu1 %v14224_v39  ;;  %16804 = vmatprep.mubr.msk.bf16.mxu0 %vm19459_vm0, %v25680_v1  ;;  %v20762_v16 = vld [vmem:[%s19541_s14 + $0x7c] sm:$0xf]  ;;  %v14346_v59 = vcombine.low %v20775_v55, %v20778_v6 }
 0x1ce   : > { %v16522_v10 = vpop.f32.mrf.mxu0  ;;  %16880 = vmatprep.mubr.msk.bf16.mxu1 %vm19459_vm0, %v25680_v1  ;;  %v14188_v44 = vcombine.low %v20759_v49, %v20762_v16 }
 0x1cf   : > { %v20766_v42 = vadd.f32 %v1951_v20, %v1477_v43  ;;  %v16598_v18 = vpop.f32.mrf.mxu1  ;;  %v2992_v43 = vor.u32 %v2991_v51, %v2988_v62  ;;  %v20791_v10 = vld [vmem:[%s19541_s14 + $0x84] sm:$0xf]  ;;  %v14226_v62 = vcombine.low %v20712_v40, %v20732_v22 }
 0x1d0   : > { %v1439_v3 = vpop.f32.mrf.mxu0  ;;  %v2995_v20 = vshrl.u32 %v14188_v44, 16  ;;  %v2998_v12 = vshll.u32 %v14188_v44, 16  ;;  %v4593_v18 = vrot.slane %v4591_v9, 3  ;;  %v14189_v51 = vcombine.low %v20788_v17, %v20791_v10 }
 0x1d1   : > { %v1478_v23 = vadd.f32 %v1439_v3, %v20406_v19  ;;  %v1954_v35 = vpop.f32.mrf.mxu1  ;;  %v4596_v3 = vrot.slane %v4594_v33, 4  ;;  %v2993_v33 = vsel %vm624_vm1, %v2983_v61, %v2992_v43 }
 0x1d2   : > { %v16523_v39 = vpop.f32.mrf.mxu0  ;;  %v3004_v61 = vshrl.u32 %v14189_v51, 16 }
 0x1d3   : > { %v20782_v36 = vadd.f32 %v1954_v35, %v1478_v23  ;;  %v16599_v19 = vpop.f32.mrf.mxu1  ;;  %v20811_v22 = vor.u32 %v4596_v3, %v4593_v18 }
 0x1d4   : > { %v1444_v63 = vpop.f32.mrf.mxu0  ;;  %16805 = vmatmul.mubr.bf16.gmra.mxu0 %v2984_v5  ;;  %v4603_v5 = vshll.u32 %v14346_v59, 16 }
 0x1d5   : > { %v1479_v8 = vadd.f32 %v1444_v63, %v20412_v21  ;;  %v1959_v38 = vpop.f32.mrf.mxu1  ;;  %16881 = vmatmul.mubr.bf16.gmra.mxu1 %v14225_v24  ;;  %16808 = vmatprep.mubr.msk.bf16.mxu0 %vm19459_vm0, %v25680_v1  ;;  %v4600_v21 = vshrl.u32 %v14346_v59, 16  ;;  %v2997_v63 = vrot.slane %v2995_v20, 3  ;;  %v20804_v59 = vld [vmem:[%s19541_s14 + $0x98] sm:$0xf]  ;;  %25720 = vst [vmem:[#allocation3_spill] sm:$0xff] %v20811_v22  ;;  %v3007_v20 = vshll.u32 %v14189_v51, 16 }
 0x1d6   : > { %v16526_v41 = vpop.f32.mrf.mxu0  ;;  %16884 = vmatprep.mubr.msk.bf16.mxu1 %vm19459_vm0, %v25680_v1  ;;  %v4605_v39 = vrot.slane %v4603_v5, 4  ;;  %v20828_v51 = vld [vmem:[%s19541_s14 + $0x8c] sm:$0xf] }
 0x1d7   : > { %v20795_v24 = vadd.f32 %v1959_v38, %v1479_v8  ;;  %v16602_v23 = vpop.f32.mrf.mxu1  ;;  %v4602_v44 = vrot.slane %v4600_v21, 3  ;;  %v3000_v41 = vrot.slane %v2998_v12, 4  ;;  %v20807_v8 = vld [vmem:[%s19541_s14 + $0x9c] sm:$0xf] }
 0x1d8   : > { %v1447_v35 = vpop.f32.mrf.mxu0  ;;  %v14347_v40 = vcombine.low %v20804_v59, %v20807_v8 }
 0x1d9   : > { %v1480_v19 = vadd.f32 %v1447_v35, %v20418_v2  ;;  %v1962_v9 = vpop.f32.mrf.mxu1  ;;  %v4606_v21 = vor.u32 %v4605_v39, %v4602_v44  ;;  %v3001_v18 = vor.u32 %v3000_v41, %v2997_v63  ;;  %v20825_v44 = vld [vmem:[%s19541_s14 + $0x88] sm:$0xf] }
 0x1da   : > { %v16527_v38 = vpop.f32.mrf.mxu0  ;;  %v4609_v39 = vshrl.u32 %v14347_v40, 16 }
 0x1db   : > { %v20813_v5 = vadd.f32 %v1962_v9, %v1480_v19  ;;  %v16603_v2 = vpop.f32.mrf.mxu1  ;;  %v20817_v12 = vsel %vm624_vm1, %v20811_v22, %v4606_v21  ;;  %v4612_v19 = vshll.u32 %v14347_v40, 16  ;;  %v14190_v22 = vcombine.low %v20825_v44, %v20828_v51  ;;  %v20839_v40 = vld [vmem:[%s19541_s14 + $0xa0] sm:$0xf] }
 0x1dc   : > { %v2125_v23 = vpop.f32.mrf.mxu0  ;;  %16809 = vmatmul.mubr.bf16.gmra.mxu0 %v2993_v33  ;;  %25722 = vst [vmem:[#allocation5_spill] sm:$0xff] %v20817_v12  ;;  %v3006_v33 = vrot.slane %v3004_v61, 3  ;;  %v3009_v2 = vrot.slane %v3007_v20, 4  ;;  %v14227_v12 = vcombine.low %v20735_v30, %v20759_v49 }
 0x1dd   : > { %25721 = vst [vmem:[#allocation4_spill] sm:$0xff] %v20813_v5  ;;  %v2244_v35 = vadd.f32 %v2125_v23, %v20427_v50  ;;  %v2621_v38 = vpop.f32.mrf.mxu1  ;;  %16885 = vmatmul.mubr.bf16.gmra.mxu1 %v14226_v62  ;;  %16812 = vmatprep.mubr.msk.bf16.mxu0 %vm19459_vm0, %v25680_v1  ;;  %v4611_v23 = vrot.slane %v4609_v39, 3  ;;  %v4614_v63 = vrot.slane %v4612_v19, 4 }
 0x1de   : > { %v16622_v3 = vpop.f32.mrf.mxu0  ;;  %16888 = vmatprep.mubr.msk.bf16.mxu1 %vm19459_vm0, %v25680_v1  ;;  %v3002_v1 = vsel %vm624_vm1, %v2992_v43, %v3001_v18  ;;  %v3010_v30 = vor.u32 %v3009_v2, %v3006_v33 }
 0x1df   : > { %v20830_v9 = vadd.f32 %v2621_v38, %v2244_v35  ;;  %v16698_v50 = vpop.f32.mrf.mxu1  ;;  %v20842_v35 = vld [vmem:[%s19541_s14 + $0xa4] sm:$0xf]  ;;  %v4615_v20 = vor.u32 %v4614_v63, %v4611_v23  ;;  %v20857_v63 = vld [vmem:[%s19541_s14 + $0x90] sm:$0xf] }
 0x1e0   : > { %v2128_v62 = vpop.f32.mrf.mxu0  ;;  %v14348_v61 = vcombine.low %v20839_v40, %v20842_v35 }
 0x1e1   : > { %25723 = vst [vmem:[#allocation6_spill] sm:$0xff] %v20830_v9  ;;  %v2245_v41 = vadd.f32 %v2128_v62, %v20433_v34  ;;  %v2624_v3 = vpop.f32.mrf.mxu1  ;;  %v20849_v49 = vsel %vm624_vm1, %v4606_v21, %v4615_v20  ;;  %v25726_v62 = vmov 0.0   ;;  %v3016_v9 = vshll.u32 %v14190_v22, 16 }
 0x1e2   : > { %v16623_v38 = vpop.f32.mrf.mxu0  ;;  %25725 = vst [vmem:[#allocation8_spill] sm:$0xff] %v20849_v49  ;;  %v4618_v21 = vshrl.u32 %v14348_v61, 16  ;;  %v4621_v33 = vshll.u32 %v14348_v61, 16  ;;  %v20871_v61 = vld [vmem:[%s19541_s14 + $0xa8] sm:$0xf] }
 0x1e3   : > { %v20846_v34 = vadd.f32 %v2624_v3, %v2245_v41  ;;  %v16699_v43 = vpop.f32.mrf.mxu1  ;;  %v3013_v38 = vshrl.u32 %v14190_v22, 16  ;;  %v3011_v41 = vsel %vm624_vm1, %v3001_v18, %v3010_v30  ;;  %v14228_v22 = vcombine.low %v20762_v16, %v20788_v17 }
 0x1e4   : > { %v2133_v39 = vpop.f32.mrf.mxu0  ;;  %16813 = vmatmul.mubr.bf16.gmra.mxu0 %v3002_v1  ;;  %v20860_v1 = vld [vmem:[%s19541_s14 + $0x94] sm:$0xf]  ;;  %v4620_v3 = vrot.slane %v4618_v21, 3  ;;  %v4623_v43 = vrot.slane %v4621_v33, 4 }
 0x1e5   : > { %25724 = vst [vmem:[#allocation7_spill] sm:$0xff] %v20846_v34  ;;  %v2246_v19 = vadd.f32 %v2133_v39, %v20441_v58  ;;  %v2629_v50 = vpop.f32.mrf.mxu1  ;;  %16889 = vmatmul.mubr.bf16.gmra.mxu1 %v14227_v12  ;;  %16816 = vmatprep.mubr.msk.bf16.mxu0 %vm19459_vm0, %v25726_v62  ;;  %v3015_v49 = vrot.slane %v3013_v38, 3  ;;  %v3018_v34 = vrot.slane %v3016_v9, 4  ;;  %v14191_v5 = vcombine.low %v20857_v63, %v20860_v1 }
 0x1e6   : > { %v16626_v23 = vpop.f32.mrf.mxu0  ;;  %16892 = vmatprep.mubr.msk.bf16.mxu1 %vm19459_vm0, %v25726_v62  ;;  %v4624_v16 = vor.u32 %v4623_v43, %v4620_v3 }
 0x1e7   : > { %v20862_v58 = vadd.f32 %v2629_v50, %v2246_v19  ;;  %v16702_v12 = vpop.f32.mrf.mxu1  ;;  %v20874_v19 = vld [vmem:[%s19541_s14 + $0xac] sm:$0xf] }
 0x1e8   : > { %v2136_v2 = vpop.f32.mrf.mxu0  ;;  %v14349_v18 = vcombine.low %v20871_v61, %v20874_v19  ;;  %v20881_v9 = vsel %vm624_vm1, %v4615_v20, %v4624_v16  ;;  %v3019_v12 = vor.u32 %v3018_v34, %v3015_v49 }
 0x1e9   : > { %25727 = vst [vmem:[#allocation9_spill] sm:$0xff] %v20862_v58  ;;  %v2247_v39 = vadd.f32 %v2136_v2, %v20447_v37  ;;  %v2632_v23 = vpop.f32.mrf.mxu1  ;;  %25728 = vst [vmem:[#allocation10_spill] sm:$0xff] %v20881_v9  ;;  %v3022_v2 = vshrl.u32 %v14191_v5, 16  ;;  %v20887_v58 = vld [vmem:[%s19541_s14 + $0x98] sm:$0xf] }
 0x1ea   : > { %v16627_v50 = vpop.f32.mrf.mxu0  ;;  %v4627_v20 = vshrl.u32 %v14349_v18, 16 }
 0x1eb   : > { %v20878_v17 = vadd.f32 %v2632_v23, %v2247_v39  ;;  %v16703_v21 = vpop.f32.mrf.mxu1  ;;  %v3025_v50 = vshll.u32 %v14191_v5, 16  ;;  %v14229_v39 = vcombine.low %v20791_v10, %v20825_v44  ;;  %v14192_v5 = vcombine.low %v20887_v58, %v20887_v58 }
 0x1ec   : > { %v2141_v37 = vpop.f32.mrf.mxu0  ;;  %16817 = vmatmul.mubr.bf16.gmra.mxu0 %v3011_v41  ;;  %v4630_v41 = vshll.u32 %v14349_v18, 16  ;;  %v4629_v34 = vrot.slane %v4627_v20, 3  ;;  %v20900_v18 = vld [vmem:[%s19541_s14 + $0xb0] sm:$0xf] }
 0x1ed   : > { %v2248_v38 = vadd.f32 %v2141_v37, %v20455_v29  ;;  %v2637_v33 = vpop.f32.mrf.mxu1  ;;  %16893 = vmatmul.mubr.bf16.gmra.mxu1 %v14228_v22  ;;  %16820 = vmatprep.mubr.msk.bf16.mxu0 %vm19459_vm0, %v25726_v62  ;;  %v3020_v37 = vsel %vm624_vm1, %v3010_v30, %v3019_v12  ;;  %v3027_v9 = vrot.slane %v3025_v50, 4 }
 0x1ee   : > { %v16630_v3 = vpop.f32.mrf.mxu0  ;;  %16896 = vmatprep.mubr.msk.bf16.mxu1 %vm19459_vm0, %v25726_v62  ;;  %v4632_v49 = vrot.slane %v4630_v41, 4 }
 0x1ef   : > { %v20891_v43 = vadd.f32 %v2637_v33, %v2248_v38  ;;  %v16706_v29 = vpop.f32.mrf.mxu1  ;;  %v3024_v3 = vrot.slane %v3022_v2, 3  ;;  %v20903_v38 = vld [vmem:[%s19541_s14 + $0xb4] sm:$0xf] }
 0x1f0   : > { %v2144_v22 = vpop.f32.mrf.mxu0  ;;  %v14350_v10 = vcombine.low %v20900_v18, %v20903_v38  ;;  %v4633_v44 = vor.u32 %v4632_v49, %v4629_v34 }
 0x1f1   : > { %v2249_v23 = vadd.f32 %v2144_v22, %v20461_v31  ;;  %v2640_v21 = vpop.f32.mrf.mxu1  ;;  %v3031_v31 = vshrl.u32 %v14192_v5, 16  ;;  %v3028_v50 = vor.u32 %v3027_v9, %v3024_v3  ;;  %v14230_v3 = vcombine.low %v20828_v51, %v20857_v63 }
 0x1f2   : > { %v16631_v33 = vpop.f32.mrf.mxu0  ;;  %v20910_v22 = vsel %vm624_vm1, %v4624_v16, %v4633_v44  ;;  %v4636_v49 = vshrl.u32 %v14350_v10, 16 }
 0x1f3   : > { %v20907_v29 = vadd.f32 %v2640_v21, %v2249_v23  ;;  %v16707_v20 = vpop.f32.mrf.mxu1  ;;  %25730 = vst [vmem:[#allocation12_spill] sm:$0xff] %v20910_v22  ;;  %v3034_v33 = vshll.u32 %v14192_v5, 16  ;;  %v4639_v23 = vshll.u32 %v14350_v10, 16  ;;  %v3029_v5 = vsel %vm624_vm1, %v3019_v12, %v3028_v50  ;;  %v18821_v22 = vld [vmem:[%s19541_s14 + $0x24] sm:$0xff]   ;;  %v20928_v10 = vld [vmem:[%s19541_s14 + $0xbc] sm:$0xf] }
 0x1f4   : > { %v2149_v41 = vpop.f32.mrf.mxu0  ;;  %16821 = vmatmul.mubr.bf16.gmra.mxu0 %v3020_v37  ;;  %v3033_v37 = vrot.slane %v3031_v31, 3 }
 0x1f5   : > { %25729 = vst [vmem:[#allocation11_spill] sm:$0xff] %v20907_v29  ;;  %v2250_v30 = vadd.f32 %v2149_v41, %v20479_v54  ;;  %v2645_v2 = vpop.f32.mrf.mxu1  ;;  %16897 = vmatmul.mubr.bf16.gmra.mxu1 %v14229_v39  ;;  %16824 = vmatprep.mubr.msk.bf16.mxu0 %vm19459_vm0, %v25726_v62  ;;  %v4638_v39 = vrot.slane %v4636_v49, 3  ;;  %v4641_v20 = vrot.slane %v4639_v23, 4  ;;  %v20925_v29 = vld [vmem:[%s19541_s14 + $0xb8] sm:$0xf] }
 0x1f6   : > { %v16634_v34 = vpop.f32.mrf.mxu0  ;;  %16900 = vmatprep.mubr.msk.bf16.mxu1 %vm19459_vm0, %v25726_v62  ;;  %v14351_v31 = vcombine.low %v20925_v29, %v20928_v10 }
 0x1f7   : > { %v20917_v16 = vadd.f32 %v2645_v2, %v2250_v30  ;;  %v16710_v21 = vpop.f32.mrf.mxu1  ;;  %v3036_v34 = vrot.slane %v3034_v33, 4  ;;  %v4642_v2 = vor.u32 %v4641_v20, %v4638_v39 }
 0x1f8   : > { %v2152_v54 = vpop.f32.mrf.mxu0  ;;  %v20941_v21 = vld [vmem:[%s19541_s14 + $0x2c] sm:$0xff]   ;;  %v4645_v20 = vshrl.u32 %v14351_v31, 16 }
 0x1f9   : > { %v2251_v41 = vadd.f32 %v2152_v54, %v20488_v48  ;;  %v2648_v9 = vpop.f32.mrf.mxu1  ;;  %v20935_v12 = vsel %vm624_vm1, %v4633_v44, %v4642_v2  ;;  %v3037_v33 = vor.u32 %v3036_v34, %v3033_v37  ;;  %v3692_v54 = vshll.u32 %v18821_v22, 16 }
 0x1fa   : > { %v16635_v30 = vpop.f32.mrf.mxu0  ;;  %25732 = vst [vmem:[#allocation14_spill] sm:$0xff] %v20935_v12  ;;  %v4648_v44 = vshll.u32 %v14351_v31, 16  ;;  %v4647_v37 = vrot.slane %v4645_v20, 3  ;;  %v3697_v12 = vshll.u32 %v20941_v21, 16  ;;  %v20956_v31 = vld [vmem:[%s19541_s14 + $0xc4] sm:$0xf] }
 0x1fb   : > { %v20932_v49 = vadd.f32 %v2648_v9, %v2251_v41  ;;  %v16711_v48 = vpop.f32.mrf.mxu1 }
 0x1fc   : > { %v2157_v23 = vpop.f32.mrf.mxu0  ;;  %16825 = vmatmul.mubr.bf16.gmra.mxu0 %v3029_v5  ;;  %v14231_v5 = vcombine.low %v20860_v1, %v20887_v58  ;;  %v4650_v34 = vrot.slane %v4648_v44, 4  ;;  %v3699_v44 = vrot.slane %v3697_v12, 1 }
 0x1fd   : > { %25731 = vst [vmem:[#allocation13_spill] sm:$0xff] %v20932_v49  ;;  %v2252_v51 = vadd.f32 %v2157_v23, %v20501_v4  ;;  %v2653_v63 = vpop.f32.mrf.mxu1  ;;  %16901 = vmatmul.mubr.bf16.gmra.mxu1 %v14230_v3  ;;  %16828 = vmatprep.mubr.msk.bf16.mxu0 %vm19459_vm0, %v25726_v62  ;;  %v3690_v3 = vshrl.u32 %v18821_v22, 16  ;;  %v3038_v23 = vsel %vm624_vm1, %v3028_v50, %v3037_v33  ;;  %v20953_v49 = vld [vmem:[%s19541_s14 + $0xc0] sm:$0xf] }
 0x1fe   : > { %v16638_v39 = vpop.f32.mrf.mxu0  ;;  %16904 = vmatprep.mubr.msk.bf16.mxu1 %vm19459_vm0, %v25726_v62  ;;  %v14352_v1 = vcombine.low %v20953_v49, %v20956_v31  ;;  %v4651_v58 = vor.u32 %v4650_v34, %v4647_v37 }
 0x1ff   : > { %v20945_v41 = vadd.f32 %v2653_v63, %v2252_v51  ;;  %v16714_v4 = vpop.f32.mrf.mxu1  ;;  %v3694_v39 = vrot.slane %v3692_v54, 1 }
 0x200   : > { %v2160_v9 = vpop.f32.mrf.mxu0  ;;  %v20963_v50 = vsel %vm624_vm1, %v4642_v2, %v4651_v58  ;;  %v20969_v4 = vld [vmem:[%s19541_s14 + $0x84] sm:$0xf]  ;;  %v4654_v2 = vshrl.u32 %v14352_v1, 16  ;;  %v4657_v34 = vshll.u32 %v14352_v1, 16  ;;  %v3701_v1 = vshrl.u32 %v20941_v21, 16 }
 0x201   : > { %v2253_v30 = vadd.f32 %v2160_v9, %v20509_v0  ;;  %v2656_v48 = vpop.f32.mrf.mxu1  ;;  %25733 = vst [vmem:[#allocation15_spill] sm:$0xff] %v20963_v50  ;;  %v3695_v20 = vor.u32 %v3694_v39, %v3690_v3  ;;  %v20972_v9 = vld [vmem:[%s19541_s14 + $0x34] sm:$0xff]  }
 0x202   : > { %v16639_v51 = vpop.f32.mrf.mxu0  ;;  %v4656_v3 = vrot.slane %v4654_v2, 3  ;;  %v4659_v12 = vrot.slane %v4657_v34, 4 }
 0x203   : > { %v20960_v22 = vadd.f32 %v2656_v48, %v2253_v30  ;;  %v16715_v0 = vpop.f32.mrf.mxu1  ;;  %v14327_v48 = vcombine.low %v20969_v4, %v20751_v26  ;;  %v3700_v51 = vsel %vm1110_vm2, %v3695_v20, %v3699_v44  ;;  %v18825_v26 = vld [vmem:[%s25675_s1 + $0x38] sm:$0xff]  }
 0x204   : > { %v2165_v63 = vpop.f32.mrf.mxu0  ;;  %16829 = vmatmul.mubr.bf16.gmra.mxu0 %v3038_v23  ;;  %v18824_v0 = vld [vmem:[%s25675_s1 + $0xb8] sm:$0xff]   ;;  %v4660_v20 = vor.u32 %v4659_v12, %v4656_v3  ;;  %v18833_v3 = vld [vmem:[%s25675_s1 + $0xb0] sm:$0xff]  }
 0x205   : > { %v2254_v33 = vadd.f32 %v2165_v63, %v20522_v53  ;;  %v2661_v54 = vpop.f32.mrf.mxu1  ;;  %16905 = vmatmul.mubr.bf16.gmra.mxu1 %v14231_v5  ;;  %16924 = vmatprep.mubr.msk.bf16.mxu0 %vm19459_vm0, %v25726_v62  ;;  %v3705_v63 = vshll.u32 %v20972_v9, 16 }
 0x206   : > { %v16642_v37 = vpop.f32.mrf.mxu0  ;;  %17000 = vmatprep.mubr.msk.bf16.mxu1 %vm19459_vm0, %v25726_v62  ;;  %v20998_v21 = vsel %vm624_vm1, %v4651_v58, %v4660_v20 }
 0x207   : > { %v20976_v30 = vadd.f32 %v2661_v54, %v2254_v33  ;;  %v16718_v53 = vpop.f32.mrf.mxu1  ;;  %v20988_v33 = vld [vmem:[%s19541_s14 + $0xc8] sm:$0xf]  ;;  %v3707_v50 = vrot.slane %v3705_v63, 1 }
 0x208   : > { %v2168_v5 = vpop.f32.mrf.mxu0 }
 0x209   : > { %25734 = vst [vmem:[#allocation16_spill] sm:$0xff] %v20976_v30  ;;  %v2255_v23 = vadd.f32 %v2168_v5, %v20536_v57  ;;  %v2664_v39 = vpop.f32.mrf.mxu1  ;;  %v14353_v57 = vcombine.low %v20988_v33, %v20988_v33  ;;  %v21002_v30 = vld [vmem:[%s19541_s14 + $0x3c] sm:$0xff]  }
 0x20a   : > { %v16643_v54 = vpop.f32.mrf.mxu0 }
 0x20b   : > { %v20995_v37 = vadd.f32 %v2664_v39, %v2255_v23  ;;  %v16719_v2 = vpop.f32.mrf.mxu1  ;;  %v3703_v54 = vor.u32 %v3701_v1, %v3699_v44  ;;  %v4663_v58 = vshrl.u32 %v14353_v57, 16 }
 0x20c   : > { %v2173_v34 = vpop.f32.mrf.mxu0  ;;  %16925 = vmatmul.mubr.bf16.vlgmr.msra.gmra.mxu0 %v3700_v51  ;;  %v14328_v51 = vcombine.low %v20754_v14, %v20775_v55  ;;  %v3709_v2 = vshrl.u32 %v20972_v9, 16  ;;  %v18834_v14 = vld [vmem:[%s25675_s1 + $0x28] sm:$0xff]  }
 0x20d   : > { %v2256_v53 = vadd.f32 %v2173_v34, %v20553_v32  ;;  %v2669_v5 = vpop.f32.mrf.mxu1  ;;  %17001 = vmatmul.mubr.bf16.vlgmr.msra.gmra.mxu1 %v14327_v48  ;;  %17089 = vmatpush3.bf16.msra.mxu0 %v18824_v0  ;;  %v18829_v32 = vld [vmem:[%s25675_s1 + $0x30] sm:$0xff]   ;;  %v4666_v48 = vshll.u32 %v14353_v57, 16  ;;  %v4665_v0 = vrot.slane %v4663_v58, 3  ;;  %v3708_v57 = vsel %vm1110_vm2, %v3703_v54, %v3707_v50  ;;  %v18839_v9 = vld [vmem:[%s25675_s1 + $0xa8] sm:$0xff]  }
 0x20e   : > { %v16646_v12 = vpop.f32.mrf.mxu0  ;;  %17037 = vmatpush3.bf16.msra.mxu1 %v18825_v26  ;;  %16928 = vmatprep.mubr.msk.bf16.mxu0 %vm19459_vm0, %v25726_v62  ;;  %v3713_v34 = vshll.u32 %v21002_v30, 16  ;;  %v3711_v58 = vor.u32 %v3709_v2, %v3707_v50  ;;  %v18847_v50 = vld [vmem:[%s25675_s1 + $0xa0] sm:$0xff]   ;;  %v3717_v2 = vshrl.u32 %v21002_v30, 16 }
 0x20f   : > { %v21012_v23 = vadd.f32 %v2669_v5, %v2256_v53  ;;  %v16722_v44 = vpop.f32.mrf.mxu1  ;;  %17004 = vmatprep.mubr.msk.bf16.mxu1 %vm19459_vm0, %v25726_v62  ;;  %17038 = vmatprep.subr.bf16.mxu1 %v25726_v62  ;;  %v4668_v1 = vrot.slane %v4666_v48, 4 }
 0x210   : > { %v2176_v39 = vpop.f32.mrf.mxu0  ;;  %17090 = vmatprep.subr.bf16.mxu0 %v25726_v62  ;;  %v3715_v48 = vrot.slane %v3713_v34, 1  ;;  %v21041_v44 = vld [vmem:[%s19541_s14 + $0x44] sm:$0xff]  }
 0x211   : > { %v2257_v63 = vadd.f32 %v2176_v39, %v20569_v28  ;;  %v2672_v26 = vpop.f32.mrf.mxu1  ;;  %17091 = vmatpush3.bf16.msra.mxu0 %v18833_v3  ;;  %v4669_v55 = vor.u32 %v4668_v1, %v4665_v0  ;;  %v14329_v1 = vcombine.low %v20778_v6, %v20804_v59  ;;  %v3721_v34 = vshll.u32 %v21041_v44, 16 }
 0x212   : > { %v16647_v53 = vpop.f32.mrf.mxu0  ;;  %17039 = vmatpush3.bf16.msra.mxu1 %v18829_v32  ;;  %17092 = vmatprep.subr.bf16.mxu0 %v25726_v62 }
 0x213   : > { %v21028_v5 = vadd.f32 %v2672_v26, %v2257_v63  ;;  %v16723_v28 = vpop.f32.mrf.mxu1  ;;  %17040 = vmatprep.subr.bf16.mxu1 %v25726_v62  ;;  %v21035_v3 = vsel %vm624_vm1, %v4660_v20, %v4669_v55  ;;  %v18838_v20 = vld [vmem:[%s25675_s1 + $0x20] sm:$0xff]  }
 0x214   : > { %v2181_v54 = vpop.f32.mrf.mxu0  ;;  %16929 = vmatmul.mubr.bf16.gmra.mxu0 %v3708_v57  ;;  %v3716_v57 = vsel %vm1110_vm2, %v3711_v58, %v3715_v48  ;;  %v18851_v58 = vld [vmem:[%s25675_s1 + $0x10] sm:$0xff]  }
 0x215   : > { %v2258_v12 = vadd.f32 %v2181_v54, %v20591_v27  ;;  %v2677_v32 = vpop.f32.mrf.mxu1  ;;  %17005 = vmatmul.mubr.bf16.gmra.mxu1 %v14328_v51  ;;  %16932 = vmatprep.mubr.msk.bf16.mxu0 %vm19459_vm0, %v25726_v62  ;;  %v3723_v54 = vrot.slane %v3721_v34, 1 }
 0x216   : > { %v16650_v39 = vpop.f32.mrf.mxu0  ;;  %17008 = vmatprep.mubr.msk.bf16.mxu1 %vm19459_vm0, %v25726_v62  ;;  %17041 = vmatpush3.bf16.msra.mxu1 %v18834_v14  ;;  %v18843_v14 = vld [vmem:[%s25675_s1 + $0x18] sm:$0xff]  }
 0x217   : > { %v21048_v0 = vadd.f32 %v2677_v32, %v2258_v12  ;;  %v16726_v27 = vpop.f32.mrf.mxu1  ;;  %17042 = vmatprep.subr.bf16.mxu1 %v25726_v62  ;;  %17093 = vmatpush3.bf16.msra.mxu0 %v18839_v9  ;;  %v3719_v9 = vor.u32 %v3717_v2, %v3715_v48  ;;  %v21075_v12 = vld [vmem:[%s19541_s14 + $0x4c] sm:$0xff]  }
 0x218   : > { %v2184_v51 = vpop.f32.mrf.mxu0  ;;  %17094 = vmatprep.subr.bf16.mxu0 %v25726_v62  ;;  %v18865_v48 = vld [vmem:[%s25675_s1 + $0x90] sm:$0xff]   ;;  %v14330_v27 = vcombine.low %v20807_v8, %v20839_v40  ;;  %v18855_v2 = vld [vmem:[%s25675_s1 + $0x8] sm:$0xff]  }
 0x219   : > { %v2259_v63 = vadd.f32 %v2184_v51, %v20608_v46  ;;  %v2680_v26 = vpop.f32.mrf.mxu1  ;;  %v18856_v46 = vld [vmem:[%s25675_s1 + $0x98] sm:$0xff]  }
 0x21a   : > { %v16651_v53 = vpop.f32.mrf.mxu0  ;;  %17043 = vmatpush3.bf16.msra.mxu1 %v18838_v20 }
 0x21b   : > { %v21064_v55 = vadd.f32 %v2680_v26, %v2259_v63  ;;  %v16727_v6 = vpop.f32.mrf.mxu1  ;;  %17044 = vmatprep.subr.bf16.mxu1 %v25726_v62  ;;  %17095 = vmatpush3.bf16.msra.mxu0 %v18847_v50  ;;  %v3725_v63 = vshrl.u32 %v21041_v44, 16  ;;  %v3729_v26 = vshll.u32 %v21075_v12, 16 }
 0x21c   : > { %v2189_v59 = vpop.f32.mrf.mxu0  ;;  %16933 = vmatmul.mubr.bf16.gmra.mxu0 %v3716_v57  ;;  %17096 = vmatprep.subr.bf16.mxu0 %v25726_v62 }
 0x21d   : > { %v2260_v30 = vadd.f32 %v2189_v59, %v20629_v15  ;;  %v2685_v28 = vpop.f32.mrf.mxu1  ;;  %17009 = vmatmul.mubr.bf16.gmra.mxu1 %v14329_v1  ;;  %16936 = vmatprep.mubr.msk.bf16.mxu0 %vm19459_vm0, %v25726_v62  ;;  %v3724_v1 = vsel %vm1110_vm2, %v3719_v9, %v3723_v54  ;;  %v3731_v6 = vrot.slane %v3729_v26, 1  ;;  %v18874_v9 = vld [vmem:[%s25675_s1 + $0x80] sm:$0xff]  }
 0x21e   : > { %v16654_v32 = vpop.f32.mrf.mxu0  ;;  %17012 = vmatprep.mubr.msk.bf16.mxu1 %vm19459_vm0, %v25726_v62  ;;  %17045 = vmatpush3.bf16.msra.mxu1 %v18843_v14  ;;  %v3727_v14 = vor.u32 %v3725_v63, %v3723_v54  ;;  %v18848_v26 = vld [vmem:[%s19541_s14 + $0x5c] sm:$0xff]  }
 0x21f   : > { %v21082_v39 = vadd.f32 %v2685_v28, %v2260_v30  ;;  %v16730_v15 = vpop.f32.mrf.mxu1  ;;  %17046 = vmatprep.subr.bf16.mxu1 %v25726_v62  ;;  %17097 = vmatpush3.bf16.msra.mxu0 %v18856_v46  ;;  %v18844_v46 = vld [vmem:[%s19541_s14 + $0x54] sm:$0xff]   ;;  %v18861_v30 = vld [vmem:[%s25675_s1] sm:$0xff]   ;;  %v14331_v32 = vcombine.low %v20842_v35, %v20871_v61 }
 0x220   : > { %v2192_v20 = vpop.f32.mrf.mxu0  ;;  %17098 = vmatprep.subr.bf16.mxu0 %v25726_v62 }
 0x221   : > { %v2261_v50 = vadd.f32 %v2192_v20, %v20646_v25  ;;  %v2688_v51 = vpop.f32.mrf.mxu1  ;;  %v18869_v25 = vld [vmem:[%s25675_s1 + $0x88] sm:$0xff]   ;;  %v3733_v20 = vshrl.u32 %v21075_v12, 16 }
 0x222   : > { %v16655_v57 = vpop.f32.mrf.mxu0  ;;  %17047 = vmatpush3.bf16.msra.mxu1 %v18851_v58 }
 0x223   : > { %v21098_v34 = vadd.f32 %v2688_v51, %v2261_v50  ;;  %v16731_v8 = vpop.f32.mrf.mxu1  ;;  %17048 = vmatprep.subr.bf16.mxu1 %v25726_v62  ;;  %17099 = vmatpush3.bf16.msra.mxu0 %v18865_v48  ;;  %v3732_v48 = vsel %vm1110_vm2, %v3727_v14, %v3731_v6  ;;  %v3735_v12 = vor.u32 %v3733_v20, %v3731_v6  ;;  %v3741_v14 = vshrl.u32 %v18844_v46, 16 }
 0x224   : > { %v2197_v40 = vpop.f32.mrf.mxu0  ;;  %16937 = vmatmul.mubr.bf16.gmra.mxu0 %v3724_v1  ;;  %17100 = vmatprep.subr.bf16.mxu0 %v25726_v62  ;;  %v3745_v6 = vshll.u32 %v18848_v26, 16  ;;  %v14333_v20 = vcombine.low %v20903_v38, %v20925_v29  ;;  %v18857_v29 = vld [vmem:[%s19541_s14 + $0x6c] sm:$0xff]  }
 0x225   : > { %v2262_v44 = vadd.f32 %v2197_v40, %v20667_v56  ;;  %v2693_v53 = vpop.f32.mrf.mxu1  ;;  %17013 = vmatmul.mubr.bf16.gmra.mxu1 %v14330_v27  ;;  %16940 = vmatprep.mubr.msk.bf16.mxu0 %vm19459_vm0, %v25726_v62  ;;  %v3737_v27 = vshll.u32 %v18844_v46, 16  ;;  %v14332_v40 = vcombine.low %v20874_v19, %v20900_v18  ;;  %v18852_v18 = vld [vmem:[%s19541_s14 + $0x64] sm:$0xff]  }
 0x226   : > { %v16658_v59 = vpop.f32.mrf.mxu0  ;;  %17016 = vmatprep.mubr.msk.bf16.mxu1 %vm19459_vm0, %v25726_v62  ;;  %17049 = vmatpush3.bf16.msra.mxu1 %v18855_v2  ;;  %v3747_v19 = vrot.slane %v3745_v6, 1 }
 0x227   : > { %v21114_v28 = vadd.f32 %v2693_v53, %v2262_v44  ;;  %v16734_v56 = vpop.f32.mrf.mxu1  ;;  %17050 = vmatprep.subr.bf16.mxu1 %v25726_v62  ;;  %17101 = vmatpush3.bf16.msra.mxu0 %v18869_v25  ;;  %v3739_v63 = vrot.slane %v3737_v27, 1 }
 0x228   : > { %v2200_v54 = vpop.f32.mrf.mxu0  ;;  %17102 = vmatprep.subr.bf16.mxu0 %v25726_v62 }
 0x229   : > { %v2263_v58 = vadd.f32 %v2200_v54, %v20680_v47  ;;  %v2696_v15 = vpop.f32.mrf.mxu1  ;;  %v3740_v53 = vsel %vm1110_vm2, %v3735_v12, %v3739_v63 }
 0x22a   : > { %v16659_v50 = vpop.f32.mrf.mxu0  ;;  %17051 = vmatpush3.bf16.msra.mxu1 %v18861_v30 }
 0x22b   : > { %v21126_v51 = vadd.f32 %v2696_v15, %v2263_v58  ;;  %v16735_v1 = vpop.f32.mrf.mxu1  ;;  %17140 = vmatprep.subr.bf16.mxu1 %v25726_v62  ;;  %17103 = vmatpush3.bf16.msra.mxu0 %v18874_v9 }
 0x22c   : > { %v2205_v35 = vpop.f32.mrf.mxu0  ;;  %16941 = vmatmul.mubr.bf16.gmra.mxu0 %v3732_v48  ;;  %17192 = vmatprep.subr.bf16.mxu0 %v25726_v62  ;;  %v3749_v1 = vshrl.u32 %v18848_v26, 16 }
 0x22d   : > { %v2264_v47 = vadd.f32 %v2205_v35, %v20695_v60  ;;  %v2701_v61 = vpop.f32.mrf.mxu1  ;;  %17017 = vmatmul.mubr.bf16.gmra.mxu1 %v14331_v32  ;;  %16944 = vmatprep.mubr.msk.bf16.mxu0 %vm19459_vm0, %v25726_v62  ;;  %v3753_v35 = vshll.u32 %v18852_v18, 16 }
 0x22e   : > { %v16662_v57 = vpop.f32.mrf.mxu0  ;;  %17020 = vmatprep.mubr.msk.bf16.mxu1 %vm19459_vm0, %v25726_v62 }
 0x22f   : > { %v21136_v2 = vadd.f32 %v2701_v61, %v2264_v47  ;;  %v16738_v8 = vpop.f32.mrf.mxu1  ;;  %v3755_v38 = vrot.slane %v3753_v35, 1 }
 0x230   : > { %v2208_v25 = vpop.f32.mrf.mxu0 }
 0x231   : > { %v2265_v60 = vadd.f32 %v2208_v25, %v20703_v52  ;;  %v2704_v44 = vpop.f32.mrf.mxu1  ;;  %v3743_v52 = vor.u32 %v3741_v14, %v3739_v63 }
 0x232   : > { %v16663_v59 = vpop.f32.mrf.mxu0 }
 0x233   : > { %v21142_v30 = vadd.f32 %v2704_v44, %v2265_v60  ;;  %v16739_v56 = vpop.f32.mrf.mxu1  ;;  %v3748_v50 = vsel %vm1110_vm2, %v3743_v52, %v3747_v19  ;;  %v4312_v60 = vld [vmem:[%s19541_s14 + $0x80] sm:$0x8]  ;;  %v3757_v59 = vshrl.u32 %v18852_v18, 16 }
 0x234   : > { %v2213_v9 = vpop.f32.mrf.mxu0  ;;  %16945 = vmatmul.mubr.bf16.gmra.mxu0 %v3740_v53  ;;  %v3761_v56 = vshll.u32 %v18857_v29, 16 }
 0x235   : > { %v2266_v54 = vadd.f32 %v2213_v9, %v20716_v7  ;;  %v2709_v32 = vpop.f32.mrf.mxu1  ;;  %17021 = vmatmul.mubr.bf16.gmra.mxu1 %v14332_v40  ;;  %16948 = vmatprep.mubr.msk.bf16.mxu0 %vm19459_vm0, %v25726_v62 }
 0x236   : > { %v16666_v58 = vpop.f32.mrf.mxu0  ;;  %17024 = vmatprep.mubr.msk.bf16.mxu1 %vm19459_vm0, %v25726_v62 }
 0x237   : > { %v21150_v46 = vadd.f32 %v2709_v32, %v2266_v54  ;;  %v16742_v15 = vpop.f32.mrf.mxu1  ;;  %v14344_v54 = vcombine.low %v4312_v60, %v20969_v4 }
 0x238   : > { %v2216_v48 = vpop.f32.mrf.mxu0 }
 0x239   : > { %v2267_v7 = vadd.f32 %v2216_v48, %v20724_v11  ;;  %v2712_v27 = vpop.f32.mrf.mxu1  ;;  %v3751_v11 = vor.u32 %v3749_v1, %v3747_v19  ;;  %v4583_v4 = vshrl.u32 %v14344_v54, 16  ;;  %v4586_v48 = vshll.u32 %v14344_v54, 16 }
 0x23a   : > { %v16667_v47 = vpop.f32.mrf.mxu0 }
 0x23b   : > { %v21156_v61 = vadd.f32 %v2712_v27, %v2267_v7  ;;  %v16743_v12 = vpop.f32.mrf.mxu1  ;;  %v3756_v6 = vsel %vm1110_vm2, %v3751_v11, %v3755_v38  ;;  %v3765_v47 = vshrl.u32 %v18857_v29, 16 }
 0x23c   : > { %v2221_v63 = vpop.f32.mrf.mxu0  ;;  %16949 = vmatmul.mubr.bf16.gmra.mxu0 %v3748_v50 }
 0x23d   : > { %v2268_v57 = vadd.f32 %v2221_v63, %v20737_v13  ;;  %v2717_v8 = vpop.f32.mrf.mxu1  ;;  %17025 = vmatmul.mubr.bf16.gmra.mxu1 %v14333_v20  ;;  %16952 = vmatprep.mubr.msk.bf16.mxu0 %vm19459_vm0, %v25726_v62  ;;  %v14334_v13 = vcombine.low %v20928_v10, %v20953_v49  ;;  %v3763_v10 = vrot.slane %v3761_v56, 1  ;;  %v18862_v49 = vld [vmem:[%s19541_s14 + $0x74] sm:$0xff]  }
 0x23e   : > { %v16670_v25 = vpop.f32.mrf.mxu0  ;;  %17028 = vmatprep.mubr.msk.bf16.mxu1 %vm19459_vm0, %v25726_v62  ;;  %v3769_v12 = vshll.u32 %v18862_v49, 16 }
 0x23f   : > { %v21164_v26 = vadd.f32 %v2717_v8, %v2268_v57  ;;  %v16746_v40 = vpop.f32.mrf.mxu1  ;;  %v4585_v57 = vrot.slane %v4583_v4, 3  ;;  %v4588_v8 = vrot.slane %v4586_v48, 4  ;;  %v25737_v4 = vld [vmem:[#allocation6_spill] sm:$0xff] }
 0x240   : > { %v2224_v44 = vpop.f32.mrf.mxu0 }
 0x241   : > { %v2269_v53 = vadd.f32 %v2224_v44, %v20745_v45  ;;  %v2720_v14 = vpop.f32.mrf.mxu1  ;;  %v3759_v45 = vor.u32 %v3757_v59, %v3755_v38  ;;  %v4589_v44 = vor.u32 %v4588_v8, %v4585_v57  ;;  %v25738_v57 = vld [vmem:[#allocation7_spill] sm:$0xff] }
 0x242   : > { %v16671_v9 = vpop.f32.mrf.mxu0 }
 0x243   : > { %v21172_v32 = vadd.f32 %v2720_v14, %v2269_v53  ;;  %v16747_v52 = vpop.f32.mrf.mxu1  ;;  %v3764_v35 = vsel %vm1110_vm2, %v3759_v45, %v3763_v10  ;;  %v3773_v9 = vshrl.u32 %v18862_v49, 16 }
 0x244   : > { %v2229_v19 = vpop.f32.mrf.mxu0  ;;  %16953 = vmatmul.mubr.bf16.gmra.mxu0 %v3756_v6  ;;  %v25735_v6 = vld [vmem:[#allocation4_spill] sm:$0xff] }
 0x245   : > { %v2270_v58 = vadd.f32 %v2229_v19, %v20766_v42  ;;  %v2725_v15 = vpop.f32.mrf.mxu1  ;;  %17029 = vmatmul.mubr.bf16.gmra.mxu1 %v14334_v13  ;;  %16956 = vmatprep.mubr.msk.bf16.mxu0 %vm19459_vm0, %v25726_v62  ;;  %v14335_v42 = vcombine.low %v20956_v31, %v20988_v33  ;;  %v3771_v31 = vrot.slane %v3769_v12, 1  ;;  %v18866_v33 = vld [vmem:[%s19541_s14 + $0x7c] sm:$0xff]   ;;  %v25736_v19 = vld [vmem:[#allocation3_spill] sm:$0xff] }
 0x246   : > { %v16674_v18 = vpop.f32.mrf.mxu0  ;;  %17032 = vmatprep.mubr.msk.bf16.mxu1 %vm19459_vm0, %v25726_v62  ;;  %v3777_v54 = vshll.u32 %v18866_v33, 16 }
 0x247   : > { %v21180_v20 = vadd.f32 %v2725_v15, %v2270_v58  ;;  %v16750_v7 = vpop.f32.mrf.mxu1  ;;  %v4598_v58 = vsel %vm624_vm1, %v4589_v44, %v25736_v19  ;;  %v18864_v15 = vld [vmem:[%s25675_s1 + $0xf8] sm:$0xff]   ;;  %v3775_v49 = vor.u32 %v3773_v9, %v3771_v31  ;;  %v18871_v9 = vld [vmem:[%s19541_s14 + $0x8c] sm:$0xff]  }
 0x248   : > { %v2232_v27 = vpop.f32.mrf.mxu0 }
 0x249   : > { %v2271_v50 = vadd.f32 %v2232_v27, %v20782_v36  ;;  %v2728_v1 = vpop.f32.mrf.mxu1  ;;  %v3767_v36 = vor.u32 %v3765_v47, %v3763_v10  ;;  %v3779_v27 = vrot.slane %v3777_v54, 1 }
 0x24a   : > { %v16675_v63 = vpop.f32.mrf.mxu0 }
 0x24b   : > { %v21186_v11 = vadd.f32 %v2728_v1, %v2271_v50  ;;  %v16751_v38 = vpop.f32.mrf.mxu1  ;;  %v3772_v56 = vsel %vm1110_vm2, %v3767_v36, %v3771_v31  ;;  %v18867_v1 = vld [vmem:[%s25675_s1 + $0xf0] sm:$0xff]   ;;  %v19460_v63 = vmov 0   ;;  %v18870_v31 = vld [vmem:[%s25675_s1 + $0xe8] sm:$0xff]  }
 0x24c   : > { %v2237_v25 = vpop.f32.mrf.mxu0  ;;  %16957 = vmatmul.mubr.bf16.gmra.mxu0 %v3764_v35  ;;  %242 = vst [vmem:[#allocation2 + $0xc] sm:$0xf] %v19460_v63  ;;  %243 = vst [vmem:[#allocation2 + $0x10] sm:$0xf] %v19460_v63 }
 0x24d   : > { %v2272_v40 = vadd.f32 %v2237_v25, %v20795_v24  ;;  %v2733_v60 = vpop.f32.mrf.mxu1  ;;  %17033 = vmatmul.mubr.bf16.gmra.mxu1 %v14335_v42  ;;  %16960 = vmatprep.mubr.msk.bf16.mxu0 %vm19459_vm0, %v25726_v62  ;;  %v21209_v42 = vld [vmem:[%s19541_s14 + $0x84] sm:$0xff]   ;;  %241 = vst [vmem:[#allocation2 + $0x8] sm:$0xf] %v19460_v63  ;;  %244 = vst [vmem:[#allocation2 + $0x14] sm:$0xf] %v19460_v63  ;;  %v3780_v25 = vsel %vm1110_vm2, %v3775_v49, %v3779_v27 }
 0x24e   : > { %v16678_v29 = vpop.f32.mrf.mxu0  ;;  %17052 = vmatprep.mubr.msk.bf16.mxu1 %vm19459_vm0, %v25726_v62  ;;  %245 = vst [vmem:[#allocation2 + $0xd8] sm:$0xf] %v19460_v63  ;;  %246 = vst [vmem:[#allocation2 + $0xdc] sm:$0xf] %v19460_v63 }
 0x24f   : > { %v21194_v13 = vadd.f32 %v2733_v60, %v2272_v40  ;;  %v16754_v53 = vpop.f32.mrf.mxu1  ;;  %247 = vst [vmem:[#allocation2 + $0xe0] sm:$0xf] %v19460_v63  ;;  %248 = vst [vmem:[#allocation2 + $0xe4] sm:$0xf] %v19460_v63  ;;  %v3781_v40 = vshrl.u32 %v18866_v33, 16  ;;  %v3785_v60 = vshll.u32 %v21209_v42, 16 }
 0x250   : > { %v2240_v14 = vpop.f32.mrf.mxu0  ;;  %v25740_v33 = vld [vmem:[#allocation5_spill] sm:$0xff]  ;;  %v25741_v63 = vld [vmem:[#allocation8_spill] sm:$0xff] }
 0x251   : > { %v2273_v59 = vadd.f32 %v2240_v14, %v25735_v6  ;;  %v2736_v24 = vpop.f32.mrf.mxu1  ;;  %v25739_v14 = vld [vmem:[#allocation9_spill] sm:$0xff] }
 0x252   : > { %v16679_v52 = vpop.f32.mrf.mxu0 }
 0x253   : > { %v21203_v45 = vadd.f32 %v2736_v24, %v2273_v59  ;;  %v16755_v10 = vpop.f32.mrf.mxu1  ;;  %v3783_v24 = vor.u32 %v3781_v40, %v3779_v27  ;;  %v18872_v52 = vld [vmem:[%s25675_s1 + $0xe0] sm:$0xff]   ;;  %v18875_v27 = vld [vmem:[%s25675_s1 + $0xd8] sm:$0xff]  }
 0x254   : > { %v3136_v18 = vpop.f32.mrf.mxu0  ;;  %16961 = vmatmul.mubr.bf16.gmra.mxu0 %v3772_v56  ;;  %v3787_v56 = vrot.slane %v3785_v60, 1 }
 0x255   : > { %v3255_v48 = vadd.f32 %v3136_v18, %v25737_v4  ;;  %v3414_v7 = vpop.f32.mrf.mxu1  ;;  %17053 = vmatmul.mubr.bf16.vlgmr.msra.gmra.mxu1 %v4598_v58  ;;  %16964 = vmatprep.mubr.msk.bf16.mxu0 %vm19459_vm0, %v25726_v62 }
 0x256   : > { %v16774_v50 = vpop.f32.mrf.mxu0  ;;  %17141 = vmatpush3.bf16.msra.mxu1 %v18864_v15  ;;  %17056 = vmatprep.mubr.msk.bf16.mxu1 %vm19459_vm0, %v25726_v62  ;;  %v3788_v4 = vsel %vm1110_vm2, %v3783_v24, %v3787_v56 }
 0x257   : > { %v21216_v35 = vadd.f32 %v3414_v7, %v3255_v48  ;;  %v16850_v47 = vpop.f32.mrf.mxu1  ;;  %17142 = vmatprep.subr.bf16.mxu1 %v25726_v62  ;;  %v3789_v48 = vshrl.u32 %v21209_v42, 16  ;;  %v3793_v7 = vshll.u32 %v18871_v9, 16 }
 0x258   : > { %v3139_v12 = vpop.f32.mrf.mxu0 }
 0x259   : > { %v3256_v8 = vadd.f32 %v3139_v12, %v25738_v57  ;;  %v3417_v38 = vpop.f32.mrf.mxu1  ;;  %v3791_v42 = vor.u32 %v3789_v48, %v3787_v56  ;;  %v3795_v57 = vrot.slane %v3793_v7, 1  ;;  %v18885_v48 = vld [vmem:[%s25675_s1 + $0xc0] sm:$0xff]  }
 0x25a   : > { %v16775_v36 = vpop.f32.mrf.mxu0  ;;  %17143 = vmatpush3.bf16.msra.mxu1 %v18867_v1 }
 0x25b   : > { %v21225_v29 = vadd.f32 %v3417_v38, %v3256_v8  ;;  %v16851_v44 = vpop.f32.mrf.mxu1  ;;  %17144 = vmatprep.subr.bf16.mxu1 %v25726_v62  ;;  %v18873_v8 = vld [vmem:[%s19541_s14 + $0x94] sm:$0xff]  }
 0x25c   : > { %v3144_v53 = vpop.f32.mrf.mxu0  ;;  %16965 = vmatmul.mubr.bf16.gmra.mxu0 %v3780_v25  ;;  %v18879_v25 = vld [vmem:[%s25675_s1 + $0xd0] sm:$0xff]  }
 0x25d   : > { %v3257_v6 = vadd.f32 %v3144_v53, %v25739_v14  ;;  %v3422_v59 = vpop.f32.mrf.mxu1  ;;  %17057 = vmatmul.mubr.bf16.gmra.mxu1 %v25740_v33  ;;  %16968 = vmatprep.mubr.msk.bf16.mxu0 %vm19459_vm0, %v25726_v62  ;;  %v25742_v36 = vld [vmem:[#allocation11_spill] sm:$0xff]  ;;  %v3796_v53 = vsel %vm1110_vm2, %v3791_v42, %v3795_v57  ;;  %v3797_v14 = vshrl.u32 %v18871_v9, 16  ;;  %v18882_v33 = vld [vmem:[%s25675_s1 + $0xc8] sm:$0xff]  }
 0x25e   : > { %v16778_v54 = vpop.f32.mrf.mxu0  ;;  %17060 = vmatprep.mubr.msk.bf16.mxu1 %vm19459_vm0, %v25726_v62  ;;  %17145 = vmatpush3.bf16.msra.mxu1 %v18870_v31  ;;  %v18877_v42 = vld [vmem:[%s19541_s14 + $0x84] sm:$0xff]  }
 0x25f   : > { %v21238_v19 = vadd.f32 %v3422_v59, %v3257_v6  ;;  %v16854_v58 = vpop.f32.mrf.mxu1  ;;  %17146 = vmatprep.subr.bf16.mxu1 %v25726_v62  ;;  %v3801_v6 = vshll.u32 %v18873_v8, 16  ;;  %v3799_v9 = vor.u32 %v3797_v14, %v3795_v57  ;;  %v4919_v14 = vshll.u32 %v18877_v42, 16 }
 0x260   : > { %v3147_v15 = vpop.f32.mrf.mxu0 }
 0x261   : > { %v3258_v10 = vadd.f32 %v3147_v15, %v20878_v17  ;;  %v3425_v18 = vpop.f32.mrf.mxu1 }
 0x262   : > { %v16779_v49 = vpop.f32.mrf.mxu0  ;;  %17147 = vmatpush3.bf16.msra.mxu1 %v18872_v52  ;;  %v18876_v52 = vld [vmem:[%s19541_s14 + $0x9c] ss:$0 sps:$4 sm:$0x11]  }
 0x263   : > { %v21247_v50 = vadd.f32 %v3425_v18, %v3258_v10  ;;  %v16855_v1 = vpop.f32.mrf.mxu1  ;;  %17148 = vmatprep.subr.bf16.mxu1 %v25726_v62  ;;  %v25743_v10 = vld [vmem:[#allocation10_spill] sm:$0xff]  ;;  %v3803_v18 = vrot.slane %v3801_v6, 1 }
 0x264   : > { %v3152_v47 = vpop.f32.mrf.mxu0  ;;  %16969 = vmatmul.mubr.bf16.gmra.mxu0 %v3788_v4  ;;  %v3809_v1 = vshll.u32 %v18876_v52, 16 }
 0x265   : > { %v3259_v17 = vadd.f32 %v3152_v47, %v20891_v43  ;;  %v3430_v12 = vpop.f32.mrf.mxu1  ;;  %17061 = vmatmul.mubr.bf16.gmra.mxu1 %v25741_v63  ;;  %16972 = vmatprep.mubr.msk.bf16.mxu0 %vm19459_vm0, %v25726_v62  ;;  %v25744_v47 = vld [vmem:[#allocation13_spill] sm:$0xff]  ;;  %v3804_v63 = vsel %vm1110_vm2, %v3799_v9, %v3803_v18 }
 0x266   : > { %v16782_v38 = vpop.f32.mrf.mxu0  ;;  %17064 = vmatprep.mubr.msk.bf16.mxu1 %vm19459_vm0, %v25726_v62  ;;  %17149 = vmatpush3.bf16.msra.mxu1 %v18875_v27  ;;  %v3805_v27 = vshrl.u32 %v18873_v8, 16 }
 0x267   : > { %v21260_v40 = vadd.f32 %v3430_v12, %v3259_v17  ;;  %v16858_v43 = vpop.f32.mrf.mxu1  ;;  %17150 = vmatprep.subr.bf16.mxu1 %v25726_v62 }
 0x268   : > { %v3155_v60 = vpop.f32.mrf.mxu0 }
 0x269   : > { %v3260_v31 = vadd.f32 %v3155_v60, %v25742_v36  ;;  %v3433_v44 = vpop.f32.mrf.mxu1  ;;  %v3807_v60 = vor.u32 %v3805_v27, %v3803_v18  ;;  %v3811_v36 = vrot.slane %v3809_v1, 1  ;;  %v25747_v1 = vld [vmem:[#allocation14_spill] sm:$0xff] }
 0x26a   : > { %v16783_v59 = vpop.f32.mrf.mxu0  ;;  %17151 = vmatpush3.bf16.msra.mxu1 %v18879_v25 }
 0x26b   : > { %v21268_v24 = vadd.f32 %v3433_v44, %v3260_v31  ;;  %v16859_v56 = vpop.f32.mrf.mxu1  ;;  %17152 = vmatprep.subr.bf16.mxu1 %v25726_v62  ;;  %v25745_v44 = vld [vmem:[#allocation12_spill] sm:$0xff] }
 0x26c   : > { %v3160_v54 = vpop.f32.mrf.mxu0  ;;  %16973 = vmatmul.mubr.bf16.gmra.mxu0 %v3796_v53  ;;  %v18878_v53 = vld [vmem:[%s19541_s14 + $0x8c] sm:$0xff]  }
 0x26d   : > { %v3261_v58 = vadd.f32 %v3160_v54, %v20917_v16  ;;  %v3438_v15 = vpop.f32.mrf.mxu1  ;;  %17065 = vmatmul.mubr.bf16.gmra.mxu1 %v25743_v10  ;;  %16976 = vmatprep.mubr.msk.bf16.mxu0 %vm19459_vm0, %v25726_v62  ;;  %v3812_v54 = vsel %vm1110_vm2, %v3807_v60, %v3811_v36  ;;  %v4924_v10 = vshll.u32 %v18878_v53, 16  ;;  %v18880_v36 = vld [vmem:[%s25675_s1 + $0x138] sm:$0xff]  }
 0x26e   : > { %v16786_v4 = vpop.f32.mrf.mxu0  ;;  %17068 = vmatprep.mubr.msk.bf16.mxu1 %vm19459_vm0, %v25726_v62  ;;  %17153 = vmatpush3.bf16.msra.mxu1 %v18882_v33 }
 0x26f   : > { %v21281_v7 = vadd.f32 %v3438_v15, %v3261_v58  ;;  %v16862_v16 = vpop.f32.mrf.mxu1  ;;  %17154 = vmatprep.subr.bf16.mxu1 %v25726_v62  ;;  %v4917_v58 = vshrl.u32 %v18877_v42, 16  ;;  %v4921_v15 = vrot.slane %v4919_v14, 1 }
 0x270   : > { %v3163_v49 = vpop.f32.mrf.mxu0  ;;  %v25746_v16 = vld [vmem:[#allocation16_spill] sm:$0xff] }
 0x271   : > { %v3262_v17 = vadd.f32 %v3163_v49, %v25744_v47  ;;  %v3441_v12 = vpop.f32.mrf.mxu1  ;;  %v4926_v47 = vrot.slane %v4924_v10, 1  ;;  %v5172_v10 = vld [vmem:[%s19541_s14 + $0x8c] sm:$0x8] }
 0x272   : > { %v16787_v57 = vpop.f32.mrf.mxu0  ;;  %17155 = vmatpush3.bf16.msra.mxu1 %v18885_v48 }
 0x273   : > { %v21287_v38 = vadd.f32 %v3441_v12, %v3262_v17  ;;  %v16863_v25 = vpop.f32.mrf.mxu1  ;;  %17244 = vmatprep.subr.bf16.mxu1 %v25726_v62  ;;  %v18881_v17 = vld [vmem:[%s19541_s14 + $0x94] sm:$0xff]  }
 0x274   : > { %v3168_v43 = vpop.f32.mrf.mxu0  ;;  %16977 = vmatmul.mubr.bf16.gmra.mxu0 %v3804_v63 }
 0x275   : > { %v3263_v8 = vadd.f32 %v3168_v43, %v20945_v41  ;;  %v3446_v31 = vpop.f32.mrf.mxu1  ;;  %17069 = vmatmul.mubr.bf16.gmra.mxu1 %v25745_v44  ;;  %16980 = vmatprep.mubr.msk.bf16.mxu0 %vm19459_vm0, %v25726_v62 }
 0x276   : > { %v16790_v6 = vpop.f32.mrf.mxu0  ;;  %17072 = vmatprep.mubr.msk.bf16.mxu1 %vm19459_vm0, %v25726_v62 }
 0x277   : > { %v21297_v59 = vadd.f32 %v3446_v31, %v3263_v8  ;;  %v16866_v33 = vpop.f32.mrf.mxu1  ;;  %v4928_v8 = vshrl.u32 %v18878_v53, 16  ;;  %v4932_v31 = vshll.u32 %v18881_v17, 16 }
 0x278   : > { %v3171_v56 = vpop.f32.mrf.mxu0 }
 0x279   : > { %v3264_v41 = vadd.f32 %v3171_v56, %v20960_v22  ;;  %v3449_v52 = vpop.f32.mrf.mxu1  ;;  %v4922_v22 = vor.u32 %v4921_v15, %v4917_v58  ;;  %v21320_v56 = vld [vmem:[%s19541_s14 + $0x9c] sm:$0xff]   ;;  %v4930_v53 = vor.u32 %v4928_v8, %v4926_v47  ;;  %v18883_v58 = vld [vmem:[%s25675_s1 + $0x130] sm:$0xff]  }
 0x27a   : > { %v16791_v9 = vpop.f32.mrf.mxu0 }
 0x27b   : > { %v21301_v18 = vadd.f32 %v3449_v52, %v3264_v41  ;;  %v16867_v4 = vpop.f32.mrf.mxu1  ;;  %v4927_v60 = vsel %vm1110_vm2, %v4922_v22, %v4926_v47  ;;  %v25748_v41 = vld [vmem:[#allocation15_spill] sm:$0xff]  ;;  %v4934_v52 = vrot.slane %v4932_v31, 1 }
 0x27c   : > { %v3176_v48 = vpop.f32.mrf.mxu0  ;;  %16981 = vmatmul.mubr.bf16.gmra.mxu0 %v3812_v54 }
 0x27d   : > { %v3265_v49 = vadd.f32 %v3176_v48, %v25746_v16  ;;  %v3454_v27 = vpop.f32.mrf.mxu1  ;;  %17073 = vmatmul.mubr.bf16.gmra.mxu1 %v25747_v1  ;;  %17104 = vmatprep.mubr.msk.bf16.mxu0 %vm19459_vm0, %v25726_v62  ;;  %v21339_v48 = vld [vmem:[%s19541_s14 + $0x94] sm:$0xf]  ;;  %v21342_v16 = vld [vmem:[%s19541_s14 + $0x98] sm:$0xf]  ;;  %v4940_v1 = vshll.u32 %v21320_v56, 16 }
 0x27e   : > { %v16794_v12 = vpop.f32.mrf.mxu0  ;;  %17076 = vmatprep.mubr.msk.bf16.mxu1 %vm19459_vm0, %v25726_v62 }
 0x27f   : > { %v21310_v63 = vadd.f32 %v3454_v27, %v3265_v49  ;;  %v16870_v42 = vpop.f32.mrf.mxu1  ;;  %v4936_v27 = vshrl.u32 %v18881_v17, 16  ;;  %v4935_v12 = vsel %vm1110_vm2, %v4930_v53, %v4934_v52  ;;  %v14413_v17 = vcombine.low %v21339_v48, %v21342_v16 }
 0x280   : > { %v3179_v57 = vpop.f32.mrf.mxu0  ;;  %v4942_v8 = vrot.slane %v4940_v1, 1  ;;  %v4944_v1 = vshrl.u32 %v21320_v56, 16 }
 0x281   : > { %v3266_v25 = vadd.f32 %v3179_v57, %v20995_v37  ;;  %v3457_v43 = vpop.f32.mrf.mxu1  ;;  %v5267_v53 = vshll.u32 %v14413_v17, 16 }
 0x282   : > { %v16795_v44 = vpop.f32.mrf.mxu0 }
 0x283   : > { %v21317_v14 = vadd.f32 %v3457_v43, %v3266_v25  ;;  %v16871_v6 = vpop.f32.mrf.mxu1  ;;  %v18886_v25 = vld [vmem:[%s25675_s1 + $0x128] sm:$0xff]  }
 0x284   : > { %v3184_v33 = vpop.f32.mrf.mxu0  ;;  %17105 = vmatmul.mubr.bf16.vlgmr.msra.gmra.mxu0 %v4927_v60  ;;  %v21361_v6 = vld [vmem:[%s19541_s14 + $0xa4] sm:$0xff]  }
 0x285   : > { %v3267_v37 = vadd.f32 %v3184_v33, %v21012_v23  ;;  %v3462_v54 = vpop.f32.mrf.mxu1  ;;  %17077 = vmatmul.mubr.bf16.gmra.mxu1 %v25748_v41  ;;  %17193 = vmatpush3.bf16.msra.mxu0 %v18880_v36  ;;  %v21333_v23 = vld [vmem:[%s19541_s14 + $0x90] sm:$0xf]  ;;  %v4938_v36 = vor.u32 %v4936_v27, %v4934_v52  ;;  %v5264_v41 = vshrl.u32 %v14413_v17, 16 }
 0x286   : > { %v16798_v15 = vpop.f32.mrf.mxu0  ;;  %17080 = vmatprep.mubr.msk.bf16.mxu1 %vm19459_vm0, %v25726_v62  ;;  %17108 = vmatprep.mubr.msk.bf16.mxu0 %vm19459_vm0, %v25726_v62  ;;  %v14412_v42 = vcombine.low %v5172_v10, %v21333_v23 }
 0x287   : > { %v21335_v9 = vadd.f32 %v3462_v54, %v3267_v37  ;;  %v16874_v4 = vpop.f32.mrf.mxu1  ;;  %17194 = vmatprep.subr.bf16.mxu0 %v25726_v62  ;;  %v21375_v15 = vld [vmem:[%s19541_s14 + $0xa0] sm:$0xf] }
 0x288   : > { %v3187_v49 = vpop.f32.mrf.mxu0  ;;  %v5256_v33 = vshrl.u32 %v14412_v42, 16  ;;  %v5259_v54 = vshll.u32 %v14412_v42, 16  ;;  %v4943_v4 = vsel %vm1110_vm2, %v4938_v36, %v4942_v8 }
 0x289   : > { %v3268_v22 = vadd.f32 %v3187_v49, %v21028_v5  ;;  %v3465_v47 = vpop.f32.mrf.mxu1  ;;  %17195 = vmatpush3.bf16.msra.mxu0 %v18883_v58  ;;  %v21372_v58 = vld [vmem:[%s19541_s14 + $0x9c] sm:$0xf] }
 0x28a   : > { %v16799_v57 = vpop.f32.mrf.mxu0  ;;  %17196 = vmatprep.subr.bf16.mxu0 %v25726_v62  ;;  %v5261_v42 = vrot.slane %v5259_v54, 4  ;;  %v14414_v17 = vcombine.low %v21372_v58, %v21375_v15 }
 0x28b   : > { %v21354_v43 = vadd.f32 %v3465_v47, %v3268_v22  ;;  %v16875_v5 = vpop.f32.mrf.mxu1  ;;  %v4948_v22 = vshll.u32 %v21361_v6, 16  ;;  %v5258_v47 = vrot.slane %v5256_v33, 3  ;;  %v5266_v57 = vrot.slane %v5264_v41, 3 }
 0x28c   : > { %v3192_v60 = vpop.f32.mrf.mxu0  ;;  %17109 = vmatmul.mubr.bf16.gmra.mxu0 %v4935_v12  ;;  %v18895_v5 = vld [vmem:[%s25675_s1 + $0x118] sm:$0xff]  }
 0x28d   : > { %v3269_v31 = vadd.f32 %v3192_v60, %v21048_v0  ;;  %v3470_v44 = vpop.f32.mrf.mxu1  ;;  %17081 = vmatmul.mubr.bf16.gmra.mxu1 %v20998_v21  ;;  %17112 = vmatprep.mubr.msk.bf16.mxu0 %vm19459_vm0, %v25726_v62  ;;  %v18891_v0 = vld [vmem:[%s25675_s1 + $0x120] sm:$0xff]   ;;  %v4950_v33 = vrot.slane %v4948_v22, 1  ;;  %v5262_v41 = vor.u32 %v5261_v42, %v5258_v47  ;;  %v4952_v47 = vshrl.u32 %v21361_v6, 16  ;;  %v18903_v6 = vld [vmem:[%s25675_s1 + $0x108] sm:$0xff]  }
 0x28e   : > { %v16802_v37 = vpop.f32.mrf.mxu0  ;;  %17084 = vmatprep.mubr.msk.bf16.mxu1 %vm19459_vm0, %v25726_v62  ;;  %17197 = vmatpush3.bf16.msra.mxu0 %v18886_v25  ;;  %v5269_v25 = vrot.slane %v5267_v53, 4 }
 0x28f   : > { %v21368_v52 = vadd.f32 %v3470_v44, %v3269_v31  ;;  %v16878_v21 = vpop.f32.mrf.mxu1  ;;  %17198 = vmatprep.subr.bf16.mxu0 %v25726_v62  ;;  %v4946_v44 = vor.u32 %v4944_v1, %v4942_v8  ;;  %v21394_v37 = vld [vmem:[%s19541_s14 + $0xac] sm:$0xff]   ;;  %v21404_v8 = vld [vmem:[%s19541_s14 + $0xa4] sm:$0xf] }
 0x290   : > { %v3195_v10 = vpop.f32.mrf.mxu0  ;;  %v5270_v53 = vor.u32 %v5269_v25, %v5266_v57  ;;  %v18890_v25 = vld [vmem:[%s25675_s1 + $0x178] sm:$0xff]  }
 0x291   : > { %v3270_v49 = vadd.f32 %v3195_v10, %v21064_v55  ;;  %v3473_v27 = vpop.f32.mrf.mxu1  ;;  %v4951_v22 = vsel %vm1110_vm2, %v4946_v44, %v4950_v33 }
 0x292   : > { %v16803_v12 = vpop.f32.mrf.mxu0  ;;  %17199 = vmatpush3.bf16.msra.mxu0 %v18891_v0  ;;  %v5273_v0 = vshrl.u32 %v14414_v17, 16  ;;  %v5271_v57 = vsel %vm624_vm1, %v5262_v41, %v5270_v53 }
 0x293   : > { %v21386_v55 = vadd.f32 %v3473_v27, %v3270_v49  ;;  %v16879_v60 = vpop.f32.mrf.mxu1  ;;  %17200 = vmatprep.subr.bf16.mxu0 %v25726_v62  ;;  %v4956_v12 = vshll.u32 %v21394_v37, 16 }
 0x294   : > { %v3200_v56 = vpop.f32.mrf.mxu0  ;;  %17113 = vmatmul.mubr.bf16.gmra.mxu0 %v4943_v4  ;;  %v21407_v4 = vld [vmem:[%s19541_s14 + $0xa8] sm:$0xf] }
 0x295   : > { %v3271_v36 = vadd.f32 %v3200_v56, %v21082_v39  ;;  %v3478_v31 = vpop.f32.mrf.mxu1  ;;  %17085 = vmatmul.mubr.bf16.gmra.mxu1 %v21035_v3  ;;  %17116 = vmatprep.mubr.msk.bf16.mxu0 %vm19459_vm0, %v25726_v62  ;;  %v5276_v39 = vshll.u32 %v14414_v17, 16  ;;  %v18899_v3 = vld [vmem:[%s25675_s1 + $0x110] sm:$0xff]   ;;  %v5275_v17 = vrot.slane %v5273_v0, 3  ;;  %v4958_v41 = vrot.slane %v4956_v12, 1 }
 0x296   : > { %v16806_v54 = vpop.f32.mrf.mxu0  ;;  %17156 = vmatprep.mubr.msk.bf16.mxu1 %vm19459_vm0, %v25726_v62  ;;  %17201 = vmatpush3.bf16.msra.mxu0 %v18895_v5  ;;  %v21430_v0 = vld [vmem:[%s19541_s14 + $0xb4] sm:$0xff]  }
 0x297   : > { %v21401_v21 = vadd.f32 %v3478_v31, %v3271_v36  ;;  %v16882_v10 = vpop.f32.mrf.mxu1  ;;  %17202 = vmatprep.subr.bf16.mxu0 %v25726_v62  ;;  %v5278_v5 = vrot.slane %v5276_v39, 4  ;;  %v4954_v54 = vor.u32 %v4952_v47, %v4950_v33  ;;  %v21441_v33 = vld [vmem:[%s19541_s14 + $0xac] sm:$0xf]  ;;  %v18909_v47 = vld [vmem:[%s25675_s1 + $0x100] sm:$0xff]  }
 0x298   : > { %v3203_v49 = vpop.f32.mrf.mxu0 }
 0x299   : > { %v3272_v27 = vadd.f32 %v3203_v49, %v21098_v34  ;;  %v3481_v1 = vpop.f32.mrf.mxu1  ;;  %v14415_v34 = vcombine.low %v21404_v8, %v21407_v4 }
 0x29a   : > { %v16807_v42 = vpop.f32.mrf.mxu0  ;;  %17203 = vmatpush3.bf16.msra.mxu0 %v18899_v3  ;;  %v5279_v3 = vor.u32 %v5278_v5, %v5275_v17  ;;  %v4960_v17 = vshrl.u32 %v21394_v37, 16  ;;  %v4964_v5 = vshll.u32 %v21430_v0, 16 }
 0x29b   : > { %v21420_v60 = vadd.f32 %v3481_v1, %v3272_v27  ;;  %v16883_v56 = vpop.f32.mrf.mxu1  ;;  %17204 = vmatprep.subr.bf16.mxu0 %v25726_v62  ;;  %v5282_v10 = vshrl.u32 %v14415_v34, 16  ;;  %v5285_v49 = vshll.u32 %v14415_v34, 16 }
 0x29c   : > { %v3208_v36 = vpop.f32.mrf.mxu0  ;;  %17117 = vmatmul.mubr.bf16.gmra.mxu0 %v4951_v22  ;;  %v21444_v22 = vld [vmem:[%s19541_s14 + $0xb0] sm:$0xf]  ;;  %v5280_v56 = vsel %vm624_vm1, %v5270_v53, %v5279_v3 }
 0x29d   : > { %v3273_v31 = vadd.f32 %v3208_v36, %v21114_v28  ;;  %v3486_v44 = vpop.f32.mrf.mxu1  ;;  %17157 = vmatmul.mubr.bf16.vlgmr.msra.gmra.mxu1 %v5271_v57  ;;  %17120 = vmatprep.mubr.msk.bf16.mxu0 %vm19459_vm0, %v25726_v62  ;;  %v18894_v28 = vld [vmem:[%s25675_s1 + $0x170] sm:$0xff]   ;;  %v5287_v36 = vrot.slane %v5285_v49, 4  ;;  %v21468_v49 = vld [vmem:[%s19541_s14 + $0xbc] sm:$0xff]  }
 0x29e   : > { %v16810_v39 = vpop.f32.mrf.mxu0  ;;  %17245 = vmatpush3.bf16.msra.mxu1 %v18890_v25  ;;  %17160 = vmatprep.mubr.msk.bf16.mxu1 %vm19459_vm0, %v25726_v62  ;;  %v4959_v25 = vsel %vm1110_vm2, %v4954_v54, %v4958_v41 }
 0x29f   : > { %v21437_v27 = vadd.f32 %v3486_v44, %v3273_v31  ;;  %v16886_v1 = vpop.f32.mrf.mxu1  ;;  %17246 = vmatprep.subr.bf16.mxu1 %v25726_v62  ;;  %17205 = vmatpush3.bf16.msra.mxu0 %v18903_v6  ;;  %v5284_v6 = vrot.slane %v5282_v10, 3  ;;  %v18898_v31 = vld [vmem:[%s25675_s1 + $0x168] sm:$0xff]   ;;  %v4966_v10 = vrot.slane %v4964_v5, 1 }
 0x2a0   : > { %v3211_v12 = vpop.f32.mrf.mxu0  ;;  %17206 = vmatprep.subr.bf16.mxu0 %v25726_v62 }
 0x2a1   : > { %v3274_v42 = vadd.f32 %v3211_v12, %v21126_v51  ;;  %v3489_v57 = vpop.f32.mrf.mxu1  ;;  %v14416_v51 = vcombine.low %v21441_v33, %v21444_v22 }
 0x2a2   : > { %v16811_v34 = vpop.f32.mrf.mxu0  ;;  %17247 = vmatpush3.bf16.msra.mxu1 %v18894_v28  ;;  %v4962_v28 = vor.u32 %v4960_v17, %v4958_v41  ;;  %v21479_v41 = vld [vmem:[%s19541_s14 + $0xb4] sm:$0xf]  ;;  %v21482_v17 = vld [vmem:[%s19541_s14 + $0xb8] sm:$0xf] }
 0x2a3   : > { %v21460_v44 = vadd.f32 %v3489_v57, %v3274_v42  ;;  %v16887_v54 = vpop.f32.mrf.mxu1  ;;  %17248 = vmatprep.subr.bf16.mxu1 %v25726_v62  ;;  %17207 = vmatpush3.bf16.msra.mxu0 %v18909_v47  ;;  %v5288_v47 = vor.u32 %v5287_v36, %v5284_v6  ;;  %v5291_v12 = vshrl.u32 %v14416_v51, 16  ;;  %v5294_v42 = vshll.u32 %v14416_v51, 16 }
 0x2a4   : > { %v3216_v37 = vpop.f32.mrf.mxu0  ;;  %17121 = vmatmul.mubr.bf16.gmra.mxu0 %v4959_v25  ;;  %17296 = vmatprep.subr.bf16.mxu0 %v25726_v62  ;;  %v4967_v6 = vsel %vm1110_vm2, %v4962_v28, %v4966_v10  ;;  %v4968_v36 = vshrl.u32 %v21430_v0, 16 }
 0x2a5   : > { %v3275_v53 = vadd.f32 %v3216_v37, %v21136_v2  ;;  %v3494_v39 = vpop.f32.mrf.mxu1  ;;  %17161 = vmatmul.mubr.bf16.gmra.mxu1 %v5280_v56  ;;  %17124 = vmatprep.mubr.msk.bf16.mxu0 %vm19459_vm0, %v25726_v62  ;;  %v18902_v2 = vld [vmem:[%s25675_s1 + $0x160] sm:$0xff]   ;;  %v5289_v54 = vsel %vm624_vm1, %v5279_v3, %v5288_v47  ;;  %v5293_v37 = vrot.slane %v5291_v12, 3 }
 0x2a6   : > { %v16814_v1 = vpop.f32.mrf.mxu0  ;;  %17164 = vmatprep.mubr.msk.bf16.mxu1 %vm19459_vm0, %v25726_v62  ;;  %17249 = vmatpush3.bf16.msra.mxu1 %v18898_v31  ;;  %v4972_v31 = vshll.u32 %v21468_v49, 16 }
 0x2a7   : > { %v21475_v57 = vadd.f32 %v3494_v39, %v3275_v53  ;;  %v16890_v25 = vpop.f32.mrf.mxu1  ;;  %17250 = vmatprep.subr.bf16.mxu1 %v25726_v62  ;;  %v5296_v53 = vrot.slane %v5294_v42, 4  ;;  %v14417_v39 = vcombine.low %v21479_v41, %v21482_v17  ;;  %v4970_v42 = vor.u32 %v4968_v36, %v4966_v10  ;;  %v21514_v10 = vld [vmem:[%s19541_s14 + $0xc0] sm:$0xf] }
 0x2a8   : > { %v3219_v5 = vpop.f32.mrf.mxu0  ;;  %v21501_v25 = vld [vmem:[%s19541_s14 + $0xc4] sm:$0xff]  }
 0x2a9   : > { %v3276_v34 = vadd.f32 %v3219_v5, %v21142_v30  ;;  %v3497_v56 = vpop.f32.mrf.mxu1  ;;  %v18906_v30 = vld [vmem:[%s25675_s1 + $0x158] sm:$0xff]  }
 0x2aa   : > { %v16815_v51 = vpop.f32.mrf.mxu0  ;;  %17251 = vmatpush3.bf16.msra.mxu1 %v18902_v2  ;;  %v4974_v2 = vrot.slane %v4972_v31, 1 }
 0x2ab   : > { %v21494_v1 = vadd.f32 %v3497_v56, %v3276_v34  ;;  %v16891_v28 = vpop.f32.mrf.mxu1  ;;  %17252 = vmatprep.subr.bf16.mxu1 %v25726_v62  ;;  %v5297_v34 = vor.u32 %v5296_v53, %v5293_v37  ;;  %v5300_v56 = vshrl.u32 %v14417_v39, 16 }
 0x2ac   : > { %v3224_v0 = vpop.f32.mrf.mxu0  ;;  %17125 = vmatmul.mubr.bf16.gmra.mxu0 %v4967_v6  ;;  %v5303_v6 = vshll.u32 %v14417_v39, 16  ;;  %v21511_v28 = vld [vmem:[%s19541_s14 + $0xbc] sm:$0xf]  ;;  %v4975_v53 = vsel %vm1110_vm2, %v4970_v42, %v4974_v2  ;;  %v4976_v39 = vshrl.u32 %v21468_v49, 16 }
 0x2ad   : > { %25749 = vst [vmem:[#allocation4_spill] sm:$0xff] %v21494_v1  ;;  %v3277_v3 = vadd.f32 %v3224_v0, %v21150_v46  ;;  %v3502_v12 = vpop.f32.mrf.mxu1  ;;  %17165 = vmatmul.mubr.bf16.gmra.mxu1 %v5289_v54  ;;  %17128 = vmatprep.mubr.msk.bf16.mxu0 %vm19459_vm0, %v25726_v62  ;;  %v18912_v46 = vld [vmem:[%s25675_s1 + $0x150] sm:$0xff]  }
 0x2ae   : > { %v16818_v5 = vpop.f32.mrf.mxu0  ;;  %17168 = vmatprep.mubr.msk.bf16.mxu1 %vm19459_vm0, %v25726_v62  ;;  %17253 = vmatpush3.bf16.msra.mxu1 %v18906_v30  ;;  %v4980_v30 = vshll.u32 %v21501_v25, 16 }
 0x2af   : > { %v21508_v51 = vadd.f32 %v3502_v12, %v3277_v3  ;;  %v16894_v54 = vpop.f32.mrf.mxu1  ;;  %17254 = vmatprep.subr.bf16.mxu1 %v25726_v62  ;;  %v5298_v3 = vsel %vm624_vm1, %v5288_v47, %v5297_v34  ;;  %v5302_v12 = vrot.slane %v5300_v56, 3  ;;  %v5305_v5 = vrot.slane %v5303_v6, 4 }
 0x2b0   : > { %v3227_v36 = vpop.f32.mrf.mxu0  ;;  %v14418_v54 = vcombine.low %v21511_v28, %v21514_v10  ;;  %v4978_v6 = vor.u32 %v4976_v39, %v4974_v2  ;;  %v21545_v2 = vld [vmem:[%s19541_s14 + $0xc8] sm:$0xf] }
 0x2b1   : > { %25750 = vst [vmem:[#allocation3_spill] sm:$0xff] %v21508_v51  ;;  %v3278_v31 = vadd.f32 %v3227_v36, %v21156_v61  ;;  %v3505_v37 = vpop.f32.mrf.mxu1  ;;  %v18916_v61 = vld [vmem:[%s25675_s1 + $0x148] sm:$0xff]  }
 0x2b2   : > { %v16819_v0 = vpop.f32.mrf.mxu0  ;;  %17255 = vmatpush3.bf16.msra.mxu1 %v18912_v46  ;;  %v4982_v46 = vrot.slane %v4980_v30, 1 }
 0x2b3   : > { %v21527_v36 = vadd.f32 %v3505_v37, %v3278_v31  ;;  %v16895_v42 = vpop.f32.mrf.mxu1  ;;  %17256 = vmatprep.subr.bf16.mxu1 %v25726_v62  ;;  %v18907_v0 = vld [vmem:[%s19541_s14 + $0xcc] ss:$0 sps:$4 sm:$0x11]   ;;  %v5306_v31 = vor.u32 %v5305_v5, %v5302_v12  ;;  %v5309_v37 = vshrl.u32 %v14418_v54, 16  ;;  %v4984_v5 = vshrl.u32 %v21501_v25, 16 }
 0x2b4   : > { %v3232_v49 = vpop.f32.mrf.mxu0  ;;  %17129 = vmatmul.mubr.bf16.gmra.mxu0 %v4975_v53  ;;  %v5312_v42 = vshll.u32 %v14418_v54, 16  ;;  %v4983_v12 = vsel %vm1110_vm2, %v4978_v6, %v4982_v46  ;;  %v4988_v54 = vshll.u32 %v18907_v0, 16 }
 0x2b5   : > { %25751 = vst [vmem:[#allocation6_spill] sm:$0xff] %v21527_v36  ;;  %v3279_v47 = vadd.f32 %v3232_v49, %v21164_v26  ;;  %v3510_v56 = vpop.f32.mrf.mxu1  ;;  %17169 = vmatmul.mubr.bf16.gmra.mxu1 %v5298_v3  ;;  %17132 = vmatprep.mubr.msk.bf16.mxu0 %vm19459_vm0, %v25726_v62  ;;  %v18920_v26 = vld [vmem:[%s25675_s1 + $0x140] sm:$0xff]  }
 0x2b6   : > { %v16822_v51 = vpop.f32.mrf.mxu0  ;;  %17172 = vmatprep.mubr.msk.bf16.mxu1 %vm19459_vm0, %v25726_v62  ;;  %17257 = vmatpush3.bf16.msra.mxu1 %v18916_v61  ;;  %v21542_v49 = vld [vmem:[%s19541_s14 + $0xc4] sm:$0xf]  ;;  %v4990_v0 = vrot.slane %v4988_v54, 1 }
 0x2b7   : > { %v21539_v53 = vadd.f32 %v3510_v56, %v3279_v47  ;;  %v16898_v3 = vpop.f32.mrf.mxu1  ;;  %17258 = vmatprep.subr.bf16.mxu1 %v25726_v62  ;;  %v5307_v47 = vsel %vm624_vm1, %v5297_v34, %v5306_v31  ;;  %v5311_v56 = vrot.slane %v5309_v37, 3  ;;  %v4986_v34 = vor.u32 %v4984_v5, %v4982_v46 }
 0x2b8   : > { %v3235_v51 = vpop.f32.mrf.mxu0  ;;  %v5314_v3 = vrot.slane %v5312_v42, 4 }
 0x2b9   : > { %25752 = vst [vmem:[#allocation7_spill] sm:$0xff] %v21539_v53  ;;  %v3280_v39 = vadd.f32 %v3235_v51, %v21172_v32  ;;  %v3513_v30 = vpop.f32.mrf.mxu1  ;;  %v14419_v53 = vcombine.low %v21542_v49, %v21545_v2  ;;  %v4991_v46 = vsel %vm1110_vm2, %v4986_v34, %v4990_v0 }
 0x2ba   : > { %v16823_v61 = vpop.f32.mrf.mxu0  ;;  %17259 = vmatpush3.bf16.msra.mxu1 %v18920_v26 }
 0x2bb   : > { %v21554_v36 = vadd.f32 %v3513_v30, %v3280_v39  ;;  %v16899_v1 = vpop.f32.mrf.mxu1  ;;  %17348 = vmatprep.subr.bf16.mxu1 %v25726_v62  ;;  %v5318_v42 = vshrl.u32 %v14419_v53, 16  ;;  %v5321_v26 = vshll.u32 %v14419_v53, 16  ;;  %v21565_v30 = vld [vmem:[%s19541_s14 + $0xcc] sm:$0xf] }
 0x2bc   : > { %v3240_v32 = vpop.f32.mrf.mxu0  ;;  %17133 = vmatmul.mubr.bf16.gmra.mxu0 %v4983_v12  ;;  %v5315_v1 = vor.u32 %v5314_v3, %v5311_v56 }
 0x2bd   : > { %v3281_v25 = vadd.f32 %v3240_v32, %v21180_v20  ;;  %v3518_v6 = vpop.f32.mrf.mxu1  ;;  %17173 = vmatmul.mubr.bf16.gmra.mxu1 %v5307_v47  ;;  %17136 = vmatprep.mubr.msk.bf16.mxu0 %vm19459_vm0, %v25726_v62  ;;  %v21568_v20 = vld [vmem:[%s19541_s14 + $0xd0] sm:$0xf]  ;;  %v5320_v32 = vrot.slane %v5318_v42, 3  ;;  %v5323_v56 = vrot.slane %v5321_v26, 4 }
 0x2be   : > { %v16826_v37 = vpop.f32.mrf.mxu0  ;;  %17176 = vmatprep.mubr.msk.bf16.mxu1 %vm19459_vm0, %v25726_v62  ;;  %v5316_v54 = vsel %vm624_vm1, %v5306_v31, %v5315_v1  ;;  %v14420_v53 = vcombine.low %v21565_v30, %v21568_v20 }
 0x2bf   : > { %v21562_v51 = vadd.f32 %v3518_v6, %v3281_v25  ;;  %v16902_v39 = vpop.f32.mrf.mxu1  ;;  %v5324_v31 = vor.u32 %v5323_v56, %v5320_v32 }
 0x2c0   : > { %v3243_v12 = vpop.f32.mrf.mxu0  ;;  %v5327_v0 = vshrl.u32 %v14420_v53, 16  ;;  %v5330_v42 = vshll.u32 %v14420_v53, 16 }
 0x2c1   : > { %v3282_v61 = vadd.f32 %v3243_v12, %v21186_v11  ;;  %v3521_v47 = vpop.f32.mrf.mxu1  ;;  %v21585_v12 = vld [vmem:[%s19541_s14 + $0xd4] sm:$0xf]  ;;  %v5325_v32 = vsel %vm624_vm1, %v5315_v1, %v5324_v31 }
 0x2c2   : > { %v16827_v5 = vpop.f32.mrf.mxu0  ;;  %v5329_v56 = vrot.slane %v5327_v0, 3  ;;  %v5332_v53 = vrot.slane %v5330_v42, 4  ;;  %v18917_v1 = vld [vmem:[%s25675_s1 + $0x1b0] sm:$0xff]  }
 0x2c3   : > { %v21575_v3 = vadd.f32 %v3521_v47, %v3282_v61  ;;  %v16903_v25 = vpop.f32.mrf.mxu1  ;;  %v18913_v5 = vld [vmem:[%s25675_s1 + $0x1b8] sm:$0xff]  }
 0x2c4   : > { %v3248_v6 = vpop.f32.mrf.mxu0  ;;  %17137 = vmatmul.mubr.bf16.gmra.mxu0 %v4991_v46  ;;  %v14421_v25 = vcombine.low %v21585_v12, %v21585_v12  ;;  %v5333_v42 = vor.u32 %v5332_v53, %v5329_v56 }
 0x2c5   : > { %v3283_v37 = vadd.f32 %v3248_v6, %v21194_v13  ;;  %v3526_v11 = vpop.f32.mrf.mxu1  ;;  %17177 = vmatmul.mubr.bf16.gmra.mxu1 %v5316_v54  ;;  %17208 = vmatprep.mubr.msk.bf16.mxu0 %vm19459_vm0, %v25726_v62  ;;  %v14446_v13 = vcombine.low %v21333_v23, %v21339_v48 }
 0x2c6   : > { %v16830_v34 = vpop.f32.mrf.mxu0  ;;  %17180 = vmatprep.mubr.msk.bf16.mxu1 %vm19459_vm0, %v25726_v62 }
 0x2c7   : > { %v21582_v26 = vadd.f32 %v3526_v11, %v3283_v37  ;;  %v16906_v39 = vpop.f32.mrf.mxu1  ;;  %v226_v11 = vlaneseq }
 0x2c8   : > { %v3251_v61 = vpop.f32.mrf.mxu0  ;;  %v5336_v39 = vshrl.u32 %v14421_v25, 16 }
 0x2c9   : > { %v3284_v47 = vadd.f32 %v3251_v61, %v21203_v45  ;;  %v3529_v46 = vpop.f32.mrf.mxu1  ;;  %v21601_v45 = vld [vmem:[%s25676_s2] ss:$0 sm:$0xff]  ;;  %v5339_v61 = vshll.u32 %v14421_v25, 16  ;;  %v5334_v25 = vsel %vm624_vm1, %v5324_v31, %v5333_v42 }
 0x2ca   : > { %v16831_v54 = vpop.f32.mrf.mxu0 }
 0x2cb   : > { %v21596_v6 = vadd.f32 %v3529_v46, %v3284_v47  ;;  %v16907_v37 = vpop.f32.mrf.mxu1 }
 0x2cc   : > { %v3910_v23 = vpop.f32.mrf.mxu0  ;;  %17209 = vmatmul.mubr.bf16.vlgmr.msra.gmra.mxu0 %v14446_v13  ;;  %v21613_v13 = vshrl.u32 %v226_v11, 7  ;;  %v5338_v37 = vrot.slane %v5336_v39, 3  ;;  %v5341_v11 = vrot.slane %v5339_v61, 4 }
 0x2cd   : > { %v4029_v48 = vadd.f32 %v3910_v23, %v21216_v35  ;;  %v21604_v34 = vpop.f32.mrf.mxu1  ;;  %17181 = vmatmul.mubr.bf16.gmra.mxu1 %v5325_v32  ;;  %17297 = vmatpush3.bf16.msra.mxu0 %v18913_v5  ;;  %v14447_v5 = vcombine.low %v21342_v16, %v21372_v58  ;;  %v18921_v23 = vld [vmem:[%s25675_s1 + $0x1a8] sm:$0xff]  }
 0x2ce   : > { %v16926_v0 = vpop.f32.mrf.mxu0  ;;  %17184 = vmatprep.mubr.msk.bf16.mxu1 %vm19459_vm0, %v25726_v62  ;;  %17212 = vmatprep.mubr.msk.bf16.mxu0 %vm19459_vm0, %v25726_v62  ;;  %vm230_vm3 = vcmp.ge.s32.totalorder %v21613_v13, 1 }
 0x2cf   : > { %v4066_v35 = vadd.f32 %v21601_v45, %v4029_v48  ;;  %v17002_v47 = vpop.f32.mrf.mxu1  ;;  %17298 = vmatprep.subr.bf16.mxu0 %v25726_v62  ;;  %v18923_v48 = vld [vmem:[%s19541_s14 + $0x90] sm:$0xff]  }
 0x2d0   : > { %v3913_v46 = vpop.f32.mrf.mxu0  ;;  %v21640_v47 = vld [vmem:[%s19541_s14 + $0x98] sm:$0xff]  }
 0x2d1   : > { %v4030_v54 = vadd.f32 %v3913_v46, %v21225_v29  ;;  %v21620_v32 = vpop.f32.mrf.mxu1  ;;  %17299 = vmatpush3.bf16.msra.mxu0 %v18917_v1  ;;  %v4096_v56 = vmax.f32 %v4066_v35, 0.0  ;;  %v5342_v35 = vor.u32 %v5341_v11, %v5338_v37  ;;  %v5815_v46 = vshll.u32 %v18923_v48, 16 }
 0x2d2   : > { %v16927_v53 = vpop.f32.mrf.mxu0  ;;  %17300 = vmatprep.subr.bf16.mxu0 %v25726_v62  ;;  %v14448_v37 = vcombine.low %v21375_v15, %v21404_v8 }
 0x2d3   : > { %v4067_v29 = vadd.f32 %v21601_v45, %v4030_v54  ;;  %v17003_v16 = vpop.f32.mrf.mxu1  ;;  %v4132_v39 = vsel %vm230_vm3, %v4096_v56, 0.0  ;;  %v21648_v56 = vadd.s32 16, %v21613_v13  ;;  %v19090_v13 = vld [vmem:[%s25677_s3 + $0x1b8] sm:$0xff]  }
 0x2d4   : > { %v3918_v58 = vpop.f32.mrf.mxu0  ;;  %17213 = vmatmul.mubr.bf16.gmra.mxu0 %v14447_v5  ;;  %v5343_v16 = vsel %vm624_vm1, %v5333_v42, %v5342_v35 }
 0x2d5   : > { %v4097_v1 = vmax.f32 %v4067_v29, 0.0  ;;  %v4031_v31 = vadd.f32 %v3918_v58, %v21238_v19  ;;  %v21631_v0 = vpop.f32.mrf.mxu1  ;;  %17185 = vmatmul.mubr.bf16.gmra.mxu1 %v5334_v25  ;;  %17216 = vmatprep.mubr.msk.bf16.mxu0 %vm19459_vm0, %v25726_v62  ;;  %v18926_v19 = vld [vmem:[%s25675_s1 + $0x1a0] sm:$0xff]   ;;  %v5813_v58 = vshrl.u32 %v18923_v48, 16  ;;  %vm235_vm4 = vcmp.le.s32.totalorder %v21648_v56, 16 }
 0x2d6   : > { %v16930_v61 = vpop.f32.mrf.mxu0  ;;  %17188 = vmatprep.mubr.msk.bf16.mxu1 %vm19459_vm0, %v25726_v62  ;;  %17301 = vmatpush3.bf16.msra.mxu0 %v18921_v23 }
 0x2d7   : > { %v15319_v5 = vpack.c.bf16 %v4097_v1, %v4132_v39  ;;  %v4068_v54 = vadd.f32 %v21601_v45, %v4031_v31  ;;  %v17006_v53 = vpop.f32.mrf.mxu1  ;;  %17302 = vmatprep.subr.bf16.mxu0 %v25726_v62  ;;  %v5817_v1 = vrot.slane %v5815_v46, 1  ;;  %v5820_v31 = vshll.u32 %v21640_v47, 16  ;;  %v18930_v39 = vld [vmem:[%s25675_s1 + $0x198] sm:$0xff]  }
 0x2d8   : > { %v3921_v25 = vpop.f32.mrf.mxu0  ;;  %v18934_v53 = vld [vmem:[%s25675_s1 + $0x190] sm:$0xff]  }
 0x2d9   : > { %15532 = vst [vmem:[#allocation2 + $0x18] sm:$0xff] %v15319_v5   ;;  %v4032_v11 = vadd.f32 %v3921_v25, %v21247_v50  ;;  %v21653_v23 = vpop.f32.mrf.mxu1  ;;  %v4098_v61 = vmax.f32 %v4068_v54, 0.0  ;;  %v5822_v5 = vrot.slane %v5820_v31, 1  ;;  %v21671_v54 = vld [vmem:[%s19541_s14 + $0xa0] sm:$0xff]  }
 0x2da   : > { %v16931_v29 = vpop.f32.mrf.mxu0  ;;  %17303 = vmatpush3.bf16.msra.mxu0 %v18926_v19  ;;  %v5818_v19 = vor.u32 %v5817_v1, %v5813_v58 }
 0x2db   : > { %v4069_v15 = vadd.f32 %v21601_v45, %v4032_v11  ;;  %v17007_v8 = vpop.f32.mrf.mxu1  ;;  %17304 = vmatprep.subr.bf16.mxu0 %v25726_v62  ;;  %v4134_v25 = vsel %vm235_vm4, %v4098_v61, 0.0 }
 0x2dc   : > { %v3926_v50 = vpop.f32.mrf.mxu0  ;;  %17217 = vmatmul.mubr.bf16.gmra.mxu0 %v14448_v37  ;;  %v5823_v61 = vsel %vm1110_vm2, %v5818_v19, %v5822_v5  ;;  %v5824_v8 = vshrl.u32 %v21640_v47, 16 }
 0x2dd   : > { %v4099_v42 = vmax.f32 %v4069_v15, 0.0  ;;  %v21663_v48 = vpop.f32.mrf.mxu1  ;;  %17189 = vmatmul.mubr.bf16.gmra.mxu1 %v5343_v16  ;;  %17220 = vmatprep.mubr.msk.bf16.mxu0 %vm19459_vm0, %v25726_v62  ;;  %v4033_v35 = vadd.f32 %v3926_v50, %v21260_v40  ;;  %v14449_v16 = vcombine.low %v21407_v4, %v21441_v33  ;;  %v18925_v15 = vld [vmem:[%s25675_s1 + $0x1f8] sm:$0xff]   ;;  %v5828_v50 = vshll.u32 %v21671_v54, 16 }
 0x2de   : > { %v16934_v46 = vpop.f32.mrf.mxu0  ;;  %17260 = vmatprep.mubr.msk.bf16.mxu1 %vm19459_vm0, %v25726_v62  ;;  %17305 = vmatpush3.bf16.msra.mxu0 %v18930_v39 }
 0x2df   : > { %v4135_v37 = vsel %vm230_vm3, %v4099_v42, 0.0  ;;  %v17010_v40 = vpop.f32.mrf.mxu1  ;;  %17306 = vmatprep.subr.bf16.mxu0 %v25726_v62  ;;  %v4070_v31 = vadd.f32 %v21601_v45, %v4033_v35 }
 0x2e0   : > { %v15324_v11 = vpack.c.bf16 %v4135_v37, %v4134_v25  ;;  %v3929_v29 = vpop.f32.mrf.mxu0  ;;  %v21696_v4 = vld [vmem:[#allocation2 + $0x18] sm:$0xf]  ;;  %v21700_v35 = vld [vmem:[#allocation2 + $0x1c] sm:$0xf] }
 0x2e1   : > { %v4034_v58 = vadd.f32 %v3929_v29, %v21268_v24  ;;  %v21684_v1 = vpop.f32.mrf.mxu1  ;;  %v18938_v24 = vld [vmem:[%s25675_s1 + $0x188] sm:$0xff]   ;;  %25753 = vst [vmem:[#allocation9_spill] sm:$0xff] %v21696_v4  ;;  %25754 = vst [vmem:[#allocation5_spill] sm:$0xff] %v21700_v35  ;;  %v4100_v37 = vmax.f32 %v4070_v31, 0.0  ;;  %v5830_v29 = vrot.slane %v5828_v50, 1 }
 0x2e2   : > { %15533 = vst [vmem:[#allocation2 + $0x20] sm:$0xff] %v15324_v11   ;;  %v16935_v39 = vpop.f32.mrf.mxu0  ;;  %17307 = vmatpush3.bf16.msra.mxu0 %v18934_v53  ;;  %v21708_v53 = vld [vmem:[%s19541_s14 + $0xa8] sm:$0xff]   ;;  %v5826_v11 = vor.u32 %v5824_v8, %v5822_v5  ;;  %v18944_v5 = vld [vmem:[%s25675_s1 + $0x180] sm:$0xff]   ;;  %v14450_v8 = vcombine.low %v21444_v22, %v21479_v41 }
 0x2e3   : > { %v4071_v33 = vadd.f32 %v21601_v45, %v4034_v58  ;;  %v17011_v42 = vpop.f32.mrf.mxu1  ;;  %17308 = vmatprep.subr.bf16.mxu0 %v25726_v62  ;;  %v18933_v22 = vld [vmem:[%s25675_s1 + $0x1e8] sm:$0xff]  }
 0x2e4   : > { %v3934_v46 = vpop.f32.mrf.mxu0  ;;  %17221 = vmatmul.mubr.bf16.gmra.mxu0 %v14449_v16  ;;  %v5832_v42 = vshrl.u32 %v21671_v54, 16 }
 0x2e5   : > { %v4101_v47 = vmax.f32 %v4071_v33, 0.0  ;;  %v4035_v19 = vadd.f32 %v3934_v46, %v21281_v7  ;;  %v21703_v25 = vpop.f32.mrf.mxu1  ;;  %17261 = vmatmul.mubr.bf16.vlgmr.msra.gmra.mxu1 %v5823_v61  ;;  %17224 = vmatprep.mubr.msk.bf16.mxu0 %vm19459_vm0, %v25726_v62  ;;  %v18929_v7 = vld [vmem:[%s25675_s1 + $0x1f0] sm:$0xff]   ;;  %v5836_v46 = vshll.u32 %v21708_v53, 16 }
 0x2e6   : > { %v16938_v40 = vpop.f32.mrf.mxu0  ;;  %17349 = vmatpush3.bf16.msra.mxu1 %v18925_v15  ;;  %17264 = vmatprep.mubr.msk.bf16.mxu1 %vm19459_vm0, %v25726_v62 }
 0x2e7   : > { %v4137_v58 = vsel %vm235_vm4, %v4101_v47, 0.0  ;;  %v4072_v39 = vadd.f32 %v21601_v45, %v4035_v19  ;;  %v17014_v31 = vpop.f32.mrf.mxu1  ;;  %17350 = vmatprep.subr.bf16.mxu1 %v25726_v62  ;;  %17309 = vmatpush3.bf16.msra.mxu0 %v18938_v24  ;;  %v5831_v19 = vsel %vm1110_vm2, %v5826_v11, %v5830_v29 }
 0x2e8   : > { %v15329_v61 = vpack.c.bf16 %v4137_v58, %v4100_v37  ;;  %v3937_v15 = vpop.f32.mrf.mxu0  ;;  %17310 = vmatprep.subr.bf16.mxu0 %v25726_v62  ;;  %v21745_v58 = vld [vmem:[%s19541_s14 + $0xb0] sm:$0xff]  }
 0x2e9   : > { %v4036_v50 = vadd.f32 %v3937_v15, %v21287_v38  ;;  %v21728_v33 = vpop.f32.mrf.mxu1  ;;  %v4102_v24 = vmax.f32 %v4072_v39, 0.0  ;;  %v21756_v15 = vld [vmem:[#allocation2 + $0x24] sm:$0xf] }
 0x2ea   : > { %15534 = vst [vmem:[#allocation2 + $0x28] sm:$0xff] %v15329_v61   ;;  %v16939_v47 = vpop.f32.mrf.mxu0  ;;  %17351 = vmatpush3.bf16.msra.mxu1 %v18929_v7  ;;  %v5838_v7 = vrot.slane %v5836_v46, 1  ;;  %v21754_v61 = vld [vmem:[#allocation2 + $0x20] sm:$0xf]  ;;  %25756 = vst [vmem:[#allocation11_spill] sm:$0xff] %v21756_v15 }
 0x2eb   : > { %v4073_v41 = vadd.f32 %v21601_v45, %v4036_v50  ;;  %v17015_v38 = vpop.f32.mrf.mxu1  ;;  %17352 = vmatprep.subr.bf16.mxu1 %v25726_v62  ;;  %17311 = vmatpush3.bf16.msra.mxu0 %v18944_v5  ;;  %v4138_v39 = vsel %vm230_vm3, %v4102_v24, 0.0  ;;  %v5834_v5 = vor.u32 %v5832_v42, %v5830_v29  ;;  %25755 = vst [vmem:[#allocation8_spill] sm:$0xff] %v21754_v61  ;;  %v21887_v61 = vld [vmem:[%s19541_s14 + $0xb4] sm:$0xf] }
 0x2ec   : > { %v3942_v54 = vpop.f32.mrf.mxu0  ;;  %17225 = vmatmul.mubr.bf16.gmra.mxu0 %v14450_v8  ;;  %17400 = vmatprep.subr.bf16.mxu0 %v25726_v62  ;;  %v14451_v47 = vcombine.low %v21482_v17, %v21511_v28  ;;  %v5840_v38 = vshrl.u32 %v21708_v53, 16  ;;  %v18941_v17 = vld [vmem:[%s25675_s1 + $0x1d8] sm:$0xff]  }
 0x2ed   : > { %v4103_v37 = vmax.f32 %v4073_v41, 0.0  ;;  %v4037_v40 = vadd.f32 %v3942_v54, %v21297_v59  ;;  %v21740_v11 = vpop.f32.mrf.mxu1  ;;  %17265 = vmatmul.mubr.bf16.gmra.mxu1 %v5831_v19  ;;  %17228 = vmatprep.mubr.msk.bf16.mxu0 %vm19459_vm0, %v25726_v62  ;;  %v18937_v59 = vld [vmem:[%s25675_s1 + $0x1e0] sm:$0xff]   ;;  %v5839_v41 = vsel %vm1110_vm2, %v5834_v5, %v5838_v7  ;;  %v5844_v54 = vshll.u32 %v21745_v58, 16 }
 0x2ee   : > { %v16942_v31 = vpop.f32.mrf.mxu0  ;;  %17268 = vmatprep.mubr.msk.bf16.mxu1 %vm19459_vm0, %v25726_v62  ;;  %17353 = vmatpush3.bf16.msra.mxu1 %v18933_v22  ;;  %v14454_v19 = vcombine.low %v21568_v20, %v21585_v12 }
 0x2ef   : > { %v15334_v8 = vpack.c.bf16 %v4103_v37, %v4138_v39  ;;  %v4074_v50 = vadd.f32 %v21601_v45, %v4037_v40  ;;  %v17018_v46 = vpop.f32.mrf.mxu1  ;;  %17354 = vmatprep.subr.bf16.mxu1 %v25726_v62 }
 0x2f0   : > { %v3945_v24 = vpop.f32.mrf.mxu0  ;;  %v18948_v46 = vld [vmem:[%s25675_s1 + $0x1d0] sm:$0xff]  }
 0x2f1   : > { %15535 = vst [vmem:[#allocation2 + $0x30] sm:$0xff] %v15334_v8   ;;  %v4038_v29 = vadd.f32 %v3945_v24, %v21301_v18  ;;  %v21763_v42 = vpop.f32.mrf.mxu1  ;;  %v4104_v28 = vmax.f32 %v4074_v50, 0.0  ;;  %v5846_v8 = vrot.slane %v5844_v54, 1  ;;  %v21783_v50 = vld [vmem:[%s19541_s14 + $0xb8] sm:$0xff]  }
 0x2f2   : > { %v16943_v22 = vpop.f32.mrf.mxu0  ;;  %17355 = vmatpush3.bf16.msra.mxu1 %v18937_v59  ;;  %v5842_v59 = vor.u32 %v5840_v38, %v5838_v7 }
 0x2f3   : > { %v4075_v18 = vadd.f32 %v21601_v45, %v4038_v29  ;;  %v17019_v37 = vpop.f32.mrf.mxu1  ;;  %17356 = vmatprep.subr.bf16.mxu1 %v25726_v62  ;;  %v4140_v24 = vsel %vm235_vm4, %v4104_v28, 0.0  ;;  %v14452_v22 = vcombine.low %v21514_v10, %v21542_v49 }
 0x2f4   : > { %v3950_v40 = vpop.f32.mrf.mxu0  ;;  %17229 = vmatmul.mubr.bf16.gmra.mxu0 %v14451_v47  ;;  %v5847_v28 = vsel %vm1110_vm2, %v5842_v59, %v5846_v8  ;;  %v5852_v37 = vshll.u32 %v21783_v50, 16 }
 0x2f5   : > { %v4105_v39 = vmax.f32 %v4075_v18, 0.0  ;;  %v21775_v31 = vpop.f32.mrf.mxu1  ;;  %17269 = vmatmul.mubr.bf16.gmra.mxu1 %v5839_v41  ;;  %17232 = vmatprep.mubr.msk.bf16.mxu0 %vm19459_vm0, %v25726_v62  ;;  %v4039_v53 = vadd.f32 %v3950_v40, %v21310_v63  ;;  %v5848_v18 = vshrl.u32 %v21745_v58, 16  ;;  %v21807_v40 = vld [vmem:[%s19541_s14 + $0xc0] sm:$0xff]   ;;  %v21812_v58 = vld [vmem:[%s19541_s14 + $0x9c] sm:$0xf] }
 0x2f6   : > { %v16946_v5 = vpop.f32.mrf.mxu0  ;;  %17272 = vmatprep.mubr.msk.bf16.mxu1 %vm19459_vm0, %v25726_v62  ;;  %17357 = vmatpush3.bf16.msra.mxu1 %v18941_v17  ;;  %v5864_v12 = vshrl.u32 %v21807_v40, 16 }
 0x2f7   : > { %v4141_v47 = vsel %vm230_vm3, %v4105_v39, 0.0  ;;  %v17022_v63 = vpop.f32.mrf.mxu1  ;;  %17358 = vmatprep.subr.bf16.mxu1 %v25726_v62  ;;  %v4076_v54 = vadd.f32 %v21601_v45, %v4039_v53  ;;  %v6068_v53 = vld [vmem:[%s19541_s14 + $0x98] sm:$0x8] }
 0x2f8   : > { %v15339_v29 = vpack.c.bf16 %v4141_v47, %v4140_v24  ;;  %v3953_v7 = vpop.f32.mrf.mxu0  ;;  %v21820_v24 = vld [vmem:[%s19541_s14 + $0xa0] sm:$0xf]  ;;  %v21823_v47 = vld [vmem:[%s19541_s14 + $0xa4] sm:$0xf] }
 0x2f9   : > { %v4040_v41 = vadd.f32 %v3953_v7, %v21317_v14  ;;  %v21796_v38 = vpop.f32.mrf.mxu1  ;;  %v18952_v14 = vld [vmem:[%s25675_s1 + $0x1c8] sm:$0xff]   ;;  %v4106_v63 = vmax.f32 %v4076_v54, 0.0  ;;  %v5850_v7 = vor.u32 %v5848_v18, %v5846_v8  ;;  %v14513_v54 = vcombine.low %v6068_v53, %v21812_v58 }
 0x2fa   : > { %15536 = vst [vmem:[#allocation2 + $0x38] sm:$0xff] %v15339_v29   ;;  %v16947_v17 = vpop.f32.mrf.mxu0  ;;  %17359 = vmatpush3.bf16.msra.mxu1 %v18948_v46  ;;  %v14453_v18 = vcombine.low %v21545_v2, %v21565_v30 }
 0x2fb   : > { %v4077_v10 = vadd.f32 %v21601_v45, %v4040_v41  ;;  %v17023_v49 = vpop.f32.mrf.mxu1  ;;  %17360 = vmatprep.subr.bf16.mxu1 %v25726_v62 }
 0x2fc   : > { %v3958_v39 = vpop.f32.mrf.mxu0  ;;  %17233 = vmatmul.mubr.bf16.gmra.mxu0 %v14452_v22  ;;  %v5854_v22 = vrot.slane %v5852_v37, 1  ;;  %v14514_v37 = vcombine.low %v21820_v24, %v21823_v47 }
 0x2fd   : > { %v4107_v5 = vmax.f32 %v4077_v10, 0.0  ;;  %v4041_v59 = vadd.f32 %v3958_v39, %v21335_v9  ;;  %v21815_v46 = vpop.f32.mrf.mxu1  ;;  %17273 = vmatmul.mubr.bf16.gmra.mxu1 %v5847_v28  ;;  %17236 = vmatprep.mubr.msk.bf16.mxu0 %vm19459_vm0, %v25726_v62  ;;  %v18956_v9 = vld [vmem:[%s25675_s1 + $0x1c0] sm:$0xff]   ;;  %v5860_v10 = vshll.u32 %v21807_v40, 16 }
 0x2fe   : > { %v16950_v29 = vpop.f32.mrf.mxu0  ;;  %17276 = vmatprep.mubr.msk.bf16.mxu1 %vm19459_vm0, %v25726_v62  ;;  %17361 = vmatpush3.bf16.msra.mxu1 %v18952_v14  ;;  %v5855_v53 = vsel %vm1110_vm2, %v5850_v7, %v5854_v22 }
 0x2ff   : > { %v4143_v41 = vsel %vm235_vm4, %v4107_v5, 0.0  ;;  %v4078_v17 = vadd.f32 %v21601_v45, %v4041_v59  ;;  %v17026_v28 = vpop.f32.mrf.mxu1  ;;  %17362 = vmatprep.subr.bf16.mxu1 %v25726_v62  ;;  %v5856_v29 = vshrl.u32 %v21783_v50, 16  ;;  %v5862_v30 = vrot.slane %v5860_v10, 1  ;;  %v21856_v10 = vld [vmem:[%s19541_s14 + $0xac] sm:$0xf] }
 0x300   : > { %v15344_v49 = vpack.c.bf16 %v4143_v41, %v4106_v63  ;;  %v3961_v8 = vpop.f32.mrf.mxu0  ;;  %v6152_v41 = vshrl.u32 %v14513_v54, 16  ;;  %v6155_v28 = vshll.u32 %v14513_v54, 16 }
 0x301   : > { %v4042_v14 = vadd.f32 %v3961_v8, %v21354_v43  ;;  %v21841_v39 = vpop.f32.mrf.mxu1  ;;  %v4108_v5 = vmax.f32 %v4078_v17, 0.0  ;;  %v21848_v17 = vld [vmem:[%s19541_s14 + $0xa8] sm:$0xf]  ;;  %v5858_v54 = vor.u32 %v5856_v29, %v5854_v22 }
 0x302   : > { %15537 = vst [vmem:[#allocation2 + $0x40] sm:$0xff] %v15344_v49   ;;  %v16951_v59 = vpop.f32.mrf.mxu0  ;;  %17363 = vmatpush3.bf16.msra.mxu1 %v18956_v9  ;;  %v6160_v49 = vshrl.u32 %v14514_v37, 16  ;;  %v6163_v9 = vshll.u32 %v14514_v37, 16  ;;  %v14515_v16 = vcombine.low %v21848_v17, %v21856_v10 }
 0x303   : > { %v4079_v63 = vadd.f32 %v21601_v45, %v4042_v14  ;;  %v17027_v2 = vpop.f32.mrf.mxu1  ;;  %17452 = vmatprep.subr.bf16.mxu1 %v25726_v62  ;;  %v4144_v14 = vsel %vm230_vm3, %v4108_v5, 0.0  ;;  %v21863_v59 = vld [vmem:[%s19541_s14 + $0xc8] sm:$0xff]   ;;  %v6154_v5 = vrot.slane %v6152_v41, 3  ;;  %v5863_v20 = vsel %vm1110_vm2, %v5858_v54, %v5862_v30 }
 0x304   : > { %v3966_v43 = vpop.f32.mrf.mxu0  ;;  %17237 = vmatmul.mubr.bf16.gmra.mxu0 %v14453_v18  ;;  %v5868_v41 = vshll.u32 %v21863_v59, 16  ;;  %v6169_v15 = vshrl.u32 %v14515_v16, 16 }
 0x305   : > { %v4109_v8 = vmax.f32 %v4079_v63, 0.0  ;;  %v4043_v7 = vadd.f32 %v3966_v43, %v21368_v52  ;;  %v21851_v50 = vpop.f32.mrf.mxu1  ;;  %17277 = vmatmul.mubr.bf16.gmra.mxu1 %v5855_v53  ;;  %17240 = vmatprep.mubr.msk.bf16.mxu0 %vm19459_vm0, %v25726_v62  ;;  %v21865_v52 = vld [vmem:[#allocation2 + $0x28] sm:$0xf]  ;;  %v21867_v63 = vld [vmem:[#allocation2 + $0x2c] sm:$0xf] }
 0x306   : > { %v16954_v18 = vpop.f32.mrf.mxu0  ;;  %17280 = vmatprep.mubr.msk.bf16.mxu1 %vm19459_vm0, %v25726_v62  ;;  %25757 = vst [vmem:[#allocation10_spill] sm:$0xff] %v21865_v52  ;;  %25758 = vst [vmem:[#allocation13_spill] sm:$0xff] %v21867_v63 }
 0x307   : > { %v15349_v53 = vpack.c.bf16 %v4109_v8, %v4144_v14  ;;  %v4080_v2 = vadd.f32 %v21601_v45, %v4043_v7  ;;  %v17030_v37 = vpop.f32.mrf.mxu1  ;;  %v6157_v18 = vrot.slane %v6155_v28, 4  ;;  %v6162_v8 = vrot.slane %v6160_v49, 3 }
 0x308   : > { %v3969_v43 = vpop.f32.mrf.mxu0  ;;  %v6165_v14 = vrot.slane %v6163_v9, 4  ;;  %v6172_v49 = vshll.u32 %v14515_v16, 16  ;;  %v21884_v9 = vld [vmem:[%s19541_s14 + $0xb0] sm:$0xf]  ;;  %v5866_v16 = vor.u32 %v5864_v12, %v5862_v30 }
 0x309   : > { %15538 = vst [vmem:[#allocation2 + $0x48] sm:$0xff] %v15349_v53   ;;  %v4044_v22 = vadd.f32 %v3969_v43, %v21386_v55  ;;  %v21875_v29 = vpop.f32.mrf.mxu1  ;;  %v4110_v28 = vmax.f32 %v4080_v2, 0.0  ;;  %v6158_v40 = vor.u32 %v6157_v18, %v6154_v5  ;;  %v6171_v18 = vrot.slane %v6169_v15, 3 }
 0x30a   : > { %v16955_v37 = vpop.f32.mrf.mxu0  ;;  %v6166_v54 = vor.u32 %v6165_v14, %v6162_v8  ;;  %v14516_v8 = vcombine.low %v21884_v9, %v21887_v61 }
 0x30b   : > { %v4081_v53 = vadd.f32 %v21601_v45, %v4044_v22  ;;  %v17031_v55 = vpop.f32.mrf.mxu1 }
 0x30c   : > { %v3974_v43 = vpop.f32.mrf.mxu0  ;;  %17241 = vmatmul.mubr.bf16.gmra.mxu0 %v14454_v19  ;;  %v5870_v19 = vrot.slane %v5868_v41, 1  ;;  %v21897_v55 = vld [vmem:[%s19541_s14 + $0xd0] sm:$0xff]   ;;  %v6167_v12 = vsel %vm624_vm1, %v6158_v40, %v6166_v54  ;;  %v18949_v41 = vld [vmem:[%s25675_s1 + $0x238] sm:$0xff]  }
 0x30d   : > { %v4111_v37 = vmax.f32 %v4081_v53, 0.0  ;;  %v21889_v7 = vpop.f32.mrf.mxu1  ;;  %17281 = vmatmul.mubr.bf16.gmra.mxu1 %v5863_v20  ;;  %17312 = vmatprep.mubr.msk.bf16.mxu0 %vm19459_vm0, %v25726_v62  ;;  %v4045_v2 = vadd.f32 %v3974_v43, %v21401_v21  ;;  %v4146_v53 = vsel %vm235_vm4, %v4110_v28, 0.0  ;;  %v6174_v21 = vrot.slane %v6172_v49, 4  ;;  %v18954_v40 = vld [vmem:[%s19541_s14 + $0xd8] ss:$0 sps:$4 sm:$0x11]  }
 0x30e   : > { %v16958_v22 = vpop.f32.mrf.mxu0  ;;  %17284 = vmatprep.mubr.msk.bf16.mxu1 %vm19459_vm0, %v25726_v62  ;;  %v5871_v15 = vsel %vm1110_vm2, %v5866_v16, %v5870_v19  ;;  %v5872_v43 = vshrl.u32 %v21863_v59, 16  ;;  %v5876_v49 = vshll.u32 %v21897_v55, 16  ;;  %v18953_v59 = vld [vmem:[%s25675_s1 + $0x230] sm:$0xff]  }
 0x30f   : > { %v4147_v20 = vsel %vm230_vm3, %v4111_v37, 0.0  ;;  %v17034_v63 = vpop.f32.mrf.mxu1 }
 0x310   : > { %v15354_v52 = vpack.c.bf16 %v4147_v20, %v4146_v53  ;;  %v3977_v5 = vpop.f32.mrf.mxu0  ;;  %v4082_v63 = vadd.f32 %v21601_v45, %v4045_v2  ;;  %v21918_v53 = vor.u32 %v6174_v21, %v6171_v18  ;;  %v6181_v20 = vshll.u32 %v14516_v8, 16 }
 0x311   : > { %v4046_v30 = vadd.f32 %v3977_v5, %v21420_v60  ;;  %v21906_v14 = vpop.f32.mrf.mxu1  ;;  %v5878_v21 = vrot.slane %v5876_v49, 1  ;;  %v5884_v49 = vshll.u32 %v18954_v40, 16 }
 0x312   : > { %25759 = vst [vmem:[#allocation12_spill] sm:$0xff] %v21906_v14  ;;  %15539 = vst [vmem:[#allocation2 + $0x50] sm:$0xff] %v15354_v52   ;;  %v16959_v28 = vpop.f32.mrf.mxu0  ;;  %v6178_v52 = vshrl.u32 %v14516_v8, 16 }
 0x313   : > { %v4083_v60 = vadd.f32 %v21601_v45, %v4046_v30  ;;  %v17035_v37 = vpop.f32.mrf.mxu1  ;;  %v21927_v30 = vld [vmem:[%s19541_s14 + $0xb8] sm:$0xf]  ;;  %v21930_v28 = vld [vmem:[%s19541_s14 + $0xbc] sm:$0xf] }
 0x314   : > { %v3982_v22 = vpop.f32.mrf.mxu0  ;;  %17313 = vmatmul.mubr.bf16.vlgmr.msra.gmra.mxu0 %v6167_v12  ;;  %v4112_v12 = vmax.f32 %v4082_v63, 0.0  ;;  %v6176_v63 = vsel %vm624_vm1, %v6166_v54, %v21918_v53  ;;  %v18957_v54 = vld [vmem:[%s25675_s1 + $0x228] sm:$0xff]  }
 0x315   : > { %v4113_v2 = vmax.f32 %v4083_v60, 0.0  ;;  %v4047_v5 = vadd.f32 %v3982_v22, %v21437_v27  ;;  %v21921_v16 = vpop.f32.mrf.mxu1  ;;  %17285 = vmatmul.mubr.bf16.gmra.mxu1 %v5871_v15  ;;  %17401 = vmatpush3.bf16.msra.mxu0 %v18949_v41  ;;  %v5874_v27 = vor.u32 %v5872_v43, %v5870_v19  ;;  %v5880_v22 = vshrl.u32 %v21897_v55, 16 }
 0x316   : > { %v16962_v18 = vpop.f32.mrf.mxu0  ;;  %17288 = vmatprep.mubr.msk.bf16.mxu1 %vm19459_vm0, %v25726_v62  ;;  %17316 = vmatprep.mubr.msk.bf16.mxu0 %vm19459_vm0, %v25726_v62 }
 0x317   : > { %v4149_v8 = vsel %vm235_vm4, %v4113_v2, 0.0  ;;  %v4084_v41 = vadd.f32 %v21601_v45, %v4047_v5  ;;  %v17054_v15 = vpop.f32.mrf.mxu1  ;;  %17402 = vmatprep.subr.bf16.mxu0 %v25726_v62  ;;  %v14517_v18 = vcombine.low %v21927_v30, %v21930_v28  ;;  %v6180_v2 = vrot.slane %v6178_v52, 3  ;;  %v21955_v52 = vld [vmem:[%s19541_s14 + $0xc0] sm:$0xf] }
 0x318   : > { %v15359_v60 = vpack.c.bf16 %v4149_v8, %v4112_v12  ;;  %v3985_v37 = vpop.f32.mrf.mxu0  ;;  %v6183_v5 = vrot.slane %v6181_v20, 4  ;;  %v5879_v15 = vsel %vm1110_vm2, %v5874_v27, %v5878_v21 }
 0x319   : > { %v4048_v19 = vadd.f32 %v3985_v37, %v21460_v44  ;;  %v21946_v43 = vpop.f32.mrf.mxu1  ;;  %17403 = vmatpush3.bf16.msra.mxu0 %v18953_v59  ;;  %v4114_v12 = vmax.f32 %v4084_v41, 0.0  ;;  %v6187_v40 = vshrl.u32 %v14517_v18, 16 }
 0x31a   : > { %15540 = vst [vmem:[#allocation2 + $0x58] sm:$0xff] %v15359_v60   ;;  %v16963_v8 = vpop.f32.mrf.mxu0  ;;  %17404 = vmatprep.subr.bf16.mxu0 %v25726_v62  ;;  %v6184_v27 = vor.u32 %v6183_v5, %v6180_v2  ;;  %v6190_v60 = vshll.u32 %v14517_v18, 16 }
 0x31b   : > { %v4085_v44 = vadd.f32 %v21601_v45, %v4048_v19  ;;  %v17055_v55 = vpop.f32.mrf.mxu1  ;;  %v21963_v8 = vld [vmem:[%s19541_s14 + $0xc4] sm:$0xf]  ;;  %v4150_v19 = vsel %vm230_vm3, %v4114_v12, 0.0 }
 0x31c   : > { %v3990_v37 = vpop.f32.mrf.mxu0  ;;  %17317 = vmatmul.mubr.bf16.gmra.mxu0 %v6176_v63  ;;  %v5886_v55 = vrot.slane %v5884_v49, 1  ;;  %v14518_v12 = vcombine.low %v21955_v52, %v21963_v8  ;;  %v6189_v49 = vrot.slane %v6187_v40, 3 }
 0x31d   : > { %v4115_v20 = vmax.f32 %v4085_v44, 0.0  ;;  %v4049_v59 = vadd.f32 %v3990_v37, %v21475_v57  ;;  %v21958_v41 = vpop.f32.mrf.mxu1  ;;  %17289 = vmatmul.mubr.bf16.gmra.mxu1 %v5879_v15  ;;  %17320 = vmatprep.mubr.msk.bf16.mxu0 %vm19459_vm0, %v25726_v62  ;;  %v5882_v44 = vor.u32 %v5880_v22, %v5878_v21  ;;  %v18961_v57 = vld [vmem:[%s25675_s1 + $0x220] sm:$0xff]   ;;  %v25760_v37 = vld [vmem:[#allocation4_spill] sm:$0xff]  ;;  %v6185_v22 = vsel %vm624_vm1, %v21918_v53, %v6184_v27 }
 0x31e   : > { %v16966_v63 = vpop.f32.mrf.mxu0  ;;  %17292 = vmatprep.mubr.msk.bf16.mxu1 %vm19459_vm0, %v25726_v62  ;;  %17405 = vmatpush3.bf16.msra.mxu0 %v18957_v54  ;;  %v6192_v54 = vrot.slane %v6190_v60, 4  ;;  %v6196_v53 = vshrl.u32 %v14518_v12, 16 }
 0x31f   : > { %v15364_v15 = vpack.c.bf16 %v4115_v20, %v4150_v19  ;;  %v4086_v2 = vadd.f32 %v21601_v45, %v4049_v59  ;;  %v17058_v18 = vpop.f32.mrf.mxu1  ;;  %17406 = vmatprep.subr.bf16.mxu0 %v25726_v62  ;;  %v5887_v59 = vsel %vm1110_vm2, %v5882_v44, %v5886_v55  ;;  %v18965_v19 = vld [vmem:[%s25675_s1 + $0x218] sm:$0xff]   ;;  %v6199_v55 = vshll.u32 %v14518_v12, 16 }
 0x320   : > { %v3993_v5 = vpop.f32.mrf.mxu0  ;;  %v21991_v44 = vor.u32 %v6192_v54, %v6189_v49 }
 0x321   : > { %15541 = vst [vmem:[#allocation2 + $0x60] sm:$0xff] %v15364_v15   ;;  %v4050_v63 = vadd.f32 %v3993_v5, %v25760_v37  ;;  %v21977_v21 = vpop.f32.mrf.mxu1  ;;  %v4116_v15 = vmax.f32 %v4086_v2, 0.0  ;;  %v21997_v2 = vld [vmem:[%s19541_s14 + $0xcc] sm:$0xf] }
 0x322   : > { %v16967_v20 = vpop.f32.mrf.mxu0  ;;  %17407 = vmatpush3.bf16.msra.mxu0 %v18961_v57  ;;  %v21994_v57 = vld [vmem:[%s19541_s14 + $0xc8] sm:$0xf] }
 0x323   : > { %v4087_v18 = vadd.f32 %v21601_v45, %v4050_v63  ;;  %v17059_v5 = vpop.f32.mrf.mxu1  ;;  %17408 = vmatprep.subr.bf16.mxu0 %v25726_v62  ;;  %v25761_v63 = vld [vmem:[#allocation3_spill] sm:$0xff]  ;;  %v4152_v49 = vsel %vm235_vm4, %v4116_v15, 0.0  ;;  %v6194_v15 = vsel %vm624_vm1, %v6184_v27, %v21991_v44  ;;  %v18973_v27 = vld [vmem:[%s25675_s1 + $0x208] sm:$0xff]  }
 0x324   : > { %v3998_v37 = vpop.f32.mrf.mxu0  ;;  %17321 = vmatmul.mubr.bf16.gmra.mxu0 %v6185_v22  ;;  %v18969_v22 = vld [vmem:[%s25675_s1 + $0x210] sm:$0xff]  }
 0x325   : > { %v4117_v40 = vmax.f32 %v4087_v18, 0.0  ;;  %v21987_v60 = vpop.f32.mrf.mxu1  ;;  %17293 = vmatmul.mubr.bf16.gmra.mxu1 %v5887_v59  ;;  %17324 = vmatprep.mubr.msk.bf16.mxu0 %vm19459_vm0, %v25726_v62  ;;  %v4051_v20 = vadd.f32 %v3998_v37, %v25761_v63  ;;  %v14547_v37 = vcombine.low %v21812_v58, %v21820_v24  ;;  %v25762_v63 = vld [vmem:[#allocation6_spill] sm:$0xff]  ;;  %v18960_v58 = vld [vmem:[%s25677_s3 + $0x78] sm:$0xff]  }
 0x326   : > { %v16970_v5 = vpop.f32.mrf.mxu0  ;;  %17364 = vmatprep.mubr.msk.bf16.mxu1 %vm19459_vm0, %v25726_v62  ;;  %17409 = vmatpush3.bf16.msra.mxu0 %v18965_v19  ;;  %v14519_v19 = vcombine.low %v21994_v57, %v21997_v2 }
 0x327   : > { %v4153_v12 = vsel %vm230_vm3, %v4117_v40, 0.0  ;;  %v17062_v54 = vpop.f32.mrf.mxu1  ;;  %17410 = vmatprep.subr.bf16.mxu0 %v25726_v62  ;;  %v6198_v40 = vrot.slane %v6196_v53, 3 }
 0x328   : > { %v15369_v59 = vpack.c.bf16 %v4153_v12, %v4152_v49  ;;  %v4001_v18 = vpop.f32.mrf.mxu0  ;;  %v6201_v54 = vrot.slane %v6199_v55, 4  ;;  %v4088_v49 = vadd.f32 %v21601_v45, %v4051_v20  ;;  %v6205_v55 = vshrl.u32 %v14519_v19, 16  ;;  %v22029_v20 = vld [vmem:[%s19541_s14 + $0xd0] sm:$0xf] }
 0x329   : > { %v4052_v5 = vadd.f32 %v4001_v18, %v25762_v63  ;;  %v22015_v35 = vpop.f32.mrf.mxu1  ;;  %v25763_v63 = vld [vmem:[#allocation7_spill] sm:$0xff] }
 0x32a   : > { %15542 = vst [vmem:[#allocation2 + $0x68] sm:$0xff] %v15369_v59   ;;  %v16971_v12 = vpop.f32.mrf.mxu0  ;;  %17411 = vmatpush3.bf16.msra.mxu0 %v18969_v22  ;;  %v6208_v22 = vshll.u32 %v14519_v19, 16 }
 0x32b   : > { %v4089_v24 = vadd.f32 %v21601_v45, %v4052_v5  ;;  %v17063_v18 = vpop.f32.mrf.mxu1  ;;  %17412 = vmatprep.subr.bf16.mxu0 %v25726_v62  ;;  %v22036_v45 = vor.u32 %v6201_v54, %v6198_v40  ;;  %v22039_v5 = vld [vmem:[%s19541_s14 + $0xd4] sm:$0xf]  ;;  %v22051_v40 = vld [vmem:[%s25676_s2] ss:$0 sm:$0xff] }
 0x32c   : > { %v4006_v53 = vpop.f32.mrf.mxu0  ;;  %17325 = vmatmul.mubr.bf16.gmra.mxu0 %v6194_v15  ;;  %v4118_v18 = vmax.f32 %v4088_v49, 0.0  ;;  %v18964_v15 = vld [vmem:[%s25677_s3 + $0x70] sm:$0xff]  }
 0x32d   : > { %v4119_v59 = vmax.f32 %v4089_v24, 0.0  ;;  %v4053_v12 = vadd.f32 %v4006_v53, %v25763_v63  ;;  %v22032_v4 = vpop.f32.mrf.mxu1  ;;  %17365 = vmatmul.mubr.bf16.vlgmr.msra.gmra.mxu1 %v14547_v37  ;;  %17328 = vmatprep.mubr.msk.bf16.mxu0 %vm19459_vm0, %v25726_v62  ;;  %v14548_v24 = vcombine.low %v21823_v47, %v21848_v17  ;;  %v14520_v53 = vcombine.low %v22029_v20, %v22039_v5  ;;  %v18968_v47 = vld [vmem:[%s25677_s3 + $0x68] sm:$0xff]  }
 0x32e   : > { %v16974_v14 = vpop.f32.mrf.mxu0  ;;  %17453 = vmatpush3.bf16.msra.mxu1 %v18960_v58  ;;  %17368 = vmatprep.mubr.msk.bf16.mxu1 %vm19459_vm0, %v25726_v62 }
 0x32f   : > { %v4155_v37 = vsel %vm235_vm4, %v4119_v59, 0.0  ;;  %v4090_v19 = vadd.f32 %v22051_v40, %v4053_v12  ;;  %v17066_v54 = vpop.f32.mrf.mxu1  ;;  %17454 = vmatprep.subr.bf16.mxu1 %v25726_v62  ;;  %17413 = vmatpush3.bf16.msra.mxu0 %v18973_v27  ;;  %v18979_v14 = vld [vmem:[%s25675_s1 + $0x200] sm:$0xff]   ;;  %v6203_v27 = vsel %vm624_vm1, %v21991_v44, %v22036_v45  ;;  %v6207_v12 = vrot.slane %v6205_v55, 3  ;;  %v22075_v55 = vld [vmem:[%s19541_s14 + $0xd8] sm:$0xf] }
 0x330   : > { %v15374_v49 = vpack.c.bf16 %v4155_v37, %v4118_v18  ;;  %v4009_v58 = vpop.f32.mrf.mxu0  ;;  %17414 = vmatprep.subr.bf16.mxu0 %v25726_v62  ;;  %v6210_v18 = vrot.slane %v6208_v22, 4  ;;  %v6214_v44 = vshrl.u32 %v14520_v53, 16 }
 0x331   : > { %v4054_v59 = vadd.f32 %v4009_v58, %v21554_v36  ;;  %v22064_v63 = vpop.f32.mrf.mxu1  ;;  %v4120_v37 = vmax.f32 %v4090_v19, 0.0 }
 0x332   : > { %15543 = vst [vmem:[#allocation2 + $0x70] sm:$0xff] %v15374_v49   ;;  %v16975_v54 = vpop.f32.mrf.mxu0  ;;  %17455 = vmatpush3.bf16.msra.mxu1 %v18964_v15  ;;  %v6211_v49 = vor.u32 %v6210_v18, %v6207_v12  ;;  %v14549_v12 = vcombine.low %v21856_v10, %v21884_v9 }
 0x333   : > { %v4091_v17 = vadd.f32 %v22051_v40, %v4054_v59  ;;  %v17067_v36 = vpop.f32.mrf.mxu1  ;;  %17456 = vmatprep.subr.bf16.mxu1 %v25726_v62  ;;  %17415 = vmatpush3.bf16.msra.mxu0 %v18979_v14  ;;  %v6217_v59 = vshll.u32 %v14520_v53, 16  ;;  %v22084_v54 = vld [vmem:[%s19541_s14 + $0xdc] sm:$0xf]  ;;  %v4156_v14 = vsel %vm230_vm3, %v4120_v37, 0.0 }
 0x334   : > { %v4014_v58 = vpop.f32.mrf.mxu0  ;;  %17329 = vmatmul.mubr.bf16.gmra.mxu0 %v6203_v27  ;;  %17528 = vmatprep.subr.bf16.mxu0 %v25726_v62  ;;  %v14521_v18 = vcombine.low %v22075_v55, %v22084_v54 }
 0x335   : > { %v4121_v22 = vmax.f32 %v4091_v17, 0.0  ;;  %v4055_v15 = vadd.f32 %v4014_v58, %v21562_v51  ;;  %v22079_v19 = vpop.f32.mrf.mxu1  ;;  %17369 = vmatmul.mubr.bf16.gmra.mxu1 %v14548_v24  ;;  %17332 = vmatprep.mubr.msk.bf16.mxu0 %vm19459_vm0, %v25726_v62  ;;  %v18972_v51 = vld [vmem:[%s25677_s3 + $0x60] sm:$0xff]   ;;  %v6212_v58 = vsel %vm624_vm1, %v22036_v45, %v6211_v49 }
 0x336   : > { %v16978_v27 = vpop.f32.mrf.mxu0  ;;  %17372 = vmatprep.mubr.msk.bf16.mxu1 %vm19459_vm0, %v25726_v62  ;;  %17457 = vmatpush3.bf16.msra.mxu1 %v18968_v47 }
 0x337   : > { %v15379_v24 = vpack.c.bf16 %v4121_v22, %v4156_v14  ;;  %v4092_v17 = vadd.f32 %v22051_v40, %v4055_v15  ;;  %v17070_v36 = vpop.f32.mrf.mxu1  ;;  %17458 = vmatprep.subr.bf16.mxu1 %v25726_v62  ;;  %v6216_v22 = vrot.slane %v6214_v44, 3  ;;  %v6219_v15 = vrot.slane %v6217_v59, 4  ;;  %v18976_v27 = vld [vmem:[%s25677_s3 + $0x58] sm:$0xff]  }
 0x338   : > { %v4017_v53 = vpop.f32.mrf.mxu0  ;;  %v6223_v36 = vshrl.u32 %v14521_v18, 16 }
 0x339   : > { %15544 = vst [vmem:[#allocation2 + $0x78] sm:$0xff] %v15379_v24   ;;  %v4056_v37 = vadd.f32 %v4017_v53, %v21575_v3  ;;  %v22100_v47 = vpop.f32.mrf.mxu1  ;;  %v4122_v10 = vmax.f32 %v4092_v17, 0.0  ;;  %v6226_v53 = vshll.u32 %v14521_v18, 16  ;;  %v6220_v59 = vor.u32 %v6219_v15, %v6216_v22  ;;  %v18983_v18 = vld [vmem:[%s25677_s3 + $0x50] sm:$0xff]  }
 0x33a   : > { %v16979_v14 = vpop.f32.mrf.mxu0  ;;  %17459 = vmatpush3.bf16.msra.mxu1 %v18972_v51 }
 0x33b   : > { %v4093_v9 = vadd.f32 %v22051_v40, %v4056_v37  ;;  %v17071_v24 = vpop.f32.mrf.mxu1  ;;  %17460 = vmatprep.subr.bf16.mxu1 %v25726_v62  ;;  %v22117_v37 = vld [vmem:[%s19541_s14 + $0xe0] sm:$0xf]  ;;  %v6225_v14 = vrot.slane %v6223_v36, 3  ;;  %v18987_v36 = vld [vmem:[%s25677_s3 + $0x48] sm:$0xff]  }
 0x33c   : > { %v4022_v3 = vpop.f32.mrf.mxu0  ;;  %17333 = vmatmul.mubr.bf16.gmra.mxu0 %v6212_v58 }
 0x33d   : > { %v4123_v45 = vmax.f32 %v4093_v9, 0.0  ;;  %v22109_v44 = vpop.f32.mrf.mxu1  ;;  %17373 = vmatmul.mubr.bf16.gmra.mxu1 %v14549_v12  ;;  %17336 = vmatprep.mubr.msk.bf16.mxu0 %vm19459_vm0, %v25726_v62  ;;  %v4057_v51 = vadd.f32 %v4022_v3, %v21582_v26  ;;  %v4158_v12 = vsel %vm235_vm4, %v4122_v10, 0.0  ;;  %v6228_v9 = vrot.slane %v6226_v53, 4 }
 0x33e   : > { %v16982_v17 = vpop.f32.mrf.mxu0  ;;  %17376 = vmatprep.mubr.msk.bf16.mxu1 %vm19459_vm0, %v25726_v62  ;;  %17461 = vmatpush3.bf16.msra.mxu1 %v18976_v27  ;;  %v6221_v3 = vsel %vm624_vm1, %v6211_v49, %v6220_v59  ;;  %v14522_v10 = vcombine.low %v22117_v37, %v22117_v37 }
 0x33f   : > { %v4159_v58 = vsel %vm230_vm3, %v4123_v45, 0.0  ;;  %v17074_v22 = vpop.f32.mrf.mxu1  ;;  %17462 = vmatprep.subr.bf16.mxu1 %v25726_v62  ;;  %v14550_v17 = vcombine.low %v21887_v61, %v21927_v30  ;;  %v4094_v45 = vadd.f32 %v22051_v40, %v4057_v51  ;;  %v6229_v30 = vor.u32 %v6228_v9, %v6225_v14 }
 0x340   : > { %v15384_v26 = vpack.c.bf16 %v4159_v58, %v4158_v12  ;;  %v4025_v15 = vpop.f32.mrf.mxu0  ;;  %v6232_v58 = vshrl.u32 %v14522_v10, 16  ;;  %v19408_v56 = vld [vmem:[#allocation2 + $0x7c] sm:$0xf] }
 0x341   : > { %v4058_v27 = vadd.f32 %v4025_v15, %v21596_v6  ;;  %v22128_v24 = vpop.f32.mrf.mxu1  ;;  %v4763_v6 = vadd.f32 %v21921_v16, %v21604_v34  ;;  %v6235_v34 = vshll.u32 %v14522_v10, 16  ;;  %v4124_v16 = vmax.f32 %v4094_v45, 0.0 }
 0x342   : > { %15545 = vst [vmem:[#allocation2 + $0x80] sm:$0xff] %v15384_v26   ;;  %v16983_v22 = vpop.f32.mrf.mxu0  ;;  %17463 = vmatpush3.bf16.msra.mxu1 %v18983_v18  ;;  %v18991_v26 = vld [vmem:[%s25677_s3 + $0x40] sm:$0xff]   ;;  %v4766_v15 = vadd.f32 %v21946_v43, %v21620_v32  ;;  %v14551_v10 = vcombine.low %v21930_v28, %v21955_v52  ;;  %v6234_v32 = vrot.slane %v6232_v58, 3 }
 0x343   : > { %v4095_v49 = vadd.f32 %v22051_v40, %v4058_v27  ;;  %v17075_v53 = vpop.f32.mrf.mxu1  ;;  %17464 = vmatprep.subr.bf16.mxu1 %v25726_v62  ;;  %v18981_v27 = vld [vmem:[%s19541_s14 + $0x9c] sm:$0xff]   ;;  %v6237_v43 = vrot.slane %v6235_v34, 4 }
 0x344   : > { %v5083_v61 = vpop.f32.mrf.mxu0  ;;  %17337 = vmatmul.mubr.bf16.gmra.mxu0 %v6221_v3 }
 0x345   : > { %v4125_v12 = vmax.f32 %v4095_v49, 0.0  ;;  %v22143_v51 = vpop.f32.mrf.mxu1  ;;  %v22145_v18 = vadd.f32 %v5083_v61, %v4763_v6  ;;  %17377 = vmatmul.mubr.bf16.gmra.mxu1 %v14550_v17  ;;  %17340 = vmatprep.mubr.msk.bf16.mxu0 %vm19459_vm0, %v25726_v62  ;;  %v4771_v49 = vadd.f32 %v21958_v41, %v21631_v0  ;;  %v22170_v61 = vld [vmem:[%s19541_s14 + $0xa4] sm:$0xff]   ;;  %v6709_v0 = vshrl.u32 %v18981_v27, 16 }
 0x346   : > { %v17106_v40 = vpop.f32.mrf.mxu0  ;;  %17380 = vmatprep.mubr.msk.bf16.mxu1 %vm19459_vm0, %v25726_v62  ;;  %17465 = vmatpush3.bf16.msra.mxu1 %v18987_v36  ;;  %v6230_v36 = vsel %vm624_vm1, %v6220_v59, %v6229_v30  ;;  %v6238_v59 = vor.u32 %v6237_v43, %v6234_v32  ;;  %v4774_v41 = vadd.f32 %v21977_v21, %v21653_v23  ;;  %v22195_v23 = vld [vmem:[#allocation2 + $0x48] sm:$0xf]  ;;  %v22197_v21 = vld [vmem:[#allocation2 + $0x4c] sm:$0xf] }
 0x347   : > { %v4161_v14 = vsel %vm235_vm4, %v4125_v12, 0.0  ;;  %v17078_v9 = vpop.f32.mrf.mxu1  ;;  %17466 = vmatprep.subr.bf16.mxu1 %v25726_v62  ;;  %v6711_v12 = vshll.u32 %v18981_v27, 16  ;;  %v14552_v27 = vcombine.low %v21963_v8, %v21994_v57  ;;  %v4779_v32 = vadd.f32 %v21987_v60, %v21663_v48  ;;  %v22214_v60 = vld [vmem:[#allocation2 + $0x50] sm:$0xf] }
 0x348   : > { %v15389_v3 = vpack.c.bf16 %v4161_v14, %v4124_v16  ;;  %v5086_v17 = vpop.f32.mrf.mxu0  ;;  %v22186_v9 = vld [vmem:[#allocation2 + $0x44] sm:$0xf] }
 0x349   : > { %v22162_v45 = vpop.f32.mrf.mxu1  ;;  %v22164_v22 = vadd.f32 %v5086_v17, %v4766_v15  ;;  %v6713_v40 = vrot.slane %v6711_v12, 1  ;;  %v22184_v15 = vld [vmem:[#allocation2 + $0x40] sm:$0xf] }
 0x34a   : > { %15546 = vst [vmem:[#allocation2 + $0x88] sm:$0xff] %v15389_v3   ;;  %v17107_v6 = vpop.f32.mrf.mxu0  ;;  %17467 = vmatpush3.bf16.msra.mxu1 %v18991_v26  ;;  %v6716_v26 = vshll.u32 %v22170_v61, 16 }
 0x34b   : > { %v17079_v53 = vpop.f32.mrf.mxu1  ;;  %17604 = vmatprep.subr.bf16.mxu1 %v25726_v62  ;;  %v6714_v48 = vor.u32 %v6713_v40, %v6709_v0 }
 0x34c   : > { %v5091_v28 = vpop.f32.mrf.mxu0  ;;  %17341 = vmatmul.mubr.bf16.gmra.mxu0 %v6230_v36  ;;  %v22202_v53 = vld [vmem:[%s19541_s14 + $0xac] sm:$0xff]  }
 0x34d   : > { %v22173_v52 = vpop.f32.mrf.mxu1  ;;  %v22175_v16 = vadd.f32 %v5091_v28, %v4771_v49  ;;  %17381 = vmatmul.mubr.bf16.gmra.mxu1 %v14551_v10  ;;  %17344 = vmatprep.mubr.msk.bf16.mxu0 %vm19459_vm0, %v25726_v62  ;;  %v6239_v10 = vsel %vm624_vm1, %v6229_v30, %v6238_v59  ;;  %v6718_v49 = vrot.slane %v6716_v26, 1  ;;  %v22216_v28 = vld [vmem:[#allocation2 + $0x54] sm:$0xf]  ;;  %v14553_v26 = vcombine.low %v21997_v2, %v22029_v20 }
 0x34e   : > { %v17110_v58 = vpop.f32.mrf.mxu0  ;;  %17384 = vmatprep.mubr.msk.bf16.mxu1 %vm19459_vm0, %v25726_v62  ;;  %v6724_v2 = vshll.u32 %v22202_v53, 16 }
 0x34f   : > { %v17082_v34 = vpop.f32.mrf.mxu1  ;;  %v4782_v58 = vadd.f32 %v22015_v35, %v21684_v1  ;;  %v18984_v1 = vld [vmem:[%s25677_s3 + $0x38] sm:$0xff]   ;;  %v6720_v35 = vshrl.u32 %v22170_v61, 16  ;;  %v22253_v61 = vld [vmem:[#allocation2 + $0x6c] sm:$0xf] }
 0x350   : > { %v5094_v14 = vpop.f32.mrf.mxu0  ;;  %25769 = vst [vmem:[#allocation6_spill] sm:$0xff] %v22253_v61 }
 0x351   : > { %v22188_v3 = vpop.f32.mrf.mxu1  ;;  %v22190_v17 = vadd.f32 %v5094_v14, %v4774_v41  ;;  %v22224_v14 = vld [vmem:[#allocation2 + $0x58] sm:$0xf] }
 0x352   : > { %v17111_v36 = vpop.f32.mrf.mxu0  ;;  %25764 = vst [vmem:[#allocation16_spill] sm:$0xff] %v22224_v14 }
 0x353   : > { %v17083_v43 = vpop.f32.mrf.mxu1  ;;  %v6719_v36 = vsel %vm1110_vm2, %v6714_v48, %v6718_v49  ;;  %v22260_v48 = vld [vmem:[#allocation2 + $0x70] sm:$0xf] }
 0x354   : > { %v5099_v6 = vpop.f32.mrf.mxu0  ;;  %17345 = vmatmul.mubr.bf16.gmra.mxu0 %v6239_v10  ;;  %v22226_v10 = vld [vmem:[#allocation2 + $0x5c] sm:$0xf]  ;;  %25770 = vst [vmem:[#allocation7_spill] sm:$0xff] %v22260_v48 }
 0x355   : > { %v22208_v57 = vpop.f32.mrf.mxu1  ;;  %v22210_v12 = vadd.f32 %v5099_v6, %v4779_v32  ;;  %17385 = vmatmul.mubr.bf16.gmra.mxu1 %v14552_v27  ;;  %17416 = vmatprep.mubr.msk.bf16.mxu0 %vm19459_vm0, %v25726_v62  ;;  %25765 = vst [vmem:[#allocation14_spill] sm:$0xff] %v22226_v10  ;;  %v4787_v32 = vadd.f32 %v22032_v4, %v21703_v25  ;;  %v22242_v6 = vld [vmem:[#allocation2 + $0x60] sm:$0xf]  ;;  %v6726_v25 = vrot.slane %v6724_v2, 1 }
 0x356   : > { %v17114_v59 = vpop.f32.mrf.mxu0  ;;  %17388 = vmatprep.mubr.msk.bf16.mxu1 %vm19459_vm0, %v25726_v62  ;;  %25766 = vst [vmem:[#allocation15_spill] sm:$0xff] %v22242_v6  ;;  %v6722_v4 = vor.u32 %v6720_v35, %v6718_v49  ;;  %v22276_v35 = vld [vmem:[#allocation2 + $0x78] sm:$0xf]  ;;  %v14554_v2 = vcombine.low %v22039_v5, %v22075_v55  ;;  %v18992_v55 = vld [vmem:[%s25677_s3 + $0x28] sm:$0xff]  }
 0x357   : > { %v17086_v41 = vpop.f32.mrf.mxu1  ;;  %v22244_v59 = vld [vmem:[#allocation2 + $0x64] sm:$0xf]  ;;  %25772 = vst [vmem:[#allocation18_spill] sm:$0xff] %v22276_v35  ;;  %v19391_v6 = vld [vmem:[#allocation2 + $0x28] sm:$0xf] }
 0x358   : > { %v5102_v34 = vpop.f32.mrf.mxu0  ;;  %25767 = vst [vmem:[#allocation4_spill] sm:$0xff] %v22244_v59  ;;  %v22249_v41 = vld [vmem:[%s19541_s14 + $0xb4] sm:$0xff]   ;;  %v22291_v59 = vld [vmem:[#allocation2 + $0x80] sm:$0xf] }
 0x359   : > { %v22230_v40 = vpop.f32.mrf.mxu1  ;;  %v22232_v27 = vadd.f32 %v5102_v34, %v4782_v58  ;;  %v22251_v34 = vld [vmem:[#allocation2 + $0x68] sm:$0xf]  ;;  %v6732_v49 = vshll.u32 %v22249_v41, 16  ;;  %25774 = vst [vmem:[#allocation20_spill] sm:$0xff] %v22291_v59 }
 0x35a   : > { %v17115_v20 = vpop.f32.mrf.mxu0  ;;  %25768 = vst [vmem:[#allocation3_spill] sm:$0xff] %v22251_v34 }
 0x35b   : > { %v17087_v43 = vpop.f32.mrf.mxu1 }
 0x35c   : > { %v5107_v58 = vpop.f32.mrf.mxu0  ;;  %17417 = vmatmul.mubr.bf16.vlgmr.msra.gmra.mxu0 %v6719_v36  ;;  %v18988_v43 = vld [vmem:[%s25677_s3 + $0x30] sm:$0xff]  }
 0x35d   : > { %v22255_v20 = vadd.f32 %v5107_v58, %v4787_v32  ;;  %v5435_v0 = vpop.f32.mrf.mxu1  ;;  %17389 = vmatmul.mubr.bf16.gmra.mxu1 %v14553_v26  ;;  %17529 = vmatpush3.bf16.msra.mxu0 %v18984_v1  ;;  %v22262_v36 = vld [vmem:[#allocation2 + $0x74] sm:$0xf]  ;;  %v4790_v26 = vadd.f32 %v22064_v63, %v21728_v33  ;;  %v6727_v63 = vsel %vm1110_vm2, %v6722_v4, %v6726_v25 }
 0x35e   : > { %25771 = vst [vmem:[#allocation17_spill] sm:$0xff] %v22262_v36  ;;  %v22265_v8 = vadd.f32 %v5435_v0, %v22145_v18  ;;  %v17118_v30 = vpop.f32.mrf.mxu0  ;;  %17392 = vmatprep.mubr.msk.bf16.mxu1 %vm19459_vm0, %v25726_v62  ;;  %17420 = vmatprep.mubr.msk.bf16.mxu0 %vm19459_vm0, %v25726_v62  ;;  %v22278_v18 = vld [vmem:[#allocation2 + $0x7c] sm:$0xf]  ;;  %v4795_v4 = vadd.f32 %v22079_v19, %v21740_v11  ;;  %v19388_v36 = vld [vmem:[#allocation2 + $0x20] sm:$0xf] }
 0x35f   : > { %v17158_v1 = vpop.f32.mrf.mxu1  ;;  %17530 = vmatprep.subr.bf16.mxu0 %v25726_v62  ;;  %25773 = vst [vmem:[#allocation19_spill] sm:$0xff] %v22278_v18  ;;  %v22293_v30 = vld [vmem:[#allocation2 + $0x84] sm:$0xf]  ;;  %v6734_v18 = vrot.slane %v6732_v49, 1  ;;  %v22317_v11 = vld [vmem:[%s19541_s14 + $0xbc] sm:$0xff]   ;;  %v14555_v49 = vcombine.low %v22084_v54, %v22117_v37  ;;  %v4803_v54 = vadd.f32 %v22109_v44, %v21775_v31 }
 0x360   : > { %v5110_v0 = vpop.f32.mrf.mxu0  ;;  %v6728_v1 = vshrl.u32 %v22202_v53, 16  ;;  %25775 = vst [vmem:[#allocation21_spill] sm:$0xff] %v22293_v30 }
 0x361   : > { %v22286_v58 = vadd.f32 %v5110_v0, %v4790_v26  ;;  %v5438_v33 = vpop.f32.mrf.mxu1  ;;  %17531 = vmatpush3.bf16.msra.mxu0 %v18988_v43  ;;  %v22306_v0 = vld [vmem:[#allocation2 + $0x88] sm:$0xf] }
 0x362   : > { %v22296_v61 = vadd.f32 %v5438_v33, %v22164_v22  ;;  %v17119_v5 = vpop.f32.mrf.mxu0  ;;  %17532 = vmatprep.subr.bf16.mxu0 %v25726_v62  ;;  %25776 = vst [vmem:[#allocation22_spill] sm:$0xff] %v22306_v0  ;;  %v22308_v22 = vld [vmem:[#allocation2 + $0x8c] sm:$0xf]  ;;  %v6730_v53 = vor.u32 %v6728_v1, %v6726_v25 }
 0x363   : > { %v17159_v43 = vpop.f32.mrf.mxu1  ;;  %25777 = vst [vmem:[#allocation23_spill] sm:$0xff] %v22308_v22  ;;  %v22530_v33 = vld [vmem:[#allocation2 + $0x2c] sm:$0xf] }
 0x364   : > { %v5115_v26 = vpop.f32.mrf.mxu0  ;;  %17421 = vmatmul.mubr.bf16.gmra.mxu0 %v6727_v63 }
 0x365   : > { %v22312_v5 = vadd.f32 %v5115_v26, %v4795_v4  ;;  %v5443_v32 = vpop.f32.mrf.mxu1  ;;  %17393 = vmatmul.mubr.bf16.gmra.mxu1 %v14554_v2  ;;  %17424 = vmatprep.mubr.msk.bf16.mxu0 %vm19459_vm0, %v25726_v62  ;;  %v18996_v4 = vld [vmem:[%s25677_s3 + $0x20] sm:$0xff]   ;;  %v4798_v2 = vadd.f32 %v22100_v47, %v21763_v42  ;;  %v6736_v26 = vshrl.u32 %v22249_v41, 16 }
 0x366   : > { %v22320_v19 = vadd.f32 %v5443_v32, %v22175_v16  ;;  %v17122_v63 = vpop.f32.mrf.mxu0  ;;  %17396 = vmatprep.mubr.msk.bf16.mxu1 %vm19459_vm0, %v25726_v62  ;;  %17533 = vmatpush3.bf16.msra.mxu0 %v18992_v55  ;;  %v6735_v55 = vsel %vm1110_vm2, %v6730_v53, %v6734_v18 }
 0x367   : > { %v17162_v43 = vpop.f32.mrf.mxu1  ;;  %17534 = vmatprep.subr.bf16.mxu0 %v25726_v62  ;;  %v6740_v63 = vshll.u32 %v22317_v11, 16 }
 0x368   : > { %v5118_v16 = vpop.f32.mrf.mxu0  ;;  %v18999_v43 = vld [vmem:[%s25677_s3 + $0x18] sm:$0xff]  }
 0x369   : > { %v22334_v32 = vadd.f32 %v5118_v16, %v4798_v2  ;;  %v5446_v1 = vpop.f32.mrf.mxu1  ;;  %v22352_v16 = vld [vmem:[#allocation2 + $0xc] sm:$0xf] }
 0x36a   : > { %v22340_v42 = vadd.f32 %v5446_v1, %v22190_v17  ;;  %v17123_v47 = vpop.f32.mrf.mxu0  ;;  %17535 = vmatpush3.bf16.msra.mxu0 %v18996_v4  ;;  %v6738_v17 = vor.u32 %v6736_v26, %v6734_v18  ;;  %v6742_v4 = vrot.slane %v6740_v63, 1  ;;  %v22355_v1 = vld [vmem:[%s19541_s14 + $0xc4] sm:$0xff]   ;;  %v4806_v18 = vadd.f32 %v22128_v24, %v21796_v38  ;;  %v22367_v26 = vld [vmem:[#allocation2 + $0x10] sm:$0xf] }
 0x36b   : > { %v17163_v37 = vpop.f32.mrf.mxu1  ;;  %17536 = vmatprep.subr.bf16.mxu0 %v25726_v62 }
 0x36c   : > { %v5123_v53 = vpop.f32.mrf.mxu0  ;;  %17425 = vmatmul.mubr.bf16.gmra.mxu0 %v6735_v55  ;;  %v6744_v37 = vshrl.u32 %v22317_v11, 16  ;;  %v19008_v11 = vld [vmem:[%s25677_s3 + $0x8] sm:$0xff]  }
 0x36d   : > { %v22348_v41 = vadd.f32 %v5123_v53, %v4803_v54  ;;  %v5451_v2 = vpop.f32.mrf.mxu1  ;;  %17397 = vmatmul.mubr.bf16.gmra.mxu1 %v14555_v49  ;;  %17428 = vmatprep.mubr.msk.bf16.mxu0 %vm19459_vm0, %v25726_v62  ;;  %v19004_v49 = vld [vmem:[%s25677_s3 + $0x10] sm:$0xff]   ;;  %v6748_v53 = vshll.u32 %v22355_v1, 16 }
 0x36e   : > { %v22358_v31 = vadd.f32 %v5451_v2, %v22210_v12  ;;  %v17126_v44 = vpop.f32.mrf.mxu0  ;;  %17468 = vmatprep.mubr.msk.bf16.mxu1 %vm19459_vm0, %v25726_v62  ;;  %17537 = vmatpush3.bf16.msra.mxu0 %v18999_v43  ;;  %v14633_v12 = vcombine.low %v22352_v16, %v22367_v26  ;;  %v6743_v43 = vsel %vm1110_vm2, %v6738_v17, %v6742_v4  ;;  %v18995_v2 = vld [vmem:[%s25677_s3 + $0xb8] sm:$0xff]  }
 0x36f   : > { %v17166_v55 = vpop.f32.mrf.mxu1  ;;  %17538 = vmatprep.subr.bf16.mxu0 %v25726_v62  ;;  %v4811_v44 = vadd.f32 %v22143_v51, %v21815_v46 }
 0x370   : > { %v5126_v63 = vpop.f32.mrf.mxu0 }
 0x371   : > { %v22372_v47 = vadd.f32 %v5126_v63, %v4806_v18  ;;  %v5454_v54 = vpop.f32.mrf.mxu1  ;;  %v6750_v63 = vrot.slane %v6748_v53, 1  ;;  %v22412_v53 = vld [vmem:[#allocation2 + $0x18] sm:$0xf] }
 0x372   : > { %v22378_v38 = vadd.f32 %v5454_v54, %v22232_v27  ;;  %v17127_v24 = vpop.f32.mrf.mxu0  ;;  %17539 = vmatpush3.bf16.msra.mxu0 %v19004_v49  ;;  %v6746_v49 = vor.u32 %v6744_v37, %v6742_v4  ;;  %v22394_v54 = vld [vmem:[%s19541_s14 + $0xcc] sm:$0xff]   ;;  %v22410_v37 = vld [vmem:[#allocation2 + $0x14] sm:$0xf] }
 0x373   : > { %v17167_v18 = vpop.f32.mrf.mxu1  ;;  %17540 = vmatprep.subr.bf16.mxu0 %v25726_v62 }
 0x374   : > { %v5131_v17 = vpop.f32.mrf.mxu0  ;;  %17429 = vmatmul.mubr.bf16.gmra.mxu0 %v6743_v43  ;;  %v19003_v43 = vld [vmem:[%s25677_s3 + $0xb0] sm:$0xff]   ;;  %v6756_v18 = vshll.u32 %v22394_v54, 16 }
 0x375   : > { %v22389_v27 = vadd.f32 %v5131_v17, %v4811_v44  ;;  %v5459_v55 = vpop.f32.mrf.mxu1  ;;  %17469 = vmatmul.mubr.bf16.vlgmr.msra.gmra.mxu1 %v14633_v12  ;;  %17432 = vmatprep.mubr.msk.bf16.mxu0 %vm19459_vm0, %v25726_v62  ;;  %v4814_v12 = vadd.f32 %v22162_v45, %v21841_v39  ;;  %v6751_v39 = vsel %vm1110_vm2, %v6746_v49, %v6750_v63  ;;  %v6752_v45 = vshrl.u32 %v22355_v1, 16 }
 0x376   : > { %v22397_v46 = vadd.f32 %v5459_v55, %v22255_v20  ;;  %v17130_v51 = vpop.f32.mrf.mxu0  ;;  %17605 = vmatpush3.bf16.msra.mxu1 %v18995_v2  ;;  %17472 = vmatprep.mubr.msk.bf16.mxu1 %vm19459_vm0, %v25726_v62  ;;  %v19016_v20 = vld [vmem:[%s25677_s3] sm:$0xff]   ;;  %v19012_v55 = vld [vmem:[%s25677_s3 + $0xa8] sm:$0xff]   ;;  %v14634_v49 = vcombine.low %v22410_v37, %v22412_v53 }
 0x377   : > { %v17170_v24 = vpop.f32.mrf.mxu1  ;;  %17606 = vmatprep.subr.bf16.mxu1 %v25726_v62  ;;  %17541 = vmatpush3.bf16.msra.mxu0 %v19008_v11  ;;  %v4819_v51 = vadd.f32 %v22173_v52, %v21851_v50  ;;  %v6758_v50 = vrot.slane %v6756_v18, 1  ;;  %v22437_v52 = vld [vmem:[%s19541_s14 + $0xd4] sm:$0xff]  }
 0x378   : > { %v5134_v4 = vpop.f32.mrf.mxu0  ;;  %17542 = vmatprep.subr.bf16.mxu0 %v25726_v62  ;;  %v6754_v24 = vor.u32 %v6752_v45, %v6750_v63  ;;  %v22450_v45 = vld [vmem:[#allocation2 + $0x20] sm:$0xf] }
 0x379   : > { %v22415_v2 = vadd.f32 %v5134_v4, %v4814_v12  ;;  %v5462_v44 = vpop.f32.mrf.mxu1 }
 0x37a   : > { %v22421_v11 = vadd.f32 %v5462_v44, %v22286_v58  ;;  %v17131_v17 = vpop.f32.mrf.mxu0  ;;  %17607 = vmatpush3.bf16.msra.mxu1 %v19003_v43 }
 0x37b   : > { %v17171_v12 = vpop.f32.mrf.mxu1  ;;  %17608 = vmatprep.subr.bf16.mxu1 %v25726_v62  ;;  %17543 = vmatpush3.bf16.msra.mxu0 %v19016_v20  ;;  %v19019_v20 = vld [vmem:[%s25677_s3 + $0xa0] sm:$0xff]  }
 0x37c   : > { %v5139_v1 = vpop.f32.mrf.mxu0  ;;  %17433 = vmatmul.mubr.bf16.gmra.mxu0 %v6751_v39  ;;  %17680 = vmatprep.subr.bf16.mxu0 %v25726_v62  ;;  %v4822_v39 = vadd.f32 %v22188_v3, %v21875_v29  ;;  %v6764_v12 = vshll.u32 %v22437_v52, 16  ;;  %v22460_v29 = vld [vmem:[#allocation2 + $0x1c] sm:$0xf] }
 0x37d   : > { %v22432_v58 = vadd.f32 %v5139_v1, %v4819_v51  ;;  %v5467_v43 = vpop.f32.mrf.mxu1  ;;  %17473 = vmatmul.mubr.bf16.gmra.mxu1 %v14634_v49  ;;  %17436 = vmatprep.mubr.msk.bf16.mxu0 %vm19459_vm0, %v25726_v62  ;;  %v6759_v51 = vsel %vm1110_vm2, %v6754_v24, %v6758_v50  ;;  %v19023_v3 = vld [vmem:[%s25677_s3 + $0x98] sm:$0xff]   ;;  %v14658_v0 = vcombine.low %v22412_v53, %v22460_v29 }
 0x37e   : > { %v22440_v4 = vadd.f32 %v5467_v43, %v22312_v5  ;;  %v17134_v44 = vpop.f32.mrf.mxu0  ;;  %17476 = vmatprep.mubr.msk.bf16.mxu1 %vm19459_vm0, %v25726_v62  ;;  %17609 = vmatpush3.bf16.msra.mxu1 %v19012_v55  ;;  %v6760_v55 = vshrl.u32 %v22394_v54, 16  ;;  %v4827_v43 = vadd.f32 %v22208_v57, %v21889_v7  ;;  %v14635_v54 = vcombine.low %v22460_v29, %v22450_v45 }
 0x37f   : > { %v17174_v17 = vpop.f32.mrf.mxu1  ;;  %17610 = vmatprep.subr.bf16.mxu1 %v25726_v62 }
 0x380   : > { %v5142_v63 = vpop.f32.mrf.mxu0  ;;  %v6766_v17 = vrot.slane %v6764_v12, 1 }
 0x381   : > { %v22452_v5 = vadd.f32 %v5142_v63, %v4822_v39  ;;  %v5470_v18 = vpop.f32.mrf.mxu1  ;;  %v19009_v63 = vld [vmem:[%s19541_s14 + $0xdc] sm:$0xff]  }
 0x382   : > { %v22458_v49 = vadd.f32 %v5470_v18, %v22334_v32  ;;  %v17135_v1 = vpop.f32.mrf.mxu0  ;;  %17611 = vmatpush3.bf16.msra.mxu1 %v19019_v20  ;;  %v6762_v20 = vor.u32 %v6760_v55, %v6758_v50  ;;  %v19029_v18 = vld [vmem:[%s25677_s3 + $0x90] sm:$0xff]   ;;  %v22486_v55 = vld [vmem:[#allocation2 + $0x28] sm:$0xf] }
 0x383   : > { %v17175_v24 = vpop.f32.mrf.mxu1  ;;  %17612 = vmatprep.subr.bf16.mxu1 %v25726_v62 }
 0x384   : > { %v5147_v32 = vpop.f32.mrf.mxu0  ;;  %17437 = vmatmul.mubr.bf16.gmra.mxu0 %v6759_v51  ;;  %v25778_v51 = vld [vmem:[#allocation12_spill] sm:$0xff]  ;;  %v6767_v24 = vsel %vm1110_vm2, %v6762_v20, %v6766_v17 }
 0x385   : > { %v22470_v44 = vadd.f32 %v5147_v32, %v4827_v43  ;;  %v5475_v39 = vpop.f32.mrf.mxu1  ;;  %17477 = vmatmul.mubr.bf16.gmra.mxu1 %v14635_v54  ;;  %17440 = vmatprep.mubr.msk.bf16.mxu0 %vm19459_vm0, %v25726_v62  ;;  %v4830_v1 = vadd.f32 %v22230_v40, %v25778_v51  ;;  %v6772_v54 = vshll.u32 %v19009_v63, 16  ;;  %v22495_v40 = vld [vmem:[#allocation2 + $0x24] sm:$0xf] }
 0x386   : > { %v22476_v7 = vadd.f32 %v5475_v39, %v22348_v41  ;;  %v17138_v57 = vpop.f32.mrf.mxu0  ;;  %17480 = vmatprep.mubr.msk.bf16.mxu1 %vm19459_vm0, %v25726_v62  ;;  %17613 = vmatpush3.bf16.msra.mxu1 %v19023_v3  ;;  %v6768_v3 = vshrl.u32 %v22437_v52, 16 }
 0x387   : > { %v17178_v43 = vpop.f32.mrf.mxu1  ;;  %17614 = vmatprep.subr.bf16.mxu1 %v25726_v62  ;;  %v19035_v57 = vld [vmem:[%s25677_s3 + $0x88] sm:$0xff]  }
 0x388   : > { %v5150_v50 = vpop.f32.mrf.mxu0  ;;  %v6774_v43 = vrot.slane %v6772_v54, 1 }
 0x389   : > { %v22488_v41 = vadd.f32 %v5150_v50, %v4830_v1  ;;  %v5478_v12 = vpop.f32.mrf.mxu1  ;;  %v14636_v1 = vcombine.low %v22495_v40, %v22486_v55  ;;  %v19013_v50 = vld [vmem:[%s19541_s14 + $0xe4] ss:$0 sps:$4 sm:$0x11]  }
 0x38a   : > { %v22493_v32 = vadd.f32 %v5478_v12, %v22372_v47  ;;  %v17139_v39 = vpop.f32.mrf.mxu0  ;;  %17615 = vmatpush3.bf16.msra.mxu1 %v19029_v18  ;;  %v6770_v18 = vor.u32 %v6768_v3, %v6766_v17  ;;  %v22518_v17 = vld [vmem:[#allocation2 + $0x30] sm:$0xf]  ;;  %v6776_v3 = vshrl.u32 %v19009_v63, 16 }
 0x38b   : > { %v17179_v51 = vpop.f32.mrf.mxu1  ;;  %17616 = vmatprep.subr.bf16.mxu1 %v25726_v62 }
 0x38c   : > { %v5640_v52 = vpop.f32.mrf.mxu0  ;;  %17441 = vmatmul.mubr.bf16.gmra.mxu0 %v6767_v24  ;;  %v7115_v51 = vld [vmem:[#allocation2 + $0x8] sm:$0x8] }
 0x38d   : > { %v5483_v20 = vpop.f32.mrf.mxu1  ;;  %v22504_v47 = vadd.f32 %v5640_v52, %v22265_v8  ;;  %17481 = vmatmul.mubr.bf16.gmra.mxu1 %v14636_v1  ;;  %17444 = vmatprep.mubr.msk.bf16.mxu0 %vm19459_vm0, %v25726_v62  ;;  %v19041_v8 = vld [vmem:[%s25677_s3 + $0x80] sm:$0xff]   ;;  %v6775_v52 = vsel %vm1110_vm2, %v6770_v18, %v6774_v43 }
 0x38e   : > { %v22510_v12 = vadd.f32 %v5483_v20, %v22389_v27  ;;  %v17210_v39 = vpop.f32.mrf.mxu0  ;;  %17484 = vmatprep.mubr.msk.bf16.mxu1 %vm19459_vm0, %v25726_v62  ;;  %17617 = vmatpush3.bf16.msra.mxu1 %v19035_v57  ;;  %v6780_v20 = vshll.u32 %v19013_v50, 16  ;;  %v14656_v57 = vcombine.low %v7115_v51, %v22352_v16  ;;  %v6778_v50 = vor.u32 %v6776_v3, %v6774_v43 }
 0x38f   : > { %v17182_v24 = vpop.f32.mrf.mxu1  ;;  %17618 = vmatprep.subr.bf16.mxu1 %v25726_v62  ;;  %v14657_v39 = vcombine.low %v22367_v26, %v22410_v37 }
 0x390   : > { %v5643_v1 = vpop.f32.mrf.mxu0  ;;  %v7489_v26 = vshrl.u32 %v14656_v57, 16  ;;  %v7492_v37 = vshll.u32 %v14656_v57, 16 }
 0x391   : > { %v5486_v54 = vpop.f32.mrf.mxu1  ;;  %v22521_v27 = vadd.f32 %v5643_v1, %v22296_v61  ;;  %v14637_v61 = vcombine.low %v22530_v33, %v22518_v17  ;;  %v7500_v43 = vshll.u32 %v14657_v39, 16 }
 0x392   : > { %v22528_v24 = vadd.f32 %v5486_v54, %v22415_v2  ;;  %v17211_v25 = vpop.f32.mrf.mxu0  ;;  %17619 = vmatpush3.bf16.msra.mxu1 %v19041_v8  ;;  %v7497_v2 = vshrl.u32 %v14657_v39, 16  ;;  %v22554_v39 = vld [vmem:[#allocation2 + $0x34] sm:$0xf] }
 0x393   : > { %v17183_v63 = vpop.f32.mrf.mxu1  ;;  %17756 = vmatprep.subr.bf16.mxu1 %v25726_v62  ;;  %v6782_v25 = vrot.slane %v6780_v20, 1 }
 0x394   : > { %v5648_v18 = vpop.f32.mrf.mxu0  ;;  %17445 = vmatmul.mubr.bf16.gmra.mxu0 %v6775_v52  ;;  %v11110_v52 = vld [vmem:[#allocation2 + $0x88] sm:$0xf]  ;;  %v11111_v63 = vld [vmem:[#allocation2 + $0x8c] sm:$0xf] }
 0x395   : > { %v5491_v16 = vpop.f32.mrf.mxu1  ;;  %v22536_v51 = vadd.f32 %v5648_v18, %v22320_v19  ;;  %17485 = vmatmul.mubr.bf16.gmra.mxu1 %v14637_v61  ;;  %17448 = vmatprep.mubr.msk.bf16.mxu0 %vm19459_vm0, %v25726_v62  ;;  %v22545_v19 = vld [vmem:[#allocation2 + $0x38] sm:$0xf]  ;;  %v6783_v57 = vsel %vm1110_vm2, %v6778_v50, %v6782_v25  ;;  %v7491_v18 = vrot.slane %v7489_v26, 3 }
 0x396   : > { %v22541_v8 = vadd.f32 %v5491_v16, %v22432_v58  ;;  %v17214_v1 = vpop.f32.mrf.mxu0  ;;  %17488 = vmatprep.mubr.msk.bf16.mxu1 %vm19459_vm0, %v25726_v62  ;;  %v7494_v58 = vrot.slane %v7492_v37, 4  ;;  %v7499_v16 = vrot.slane %v7497_v2, 3  ;;  %v7506_v2 = vshrl.u32 %v14658_v0, 16 }
 0x397   : > { %v17186_v3 = vpop.f32.mrf.mxu1 }
 0x398   : > { %v5651_v54 = vpop.f32.mrf.mxu0  ;;  %v7502_v3 = vrot.slane %v7500_v43, 4  ;;  %v7509_v43 = vshll.u32 %v14658_v0, 16 }
 0x399   : > { %v5494_v61 = vpop.f32.mrf.mxu1  ;;  %v22548_v20 = vadd.f32 %v5651_v54, %v22340_v42  ;;  %v14638_v42 = vcombine.low %v22554_v39, %v22545_v19  ;;  %v14993_v54 = vcombine.low %v11110_v52, %v11111_v63  ;;  %v22570_v63 = vld [vmem:[#allocation2 + $0x40] sm:$0xf] }
 0x39a   : > { %v22552_v1 = vadd.f32 %v5494_v61, %v22452_v5  ;;  %v17215_v22 = vpop.f32.mrf.mxu0  ;;  %v7503_v37 = vor.u32 %v7502_v3, %v7499_v16  ;;  %v14659_v61 = vcombine.low %v22450_v45, %v22495_v40  ;;  %v22584_v3 = vld [vmem:[#allocation2 + $0x3c] sm:$0xf]  ;;  %v7508_v40 = vrot.slane %v7506_v2, 3 }
 0x39b   : > { %v17187_v30 = vpop.f32.mrf.mxu1  ;;  %v7495_v22 = vor.u32 %v7494_v58, %v7491_v18  ;;  %v11390_v29 = vshll.u32 %v14993_v54, 16  ;;  %v19020_v58 = vld [vmem:[%s25677_s3 + $0xf8] sm:$0xff]  }
 0x39c   : > { %v5656_v59 = vpop.f32.mrf.mxu0  ;;  %17449 = vmatmul.mubr.bf16.gmra.mxu0 %v6783_v57  ;;  %v11387_v30 = vshrl.u32 %v14993_v54, 16 }
 0x39d   : > { %v5499_v50 = vpop.f32.mrf.mxu1  ;;  %v22561_v25 = vadd.f32 %v5656_v59, %v22358_v31  ;;  %17489 = vmatmul.mubr.bf16.gmra.mxu1 %v14638_v42  ;;  %17544 = vmatprep.mubr.msk.bf16.mxu0 %vm19459_vm0, %v25726_v62  ;;  %v11109_v59 = vld [vmem:[#allocation2 + $0x84] sm:$0xf]  ;;  %v11108_v31 = vld [vmem:[#allocation2 + $0x80] sm:$0x8]  ;;  %v7504_v18 = vsel %vm624_vm1, %v7495_v22, %v7503_v37  ;;  %v11392_v54 = vrot.slane %v11390_v29, 4  ;;  %v19026_v29 = vld [vmem:[%s25677_s3 + $0xf0] sm:$0xff]  }
 0x39e   : > { %v22566_v5 = vadd.f32 %v5499_v50, %v22470_v44  ;;  %v17218_v53 = vpop.f32.mrf.mxu0  ;;  %17492 = vmatprep.mubr.msk.bf16.mxu1 %vm19459_vm0, %v25726_v62  ;;  %v11389_v42 = vrot.slane %v11387_v30, 3  ;;  %v14992_v50 = vcombine.low %v11108_v31, %v11109_v59  ;;  %v7518_v30 = vshll.u32 %v14659_v61, 16 }
 0x39f   : > { %v17190_v26 = vpop.f32.mrf.mxu1  ;;  %v7511_v53 = vrot.slane %v7509_v43, 4 }
 0x3a0   : > { %v5659_v52 = vpop.f32.mrf.mxu0  ;;  %v11379_v26 = vshrl.u32 %v14992_v50, 16  ;;  %v22601_v31 = vor.u32 %v11392_v54, %v11389_v42  ;;  %v7520_v54 = vrot.slane %v7518_v30, 4 }
 0x3a1   : > { %v5502_v44 = vpop.f32.mrf.mxu1  ;;  %v22575_v57 = vadd.f32 %v5659_v52, %v22378_v38  ;;  %v14639_v38 = vcombine.low %v22584_v3, %v22570_v63  ;;  %v11382_v52 = vshll.u32 %v14992_v50, 16 }
 0x3a2   : > { %v22582_v0 = vadd.f32 %v5502_v44, %v22488_v41  ;;  %v17219_v16 = vpop.f32.mrf.mxu0  ;;  %v7515_v44 = vshrl.u32 %v14659_v61, 16  ;;  %v7512_v61 = vor.u32 %v7511_v53, %v7508_v40  ;;  %v19030_v40 = vld [vmem:[%s25677_s3 + $0xe8] sm:$0xff]   ;;  %v14660_v53 = vcombine.low %v22486_v55, %v22530_v33 }
 0x3a3   : > { %v17191_v45 = vpop.f32.mrf.mxu1  ;;  %v11384_v43 = vrot.slane %v11382_v52, 4  ;;  %v22604_v16 = vld [vmem:[#allocation2 + $0x48] sm:$0xf] }
 0x3a4   : > { %v5664_v22 = vpop.f32.mrf.mxu0  ;;  %17545 = vmatmul.mubr.bf16.vlgmr.msra.gmra.mxu0 %v7504_v18  ;;  %v7517_v42 = vrot.slane %v7515_v44, 3 }
 0x3a5   : > { %v22589_v35 = vadd.f32 %v5664_v22, %v22397_v46  ;;  %v5979_v41 = vpop.f32.mrf.mxu1  ;;  %17493 = vmatmul.mubr.bf16.gmra.mxu1 %v14639_v38  ;;  %17681 = vmatpush3.bf16.msra.mxu0 %v19020_v58  ;;  %v11381_v46 = vrot.slane %v11379_v26, 3  ;;  %v22612_v26 = vld [vmem:[#allocation2 + $0x44] sm:$0xf] }
 0x3a6   : > { %v22595_v59 = vadd.f32 %v5979_v41, %v22504_v47  ;;  %v17222_v2 = vpop.f32.mrf.mxu0  ;;  %17496 = vmatprep.mubr.msk.bf16.mxu1 %vm19459_vm0, %v25726_v62  ;;  %17548 = vmatprep.mubr.msk.bf16.mxu0 %vm19459_vm0, %v25726_v62  ;;  %v14640_v52 = vcombine.low %v22612_v26, %v22604_v16  ;;  %v7513_v41 = vsel %vm624_vm1, %v7503_v37, %v7512_v61  ;;  %v19036_v37 = vld [vmem:[%s25677_s3 + $0xe0] sm:$0xff]  }
 0x3a7   : > { %v17262_v18 = vpop.f32.mrf.mxu1  ;;  %17682 = vmatprep.subr.bf16.mxu0 %v25726_v62  ;;  %v11385_v47 = vor.u32 %v11384_v43, %v11381_v46  ;;  %v7521_v55 = vor.u32 %v7520_v54, %v7517_v42  ;;  %v7524_v46 = vshrl.u32 %v14660_v53, 16  ;;  %v7527_v43 = vshll.u32 %v14660_v53, 16  ;;  %v22649_v42 = vld [vmem:[#allocation2 + $0x4c] sm:$0xf] }
 0x3a8   : > { %v5667_v58 = vpop.f32.mrf.mxu0  ;;  %v14661_v53 = vcombine.low %v22518_v17, %v22554_v39 }
 0x3a9   : > { %v22607_v50 = vadd.f32 %v5667_v58, %v22421_v11  ;;  %v5982_v45 = vpop.f32.mrf.mxu1  ;;  %17683 = vmatpush3.bf16.msra.mxu0 %v19026_v29  ;;  %v22620_v11 = vsel %vm624_vm1, %v11385_v47, %v22601_v31  ;;  %v22641_v58 = vld [vmem:[#allocation2 + $0x50] sm:$0xf]  ;;  %v7522_v54 = vsel %vm624_vm1, %v7512_v61, %v7521_v55 }
 0x3aa   : > { %v22610_v38 = vadd.f32 %v5982_v45, %v22521_v27  ;;  %v17223_v22 = vpop.f32.mrf.mxu0  ;;  %17684 = vmatprep.subr.bf16.mxu0 %v25726_v62  ;;  %25779 = vst [vmem:[#allocation12_spill] sm:$0xff] %v22620_v11  ;;  %v19387_v11 = vld [vmem:[#allocation2 + $0x1c] sm:$0xf] }
 0x3ab   : > { %v17263_v27 = vpop.f32.mrf.mxu1 }
 0x3ac   : > { %v5672_v44 = vpop.f32.mrf.mxu0  ;;  %17549 = vmatmul.mubr.bf16.gmra.mxu0 %v7513_v41 }
 0x3ad   : > { %v22628_v30 = vadd.f32 %v5672_v44, %v22440_v4  ;;  %v5987_v29 = vpop.f32.mrf.mxu1  ;;  %17497 = vmatmul.mubr.bf16.gmra.mxu1 %v14640_v52  ;;  %17552 = vmatprep.mubr.msk.bf16.mxu0 %vm19459_vm0, %v25726_v62  ;;  %v7526_v52 = vrot.slane %v7524_v46, 3 }
 0x3ae   : > { %v22633_v2 = vadd.f32 %v5987_v29, %v22536_v51  ;;  %v17226_v33 = vpop.f32.mrf.mxu0  ;;  %17500 = vmatprep.mubr.msk.bf16.mxu1 %vm19459_vm0, %v25726_v62  ;;  %17685 = vmatpush3.bf16.msra.mxu0 %v19030_v40  ;;  %v19042_v40 = vld [vmem:[%s25677_s3 + $0xd8] sm:$0xff]   ;;  %v19049_v29 = vld [vmem:[%s25677_s3 + $0xd0] sm:$0xff]  }
 0x3af   : > { %v17266_v4 = vpop.f32.mrf.mxu1  ;;  %17686 = vmatprep.subr.bf16.mxu0 %v25726_v62 }
 0x3b0   : > { %v5675_v18 = vpop.f32.mrf.mxu0  ;;  %v7536_v4 = vshll.u32 %v14661_v53, 16 }
 0x3b1   : > { %v22644_v51 = vadd.f32 %v5675_v18, %v22458_v49  ;;  %v5990_v47 = vpop.f32.mrf.mxu1  ;;  %v14641_v49 = vcombine.low %v22649_v42, %v22641_v58 }
 0x3b2   : > { %v22647_v45 = vadd.f32 %v5990_v47, %v22548_v20  ;;  %v17227_v22 = vpop.f32.mrf.mxu0  ;;  %17687 = vmatpush3.bf16.msra.mxu0 %v19036_v37  ;;  %v7529_v20 = vrot.slane %v7527_v43, 4  ;;  %v7533_v37 = vshrl.u32 %v14661_v53, 16  ;;  %v22674_v43 = vld [vmem:[#allocation2 + $0x58] sm:$0xf]  ;;  %v14662_v47 = vcombine.low %v22545_v19, %v22584_v3  ;;  %v19053_v53 = vld [vmem:[%s25677_s3 + $0xc8] sm:$0xff]  }
 0x3b3   : > { %v17267_v27 = vpop.f32.mrf.mxu1  ;;  %17688 = vmatprep.subr.bf16.mxu0 %v25726_v62 }
 0x3b4   : > { %v5680_v41 = vpop.f32.mrf.mxu0  ;;  %17553 = vmatmul.mubr.bf16.gmra.mxu0 %v7522_v54 }
 0x3b5   : > { %v22661_v61 = vadd.f32 %v5680_v41, %v22476_v7  ;;  %v5995_v44 = vpop.f32.mrf.mxu1  ;;  %17501 = vmatmul.mubr.bf16.gmra.mxu1 %v14641_v49  ;;  %17556 = vmatprep.mubr.msk.bf16.mxu0 %vm19459_vm0, %v25726_v62  ;;  %v7530_v7 = vor.u32 %v7529_v20, %v7526_v52  ;;  %v7535_v52 = vrot.slane %v7533_v37, 3  ;;  %v7538_v20 = vrot.slane %v7536_v4, 4  ;;  %v22707_v4 = vld [vmem:[#allocation2 + $0x60] sm:$0xf] }
 0x3b6   : > { %v22666_v17 = vadd.f32 %v5995_v44, %v22561_v25  ;;  %v17230_v39 = vpop.f32.mrf.mxu0  ;;  %17504 = vmatprep.mubr.msk.bf16.mxu1 %vm19459_vm0, %v25726_v62  ;;  %17689 = vmatpush3.bf16.msra.mxu0 %v19042_v40  ;;  %v22684_v40 = vld [vmem:[#allocation2 + $0x54] sm:$0xf] }
 0x3b7   : > { %v17270_v33 = vpop.f32.mrf.mxu1  ;;  %17690 = vmatprep.subr.bf16.mxu0 %v25726_v62  ;;  %v7531_v49 = vsel %vm624_vm1, %v7521_v55, %v7530_v7  ;;  %v7542_v55 = vshrl.u32 %v14662_v47, 16  ;;  %v7545_v39 = vshll.u32 %v14662_v47, 16 }
 0x3b8   : > { %v5683_v46 = vpop.f32.mrf.mxu0  ;;  %v7539_v33 = vor.u32 %v7538_v20, %v7535_v52 }
 0x3b9   : > { %v22677_v25 = vadd.f32 %v5683_v46, %v22493_v32  ;;  %v5998_v18 = vpop.f32.mrf.mxu1  ;;  %v14642_v32 = vcombine.low %v22684_v40, %v22674_v43 }
 0x3ba   : > { %v22682_v22 = vadd.f32 %v5998_v18, %v22575_v57  ;;  %v17231_v54 = vpop.f32.mrf.mxu0  ;;  %17691 = vmatpush3.bf16.msra.mxu0 %v19049_v29 }
 0x3bb   : > { %v17271_v27 = vpop.f32.mrf.mxu1  ;;  %17692 = vmatprep.subr.bf16.mxu0 %v25726_v62  ;;  %v22715_v54 = vld [vmem:[#allocation2 + $0x5c] sm:$0xf] }
 0x3bc   : > { %v5688_v19 = vpop.f32.mrf.mxu0  ;;  %17557 = vmatmul.mubr.bf16.gmra.mxu0 %v7531_v49  ;;  %v7547_v27 = vrot.slane %v7545_v39, 4  ;;  %v14643_v52 = vcombine.low %v22715_v54, %v22707_v4 }
 0x3bd   : > { %v22694_v57 = vadd.f32 %v5688_v19, %v22510_v12  ;;  %v6003_v3 = vpop.f32.mrf.mxu1  ;;  %17505 = vmatmul.mubr.bf16.gmra.mxu1 %v14642_v32  ;;  %17560 = vmatprep.mubr.msk.bf16.mxu0 %vm19459_vm0, %v25726_v62  ;;  %v19057_v12 = vld [vmem:[%s25677_s3 + $0xc0] sm:$0xff]   ;;  %v14663_v32 = vcombine.low %v22570_v63, %v22612_v26 }
 0x3be   : > { %v22699_v41 = vadd.f32 %v6003_v3, %v22589_v35  ;;  %v17234_v44 = vpop.f32.mrf.mxu0  ;;  %17508 = vmatprep.mubr.msk.bf16.mxu1 %vm19459_vm0, %v25726_v62  ;;  %17693 = vmatpush3.bf16.msra.mxu0 %v19053_v53  ;;  %v7544_v53 = vrot.slane %v7542_v55, 3 }
 0x3bf   : > { %v17274_v29 = vpop.f32.mrf.mxu1  ;;  %17694 = vmatprep.subr.bf16.mxu0 %v25726_v62  ;;  %v7551_v44 = vshrl.u32 %v14663_v32, 16  ;;  %v7554_v55 = vshll.u32 %v14663_v32, 16 }
 0x3c0   : > { %v5691_v37 = vpop.f32.mrf.mxu0 }
 0x3c1   : > { %v22710_v35 = vadd.f32 %v5691_v37, %v22528_v24  ;;  %v6006_v46 = vpop.f32.mrf.mxu1  ;;  %v7540_v24 = vsel %vm624_vm1, %v7530_v7, %v7539_v33  ;;  %v7548_v7 = vor.u32 %v7547_v27, %v7544_v53  ;;  %v14664_v53 = vcombine.low %v22604_v16, %v22649_v42 }
 0x3c2   : > { %v22713_v18 = vadd.f32 %v6006_v46, %v22607_v50  ;;  %v17235_v47 = vpop.f32.mrf.mxu0  ;;  %17695 = vmatpush3.bf16.msra.mxu0 %v19057_v12  ;;  %v22733_v12 = vld [vmem:[#allocation2 + $0x68] sm:$0xf]  ;;  %v22741_v46 = vld [vmem:[#allocation2 + $0x64] sm:$0xf] }
 0x3c3   : > { %v17275_v49 = vpop.f32.mrf.mxu1  ;;  %17832 = vmatprep.subr.bf16.mxu0 %v25726_v62  ;;  %v7549_v47 = vsel %vm624_vm1, %v7539_v33, %v7548_v7  ;;  %v14644_v32 = vcombine.low %v22741_v46, %v22733_v12 }
 0x3c4   : > { %v5696_v20 = vpop.f32.mrf.mxu0  ;;  %17561 = vmatmul.mubr.bf16.gmra.mxu0 %v7540_v24  ;;  %v7553_v49 = vrot.slane %v7551_v44, 3  ;;  %v22758_v44 = vld [vmem:[#allocation2 + $0x70] sm:$0xf] }
 0x3c5   : > { %v22724_v50 = vadd.f32 %v5696_v20, %v22541_v8  ;;  %v6011_v19 = vpop.f32.mrf.mxu1  ;;  %17509 = vmatmul.mubr.bf16.gmra.mxu1 %v14643_v52  ;;  %17564 = vmatprep.mubr.msk.bf16.mxu0 %vm19459_vm0, %v25726_v62  ;;  %v7556_v52 = vrot.slane %v7554_v55, 4 }
 0x3c6   : > { %v22729_v63 = vadd.f32 %v6011_v19, %v22628_v30  ;;  %v17238_v26 = vpop.f32.mrf.mxu0  ;;  %17512 = vmatprep.mubr.msk.bf16.mxu1 %vm19459_vm0, %v25726_v62  ;;  %v7560_v19 = vshrl.u32 %v14664_v53, 16 }
 0x3c7   : > { %v17278_v3 = vpop.f32.mrf.mxu1  ;;  %v7557_v20 = vor.u32 %v7556_v52, %v7553_v49  ;;  %v7563_v26 = vshll.u32 %v14664_v53, 16 }
 0x3c8   : > { %v5699_v39 = vpop.f32.mrf.mxu0 }
 0x3c9   : > { %v22736_v8 = vadd.f32 %v5699_v39, %v22552_v1  ;;  %v6014_v29 = vpop.f32.mrf.mxu1  ;;  %v14665_v39 = vcombine.low %v22641_v58, %v22684_v40  ;;  %v7565_v49 = vrot.slane %v7563_v26, 4 }
 0x3ca   : > { %v22739_v37 = vadd.f32 %v6014_v29, %v22644_v51  ;;  %v17239_v30 = vpop.f32.mrf.mxu0 }
 0x3cb   : > { %v17279_v27 = vpop.f32.mrf.mxu1  ;;  %v22768_v30 = vld [vmem:[#allocation2 + $0x6c] sm:$0xf]  ;;  %v7569_v40 = vshrl.u32 %v14665_v39, 16 }
 0x3cc   : > { %v5704_v1 = vpop.f32.mrf.mxu0  ;;  %17565 = vmatmul.mubr.bf16.gmra.mxu0 %v7549_v47  ;;  %v14645_v53 = vcombine.low %v22768_v30, %v22758_v44  ;;  %v7558_v27 = vsel %vm624_vm1, %v7548_v7, %v7557_v20  ;;  %v7572_v7 = vshll.u32 %v14665_v39, 16  ;;  %v14666_v39 = vcombine.low %v22674_v43, %v22715_v54 }
 0x3cd   : > { %v22749_v24 = vadd.f32 %v5704_v1, %v22566_v5  ;;  %v6019_v51 = vpop.f32.mrf.mxu1  ;;  %17513 = vmatmul.mubr.bf16.gmra.mxu1 %v14644_v32  ;;  %17568 = vmatprep.mubr.msk.bf16.mxu0 %vm19459_vm0, %v25726_v62  ;;  %v7562_v32 = vrot.slane %v7560_v19, 3  ;;  %v22783_v19 = vld [vmem:[#allocation2 + $0x78] sm:$0xf] }
 0x3ce   : > { %v22754_v33 = vadd.f32 %v6019_v51, %v22661_v61  ;;  %v17242_v16 = vpop.f32.mrf.mxu0  ;;  %17516 = vmatprep.mubr.msk.bf16.mxu1 %vm19459_vm0, %v25726_v62 }
 0x3cf   : > { %v17282_v42 = vpop.f32.mrf.mxu1  ;;  %v7566_v16 = vor.u32 %v7565_v49, %v7562_v32 }
 0x3d0   : > { %v5707_v3 = vpop.f32.mrf.mxu0 }
 0x3d1   : > { %v22761_v5 = vadd.f32 %v5707_v3, %v22582_v0  ;;  %v6022_v55 = vpop.f32.mrf.mxu1  ;;  %v7567_v32 = vsel %vm624_vm1, %v7557_v20, %v7566_v16 }
 0x3d2   : > { %v22766_v61 = vadd.f32 %v6022_v55, %v22677_v25  ;;  %v17243_v29 = vpop.f32.mrf.mxu0  ;;  %v22791_v55 = vld [vmem:[#allocation2 + $0x74] sm:$0xf] }
 0x3d3   : > { %v17283_v47 = vpop.f32.mrf.mxu1  ;;  %v7571_v29 = vrot.slane %v7569_v40, 3  ;;  %v7581_v40 = vshll.u32 %v14666_v39, 16 }
 0x3d4   : > { %v6331_v0 = vpop.f32.mrf.mxu0  ;;  %17569 = vmatmul.mubr.bf16.gmra.mxu0 %v7558_v27  ;;  %v7574_v47 = vrot.slane %v7572_v7, 4  ;;  %v14646_v27 = vcombine.low %v22791_v55, %v22783_v19 }
 0x3d5   : > { %v6027_v52 = vpop.f32.mrf.mxu1  ;;  %v22774_v1 = vadd.f32 %v6331_v0, %v22595_v59  ;;  %17517 = vmatmul.mubr.bf16.gmra.mxu1 %v14645_v53  ;;  %17572 = vmatprep.mubr.msk.bf16.mxu0 %vm19459_vm0, %v25726_v62 }
 0x3d6   : > { %v22779_v58 = vadd.f32 %v6027_v52, %v22694_v57  ;;  %v17314_v25 = vpop.f32.mrf.mxu0  ;;  %17520 = vmatprep.mubr.msk.bf16.mxu1 %vm19459_vm0, %v25726_v62  ;;  %v7575_v54 = vor.u32 %v7574_v47, %v7571_v29  ;;  %v14667_v47 = vcombine.low %v22707_v4, %v22741_v46 }
 0x3d7   : > { %v17286_v51 = vpop.f32.mrf.mxu1  ;;  %v7578_v25 = vshrl.u32 %v14666_v39, 16 }
 0x3d8   : > { %v6334_v42 = vpop.f32.mrf.mxu0  ;;  %v22808_v51 = vld [vmem:[#allocation2 + $0x80] sm:$0xf]  ;;  %v7576_v29 = vsel %vm624_vm1, %v7566_v16, %v7575_v54 }
 0x3d9   : > { %v6030_v59 = vpop.f32.mrf.mxu1  ;;  %v22786_v26 = vadd.f32 %v6334_v42, %v22610_v38  ;;  %v19046_v38 = vld [vmem:[#allocation2 + $0xc] sm:$0xff]  }
 0x3da   : > { %v22789_v3 = vadd.f32 %v6030_v59, %v22710_v35  ;;  %v17315_v57 = vpop.f32.mrf.mxu0  ;;  %v7976_v42 = vshll.u32 %v19046_v38, 16 }
 0x3db   : > { %v17287_v53 = vpop.f32.mrf.mxu1 }
 0x3dc   : > { %v6339_v49 = vpop.f32.mrf.mxu0  ;;  %17573 = vmatmul.mubr.bf16.gmra.mxu0 %v7567_v32 }
 0x3dd   : > { %v6035_v0 = vpop.f32.mrf.mxu1  ;;  %v22799_v35 = vadd.f32 %v6339_v49, %v22633_v2  ;;  %17521 = vmatmul.mubr.bf16.gmra.mxu1 %v14646_v27  ;;  %17576 = vmatprep.mubr.msk.bf16.mxu0 %vm19459_vm0, %v25726_v62  ;;  %v22810_v2 = vld [vmem:[#allocation2 + $0x14] sm:$0xff]   ;;  %v22818_v27 = vld [vmem:[#allocation2 + $0x7c] sm:$0xf]  ;;  %v7580_v49 = vrot.slane %v7578_v25, 3  ;;  %v7587_v25 = vshrl.u32 %v14667_v47, 16 }
 0x3de   : > { %v22804_v52 = vadd.f32 %v6035_v0, %v22724_v50  ;;  %v17318_v43 = vpop.f32.mrf.mxu0  ;;  %17524 = vmatprep.mubr.msk.bf16.mxu1 %vm19459_vm0, %v25726_v62  ;;  %v14647_v32 = vcombine.low %v22818_v27, %v22808_v51  ;;  %v7583_v0 = vrot.slane %v7581_v40, 4  ;;  %v7590_v40 = vshll.u32 %v14667_v47, 16 }
 0x3df   : > { %v17290_v20 = vpop.f32.mrf.mxu1  ;;  %v14668_v47 = vcombine.low %v22733_v12, %v22768_v30  ;;  %v19052_v30 = vld [vmem:[%s25677_s3 + $0x130] sm:$0xff]  }
 0x3e0   : > { %v6342_v7 = vpop.f32.mrf.mxu0  ;;  %v7978_v20 = vrot.slane %v7976_v42, 1 }
 0x3e1   : > { %v6038_v59 = vpop.f32.mrf.mxu1  ;;  %v22813_v57 = vadd.f32 %v6342_v7, %v22647_v45  ;;  %v7974_v45 = vshrl.u32 %v19046_v38, 16  ;;  %v7584_v38 = vor.u32 %v7583_v0, %v7580_v49 }
 0x3e2   : > { %v22816_v50 = vadd.f32 %v6038_v59, %v22736_v8  ;;  %v17319_v53 = vpop.f32.mrf.mxu0  ;;  %v7981_v8 = vshll.u32 %v22810_v2, 16 }
 0x3e3   : > { %v17291_v39 = vpop.f32.mrf.mxu1  ;;  %v7979_v53 = vor.u32 %v7978_v20, %v7974_v45  ;;  %v7585_v0 = vsel %vm624_vm1, %v7575_v54, %v7584_v38  ;;  %v7589_v45 = vrot.slane %v7587_v25, 3  ;;  %v7592_v20 = vrot.slane %v7590_v40, 4 }
 0x3e4   : > { %v6347_v43 = vpop.f32.mrf.mxu0  ;;  %17577 = vmatmul.mubr.bf16.gmra.mxu0 %v7576_v29  ;;  %v7983_v29 = vrot.slane %v7981_v8, 1  ;;  %v7596_v40 = vshrl.u32 %v14668_v47, 16 }
 0x3e5   : > { %v6043_v7 = vpop.f32.mrf.mxu1  ;;  %v22827_v59 = vadd.f32 %v6347_v43, %v22666_v17  ;;  %17525 = vmatmul.mubr.bf16.gmra.mxu1 %v14647_v32  ;;  %17580 = vmatprep.mubr.msk.bf16.mxu0 %vm19459_vm0, %v25726_v62  ;;  %v22836_v17 = vld [vmem:[#allocation2 + $0x1c] sm:$0xff]   ;;  %v7593_v25 = vor.u32 %v7592_v20, %v7589_v45  ;;  %v14669_v45 = vcombine.low %v22758_v44, %v22791_v55 }
 0x3e6   : > { %v22832_v4 = vadd.f32 %v6043_v7, %v22749_v24  ;;  %v17322_v46 = vpop.f32.mrf.mxu0  ;;  %17620 = vmatprep.mubr.msk.bf16.mxu1 %vm19459_vm0, %v25726_v62  ;;  %v19048_v7 = vld [vmem:[%s25677_s3 + $0x138] sm:$0xff]   ;;  %v19062_v55 = vld [vmem:[%s25677_s3 + $0x120] sm:$0xff]  }
 0x3e7   : > { %v17294_v16 = vpop.f32.mrf.mxu1 }
 0x3e8   : > { %v6350_v42 = vpop.f32.mrf.mxu0 }
 0x3e9   : > { %v6046_v39 = vpop.f32.mrf.mxu1  ;;  %v22839_v32 = vadd.f32 %v6350_v42, %v22682_v22  ;;  %v7984_v22 = vsel %vm1110_vm2, %v7979_v53, %v7983_v29  ;;  %v7985_v53 = vshrl.u32 %v22810_v2, 16  ;;  %v7594_v2 = vsel %vm624_vm1, %v7584_v38, %v7593_v25 }
 0x3ea   : > { %v22842_v24 = vadd.f32 %v6046_v39, %v22761_v5  ;;  %v17323_v43 = vpop.f32.mrf.mxu0  ;;  %v7989_v5 = vshll.u32 %v22836_v17, 16 }
 0x3eb   : > { %v17295_v49 = vpop.f32.mrf.mxu1  ;;  %v22866_v43 = vld [vmem:[#allocation2 + $0x24] sm:$0xff]  }
 0x3ec   : > { %v6355_v8 = vpop.f32.mrf.mxu0  ;;  %17581 = vmatmul.mubr.bf16.gmra.mxu0 %v7585_v0  ;;  %v7991_v39 = vrot.slane %v7989_v5, 1 }
 0x3ed   : > { %v22853_v46 = vadd.f32 %v6355_v8, %v22699_v41  ;;  %v22855_v16 = vpop.f32.mrf.mxu1  ;;  %17621 = vmatmul.mubr.bf16.vlgmr.msra.gmra.mxu1 %v7984_v22  ;;  %17584 = vmatprep.mubr.msk.bf16.mxu0 %vm19459_vm0, %v25726_v62  ;;  %v7599_v41 = vshll.u32 %v14668_v47, 16  ;;  %v7987_v8 = vor.u32 %v7985_v53, %v7983_v29  ;;  %v19056_v47 = vld [vmem:[%s25677_s3 + $0x128] sm:$0xff]   ;;  %v7598_v22 = vrot.slane %v7596_v40, 3 }
 0x3ee   : > { %v17326_v12 = vpop.f32.mrf.mxu0  ;;  %17757 = vmatpush3.bf16.msra.mxu1 %v19048_v7  ;;  %17624 = vmatprep.mubr.msk.bf16.mxu1 %vm19459_vm0, %v25726_v62  ;;  %v7997_v29 = vshll.u32 %v22866_v43, 16  ;;  %v7993_v53 = vshrl.u32 %v22836_v17, 16 }
 0x3ef   : > { %v17366_v54 = vpop.f32.mrf.mxu1  ;;  %17758 = vmatprep.subr.bf16.mxu1 %v25726_v62  ;;  %v7601_v5 = vrot.slane %v7599_v41, 4  ;;  %v7992_v12 = vsel %vm1110_vm2, %v7987_v8, %v7991_v39  ;;  %v7605_v41 = vshrl.u32 %v14669_v45, 16  ;;  %v22896_v8 = vld [vmem:[#allocation2 + $0x2c] sm:$0xff]  }
 0x3f0   : > { %v6358_v42 = vpop.f32.mrf.mxu0 }
 0x3f1   : > { %v22869_v7 = vadd.f32 %v6358_v42, %v22713_v18  ;;  %v22871_v49 = vpop.f32.mrf.mxu1  ;;  %v7602_v40 = vor.u32 %v7601_v5, %v7598_v22  ;;  %v14670_v22 = vcombine.low %v22783_v19, %v22818_v27  ;;  %v19072_v27 = vld [vmem:[%s25677_s3 + $0x110] sm:$0xff]  }
 0x3f2   : > { %v17327_v0 = vpop.f32.mrf.mxu0  ;;  %17759 = vmatpush3.bf16.msra.mxu1 %v19052_v30 }
 0x3f3   : > { %v17367_v20 = vpop.f32.mrf.mxu1  ;;  %17760 = vmatprep.subr.bf16.mxu1 %v25726_v62  ;;  %v7999_v0 = vrot.slane %v7997_v29, 1  ;;  %v7603_v17 = vsel %vm624_vm1, %v7593_v25, %v7602_v40 }
 0x3f4   : > { %v6363_v18 = vpop.f32.mrf.mxu0  ;;  %17585 = vmatmul.mubr.bf16.gmra.mxu0 %v7594_v2 }
 0x3f5   : > { %v22883_v30 = vadd.f32 %v6363_v18, %v22729_v63  ;;  %v22885_v54 = vpop.f32.mrf.mxu1  ;;  %17625 = vmatmul.mubr.bf16.gmra.mxu1 %v7992_v12  ;;  %17588 = vmatprep.mubr.msk.bf16.mxu0 %vm19459_vm0, %v25726_v62  ;;  %v7608_v63 = vshll.u32 %v14669_v45, 16  ;;  %v7995_v18 = vor.u32 %v7993_v53, %v7991_v39  ;;  %v19066_v45 = vld [vmem:[%s25677_s3 + $0x118] sm:$0xff]   ;;  %v7607_v12 = vrot.slane %v7605_v41, 3 }
 0x3f6   : > { %v17330_v44 = vpop.f32.mrf.mxu0  ;;  %17628 = vmatprep.mubr.msk.bf16.mxu1 %vm19459_vm0, %v25726_v62  ;;  %17761 = vmatpush3.bf16.msra.mxu1 %v19056_v47  ;;  %v8005_v39 = vshll.u32 %v22896_v8, 16  ;;  %v8001_v53 = vshrl.u32 %v22866_v43, 16 }
 0x3f7   : > { %v17370_v38 = vpop.f32.mrf.mxu1  ;;  %17762 = vmatprep.subr.bf16.mxu1 %v25726_v62  ;;  %v7610_v29 = vrot.slane %v7608_v63, 4  ;;  %v8000_v44 = vsel %vm1110_vm2, %v7995_v18, %v7999_v0  ;;  %v7614_v63 = vshrl.u32 %v14670_v22, 16  ;;  %v22926_v18 = vld [vmem:[#allocation2 + $0x34] sm:$0xff]  }
 0x3f8   : > { %v6366_v42 = vpop.f32.mrf.mxu0 }
 0x3f9   : > { %v22899_v20 = vadd.f32 %v6366_v42, %v22739_v37  ;;  %v22901_v47 = vpop.f32.mrf.mxu1  ;;  %v7611_v41 = vor.u32 %v7610_v29, %v7607_v12  ;;  %v14671_v12 = vcombine.low %v22808_v51, %v22808_v51 }
 0x3fa   : > { %v17331_v2 = vpop.f32.mrf.mxu0  ;;  %17763 = vmatpush3.bf16.msra.mxu1 %v19062_v55 }
 0x3fb   : > { %v17371_v5 = vpop.f32.mrf.mxu1  ;;  %17764 = vmatprep.subr.bf16.mxu1 %v25726_v62  ;;  %v8007_v2 = vrot.slane %v8005_v39, 1  ;;  %v7612_v43 = vsel %vm624_vm1, %v7602_v40, %v7611_v41  ;;  %v19084_v40 = vld [vmem:[%s25677_s3 + $0x100] sm:$0xff]  }
 0x3fc   : > { %v6371_v37 = vpop.f32.mrf.mxu0  ;;  %17589 = vmatmul.mubr.bf16.gmra.mxu0 %v7603_v17 }
 0x3fd   : > { %v22913_v55 = vadd.f32 %v6371_v37, %v22754_v33  ;;  %v22915_v38 = vpop.f32.mrf.mxu1  ;;  %17629 = vmatmul.mubr.bf16.gmra.mxu1 %v8000_v44  ;;  %17592 = vmatprep.mubr.msk.bf16.mxu0 %vm19459_vm0, %v25726_v62  ;;  %v7617_v33 = vshll.u32 %v14670_v22, 16  ;;  %v8003_v37 = vor.u32 %v8001_v53, %v7999_v0  ;;  %v19078_v22 = vld [vmem:[%s25677_s3 + $0x108] sm:$0xff]   ;;  %v7616_v44 = vrot.slane %v7614_v63, 3 }
 0x3fe   : > { %v17334_v19 = vpop.f32.mrf.mxu0  ;;  %17632 = vmatprep.mubr.msk.bf16.mxu1 %vm19459_vm0, %v25726_v62  ;;  %17765 = vmatpush3.bf16.msra.mxu1 %v19066_v45  ;;  %v8013_v0 = vshll.u32 %v22926_v18, 16 }
 0x3ff   : > { %v17374_v25 = vpop.f32.mrf.mxu1  ;;  %17766 = vmatprep.subr.bf16.mxu1 %v25726_v62  ;;  %v7619_v39 = vrot.slane %v7617_v33, 4  ;;  %v8008_v19 = vsel %vm1110_vm2, %v8003_v37, %v8007_v2 }
 0x400   : > { %v6374_v42 = vpop.f32.mrf.mxu0  ;;  %v8015_v37 = vrot.slane %v8013_v0, 1 }
 0x401   : > { %v22929_v5 = vadd.f32 %v6374_v42, %v22766_v61  ;;  %v22931_v45 = vpop.f32.mrf.mxu1  ;;  %v7620_v33 = vor.u32 %v7619_v39, %v7616_v44  ;;  %v7623_v42 = vshrl.u32 %v14671_v12, 16 }
 0x402   : > { %v17335_v17 = vpop.f32.mrf.mxu0  ;;  %17767 = vmatpush3.bf16.msra.mxu1 %v19072_v27 }
 0x403   : > { %v17375_v29 = vpop.f32.mrf.mxu1  ;;  %17768 = vmatprep.subr.bf16.mxu1 %v25726_v62  ;;  %v8009_v17 = vshrl.u32 %v22896_v8, 16  ;;  %v7625_v39 = vrot.slane %v7623_v42, 3  ;;  %v14737_v8 = vcombine.low %v19387_v11, %v19388_v36 }
 0x404   : > { %v6379_v61 = vpop.f32.mrf.mxu0  ;;  %17593 = vmatmul.mubr.bf16.gmra.mxu0 %v7612_v43  ;;  %v22956_v29 = vld [vmem:[#allocation2 + $0x3c] sm:$0xff]  }
 0x405   : > { %v22943_v27 = vadd.f32 %v6379_v61, %v22779_v58  ;;  %v22945_v25 = vpop.f32.mrf.mxu1  ;;  %17633 = vmatmul.mubr.bf16.gmra.mxu1 %v8008_v19  ;;  %17596 = vmatprep.mubr.msk.bf16.mxu0 %vm19459_vm0, %v25726_v62  ;;  %v7626_v58 = vshll.u32 %v14671_v12, 16  ;;  %v8011_v19 = vor.u32 %v8009_v17, %v8007_v2  ;;  %v7621_v12 = vsel %vm624_vm1, %v7611_v41, %v7620_v33  ;;  %v19389_v41 = vld [vmem:[#allocation2 + $0x18] sm:$0xf] }
 0x406   : > { %v17338_v51 = vpop.f32.mrf.mxu0  ;;  %17636 = vmatprep.mubr.msk.bf16.mxu1 %vm19459_vm0, %v25726_v62  ;;  %17769 = vmatpush3.bf16.msra.mxu1 %v19078_v22  ;;  %v8478_v17 = vshrl.u32 %v14737_v8, 16 }
 0x407   : > { %v17378_v63 = vpop.f32.mrf.mxu1  ;;  %17770 = vmatprep.subr.bf16.mxu1 %v25726_v62  ;;  %v8343_v51 = vld [vmem:[#allocation2 + $0x14] sm:$0x8] }
 0x408   : > { %v6382_v53 = vpop.f32.mrf.mxu0  ;;  %v7628_v63 = vrot.slane %v7626_v58, 4  ;;  %v14736_v42 = vcombine.low %v8343_v51, %v19389_v41 }
 0x409   : > { %v22959_v43 = vadd.f32 %v6382_v53, %v22789_v3  ;;  %v22961_v22 = vpop.f32.mrf.mxu1  ;;  %v8016_v3 = vsel %vm1110_vm2, %v8011_v19, %v8015_v37  ;;  %v8021_v53 = vshll.u32 %v22956_v29, 16 }
 0x40a   : > { %v17339_v61 = vpop.f32.mrf.mxu0  ;;  %17771 = vmatpush3.bf16.msra.mxu1 %v19084_v40  ;;  %v7629_v58 = vor.u32 %v7628_v63, %v7625_v39  ;;  %v8470_v51 = vshrl.u32 %v14736_v42, 16  ;;  %v8473_v41 = vshll.u32 %v14736_v42, 16  ;;  %v8480_v63 = vrot.slane %v8478_v17, 3 }
 0x40b   : > { %v17379_v44 = vpop.f32.mrf.mxu1  ;;  %17908 = vmatprep.subr.bf16.mxu1 %v25726_v62  ;;  %v8481_v61 = vshll.u32 %v14737_v8, 16 }
 0x40c   : > { %v6387_v0 = vpop.f32.mrf.mxu0  ;;  %17597 = vmatmul.mubr.bf16.gmra.mxu0 %v7621_v12  ;;  %v8023_v44 = vrot.slane %v8021_v53, 1  ;;  %v22977_v12 = vld [vmem:[#allocation2 + $0x44] sm:$0xff]   ;;  %v7630_v39 = vsel %vm624_vm1, %v7620_v33, %v7629_v58  ;;  %v8475_v33 = vrot.slane %v8473_v41, 4 }
 0x40d   : > { %v22968_v2 = vadd.f32 %v6387_v0, %v22804_v52  ;;  %v22970_v40 = vpop.f32.mrf.mxu1  ;;  %17637 = vmatmul.mubr.bf16.gmra.mxu1 %v8016_v3  ;;  %17600 = vmatprep.mubr.msk.bf16.mxu0 %vm19459_vm0, %v25726_v62  ;;  %v8017_v52 = vshrl.u32 %v22926_v18, 16  ;;  %v8483_v8 = vrot.slane %v8481_v61, 4  ;;  %v8350_v61 = vld [vmem:[#allocation2 + $0x30] sm:$0xf] }
 0x40e   : > { %v17342_v36 = vpop.f32.mrf.mxu0  ;;  %17640 = vmatprep.mubr.msk.bf16.mxu1 %vm19459_vm0, %v25726_v62 }
 0x40f   : > { %v17382_v11 = vpop.f32.mrf.mxu1  ;;  %v8019_v48 = vor.u32 %v8017_v52, %v8015_v37  ;;  %v8484_v58 = vor.u32 %v8483_v8, %v8480_v63 }
 0x410   : > { %v6390_v19 = vpop.f32.mrf.mxu0  ;;  %v19390_v11 = vld [vmem:[#allocation2 + $0x24] sm:$0xf] }
 0x411   : > { %v22980_v0 = vadd.f32 %v6390_v19, %v22816_v50  ;;  %v22982_v3 = vpop.f32.mrf.mxu1  ;;  %v14738_v18 = vcombine.low %v19390_v11, %v19391_v6  ;;  %v8024_v10 = vsel %vm1110_vm2, %v8019_v48, %v8023_v44  ;;  %v8029_v50 = vshll.u32 %v22977_v12, 16  ;;  %v19063_v11 = vld [vmem:[%s25677_s3 + $0x178] sm:$0xff]  }
 0x412   : > { %v17343_v36 = vpop.f32.mrf.mxu0 }
 0x413   : > { %v17383_v34 = vpop.f32.mrf.mxu1  ;;  %v8487_v48 = vshrl.u32 %v14738_v18, 16  ;;  %v8490_v17 = vshll.u32 %v14738_v18, 16  ;;  %v8031_v36 = vrot.slane %v8029_v50, 1  ;;  %v19392_v18 = vld [vmem:[#allocation2 + $0x2c] sm:$0xf] }
 0x414   : > { %v6395_v53 = vpop.f32.mrf.mxu0  ;;  %17601 = vmatmul.mubr.bf16.gmra.mxu0 %v7630_v39  ;;  %v8472_v34 = vrot.slane %v8470_v51, 3  ;;  %v22997_v39 = vld [vmem:[#allocation2 + $0x4c] sm:$0xff]  }
 0x415   : > { %v22988_v19 = vadd.f32 %v6395_v53, %v22832_v4  ;;  %v22990_v42 = vpop.f32.mrf.mxu1  ;;  %17641 = vmatmul.mubr.bf16.gmra.mxu1 %v8024_v10  ;;  %17696 = vmatprep.mubr.msk.bf16.mxu0 %vm19459_vm0, %v25726_v62  ;;  %v8025_v4 = vshrl.u32 %v22956_v29, 16  ;;  %v14739_v53 = vcombine.low %v19392_v18, %v8350_v61  ;;  %v6607_v29 = vadd.f32 %v22855_v16, %v22774_v1  ;;  %v19069_v1 = vld [vmem:[%s25677_s3 + $0x170] sm:$0xff]  }
 0x416   : > { %v17346_v37 = vpop.f32.mrf.mxu0  ;;  %17644 = vmatprep.mubr.msk.bf16.mxu1 %vm19459_vm0, %v25726_v62  ;;  %v8476_v41 = vor.u32 %v8475_v33, %v8472_v34  ;;  %v23013_v34 = vld [vmem:[%s25676_s2] ss:$0 sm:$0xff] }
 0x417   : > { %v17386_v6 = vpop.f32.mrf.mxu1  ;;  %v8027_v8 = vor.u32 %v8025_v4, %v8023_v44  ;;  %v8037_v44 = vshll.u32 %v22997_v39, 16 }
 0x418   : > { %v6398_v52 = vpop.f32.mrf.mxu0  ;;  %v8485_v37 = vsel %vm624_vm1, %v8476_v41, %v8484_v58  ;;  %v8489_v6 = vrot.slane %v8487_v48, 3  ;;  %v8496_v48 = vshrl.u32 %v14739_v53, 16  ;;  %v8352_v41 = vld [vmem:[#allocation2 + $0x38] sm:$0xf] }
 0x419   : > { %v23000_v10 = vadd.f32 %v6398_v52, %v22842_v24  ;;  %v23002_v51 = vpop.f32.mrf.mxu1  ;;  %v8492_v24 = vrot.slane %v8490_v17, 4  ;;  %v8032_v33 = vsel %vm1110_vm2, %v8027_v8, %v8031_v36  ;;  %v8499_v17 = vshll.u32 %v14739_v53, 16 }
 0x41a   : > { %v17347_v63 = vpop.f32.mrf.mxu0 }
 0x41b   : > { %v17387_v50 = vpop.f32.mrf.mxu1  ;;  %v6608_v63 = vadd.f32 %v22871_v49, %v22786_v26  ;;  %v8493_v18 = vor.u32 %v8492_v24, %v8489_v6  ;;  %v8498_v6 = vrot.slane %v8496_v48, 3  ;;  %v8501_v24 = vrot.slane %v8499_v17, 4 }
 0x41c   : > { %v6875_v52 = vpop.f32.mrf.mxu0  ;;  %17697 = vmatmul.mubr.bf16.vlgmr.msra.gmra.mxu0 %v8485_v37  ;;  %v8033_v50 = vshrl.u32 %v22977_v12, 16  ;;  %v8039_v37 = vrot.slane %v8037_v44, 1  ;;  %v19073_v12 = vld [vmem:[%s25677_s3 + $0x168] sm:$0xff]   ;;  %v6609_v44 = vadd.f32 %v22885_v54, %v22799_v35 }
 0x41d   : > { %v23017_v61 = vpop.f32.mrf.mxu1  ;;  %v6946_v4 = vadd.f32 %v6875_v52, %v6607_v29  ;;  %17645 = vmatmul.mubr.bf16.gmra.mxu1 %v8032_v33  ;;  %17833 = vmatpush3.bf16.msra.mxu0 %v19063_v11  ;;  %v23031_v52 = vld [vmem:[#allocation2 + $0x54] sm:$0xff]  }
 0x41e   : > { %v17418_v16 = vpop.f32.mrf.mxu0  ;;  %17648 = vmatprep.mubr.msk.bf16.mxu1 %vm19459_vm0, %v25726_v62  ;;  %17700 = vmatprep.mubr.msk.bf16.mxu0 %vm19459_vm0, %v25726_v62  ;;  %v23033_v33 = vld [vmem:[#allocation2 + $0x34] sm:$0xf] }
 0x41f   : > { %v6971_v8 = vadd.f32 %v23013_v34, %v6946_v4  ;;  %v17390_v11 = vpop.f32.mrf.mxu1  ;;  %17834 = vmatprep.subr.bf16.mxu0 %v25726_v62  ;;  %v14740_v26 = vcombine.low %v23033_v33, %v8352_v41 }
 0x420   : > { %v6878_v29 = vpop.f32.mrf.mxu0  ;;  %v8035_v11 = vor.u32 %v8033_v50, %v8031_v36  ;;  %v8045_v36 = vshll.u32 %v23031_v52, 16 }
 0x421   : > { %v23035_v16 = vpop.f32.mrf.mxu1  ;;  %v6947_v53 = vadd.f32 %v6878_v29, %v6608_v63  ;;  %17835 = vmatpush3.bf16.msra.mxu0 %v19069_v1  ;;  %v6989_v49 = vmax.f32 %v6971_v8, 0.0  ;;  %v8494_v1 = vsel %vm624_vm1, %v8484_v58, %v8493_v18  ;;  %v23056_v58 = vor.u32 %v8501_v24, %v8498_v6 }
 0x422   : > { %v17419_v4 = vpop.f32.mrf.mxu0  ;;  %17836 = vmatprep.subr.bf16.mxu0 %v25726_v62  ;;  %v8040_v8 = vsel %vm1110_vm2, %v8035_v11, %v8039_v37  ;;  %v8505_v50 = vshrl.u32 %v14740_v26, 16  ;;  %v8041_v6 = vshrl.u32 %v22997_v39, 16  ;;  %v8047_v24 = vrot.slane %v8045_v36, 1  ;;  %v19085_v39 = vld [vmem:[%s25677_s3 + $0x158] sm:$0xff]  }
 0x423   : > { %v6972_v14 = vadd.f32 %v23013_v34, %v6947_v53  ;;  %v17391_v63 = vpop.f32.mrf.mxu1  ;;  %v7007_v35 = vsel %vm230_vm3, %v6989_v49, 0.0  ;;  %v6610_v53 = vadd.f32 %v22901_v47, %v22813_v57  ;;  %v8508_v49 = vshll.u32 %v14740_v26, 16  ;;  %v19393_v57 = vld [vmem:[#allocation2 + $0x40] sm:$0xf] }
 0x424   : > { %v6883_v41 = vpop.f32.mrf.mxu0  ;;  %17701 = vmatmul.mubr.bf16.gmra.mxu0 %v8494_v1  ;;  %v23066_v1 = vld [vmem:[#allocation2 + $0x5c] sm:$0xff]   ;;  %v8503_v26 = vsel %vm624_vm1, %v8493_v18, %v23056_v58 }
 0x425   : > { %v6990_v48 = vmax.f32 %v6972_v14, 0.0  ;;  %v23048_v17 = vpop.f32.mrf.mxu1  ;;  %v6948_v29 = vadd.f32 %v6883_v41, %v6609_v44  ;;  %17649 = vmatmul.mubr.bf16.gmra.mxu1 %v8040_v8  ;;  %17704 = vmatprep.mubr.msk.bf16.mxu0 %vm19459_vm0, %v25726_v62  ;;  %v19079_v14 = vld [vmem:[%s25677_s3 + $0x160] sm:$0xff]   ;;  %v8053_v18 = vshll.u32 %v23066_v1, 16 }
 0x426   : > { %v17422_v54 = vpop.f32.mrf.mxu0  ;;  %17652 = vmatprep.mubr.msk.bf16.mxu1 %vm19459_vm0, %v25726_v62  ;;  %17837 = vmatpush3.bf16.msra.mxu0 %v19073_v12  ;;  %v23068_v12 = vld [vmem:[#allocation2 + $0x3c] sm:$0xf] }
 0x427   : > { %v15394_v4 = vpack.c.bf16 %v6990_v48, %v7007_v35  ;;  %v6973_v11 = vadd.f32 %v23013_v34, %v6948_v29  ;;  %v17394_v44 = vpop.f32.mrf.mxu1  ;;  %17838 = vmatprep.subr.bf16.mxu0 %v25726_v62  ;;  %v14741_v47 = vcombine.low %v23068_v12, %v19393_v57  ;;  %v8043_v29 = vor.u32 %v8041_v6, %v8039_v37 }
 0x428   : > { %v6886_v63 = vpop.f32.mrf.mxu0  ;;  %v8510_v44 = vrot.slane %v8508_v49, 4 }
 0x429   : > { %15547 = vst [vmem:[#allocation2 + $0x90] sm:$0xff] %v15394_v4   ;;  %v23070_v41 = vpop.f32.mrf.mxu1  ;;  %v6949_v8 = vadd.f32 %v6886_v63, %v6610_v53  ;;  %v6991_v36 = vmax.f32 %v6973_v11, 0.0  ;;  %v8507_v4 = vrot.slane %v8505_v50, 3  ;;  %v6611_v53 = vadd.f32 %v22915_v38, %v22827_v59  ;;  %v19091_v38 = vld [vmem:[%s25677_s3 + $0x150] sm:$0xff]  }
 0x42a   : > { %v17423_v48 = vpop.f32.mrf.mxu0  ;;  %17839 = vmatpush3.bf16.msra.mxu0 %v19079_v14  ;;  %v8048_v63 = vsel %vm1110_vm2, %v8043_v29, %v8047_v24  ;;  %v8514_v50 = vshrl.u32 %v14741_v47, 16  ;;  %v8517_v59 = vshll.u32 %v14741_v47, 16 }
 0x42b   : > { %v6974_v35 = vadd.f32 %v23013_v34, %v6949_v8  ;;  %v17395_v54 = vpop.f32.mrf.mxu1  ;;  %17840 = vmatprep.subr.bf16.mxu0 %v25726_v62  ;;  %v6612_v8 = vadd.f32 %v22931_v45, %v22839_v32  ;;  %v7009_v57 = vsel %vm235_vm4, %v6991_v36, 0.0  ;;  %v19394_v36 = vld [vmem:[#allocation2 + $0x44] sm:$0xf] }
 0x42c   : > { %v6891_v37 = vpop.f32.mrf.mxu0  ;;  %17705 = vmatmul.mubr.bf16.gmra.mxu0 %v8503_v26  ;;  %v23099_v26 = vor.u32 %v8510_v44, %v8507_v4  ;;  %v8055_v54 = vrot.slane %v8053_v18, 1  ;;  %v8516_v45 = vrot.slane %v8514_v50, 3  ;;  %v6613_v18 = vadd.f32 %v22945_v25, %v22853_v46 }
 0x42d   : > { %v6992_v14 = vmax.f32 %v6974_v35, 0.0  ;;  %v23084_v6 = vpop.f32.mrf.mxu1  ;;  %17653 = vmatmul.mubr.bf16.gmra.mxu1 %v8048_v63  ;;  %17708 = vmatprep.mubr.msk.bf16.mxu0 %vm19459_vm0, %v25726_v62  ;;  %v6950_v11 = vadd.f32 %v6891_v37, %v6611_v53  ;;  %v8049_v35 = vshrl.u32 %v23031_v52, 16  ;;  %v23103_v53 = vld [vmem:[#allocation2 + $0x64] sm:$0xff]  }
 0x42e   : > { %v17426_v49 = vpop.f32.mrf.mxu0  ;;  %17656 = vmatprep.mubr.msk.bf16.mxu1 %vm19459_vm0, %v25726_v62  ;;  %17841 = vmatpush3.bf16.msra.mxu0 %v19085_v39  ;;  %v19395_v63 = vld [vmem:[#allocation2 + $0x48] sm:$0xf] }
 0x42f   : > { %v7010_v48 = vsel %vm230_vm3, %v6992_v14, 0.0  ;;  %v17398_v29 = vpop.f32.mrf.mxu1  ;;  %17842 = vmatprep.subr.bf16.mxu0 %v25726_v62  ;;  %v14742_v49 = vcombine.low %v19394_v36, %v19395_v63  ;;  %v6975_v4 = vadd.f32 %v23013_v34, %v6950_v11  ;;  %v8051_v14 = vor.u32 %v8049_v35, %v8047_v24  ;;  %v19097_v52 = vld [vmem:[%s25677_s3 + $0x148] sm:$0xff]   ;;  %v19103_v35 = vld [vmem:[%s25677_s3 + $0x140] sm:$0xff]  }
 0x430   : > { %v15399_v47 = vpack.c.bf16 %v7010_v48, %v7009_v57  ;;  %v6894_v39 = vpop.f32.mrf.mxu0  ;;  %v8519_v29 = vrot.slane %v8517_v59, 4  ;;  %v8512_v57 = vsel %vm624_vm1, %v23056_v58, %v23099_v26  ;;  %v8061_v59 = vshll.u32 %v23103_v53, 16 }
 0x431   : > { %v23105_v37 = vpop.f32.mrf.mxu1  ;;  %v6951_v32 = vadd.f32 %v6894_v39, %v6612_v8  ;;  %v8056_v24 = vsel %vm1110_vm2, %v8051_v14, %v8055_v54  ;;  %v8523_v46 = vshrl.u32 %v14742_v49, 16  ;;  %v6993_v25 = vmax.f32 %v6975_v4, 0.0 }
 0x432   : > { %15548 = vst [vmem:[#allocation2 + $0x98] sm:$0xff] %v15399_v47   ;;  %v17427_v44 = vpop.f32.mrf.mxu0  ;;  %17843 = vmatpush3.bf16.msra.mxu0 %v19091_v38  ;;  %v23126_v58 = vor.u32 %v8519_v29, %v8516_v45  ;;  %v8057_v29 = vshrl.u32 %v23066_v1, 16 }
 0x433   : > { %v6976_v8 = vadd.f32 %v23013_v34, %v6951_v32  ;;  %v17399_v50 = vpop.f32.mrf.mxu1  ;;  %17844 = vmatprep.subr.bf16.mxu0 %v25726_v62  ;;  %v6614_v32 = vadd.f32 %v22961_v22, %v22869_v7  ;;  %v8526_v44 = vshll.u32 %v14742_v49, 16  ;;  %v8525_v7 = vrot.slane %v8523_v46, 3 }
 0x434   : > { %v6899_v11 = vpop.f32.mrf.mxu0  ;;  %17709 = vmatmul.mubr.bf16.gmra.mxu0 %v8512_v57 }
 0x435   : > { %v6994_v38 = vmax.f32 %v6976_v8, 0.0  ;;  %v6952_v48 = vadd.f32 %v6899_v11, %v6613_v18  ;;  %v23120_v47 = vpop.f32.mrf.mxu1  ;;  %17657 = vmatmul.mubr.bf16.gmra.mxu1 %v8056_v24  ;;  %17712 = vmatprep.mubr.msk.bf16.mxu0 %vm19459_vm0, %v25726_v62  ;;  %v23138_v18 = vld [vmem:[#allocation2 + $0x6c] sm:$0xff]   ;;  %v8059_v11 = vor.u32 %v8057_v29, %v8055_v54 }
 0x436   : > { %v17430_v39 = vpop.f32.mrf.mxu0  ;;  %17660 = vmatprep.mubr.msk.bf16.mxu1 %vm19459_vm0, %v25726_v62  ;;  %17845 = vmatpush3.bf16.msra.mxu0 %v19097_v52  ;;  %v8063_v52 = vrot.slane %v8061_v59, 1  ;;  %v19396_v24 = vld [vmem:[#allocation2 + $0x4c] sm:$0xf] }
 0x437   : > { %v7012_v36 = vsel %vm235_vm4, %v6994_v38, 0.0  ;;  %v6977_v63 = vadd.f32 %v23013_v34, %v6952_v48  ;;  %v17470_v4 = vpop.f32.mrf.mxu1  ;;  %17846 = vmatprep.subr.bf16.mxu0 %v25726_v62  ;;  %v19397_v38 = vld [vmem:[#allocation2 + $0x50] sm:$0xf]  ;;  %v6615_v48 = vadd.f32 %v22970_v40, %v22883_v30  ;;  %v8528_v39 = vrot.slane %v8526_v44, 4 }
 0x438   : > { %v15404_v14 = vpack.c.bf16 %v7012_v36, %v6993_v25  ;;  %v6902_v45 = vpop.f32.mrf.mxu0  ;;  %v14743_v49 = vcombine.low %v19396_v24, %v19397_v38  ;;  %v8521_v25 = vsel %vm624_vm1, %v23099_v26, %v23126_v58  ;;  %v8064_v54 = vsel %vm1110_vm2, %v8059_v11, %v8063_v52 }
 0x439   : > { %v6995_v8 = vmax.f32 %v6977_v63, 0.0  ;;  %v6953_v50 = vadd.f32 %v6902_v45, %v6614_v32  ;;  %v23140_v57 = vpop.f32.mrf.mxu1  ;;  %v8069_v32 = vshll.u32 %v23138_v18, 16  ;;  %v6616_v44 = vadd.f32 %v22982_v3, %v22899_v20 }
 0x43a   : > { %15549 = vst [vmem:[#allocation2 + $0xa0] sm:$0xff] %v15404_v14   ;;  %v17431_v22 = vpop.f32.mrf.mxu0  ;;  %17847 = vmatpush3.bf16.msra.mxu0 %v19103_v35  ;;  %v8532_v26 = vshrl.u32 %v14743_v49, 16  ;;  %v8535_v4 = vshll.u32 %v14743_v49, 16  ;;  %v8065_v24 = vshrl.u32 %v23103_v53, 16  ;;  %v19399_v49 = vld [vmem:[#allocation2 + $0x58] sm:$0xf] }
 0x43b   : > { %v6978_v1 = vadd.f32 %v23013_v34, %v6953_v50  ;;  %v17471_v59 = vpop.f32.mrf.mxu1  ;;  %17984 = vmatprep.subr.bf16.mxu0 %v25726_v62  ;;  %v7013_v30 = vsel %vm230_vm3, %v6995_v8, 0.0  ;;  %v8529_v50 = vor.u32 %v8528_v39, %v8525_v7  ;;  %v23162_v22 = vld [vmem:[#allocation2 + $0x74] sm:$0xff]   ;;  %v8071_v8 = vrot.slane %v8069_v32, 1 }
 0x43c   : > { %v6907_v46 = vpop.f32.mrf.mxu0  ;;  %17713 = vmatmul.mubr.bf16.gmra.mxu0 %v8521_v25  ;;  %v8067_v20 = vor.u32 %v8065_v24, %v8063_v52  ;;  %v8534_v3 = vrot.slane %v8532_v26, 3  ;;  %v8077_v53 = vshll.u32 %v23162_v22, 16  ;;  %v6617_v32 = vadd.f32 %v22990_v42, %v22913_v55 }
 0x43d   : > { %v6996_v35 = vmax.f32 %v6978_v1, 0.0  ;;  %v6954_v36 = vadd.f32 %v6907_v46, %v6615_v48  ;;  %v23151_v63 = vpop.f32.mrf.mxu1  ;;  %17661 = vmatmul.mubr.bf16.gmra.mxu1 %v8064_v54  ;;  %17716 = vmatprep.mubr.msk.bf16.mxu0 %vm19459_vm0, %v25726_v62  ;;  %v19398_v1 = vld [vmem:[#allocation2 + $0x54] sm:$0xf]  ;;  %v8537_v46 = vrot.slane %v8535_v4, 4 }
 0x43e   : > { %v17434_v40 = vpop.f32.mrf.mxu0  ;;  %17664 = vmatprep.mubr.msk.bf16.mxu1 %vm19459_vm0, %v25726_v62  ;;  %v14744_v59 = vcombine.low %v19398_v1, %v19399_v49  ;;  %v8079_v24 = vrot.slane %v8077_v53, 1 }
 0x43f   : > { %v15409_v14 = vpack.c.bf16 %v6996_v35, %v7013_v30  ;;  %v6979_v45 = vadd.f32 %v23013_v34, %v6954_v36  ;;  %v17474_v29 = vpop.f32.mrf.mxu1  ;;  %v8530_v35 = vsel %vm624_vm1, %v23126_v58, %v8529_v50  ;;  %v8072_v30 = vsel %vm1110_vm2, %v8067_v20, %v8071_v8  ;;  %v19400_v20 = vld [vmem:[#allocation2 + $0x5c] sm:$0xf] }
 0x440   : > { %v6910_v11 = vpop.f32.mrf.mxu0  ;;  %v8541_v26 = vshrl.u32 %v14744_v59, 16  ;;  %v8073_v58 = vshrl.u32 %v23138_v18, 16  ;;  %v23181_v55 = vor.u32 %v8537_v46, %v8534_v3  ;;  %v8544_v42 = vshll.u32 %v14744_v59, 16  ;;  %v19401_v59 = vld [vmem:[#allocation2 + $0x60] sm:$0xf] }
 0x441   : > { %15550 = vst [vmem:[#allocation2 + $0xa8] sm:$0xff] %v15409_v14   ;;  %v6955_v38 = vadd.f32 %v6910_v11, %v6616_v44  ;;  %v23165_v48 = vpop.f32.mrf.mxu1  ;;  %v6997_v54 = vmax.f32 %v6979_v45, 0.0  ;;  %v6618_v14 = vadd.f32 %v23002_v51, %v22929_v5  ;;  %v14745_v3 = vcombine.low %v19400_v20, %v19401_v59 }
 0x442   : > { %v17435_v25 = vpop.f32.mrf.mxu0  ;;  %v8075_v46 = vor.u32 %v8073_v58, %v8071_v8 }
 0x443   : > { %v6980_v7 = vadd.f32 %v23013_v34, %v6955_v38  ;;  %v17475_v39 = vpop.f32.mrf.mxu1  ;;  %v7015_v45 = vsel %vm235_vm4, %v6997_v54, 0.0  ;;  %v23189_v38 = vld [vmem:[#allocation2 + $0x7c] sm:$0xff]   ;;  %v8543_v54 = vrot.slane %v8541_v26, 3 }
 0x444   : > { %v6915_v36 = vpop.f32.mrf.mxu0  ;;  %17717 = vmatmul.mubr.bf16.gmra.mxu0 %v8530_v35  ;;  %v6619_v39 = vadd.f32 %v23017_v61, %v22943_v27  ;;  %v8550_v27 = vshrl.u32 %v14745_v3, 16  ;;  %v19402_v61 = vld [vmem:[#allocation2 + $0x64] sm:$0xf] }
 0x445   : > { %v6998_v40 = vmax.f32 %v6980_v7, 0.0  ;;  %v23174_v52 = vpop.f32.mrf.mxu1  ;;  %17665 = vmatmul.mubr.bf16.gmra.mxu1 %v8072_v30  ;;  %17720 = vmatprep.mubr.msk.bf16.mxu0 %vm19459_vm0, %v25726_v62  ;;  %v6956_v4 = vadd.f32 %v6915_v36, %v6617_v32  ;;  %v8546_v7 = vrot.slane %v8544_v42, 4  ;;  %v8539_v32 = vsel %vm624_vm1, %v8529_v50, %v23181_v55  ;;  %v19403_v42 = vld [vmem:[#allocation2 + $0x68] sm:$0xf] }
 0x446   : > { %v17438_v44 = vpop.f32.mrf.mxu0  ;;  %17668 = vmatprep.mubr.msk.bf16.mxu1 %vm19459_vm0, %v25726_v62  ;;  %v8080_v30 = vsel %vm1110_vm2, %v8075_v46, %v8079_v24  ;;  %v23205_v50 = vcombine.low %v19402_v61, %v19403_v42 }
 0x447   : > { %v7016_v29 = vsel %vm230_vm3, %v6998_v40, 0.0  ;;  %v17478_v11 = vpop.f32.mrf.mxu1  ;;  %v6981_v5 = vadd.f32 %v23013_v34, %v6956_v4  ;;  %v8085_v40 = vshll.u32 %v23189_v38, 16  ;;  %v11112_v4 = vld [vmem:[#allocation2 + $0x90] sm:$0xf]  ;;  %v11113_v44 = vld [vmem:[#allocation2 + $0x94] sm:$0xf] }
 0x448   : > { %v15414_v1 = vpack.c.bf16 %v7016_v29, %v7015_v45  ;;  %v6918_v49 = vpop.f32.mrf.mxu0  ;;  %v8081_v29 = vshrl.u32 %v23162_v22, 16  ;;  %v23210_v11 = vor.u32 %v8546_v7, %v8543_v54  ;;  %v8552_v7 = vrot.slane %v8550_v27, 3 }
 0x449   : > { %v6957_v25 = vadd.f32 %v6918_v49, %v6618_v14  ;;  %v23191_v18 = vpop.f32.mrf.mxu1  ;;  %v6999_v14 = vmax.f32 %v6981_v5, 0.0  ;;  %v6620_v49 = vadd.f32 %v23035_v16, %v22959_v43  ;;  %v8559_v42 = vshrl.u32 %v23205_v50, 16 }
 0x44a   : > { %15551 = vst [vmem:[#allocation2 + $0xb0] sm:$0xff] %v15414_v1   ;;  %v17439_v51 = vpop.f32.mrf.mxu0  ;;  %v14994_v1 = vcombine.low %v11112_v4, %v11113_v44  ;;  %v8083_v16 = vor.u32 %v8081_v29, %v8079_v24  ;;  %v6621_v44 = vadd.f32 %v23048_v17, %v22968_v2  ;;  %v8562_v24 = vshll.u32 %v23205_v50, 16 }
 0x44b   : > { %v6982_v35 = vadd.f32 %v23013_v34, %v6957_v25  ;;  %v17479_v53 = vpop.f32.mrf.mxu1  ;;  %v8553_v51 = vshll.u32 %v14745_v3, 16  ;;  %v8089_v17 = vshrl.u32 %v23189_v38, 16 }
 0x44c   : > { %v6923_v36 = vpop.f32.mrf.mxu0  ;;  %17721 = vmatmul.mubr.bf16.gmra.mxu0 %v8539_v32  ;;  %v11396_v53 = vshrl.u32 %v14994_v1, 16  ;;  %v11399_v32 = vshll.u32 %v14994_v1, 16  ;;  %v11115_v1 = vld [vmem:[#allocation2 + $0x9c] sm:$0xf] }
 0x44d   : > { %v7000_v8 = vmax.f32 %v6982_v35, 0.0  ;;  %v6958_v26 = vadd.f32 %v6923_v36, %v6619_v39  ;;  %v23201_v58 = vpop.f32.mrf.mxu1  ;;  %17669 = vmatmul.mubr.bf16.gmra.mxu1 %v8080_v30  ;;  %17724 = vmatprep.mubr.msk.bf16.mxu0 %vm19459_vm0, %v25726_v62  ;;  %v8087_v39 = vrot.slane %v8085_v40, 1  ;;  %v19086_v35 = vld [vmem:[#allocation2 + $0x84] ss:$0 sps:$4 sm:$0x11]   ;;  %v8548_v40 = vsel %vm624_vm1, %v23181_v55, %v23210_v11 }
 0x44e   : > { %v17442_v45 = vpop.f32.mrf.mxu0  ;;  %17672 = vmatprep.mubr.msk.bf16.mxu1 %vm19459_vm0, %v25726_v62  ;;  %v11398_v30 = vrot.slane %v11396_v53, 3  ;;  %v11401_v4 = vrot.slane %v11399_v32, 4  ;;  %v11114_v55 = vld [vmem:[#allocation2 + $0x98] sm:$0xf]  ;;  %v8093_v50 = vshll.u32 %v19086_v35, 16 }
 0x44f   : > { %v7018_v25 = vsel %vm235_vm4, %v7000_v8, 0.0  ;;  %v6983_v20 = vadd.f32 %v23013_v34, %v6958_v26  ;;  %v17482_v59 = vpop.f32.mrf.mxu1  ;;  %v8555_v26 = vrot.slane %v8553_v51, 4  ;;  %v8088_v27 = vsel %vm1110_vm2, %v8083_v16, %v8087_v39 }
 0x450   : > { %v15419_v5 = vpack.c.bf16 %v7018_v25, %v6999_v14  ;;  %v6926_v46 = vpop.f32.mrf.mxu0  ;;  %v11402_v14 = vor.u32 %v11401_v4, %v11398_v30  ;;  %v6622_v51 = vadd.f32 %v23070_v41, %v22980_v0  ;;  %v19404_v30 = vld [vmem:[#allocation2 + $0x6c] sm:$0xf]  ;;  %v8561_v0 = vrot.slane %v8559_v42, 3 }
 0x451   : > { %v6959_v22 = vadd.f32 %v6926_v46, %v6620_v49  ;;  %v23217_v54 = vpop.f32.mrf.mxu1  ;;  %v7001_v36 = vmax.f32 %v6983_v20, 0.0  ;;  %v14995_v20 = vcombine.low %v11114_v55, %v11115_v1  ;;  %v23244_v53 = vor.u32 %v8555_v26, %v8552_v7 }
 0x452   : > { %15552 = vst [vmem:[#allocation2 + $0xb8] sm:$0xff] %v15419_v5   ;;  %v17443_v43 = vpop.f32.mrf.mxu0  ;;  %v23239_v59 = vsel %vm624_vm1, %v22601_v31, %v11402_v14  ;;  %v19405_v31 = vld [vmem:[#allocation2 + $0x70] sm:$0xf] }
 0x453   : > { %v6984_v3 = vadd.f32 %v23013_v34, %v6959_v22  ;;  %v17483_v8 = vpop.f32.mrf.mxu1  ;;  %v7019_v49 = vsel %vm230_vm3, %v7001_v36, 0.0  ;;  %25780 = vst [vmem:[#allocation24_spill] sm:$0xff] %v23239_v59  ;;  %v8091_v22 = vor.u32 %v8089_v17, %v8087_v39  ;;  %v11405_v36 = vshrl.u32 %v14995_v20, 16  ;;  %v23827_v59 = vld [vmem:[#allocation2 + $0x54] sm:$0xf] }
 0x454   : > { %v6931_v61 = vpop.f32.mrf.mxu0  ;;  %17725 = vmatmul.mubr.bf16.gmra.mxu0 %v8548_v40  ;;  %v11408_v43 = vshll.u32 %v14995_v20, 16  ;;  %v14747_v4 = vcombine.low %v19404_v30, %v19405_v31  ;;  %v8557_v39 = vsel %vm624_vm1, %v23210_v11, %v23244_v53  ;;  %v6624_v20 = vadd.f32 %v23105_v37, %v23000_v10  ;;  %v19406_v31 = vld [vmem:[#allocation2 + $0x74] sm:$0xf] }
 0x455   : > { %v7002_v45 = vmax.f32 %v6984_v3, 0.0  ;;  %v6960_v29 = vadd.f32 %v6931_v61, %v6621_v44  ;;  %v23228_v2 = vpop.f32.mrf.mxu1  ;;  %17673 = vmatmul.mubr.bf16.gmra.mxu1 %v8088_v27  ;;  %17728 = vmatprep.mubr.msk.bf16.mxu0 %vm19459_vm0, %v25726_v62  ;;  %v8095_v3 = vrot.slane %v8093_v50, 1  ;;  %v11407_v41 = vrot.slane %v11405_v36, 3 }
 0x456   : > { %v17446_v25 = vpop.f32.mrf.mxu0  ;;  %17676 = vmatprep.mubr.msk.bf16.mxu1 %vm19459_vm0, %v25726_v62  ;;  %v11410_v8 = vrot.slane %v11408_v43, 4  ;;  %v8564_v61 = vrot.slane %v8562_v24, 4  ;;  %v6623_v27 = vadd.f32 %v23084_v6, %v22988_v19  ;;  %v8568_v1 = vshrl.u32 %v14747_v4, 16 }
 0x457   : > { %v15424_v5 = vpack.c.bf16 %v7002_v45, %v7019_v49  ;;  %v6985_v38 = vadd.f32 %v23013_v34, %v6960_v29  ;;  %v17486_v46 = vpop.f32.mrf.mxu1  ;;  %v8096_v29 = vsel %vm1110_vm2, %v8091_v22, %v8095_v3  ;;  %v11116_v49 = vld [vmem:[#allocation2 + $0xa0] sm:$0xf]  ;;  %v11117_v25 = vld [vmem:[#allocation2 + $0xa4] sm:$0xf]  ;;  %v8571_v19 = vshll.u32 %v14747_v4, 16 }
 0x458   : > { %v6934_v32 = vpop.f32.mrf.mxu0  ;;  %v11411_v17 = vor.u32 %v11410_v8, %v11407_v41  ;;  %v14996_v6 = vcombine.low %v11116_v49, %v11117_v25  ;;  %v8565_v46 = vor.u32 %v8564_v61, %v8561_v0  ;;  %v19407_v4 = vld [vmem:[#allocation2 + $0x78] sm:$0xf]  ;;  %v11119_v61 = vld [vmem:[#allocation2 + $0xac] sm:$0xf]  ;;  %v25783_v49 = vld [vmem:[#allocation5_spill] sm:$0xff] }
 0x459   : > { %15553 = vst [vmem:[#allocation2 + $0xc0] sm:$0xff] %v15424_v5   ;;  %v6961_v35 = vadd.f32 %v6934_v32, %v6622_v51  ;;  %v23246_v16 = vpop.f32.mrf.mxu1  ;;  %v7003_v40 = vmax.f32 %v6985_v38, 0.0  ;;  %v8573_v3 = vrot.slane %v8571_v19, 4 }
 0x45a   : > { %v17447_v44 = vpop.f32.mrf.mxu0  ;;  %v23262_v50 = vsel %vm624_vm1, %v11402_v14, %v11411_v17  ;;  %v11414_v36 = vshrl.u32 %v14996_v6, 16  ;;  %v11417_v43 = vshll.u32 %v14996_v6, 16  ;;  %v8570_v14 = vrot.slane %v8568_v1, 3  ;;  %v25782_v1 = vld [vmem:[#allocation9_spill] sm:$0xff] }
 0x45b   : > { %v6986_v7 = vadd.f32 %v23013_v34, %v6961_v35  ;;  %v17487_v26 = vpop.f32.mrf.mxu1  ;;  %25781 = vst [vmem:[#allocation25_spill] sm:$0xff] %v23262_v50  ;;  %v7021_v51 = vsel %vm235_vm4, %v7003_v40, 0.0  ;;  %v14748_v44 = vcombine.low %v19406_v31, %v19407_v4  ;;  %v25784_v25 = vcombine.low %v25782_v1, %v25783_v49  ;;  %v23825_v50 = vld [vmem:[#allocation2 + $0x50] sm:$0xf] }
 0x45c   : > { %v6939_v45 = vpop.f32.mrf.mxu0  ;;  %17729 = vmatmul.mubr.bf16.gmra.mxu0 %v8557_v39  ;;  %v11416_v0 = vrot.slane %v11414_v36, 3  ;;  %v11419_v41 = vrot.slane %v11417_v43, 4  ;;  %v11118_v39 = vld [vmem:[#allocation2 + $0xa8] sm:$0xf] }
 0x45d   : > { %v7004_v42 = vmax.f32 %v6986_v7, 0.0  ;;  %v23255_v55 = vpop.f32.mrf.mxu1  ;;  %17677 = vmatmul.mubr.bf16.gmra.mxu1 %v8096_v29  ;;  %17732 = vmatprep.mubr.msk.bf16.mxu0 %vm19459_vm0, %v25726_v62  ;;  %v6962_v11 = vadd.f32 %v6939_v45, %v6623_v27  ;;  %v8566_v7 = vsel %vm624_vm1, %v23244_v53, %v8565_v46  ;;  %v8580_v19 = vshll.u32 %v14748_v44, 16 }
 0x45e   : > { %v17450_v24 = vpop.f32.mrf.mxu0  ;;  %17772 = vmatprep.mubr.msk.bf16.mxu1 %vm19459_vm0, %v25726_v62  ;;  %v11420_v27 = vor.u32 %v11419_v41, %v11416_v0 }
 0x45f   : > { %v7022_v5 = vsel %vm230_vm3, %v7004_v42, 0.0  ;;  %v17490_v38 = vpop.f32.mrf.mxu1  ;;  %v6987_v10 = vadd.f32 %v23013_v34, %v6962_v11  ;;  %v8577_v24 = vshrl.u32 %v14748_v44, 16  ;;  %v19409_v44 = vld [vmem:[#allocation2 + $0x80] sm:$0xf]  ;;  %v8582_v0 = vrot.slane %v8580_v19, 4 }
 0x460   : > { %v15429_v32 = vpack.c.bf16 %v7022_v5, %v7021_v51  ;;  %v6942_v22 = vpop.f32.mrf.mxu0  ;;  %v23295_v6 = vsel %vm624_vm1, %v11411_v17, %v11420_v27  ;;  %v8574_v5 = vor.u32 %v8573_v3, %v8570_v14  ;;  %v19102_v14 = vld [vmem:[%s25677_s3 + $0x1a8] sm:$0xff]  }
 0x461   : > { %v6963_v35 = vadd.f32 %v6942_v22, %v6624_v20  ;;  %v23270_v30 = vpop.f32.mrf.mxu1  ;;  %v7005_v53 = vmax.f32 %v6987_v10, 0.0  ;;  %25785 = vst [vmem:[#allocation9_spill] sm:$0xff] %v23295_v6  ;;  %v14749_v10 = vcombine.low %v19408_v56, %v19409_v44  ;;  %v8579_v3 = vrot.slane %v8577_v24, 3  ;;  %v19410_v56 = vld [vmem:[#allocation2 + $0x84] sm:$0xf] }
 0x462   : > { %15554 = vst [vmem:[#allocation2 + $0xc8] sm:$0xff] %v15429_v32   ;;  %v17451_v37 = vpop.f32.mrf.mxu0  ;;  %v19411_v44 = vld [vmem:[#allocation2 + $0x88] sm:$0xf]  ;;  %v23791_v6 = vld [vmem:[#allocation2 + $0x4c] sm:$0xf] }
 0x463   : > { %v6988_v8 = vadd.f32 %v23013_v34, %v6963_v35  ;;  %v17491_v40 = vpop.f32.mrf.mxu1  ;;  %v14997_v34 = vcombine.low %v11118_v39, %v11119_v61  ;;  %v11121_v61 = vld [vmem:[#allocation2 + $0xb4] sm:$0xf] }
 0x464   : > { %v7728_v26 = vpop.f32.mrf.mxu0  ;;  %17733 = vmatmul.mubr.bf16.gmra.mxu0 %v8566_v7  ;;  %v25786_v7 = vld [vmem:[#allocation8_spill] sm:$0xff] }
 0x465   : > { %v7006_v45 = vmax.f32 %v6988_v8, 0.0  ;;  %v23279_v29 = vpop.f32.mrf.mxu1  ;;  %v23282_v42 = vadd.f32 %v7728_v26, %v23120_v47  ;;  %17773 = vmatmul.mubr.bf16.vlgmr.msra.gmra.mxu1 %v25784_v25  ;;  %17736 = vmatprep.mubr.msk.bf16.mxu0 %vm19459_vm0, %v25726_v62  ;;  %v19096_v47 = vld [vmem:[%s25677_s3 + $0x1b0] sm:$0xff]   ;;  %v11423_v38 = vshrl.u32 %v14997_v34, 16  ;;  %v11426_v32 = vshll.u32 %v14997_v34, 16 }
 0x466   : > { %v17546_v11 = vpop.f32.mrf.mxu0  ;;  %17909 = vmatpush3.bf16.msra.mxu1 %v19090_v13  ;;  %17776 = vmatprep.mubr.msk.bf16.mxu1 %vm19459_vm0, %v25726_v62  ;;  %v8575_v13 = vsel %vm624_vm1, %v8565_v46, %v8574_v5  ;;  %v25787_v26 = vld [vmem:[#allocation11_spill] sm:$0xff]  ;;  %v8583_v34 = vor.u32 %v8582_v0, %v8579_v3  ;;  %v25790_v3 = vld [vmem:[#allocation10_spill] sm:$0xff]  ;;  %v25791_v0 = vld [vmem:[#allocation13_spill] sm:$0xff] }
 0x467   : > { %v7024_v20 = vsel %vm235_vm4, %v7006_v45, 0.0  ;;  %v17494_v51 = vpop.f32.mrf.mxu1  ;;  %17910 = vmatprep.subr.bf16.mxu1 %v25726_v62  ;;  %v11425_v31 = vrot.slane %v11423_v38, 3  ;;  %v11428_v4 = vrot.slane %v11426_v32, 4  ;;  %v25788_v39 = vcombine.low %v25786_v7, %v25787_v26  ;;  %v11120_v46 = vld [vmem:[#allocation2 + $0xb0] sm:$0xf] }
 0x468   : > { %v15434_v22 = vpack.c.bf16 %v7024_v20, %v7005_v53  ;;  %v7731_v36 = vpop.f32.mrf.mxu0  ;;  %v14998_v49 = vcombine.low %v11120_v46, %v11121_v61  ;;  %v8586_v53 = vshrl.u32 %v14749_v10, 16  ;;  %v8589_v11 = vshll.u32 %v14749_v10, 16  ;;  %v19113_v51 = vld [vmem:[%s25677_s3 + $0x198] sm:$0xff]  }
 0x469   : > { %v23300_v43 = vpop.f32.mrf.mxu1  ;;  %v23303_v35 = vadd.f32 %v7731_v36, %v23140_v57  ;;  %v11429_v57 = vor.u32 %v11428_v4, %v11425_v31  ;;  %v8584_v31 = vsel %vm624_vm1, %v8574_v5, %v8583_v34  ;;  %v14750_v10 = vcombine.low %v19410_v56, %v19411_v44  ;;  %v11122_v5 = vld [vmem:[#allocation2 + $0xb8] sm:$0xf]  ;;  %v11123_v7 = vld [vmem:[#allocation2 + $0xbc] sm:$0xf] }
 0x46a   : > { %15555 = vst [vmem:[#allocation2 + $0xd0] sm:$0xff] %v15434_v22   ;;  %v17547_v17 = vpop.f32.mrf.mxu0  ;;  %17911 = vmatpush3.bf16.msra.mxu1 %v19096_v47  ;;  %v11432_v19 = vshrl.u32 %v14998_v49, 16  ;;  %v8588_v4 = vrot.slane %v8586_v53, 3 }
 0x46b   : > { %v17495_v37 = vpop.f32.mrf.mxu1  ;;  %17912 = vmatprep.subr.bf16.mxu1 %v25726_v62  ;;  %v23321_v45 = vsel %vm624_vm1, %v11420_v27, %v11429_v57  ;;  %v11435_v27 = vshll.u32 %v14998_v49, 16  ;;  %v8591_v17 = vrot.slane %v8589_v11, 4  ;;  %v8598_v49 = vshll.u32 %v14750_v10, 16 }
 0x46c   : > { %v7736_v41 = vpop.f32.mrf.mxu0  ;;  %17737 = vmatmul.mubr.bf16.gmra.mxu0 %v8575_v13  ;;  %25789 = vst [vmem:[#allocation5_spill] sm:$0xff] %v23321_v45  ;;  %v11434_v32 = vrot.slane %v11432_v19, 3  ;;  %v23789_v45 = vld [vmem:[#allocation2 + $0x48] sm:$0xf] }
 0x46d   : > { %v23310_v8 = vpop.f32.mrf.mxu1  ;;  %v23313_v40 = vadd.f32 %v7736_v41, %v23151_v63  ;;  %17777 = vmatmul.mubr.bf16.gmra.mxu1 %v25788_v39  ;;  %17740 = vmatprep.mubr.msk.bf16.mxu0 %vm19459_vm0, %v25726_v62  ;;  %v19109_v63 = vld [vmem:[%s25677_s3 + $0x1a0] sm:$0xff]   ;;  %v11437_v22 = vrot.slane %v11435_v27, 4  ;;  %v25792_v41 = vcombine.low %v25790_v3, %v25791_v0  ;;  %v19119_v39 = vld [vmem:[%s25677_s3 + $0x190] sm:$0xff]   ;;  %v8600_v44 = vrot.slane %v8598_v49, 4 }
 0x46e   : > { %v17550_v1 = vpop.f32.mrf.mxu0  ;;  %17780 = vmatprep.mubr.msk.bf16.mxu1 %vm19459_vm0, %v25726_v62  ;;  %17913 = vmatpush3.bf16.msra.mxu1 %v19102_v14 }
 0x46f   : > { %v17498_v25 = vpop.f32.mrf.mxu1  ;;  %17914 = vmatprep.subr.bf16.mxu1 %v25726_v62  ;;  %v11438_v14 = vor.u32 %v11437_v22, %v11434_v32  ;;  %v8592_v1 = vor.u32 %v8591_v17, %v8588_v4  ;;  %v19413_v4 = vld [vmem:[#allocation2 + $0x30] sm:$0xf] }
 0x470   : > { %v7739_v24 = vpop.f32.mrf.mxu0  ;;  %v14779_v17 = vcombine.low %v19413_v4, %v23033_v33 }
 0x471   : > { %v23329_v47 = vpop.f32.mrf.mxu1  ;;  %v23332_v20 = vadd.f32 %v7739_v24, %v23165_v48  ;;  %v23355_v46 = vsel %vm624_vm1, %v11429_v57, %v11438_v14  ;;  %v19125_v57 = vld [vmem:[%s25677_s3 + $0x188] sm:$0xff]  }
 0x472   : > { %v17551_v38 = vpop.f32.mrf.mxu0  ;;  %17915 = vmatpush3.bf16.msra.mxu1 %v19109_v63  ;;  %25793 = vst [vmem:[#allocation8_spill] sm:$0xff] %v23355_v46  ;;  %v8595_v63 = vshrl.u32 %v14750_v10, 16  ;;  %v11124_v10 = vld [vmem:[#allocation2 + $0xc0] sm:$0xf]  ;;  %v23720_v46 = vld [vmem:[#allocation2 + $0x3c] sm:$0xf] }
 0x473   : > { %v17499_v36 = vpop.f32.mrf.mxu1  ;;  %17916 = vmatprep.subr.bf16.mxu1 %v25726_v62 }
 0x474   : > { %v7744_v48 = vpop.f32.mrf.mxu0  ;;  %17741 = vmatmul.mubr.bf16.gmra.mxu0 %v8584_v31  ;;  %v8593_v31 = vsel %vm624_vm1, %v8583_v34, %v8592_v1  ;;  %v8597_v56 = vrot.slane %v8595_v63, 3 }
 0x475   : > { %v23339_v37 = vpop.f32.mrf.mxu1  ;;  %v23342_v13 = vadd.f32 %v7744_v48, %v23174_v52  ;;  %17781 = vmatmul.mubr.bf16.gmra.mxu1 %v25792_v41  ;;  %17744 = vmatprep.mubr.msk.bf16.mxu0 %vm19459_vm0, %v25726_v62  ;;  %v14999_v52 = vcombine.low %v11122_v5, %v11123_v7  ;;  %v11125_v48 = vld [vmem:[#allocation2 + $0xc4] sm:$0xf] }
 0x476   : > { %v17554_v26 = vpop.f32.mrf.mxu0  ;;  %17784 = vmatprep.mubr.msk.bf16.mxu1 %vm19459_vm0, %v25726_v62  ;;  %17917 = vmatpush3.bf16.msra.mxu1 %v19113_v51  ;;  %v19412_v51 = vld [vmem:[#allocation2 + $0x8c] sm:$0xf]  ;;  %v15000_v34 = vcombine.low %v11124_v10, %v11125_v48  ;;  %v19131_v7 = vld [vmem:[%s25677_s3 + $0x180] sm:$0xff]  }
 0x477   : > { %v17502_v61 = vpop.f32.mrf.mxu1  ;;  %17918 = vmatprep.subr.bf16.mxu1 %v25726_v62  ;;  %v11441_v53 = vshrl.u32 %v14999_v52, 16  ;;  %v11444_v11 = vshll.u32 %v14999_v52, 16  ;;  %v14751_v38 = vcombine.low %v19412_v51, %v19412_v51 }
 0x478   : > { %v7747_v25 = vpop.f32.mrf.mxu0  ;;  %v11450_v61 = vshrl.u32 %v15000_v34, 16  ;;  %v11453_v63 = vshll.u32 %v15000_v34, 16  ;;  %v19108_v34 = vld [vmem:[#allocation2 + $0x20] sm:$0xff]  }
 0x479   : > { %v23358_v24 = vpop.f32.mrf.mxu1  ;;  %v23361_v19 = vadd.f32 %v7747_v25, %v23191_v18  ;;  %v11443_v32 = vrot.slane %v11441_v53, 3  ;;  %v11446_v22 = vrot.slane %v11444_v11, 4  ;;  %v8604_v5 = vshrl.u32 %v14751_v38, 16 }
 0x47a   : > { %v17555_v27 = vpop.f32.mrf.mxu0  ;;  %17919 = vmatpush3.bf16.msra.mxu1 %v19119_v39  ;;  %v8601_v39 = vor.u32 %v8600_v44, %v8597_v56  ;;  %v8607_v52 = vshll.u32 %v14751_v38, 16  ;;  %v11452_v11 = vrot.slane %v11450_v61, 3  ;;  %v11126_v56 = vld [vmem:[#allocation2 + $0xc8] sm:$0xf] }
 0x47b   : > { %v17503_v36 = vpop.f32.mrf.mxu1  ;;  %17920 = vmatprep.subr.bf16.mxu1 %v25726_v62  ;;  %v11447_v3 = vor.u32 %v11446_v22, %v11443_v32  ;;  %v11455_v27 = vrot.slane %v11453_v63, 4  ;;  %v8606_v22 = vrot.slane %v8604_v5, 3 }
 0x47c   : > { %v7752_v18 = vpop.f32.mrf.mxu0  ;;  %17745 = vmatmul.mubr.bf16.gmra.mxu0 %v8593_v31  ;;  %v8602_v38 = vsel %vm624_vm1, %v8592_v1, %v8601_v39  ;;  %v8609_v36 = vrot.slane %v8607_v52, 4 }
 0x47d   : > { %v23369_v0 = vpop.f32.mrf.mxu1  ;;  %v23372_v41 = vadd.f32 %v7752_v18, %v23201_v58  ;;  %17785 = vmatmul.mubr.bf16.gmra.mxu1 %v14779_v17  ;;  %17748 = vmatprep.mubr.msk.bf16.mxu0 %vm19459_vm0, %v25726_v62  ;;  %v23382_v26 = vsel %vm624_vm1, %v11438_v14, %v11447_v3  ;;  %v11456_v31 = vor.u32 %v11455_v27, %v11452_v11  ;;  %v9270_v27 = vshll.u32 %v19108_v34, 16 }
 0x47e   : > { %v17558_v33 = vpop.f32.mrf.mxu0  ;;  %17788 = vmatprep.mubr.msk.bf16.mxu1 %vm19459_vm0, %v25726_v62  ;;  %17921 = vmatpush3.bf16.msra.mxu1 %v19125_v57  ;;  %25794 = vst [vmem:[#allocation11_spill] sm:$0xff] %v23382_v26  ;;  %v19414_v57 = vld [vmem:[#allocation2 + $0x38] sm:$0xf]  ;;  %v15001_v18 = vcombine.low %v11126_v56, %v11126_v56  ;;  %v8610_v48 = vor.u32 %v8609_v36, %v8606_v22 }
 0x47f   : > { %v17506_v58 = vpop.f32.mrf.mxu1  ;;  %17922 = vmatprep.subr.bf16.mxu1 %v25726_v62  ;;  %v14780_v14 = vcombine.low %v19414_v57, %v23068_v12  ;;  %v19107_v12 = vld [vmem:[#allocation2 + $0x18] sm:$0xff]   ;;  %v23401_v1 = vsel %vm624_vm1, %v11447_v3, %v11456_v31  ;;  %v9272_v56 = vrot.slane %v9270_v27, 1 }
 0x480   : > { %v7755_v49 = vpop.f32.mrf.mxu0  ;;  %25795 = vst [vmem:[#allocation10_spill] sm:$0xff] %v23401_v1  ;;  %v11462_v5 = vshll.u32 %v15001_v18, 16  ;;  %v9265_v52 = vshll.u32 %v19107_v12, 16  ;;  %v8611_v11 = vsel %vm624_vm1, %v8601_v39, %v8610_v48 }
 0x481   : > { %v23385_v25 = vpop.f32.mrf.mxu1  ;;  %v23388_v53 = vadd.f32 %v7755_v49, %v23217_v54 }
 0x482   : > { %v17559_v51 = vpop.f32.mrf.mxu0  ;;  %17923 = vmatpush3.bf16.msra.mxu1 %v19131_v7  ;;  %v11464_v63 = vrot.slane %v11462_v5, 4 }
 0x483   : > { %v17507_v32 = vpop.f32.mrf.mxu1  ;;  %18060 = vmatprep.subr.bf16.mxu1 %v25726_v62 }
 0x484   : > { %v7760_v4 = vpop.f32.mrf.mxu0  ;;  %17749 = vmatmul.mubr.bf16.gmra.mxu0 %v8602_v38  ;;  %v9267_v38 = vrot.slane %v9265_v52, 1 }
 0x485   : > { %v23393_v17 = vpop.f32.mrf.mxu1  ;;  %v23396_v54 = vadd.f32 %v7760_v4, %v23228_v2  ;;  %17789 = vmatmul.mubr.bf16.gmra.mxu1 %v14780_v14  ;;  %17752 = vmatprep.mubr.msk.bf16.mxu0 %vm19459_vm0, %v25726_v62  ;;  %v11459_v2 = vshrl.u32 %v15001_v18, 16  ;;  %v9263_v4 = vshrl.u32 %v19107_v12, 16 }
 0x486   : > { %v17562_v44 = vpop.f32.mrf.mxu0  ;;  %17792 = vmatprep.mubr.msk.bf16.mxu1 %vm19459_vm0, %v25726_v62 }
 0x487   : > { %v17510_v10 = vpop.f32.mrf.mxu1  ;;  %v11461_v3 = vrot.slane %v11459_v2, 3 }
 0x488   : > { %v7763_v33 = vpop.f32.mrf.mxu0  ;;  %v19110_v10 = vld [vmem:[%s25677_s3 + $0x1f8] sm:$0xff]  }
 0x489   : > { %v23405_v7 = vpop.f32.mrf.mxu1  ;;  %v23408_v58 = vadd.f32 %v7763_v33, %v23246_v16  ;;  %v11465_v57 = vor.u32 %v11464_v63, %v11461_v3  ;;  %v25796_v16 = vcombine.low %v22184_v15, %v22186_v9  ;;  %v9268_v9 = vor.u32 %v9267_v38, %v9263_v4 }
 0x48a   : > { %v17563_v61 = vpop.f32.mrf.mxu0 }
 0x48b   : > { %v17511_v49 = vpop.f32.mrf.mxu1  ;;  %v23424_v39 = vsel %vm624_vm1, %v11456_v31, %v11465_v57  ;;  %v9273_v31 = vsel %vm1110_vm2, %v9268_v9, %v9272_v56  ;;  %v19116_v61 = vld [vmem:[%s25677_s3 + $0x1f0] sm:$0xff]   ;;  %v19126_v9 = vld [vmem:[%s25677_s3 + $0x1e0] sm:$0xff]  }
 0x48c   : > { %v7768_v51 = vpop.f32.mrf.mxu0  ;;  %17753 = vmatmul.mubr.bf16.gmra.mxu0 %v8611_v11  ;;  %25797 = vst [vmem:[#allocation13_spill] sm:$0xff] %v23424_v39  ;;  %v9274_v49 = vshrl.u32 %v19108_v34, 16  ;;  %v23451_v11 = vld [vmem:[#allocation2 + $0x30] sm:$0xff]   ;;  %v19120_v34 = vld [vmem:[%s25677_s3 + $0x1e8] sm:$0xff]  }
 0x48d   : > { %v23411_v14 = vpop.f32.mrf.mxu1  ;;  %v23414_v32 = vadd.f32 %v7768_v51, %v23255_v55  ;;  %17793 = vmatmul.mubr.bf16.gmra.mxu1 %v25796_v16  ;;  %17848 = vmatprep.mubr.msk.bf16.mxu0 %vm19459_vm0, %v25726_v62  ;;  %v19112_v55 = vld [vmem:[#allocation2 + $0x28] sm:$0xff]  }
 0x48e   : > { %v17566_v22 = vpop.f32.mrf.mxu0  ;;  %17796 = vmatprep.mubr.msk.bf16.mxu1 %vm19459_vm0, %v25726_v62  ;;  %v9278_v2 = vshll.u32 %v19112_v55, 16  ;;  %v9276_v51 = vor.u32 %v9274_v49, %v9272_v56  ;;  %v25799_v56 = vcombine.low %v22214_v60, %v22216_v28  ;;  %v23495_v49 = vld [vmem:[#allocation2 + $0x9c] sm:$0xf] }
 0x48f   : > { %v17514_v36 = vpop.f32.mrf.mxu1  ;;  %v9286_v22 = vshll.u32 %v23451_v11, 16  ;;  %25801 = vst [vmem:[#allocation27_spill] sm:$0xff] %v23495_v49 }
 0x490   : > { %v7771_v44 = vpop.f32.mrf.mxu0 }
 0x491   : > { %v23426_v18 = vpop.f32.mrf.mxu1  ;;  %v23429_v15 = vadd.f32 %v7771_v44, %v23270_v30  ;;  %v25798_v30 = vcombine.low %v22195_v23, %v22197_v21 }
 0x492   : > { %v17567_v48 = vpop.f32.mrf.mxu0 }
 0x493   : > { %v17515_v33 = vpop.f32.mrf.mxu1  ;;  %v9282_v48 = vshrl.u32 %v19112_v55, 16  ;;  %v19132_v55 = vld [vmem:[%s25677_s3 + $0x1d8] sm:$0xff]  }
 0x494   : > { %v7776_v5 = vpop.f32.mrf.mxu0  ;;  %17849 = vmatmul.mubr.bf16.vlgmr.msra.gmra.mxu0 %v9273_v31  ;;  %v23479_v33 = vld [vmem:[#allocation2 + $0x38] sm:$0xff]  }
 0x495   : > { %v23435_v12 = vpop.f32.mrf.mxu1  ;;  %v23438_v52 = vadd.f32 %v7776_v5, %v23279_v29  ;;  %17797 = vmatmul.mubr.bf16.gmra.mxu1 %v25798_v30  ;;  %17985 = vmatpush3.bf16.msra.mxu0 %v19110_v10  ;;  %v9280_v29 = vrot.slane %v9278_v2, 1  ;;  %v23487_v5 = vld [vmem:[#allocation2 + $0xa0] sm:$0xf] }
 0x496   : > { %v17570_v3 = vpop.f32.mrf.mxu0  ;;  %17800 = vmatprep.mubr.msk.bf16.mxu1 %vm19459_vm0, %v25726_v62  ;;  %17852 = vmatprep.mubr.msk.bf16.mxu0 %vm19459_vm0, %v25726_v62  ;;  %25800 = vst [vmem:[#allocation26_spill] sm:$0xff] %v23487_v5 }
 0x497   : > { %v17518_v63 = vpop.f32.mrf.mxu1  ;;  %17986 = vmatprep.subr.bf16.mxu0 %v25726_v62  ;;  %v9281_v38 = vsel %vm1110_vm2, %v9276_v51, %v9280_v29  ;;  %v9284_v2 = vor.u32 %v9282_v48, %v9280_v29  ;;  %v9290_v48 = vshrl.u32 %v23451_v11, 16  ;;  %v23539_v11 = vld [vmem:[#allocation2 + $0xb4] sm:$0xf]  ;;  %v25816_v51 = vld [vmem:[#allocation4_spill] sm:$0xff] }
 0x498   : > { %v7779_v23 = vpop.f32.mrf.mxu0  ;;  %v9294_v63 = vshll.u32 %v23479_v33, 16  ;;  %25811 = vst [vmem:[#allocation32_spill] sm:$0xff] %v23539_v11  ;;  %v23567_v11 = vld [vmem:[#allocation2 + $0xd4] sm:$0xf] }
 0x499   : > { %v23453_v21 = vpop.f32.mrf.mxu1  ;;  %v23456_v27 = vadd.f32 %v7779_v23, %v23300_v43  ;;  %17987 = vmatpush3.bf16.msra.mxu0 %v19116_v61  ;;  %v23499_v23 = vld [vmem:[#allocation2 + $0xb0] sm:$0xf]  ;;  %25819 = vst [vmem:[#allocation4_spill] sm:$0xff] %v23567_v11  ;;  %v25826_v11 = vld [vmem:[#allocation17_spill] sm:$0xff] }
 0x49a   : > { %v17571_v57 = vpop.f32.mrf.mxu0  ;;  %17988 = vmatprep.subr.bf16.mxu0 %v25726_v62  ;;  %25803 = vst [vmem:[#allocation29_spill] sm:$0xff] %v23499_v23 }
 0x49b   : > { %v17519_v16 = vpop.f32.mrf.mxu1 }
 0x49c   : > { %v7784_v36 = vpop.f32.mrf.mxu0  ;;  %17853 = vmatmul.mubr.bf16.gmra.mxu0 %v9281_v38  ;;  %v25804_v16 = vld [vmem:[#allocation16_spill] sm:$0xff]  ;;  %v25805_v38 = vld [vmem:[#allocation14_spill] sm:$0xff] }
 0x49d   : > { %v23464_v4 = vpop.f32.mrf.mxu1  ;;  %v23467_v43 = vadd.f32 %v7784_v36, %v23310_v8  ;;  %17801 = vmatmul.mubr.bf16.gmra.mxu1 %v25799_v56  ;;  %17856 = vmatprep.mubr.msk.bf16.mxu0 %vm19459_vm0, %v25726_v62  ;;  %v9288_v8 = vrot.slane %v9286_v22, 1  ;;  %v25806_v22 = vcombine.low %v25804_v16, %v25805_v38  ;;  %v23513_v36 = vld [vmem:[#allocation2 + $0xa4] sm:$0xf] }
 0x49e   : > { %v17574_v44 = vpop.f32.mrf.mxu0  ;;  %17804 = vmatprep.mubr.msk.bf16.mxu1 %vm19459_vm0, %v25726_v62  ;;  %17989 = vmatpush3.bf16.msra.mxu0 %v19120_v34  ;;  %25807 = vst [vmem:[#allocation16_spill] sm:$0xff] %v23513_v36 }
 0x49f   : > { %v17522_v10 = vpop.f32.mrf.mxu1  ;;  %17990 = vmatprep.subr.bf16.mxu0 %v25726_v62  ;;  %v9289_v3 = vsel %vm1110_vm2, %v9284_v2, %v9288_v8  ;;  %v19139_v44 = vld [vmem:[%s25677_s3 + $0x1d0] sm:$0xff]   ;;  %v23525_v2 = vld [vmem:[#allocation2 + $0x40] sm:$0xff]   ;;  %v9292_v38 = vor.u32 %v9290_v48, %v9288_v8  ;;  %v23551_v8 = vld [vmem:[#allocation2 + $0xc8] sm:$0xf] }
 0x4a0   : > { %v7787_v60 = vpop.f32.mrf.mxu0  ;;  %25813 = vst [vmem:[#allocation34_spill] sm:$0xff] %v23551_v8 }
 0x4a1   : > { %v23482_v28 = vpop.f32.mrf.mxu1  ;;  %v23485_v31 = vadd.f32 %v7787_v60, %v23329_v47  ;;  %v23497_v47 = vld [vmem:[#allocation2 + $0xa8] sm:$0xf]  ;;  %v9296_v60 = vrot.slane %v9294_v63, 1 }
 0x4a2   : > { %v17575_v30 = vpop.f32.mrf.mxu0  ;;  %17991 = vmatpush3.bf16.msra.mxu0 %v19126_v9  ;;  %25802 = vst [vmem:[#allocation28_spill] sm:$0xff] %v23497_v47 }
 0x4a3   : > { %v17523_v61 = vpop.f32.mrf.mxu1  ;;  %17992 = vmatprep.subr.bf16.mxu0 %v25726_v62  ;;  %v23528_v30 = vld [vmem:[#allocation2 + $0xb8] sm:$0xf]  ;;  %v9297_v9 = vsel %vm1110_vm2, %v9292_v38, %v9296_v60 }
 0x4a4   : > { %v7792_v29 = vpop.f32.mrf.mxu0  ;;  %17857 = vmatmul.mubr.bf16.gmra.mxu0 %v9289_v3  ;;  %25809 = vst [vmem:[#allocation30_spill] sm:$0xff] %v23528_v30  ;;  %v23532_v3 = vld [vmem:[#allocation2 + $0xc0] sm:$0xf]  ;;  %v23565_v30 = vld [vmem:[#allocation2 + $0xc4] sm:$0xf] }
 0x4a5   : > { %v23503_v57 = vpop.f32.mrf.mxu1  ;;  %v23506_v34 = vadd.f32 %v7792_v29, %v23339_v37  ;;  %17805 = vmatmul.mubr.bf16.gmra.mxu1 %v25806_v22  ;;  %17860 = vmatprep.mubr.msk.bf16.mxu0 %vm19459_vm0, %v25726_v62  ;;  %v23520_v37 = vld [vmem:[#allocation2 + $0xac] sm:$0xf]  ;;  %25810 = vst [vmem:[#allocation31_spill] sm:$0xff] %v23532_v3 }
 0x4a6   : > { %v17578_v56 = vpop.f32.mrf.mxu0  ;;  %17808 = vmatprep.mubr.msk.bf16.mxu1 %vm19459_vm0, %v25726_v62  ;;  %17993 = vmatpush3.bf16.msra.mxu0 %v19132_v55  ;;  %25808 = vst [vmem:[#allocation14_spill] sm:$0xff] %v23520_v37  ;;  %v19145_v22 = vld [vmem:[%s25677_s3 + $0x1c8] sm:$0xff]  }
 0x4a7   : > { %v17526_v10 = vpop.f32.mrf.mxu1  ;;  %17994 = vmatprep.subr.bf16.mxu0 %v25726_v62  ;;  %v23544_v56 = vld [vmem:[#allocation2 + $0xbc] sm:$0xf] }
 0x4a8   : > { %v7795_v61 = vpop.f32.mrf.mxu0  ;;  %25812 = vst [vmem:[#allocation33_spill] sm:$0xff] %v23544_v56 }
 0x4a9   : > { %v23534_v29 = vpop.f32.mrf.mxu1  ;;  %v23537_v16 = vadd.f32 %v7795_v61, %v23358_v24  ;;  %v9302_v24 = vshll.u32 %v23525_v2, 16  ;;  %v23555_v61 = vld [vmem:[#allocation2 + $0xd0] sm:$0xf] }
 0x4aa   : > { %v17579_v63 = vpop.f32.mrf.mxu0  ;;  %17995 = vmatpush3.bf16.msra.mxu0 %v19139_v44  ;;  %25814 = vst [vmem:[#allocation35_spill] sm:$0xff] %v23555_v61  ;;  %v23569_v44 = vld [vmem:[#allocation2 + $0xd8] sm:$0xf]  ;;  %v23683_v61 = vld [vmem:[#allocation2 + $0x68] sm:$0xff]  }
 0x4ab   : > { %v17527_v55 = vpop.f32.mrf.mxu1  ;;  %17996 = vmatprep.subr.bf16.mxu0 %v25726_v62  ;;  %25820 = vst [vmem:[#allocation36_spill] sm:$0xff] %v23569_v44  ;;  %v9304_v56 = vrot.slane %v9302_v24, 1  ;;  %v25823_v44 = vld [vmem:[#allocation6_spill] sm:$0xff] }
 0x4ac   : > { %v7800_v48 = vpop.f32.mrf.mxu0  ;;  %17861 = vmatmul.mubr.bf16.gmra.mxu0 %v9297_v9  ;;  %v25815_v55 = vld [vmem:[#allocation15_spill] sm:$0xff]  ;;  %25838 = vst [vmem:[#allocation6_spill] sm:$0xff] %v23827_v59 }
 0x4ad   : > { %v23558_v63 = vadd.f32 %v7800_v48, %v23369_v0  ;;  %v8194_v10 = vpop.f32.mrf.mxu1  ;;  %v25817_v38 = vcombine.low %v25815_v55, %v25816_v51  ;;  %17864 = vmatprep.mubr.msk.bf16.mxu0 %vm19459_vm0, %v25726_v62  ;;  %25818 = vst [vmem:[#allocation15_spill] sm:$0xff] %v23565_v30  ;;  %v19151_v0 = vld [vmem:[%s25677_s3 + $0x1c0] sm:$0xff]   ;;  %v23579_v51 = vld [vmem:[#allocation2 + $0xcc] sm:$0xf] }
 0x4ae   : > { %v23572_v9 = vadd.f32 %v8194_v10, %v23282_v42  ;;  %v17582_v3 = vpop.f32.mrf.mxu0  ;;  %17997 = vmatpush3.bf16.msra.mxu0 %v19145_v22  ;;  %25821 = vst [vmem:[#allocation37_spill] sm:$0xff] %v23579_v51  ;;  %v19124_v42 = vld [vmem:[#allocation2 + $0x48] sm:$0xff]  }
 0x4af   : > { %17809 = vmatmul.mubr.bf16.gmra.mxu1 %v25817_v38  ;;  %v17622_v55 = vpop.f32.mrf.mxu1  ;;  %v9298_v38 = vshrl.u32 %v23479_v33, 16  ;;  %17998 = vmatprep.subr.bf16.mxu0 %v25726_v62  ;;  %v9310_v8 = vshll.u32 %v19124_v42, 16 }
 0x4b0   : > { %17812 = vmatprep.mubr.msk.bf16.mxu1 %vm19459_vm0, %v25726_v62  ;;  %v7803_v22 = vpop.f32.mrf.mxu0 }
 0x4b1   : > { %v23590_v23 = vadd.f32 %v7803_v22, %v23385_v25  ;;  %v8197_v37 = vpop.f32.mrf.mxu1  ;;  %v9300_v47 = vor.u32 %v9298_v38, %v9296_v60  ;;  %v25822_v22 = vld [vmem:[#allocation3_spill] sm:$0xff] }
 0x4b2   : > { %v23593_v55 = vadd.f32 %v8197_v37, %v23303_v35  ;;  %v17583_v33 = vpop.f32.mrf.mxu0  ;;  %17999 = vmatpush3.bf16.msra.mxu0 %v19151_v0  ;;  %v25824_v60 = vcombine.low %v25822_v22, %v25823_v44  ;;  %v9306_v0 = vshrl.u32 %v23525_v2, 16 }
 0x4b3   : > { %v17623_v24 = vpop.f32.mrf.mxu1  ;;  %v9305_v48 = vsel %vm1110_vm2, %v9300_v47, %v9304_v56  ;;  %18136 = vmatprep.subr.bf16.mxu0 %v25726_v62 }
 0x4b4   : > { %v7808_v3 = vpop.f32.mrf.mxu0  ;;  %17865 = vmatmul.mubr.bf16.gmra.mxu0 %v9305_v48  ;;  %v19128_v48 = vld [vmem:[#allocation2 + $0x50] sm:$0xff]   ;;  %v9308_v33 = vor.u32 %v9306_v0, %v9304_v56 }
 0x4b5   : > { %v23598_v10 = vadd.f32 %v7808_v3, %v23393_v17  ;;  %v8202_v25 = vpop.f32.mrf.mxu1  ;;  %17868 = vmatprep.mubr.msk.bf16.mxu0 %vm19459_vm0, %v25726_v62  ;;  %v9312_v17 = vrot.slane %v9310_v8, 1 }
 0x4b6   : > { %v23606_v35 = vadd.f32 %v8202_v25, %v23313_v40  ;;  %v17586_v47 = vpop.f32.mrf.mxu0 }
 0x4b7   : > { %17813 = vmatmul.mubr.bf16.gmra.mxu1 %v25824_v60  ;;  %v17626_v37 = vpop.f32.mrf.mxu1  ;;  %v9313_v22 = vsel %vm1110_vm2, %v9308_v33, %v9312_v17  ;;  %v9318_v60 = vshll.u32 %v19128_v48, 16 }
 0x4b8   : > { %17816 = vmatprep.mubr.msk.bf16.mxu1 %vm19459_vm0, %v25726_v62  ;;  %v7811_v38 = vpop.f32.mrf.mxu0  ;;  %v25825_v37 = vld [vmem:[#allocation7_spill] sm:$0xff] }
 0x4b9   : > { %v23612_v3 = vadd.f32 %v7811_v38, %v23405_v7  ;;  %v8205_v44 = vpop.f32.mrf.mxu1  ;;  %v25827_v7 = vcombine.low %v25825_v37, %v25826_v11  ;;  %v9314_v38 = vshrl.u32 %v19124_v42, 16 }
 0x4ba   : > { %v23615_v24 = vadd.f32 %v8205_v44, %v23332_v20  ;;  %v17587_v40 = vpop.f32.mrf.mxu0  ;;  %v9320_v44 = vrot.slane %v9318_v60, 1 }
 0x4bb   : > { %v17627_v25 = vpop.f32.mrf.mxu1 }
 0x4bc   : > { %v7816_v47 = vpop.f32.mrf.mxu0  ;;  %17869 = vmatmul.mubr.bf16.gmra.mxu0 %v9313_v22  ;;  %v9316_v25 = vor.u32 %v9314_v38, %v9312_v17 }
 0x4bd   : > { %v23619_v2 = vadd.f32 %v7816_v47, %v23411_v14  ;;  %v8210_v8 = vpop.f32.mrf.mxu1  ;;  %17872 = vmatprep.mubr.msk.bf16.mxu0 %vm19459_vm0, %v25726_v62  ;;  %v19130_v14 = vld [vmem:[#allocation2 + $0x58] sm:$0xff]  }
 0x4be   : > { %v23627_v20 = vadd.f32 %v8210_v8, %v23342_v13  ;;  %v17590_v56 = vpop.f32.mrf.mxu0  ;;  %v9321_v8 = vsel %vm1110_vm2, %v9316_v25, %v9320_v44  ;;  %v9326_v37 = vshll.u32 %v19130_v14, 16 }
 0x4bf   : > { %17817 = vmatmul.mubr.bf16.gmra.mxu1 %v25827_v7  ;;  %v17630_v0 = vpop.f32.mrf.mxu1  ;;  %v25828_v56 = vld [vmem:[#allocation18_spill] sm:$0xff] }
 0x4c0   : > { %17820 = vmatprep.mubr.msk.bf16.mxu1 %vm19459_vm0, %v25726_v62  ;;  %v7819_v33 = vpop.f32.mrf.mxu0  ;;  %v25829_v0 = vld [vmem:[#allocation19_spill] sm:$0xff] }
 0x4c1   : > { %v23632_v40 = vadd.f32 %v7819_v33, %v23426_v18  ;;  %v8213_v11 = vpop.f32.mrf.mxu1  ;;  %v25830_v18 = vcombine.low %v25828_v56, %v25829_v0  ;;  %v9322_v33 = vshrl.u32 %v19128_v48, 16  ;;  %v23658_v56 = vld [vmem:[#allocation2 + $0x2c] sm:$0xf] }
 0x4c2   : > { %v23635_v22 = vadd.f32 %v8213_v11, %v23361_v19  ;;  %v17591_v47 = vpop.f32.mrf.mxu0  ;;  %v9328_v11 = vrot.slane %v9326_v37, 1 }
 0x4c3   : > { %v17631_v13 = vpop.f32.mrf.mxu1 }
 0x4c4   : > { %v7824_v7 = vpop.f32.mrf.mxu0  ;;  %17873 = vmatmul.mubr.bf16.gmra.mxu0 %v9321_v8  ;;  %v9324_v8 = vor.u32 %v9322_v33, %v9320_v44 }
 0x4c5   : > { %v23639_v42 = vadd.f32 %v7824_v7, %v23435_v12  ;;  %v8218_v60 = vpop.f32.mrf.mxu1  ;;  %17876 = vmatprep.mubr.msk.bf16.mxu0 %vm19459_vm0, %v25726_v62  ;;  %v23651_v12 = vld [vmem:[#allocation2 + $0x60] sm:$0xff]   ;;  %v23656_v7 = vld [vmem:[#allocation2 + $0x28] sm:$0xf] }
 0x4c6   : > { %v23647_v19 = vadd.f32 %v8218_v60, %v23372_v41  ;;  %v17594_v17 = vpop.f32.mrf.mxu0  ;;  %v9329_v48 = vsel %vm1110_vm2, %v9324_v8, %v9328_v11  ;;  %v9334_v37 = vshll.u32 %v23651_v12, 16  ;;  %v14856_v44 = vcombine.low %v23656_v7, %v23658_v56 }
 0x4c7   : > { %17821 = vmatmul.mubr.bf16.gmra.mxu1 %v25830_v18  ;;  %v17634_v38 = vpop.f32.mrf.mxu1  ;;  %v9632_v18 = vld [vmem:[#allocation2 + $0x20] sm:$0x8]  ;;  %v23665_v17 = vld [vmem:[#allocation2 + $0x24] sm:$0xf] }
 0x4c8   : > { %17824 = vmatprep.mubr.msk.bf16.mxu1 %vm19459_vm0, %v25726_v62  ;;  %v7827_v25 = vpop.f32.mrf.mxu0 }
 0x4c9   : > { %v23654_v47 = vadd.f32 %v7827_v25, %v23453_v21  ;;  %v8221_v13 = vpop.f32.mrf.mxu1  ;;  %v25832_v25 = vld [vmem:[#allocation21_spill] sm:$0xff] }
 0x4ca   : > { %v23661_v41 = vadd.f32 %v8221_v13, %v23388_v53  ;;  %v17595_v60 = vpop.f32.mrf.mxu0  ;;  %v25831_v53 = vld [vmem:[#allocation20_spill] sm:$0xff] }
 0x4cb   : > { %v17635_v0 = vpop.f32.mrf.mxu1  ;;  %v25833_v13 = vcombine.low %v25831_v53, %v25832_v25  ;;  %v9767_v53 = vshrl.u32 %v14856_v44, 16  ;;  %v9770_v25 = vshll.u32 %v14856_v44, 16  ;;  %v9342_v44 = vshll.u32 %v23683_v61, 16 }
 0x4cc   : > { %v7832_v21 = vpop.f32.mrf.mxu0  ;;  %17877 = vmatmul.mubr.bf16.gmra.mxu0 %v9329_v48  ;;  %v14855_v0 = vcombine.low %v9632_v18, %v23665_v17 }
 0x4cd   : > { %v23670_v38 = vadd.f32 %v7832_v21, %v23464_v4  ;;  %v8226_v33 = vpop.f32.mrf.mxu1  ;;  %17880 = vmatprep.mubr.msk.bf16.mxu0 %vm19459_vm0, %v25726_v62  ;;  %v9330_v4 = vshrl.u32 %v19130_v14, 16  ;;  %v9336_v21 = vrot.slane %v9334_v37, 1 }
 0x4ce   : > { %v23678_v8 = vadd.f32 %v8226_v33, %v23396_v54  ;;  %v17598_v60 = vpop.f32.mrf.mxu0  ;;  %v23688_v33 = vld [vmem:[#allocation2 + $0x30] sm:$0xf]  ;;  %v9759_v14 = vshrl.u32 %v14855_v0, 16  ;;  %v9762_v37 = vshll.u32 %v14855_v0, 16 }
 0x4cf   : > { %17825 = vmatmul.mubr.bf16.gmra.mxu1 %v25833_v13  ;;  %v17638_v48 = vpop.f32.mrf.mxu1  ;;  %v9332_v54 = vor.u32 %v9330_v4, %v9328_v11  ;;  %v23690_v60 = vld [vmem:[#allocation2 + $0x34] sm:$0xf] }
 0x4d0   : > { %17828 = vmatprep.mubr.msk.bf16.mxu1 %vm19459_vm0, %v25726_v62  ;;  %v7835_v51 = vpop.f32.mrf.mxu0  ;;  %v14857_v11 = vcombine.low %v23688_v33, %v23690_v60 }
 0x4d1   : > { %v23686_v13 = vadd.f32 %v7835_v51, %v23482_v28  ;;  %v8229_v30 = vpop.f32.mrf.mxu1  ;;  %v9337_v5 = vsel %vm1110_vm2, %v9332_v54, %v9336_v21  ;;  %v9769_v28 = vrot.slane %v9767_v53, 3  ;;  %v9772_v51 = vrot.slane %v9770_v25, 4 }
 0x4d2   : > { %v23693_v36 = vadd.f32 %v8229_v30, %v23408_v58  ;;  %v17599_v18 = vpop.f32.mrf.mxu0  ;;  %v25834_v30 = vld [vmem:[#allocation22_spill] sm:$0xff]  ;;  %v9761_v53 = vrot.slane %v9759_v14, 3  ;;  %v9764_v25 = vrot.slane %v9762_v37, 4  ;;  %v9779_v1 = vshll.u32 %v14857_v11, 16 }
 0x4d3   : > { %v17639_v48 = vpop.f32.mrf.mxu1  ;;  %v25835_v18 = vld [vmem:[#allocation23_spill] sm:$0xff] }
 0x4d4   : > { %v7840_v49 = vpop.f32.mrf.mxu0  ;;  %17881 = vmatmul.mubr.bf16.gmra.mxu0 %v9337_v5  ;;  %v25836_v39 = vcombine.low %v25834_v30, %v25835_v18  ;;  %v23713_v48 = vld [vmem:[#allocation2 + $0x70] sm:$0xff]   ;;  %v9776_v18 = vshrl.u32 %v14857_v11, 16  ;;  %v9765_v37 = vor.u32 %v9764_v25, %v9761_v53 }
 0x4d5   : > { %v23700_v4 = vadd.f32 %v7840_v49, %v23503_v57  ;;  %v8234_v58 = vpop.f32.mrf.mxu1  ;;  %17884 = vmatprep.mubr.msk.bf16.mxu0 %vm19459_vm0, %v25726_v62  ;;  %v9338_v49 = vshrl.u32 %v23651_v12, 16  ;;  %v9344_v57 = vrot.slane %v9342_v44, 1  ;;  %v19138_v44 = vld [vmem:[%s25677_s3 + $0x238] sm:$0xff]  }
 0x4d6   : > { %v23708_v0 = vadd.f32 %v8234_v58, %v23414_v32  ;;  %v17602_v5 = vpop.f32.mrf.mxu0 }
 0x4d7   : > { %17829 = vmatmul.mubr.bf16.gmra.mxu1 %v25836_v39  ;;  %v17642_v54 = vpop.f32.mrf.mxu1  ;;  %v9773_v39 = vor.u32 %v9772_v51, %v9769_v28  ;;  %v9340_v58 = vor.u32 %v9338_v49, %v9336_v21  ;;  %v23718_v5 = vld [vmem:[#allocation2 + $0x38] sm:$0xf]  ;;  %v9781_v49 = vrot.slane %v9779_v1, 4  ;;  %v19144_v1 = vld [vmem:[%s25677_s3 + $0x230] sm:$0xff]  }
 0x4d8   : > { %17924 = vmatprep.mubr.msk.bf16.mxu1 %vm19459_vm0, %v25726_v62  ;;  %v7843_v30 = vpop.f32.mrf.mxu0  ;;  %v9778_v54 = vrot.slane %v9776_v18, 3 }
 0x4d9   : > { %v23716_v26 = vadd.f32 %v7843_v30, %v23534_v29  ;;  %v8237_v32 = vpop.f32.mrf.mxu1  ;;  %v9345_v51 = vsel %vm1110_vm2, %v9340_v58, %v9344_v57  ;;  %v9350_v29 = vshll.u32 %v23713_v48, 16  ;;  %v9774_v21 = vsel %vm624_vm1, %v9765_v37, %v9773_v39 }
 0x4da   : > { %v23723_v14 = vadd.f32 %v8237_v32, %v23429_v15  ;;  %v17603_v12 = vpop.f32.mrf.mxu0  ;;  %v14858_v15 = vcombine.low %v23718_v5, %v23720_v46 }
 0x4db   : > { %v17643_v28 = vpop.f32.mrf.mxu1  ;;  %v9352_v58 = vrot.slane %v9350_v29, 1  ;;  %v23747_v12 = vld [vmem:[#allocation2 + $0x78] sm:$0xff]  }
 0x4dc   : > { %v8709_v11 = vpop.f32.mrf.mxu0  ;;  %17885 = vmatmul.mubr.bf16.gmra.mxu0 %v9345_v51  ;;  %v9785_v28 = vshrl.u32 %v14858_v15, 16  ;;  %v9788_v51 = vshll.u32 %v14858_v15, 16 }
 0x4dd   : > { %v8242_v30 = vpop.f32.mrf.mxu1  ;;  %v23734_v53 = vadd.f32 %v8709_v11, %v23572_v9  ;;  %17888 = vmatprep.mubr.msk.bf16.mxu0 %vm19459_vm0, %v25726_v62  ;;  %v9346_v9 = vshrl.u32 %v23683_v61, 16 }
 0x4de   : > { %v23739_v25 = vadd.f32 %v8242_v30, %v23438_v52  ;;  %v17698_v32 = vpop.f32.mrf.mxu0  ;;  %v9782_v52 = vor.u32 %v9781_v49, %v9778_v54  ;;  %v23753_v30 = vld [vmem:[#allocation2 + $0x40] sm:$0xf]  ;;  %v19150_v54 = vld [vmem:[%s25677_s3 + $0x228] sm:$0xff]  }
 0x4df   : > { %17925 = vmatmul.mubr.bf16.vlgmr.msra.gmra.mxu1 %v9774_v21  ;;  %v17646_v18 = vpop.f32.mrf.mxu1  ;;  %v9348_v21 = vor.u32 %v9346_v9, %v9344_v57  ;;  %v23755_v32 = vld [vmem:[#allocation2 + $0x44] sm:$0xf]  ;;  %v9787_v9 = vrot.slane %v9785_v28, 3 }
 0x4e0   : > { %18061 = vmatpush3.bf16.msra.mxu1 %v19138_v44  ;;  %17928 = vmatprep.mubr.msk.bf16.mxu1 %vm19459_vm0, %v25726_v62  ;;  %v8712_v37 = vpop.f32.mrf.mxu0  ;;  %v9783_v18 = vsel %vm624_vm1, %v9773_v39, %v9782_v52  ;;  %v19156_v39 = vld [vmem:[%s25677_s3 + $0x220] sm:$0xff]  }
 0x4e1   : > { %18062 = vmatprep.subr.bf16.mxu1 %v25726_v62  ;;  %v8245_v44 = vpop.f32.mrf.mxu1  ;;  %v23751_v11 = vadd.f32 %v8712_v37, %v23593_v55  ;;  %v9353_v15 = vsel %vm1110_vm2, %v9348_v21, %v9352_v58  ;;  %v9358_v55 = vshll.u32 %v23747_v12, 16 }
 0x4e2   : > { %v23758_v61 = vadd.f32 %v8245_v44, %v23456_v27  ;;  %v17699_v29 = vpop.f32.mrf.mxu0  ;;  %v9790_v27 = vrot.slane %v9788_v51, 4 }
 0x4e3   : > { %v17647_v49 = vpop.f32.mrf.mxu1  ;;  %v9360_v51 = vrot.slane %v9358_v55, 1 }
 0x4e4   : > { %18063 = vmatpush3.bf16.msra.mxu1 %v19144_v1  ;;  %v8717_v57 = vpop.f32.mrf.mxu0  ;;  %17889 = vmatmul.mubr.bf16.gmra.mxu0 %v9353_v15  ;;  %v14859_v1 = vcombine.low %v23753_v30, %v23755_v32  ;;  %v23783_v49 = vld [vmem:[#allocation2 + $0x80] sm:$0xff]  }
 0x4e5   : > { %18064 = vmatprep.subr.bf16.mxu1 %v25726_v62  ;;  %v8250_v37 = vpop.f32.mrf.mxu1  ;;  %v23770_v44 = vadd.f32 %v8717_v57, %v23606_v35  ;;  %17892 = vmatprep.mubr.msk.bf16.mxu0 %vm19459_vm0, %v25726_v62  ;;  %v9354_v35 = vshrl.u32 %v23713_v48, 16 }
 0x4e6   : > { %v23775_v21 = vadd.f32 %v8250_v37, %v23467_v43  ;;  %v17702_v29 = vpop.f32.mrf.mxu0  ;;  %v9791_v43 = vor.u32 %v9790_v27, %v9787_v9  ;;  %v9794_v57 = vshrl.u32 %v14859_v1, 16  ;;  %v19160_v9 = vld [vmem:[%s25677_s3 + $0x218] sm:$0xff]  }
 0x4e7   : > { %17929 = vmatmul.mubr.bf16.gmra.mxu1 %v9783_v18  ;;  %v17650_v28 = vpop.f32.mrf.mxu1  ;;  %v9797_v18 = vshll.u32 %v14859_v1, 16 }
 0x4e8   : > { %17932 = vmatprep.mubr.msk.bf16.mxu1 %vm19459_vm0, %v25726_v62  ;;  %18065 = vmatpush3.bf16.msra.mxu1 %v19150_v54  ;;  %v8720_v15 = vpop.f32.mrf.mxu0  ;;  %v9356_v54 = vor.u32 %v9354_v35, %v9352_v58  ;;  %v9792_v28 = vsel %vm624_vm1, %v9782_v52, %v9791_v43  ;;  %v9796_v35 = vrot.slane %v9794_v57, 3  ;;  %v19166_v52 = vld [vmem:[%s25677_s3 + $0x210] sm:$0xff]  }
 0x4e9   : > { %18066 = vmatprep.subr.bf16.mxu1 %v25726_v62  ;;  %v8253_v37 = vpop.f32.mrf.mxu1  ;;  %v23787_v29 = vadd.f32 %v8720_v15, %v23615_v24  ;;  %v9366_v24 = vshll.u32 %v23783_v49, 16 }
 0x4ea   : > { %v23794_v48 = vadd.f32 %v8253_v37, %v23485_v31  ;;  %v17703_v55 = vpop.f32.mrf.mxu0  ;;  %v9361_v1 = vsel %vm1110_vm2, %v9356_v54, %v9360_v51  ;;  %v9799_v31 = vrot.slane %v9797_v18, 4 }
 0x4eb   : > { %v17651_v27 = vpop.f32.mrf.mxu1  ;;  %v9368_v18 = vrot.slane %v9366_v24, 1 }
 0x4ec   : > { %18067 = vmatpush3.bf16.msra.mxu1 %v19156_v39  ;;  %v8725_v58 = vpop.f32.mrf.mxu0  ;;  %17893 = vmatmul.mubr.bf16.gmra.mxu0 %v9361_v1  ;;  %v14860_v39 = vcombine.low %v23789_v45, %v23791_v6  ;;  %v23819_v27 = vld [vmem:[#allocation2 + $0x88] sm:$0xff]  }
 0x4ed   : > { %18068 = vmatprep.subr.bf16.mxu1 %v25726_v62  ;;  %v8258_v15 = vpop.f32.mrf.mxu1  ;;  %v23806_v37 = vadd.f32 %v8725_v58, %v23627_v20  ;;  %17896 = vmatprep.mubr.msk.bf16.mxu0 %vm19459_vm0, %v25726_v62  ;;  %v9362_v20 = vshrl.u32 %v23747_v12, 16 }
 0x4ee   : > { %v23811_v54 = vadd.f32 %v8258_v15, %v23506_v34  ;;  %v17706_v55 = vpop.f32.mrf.mxu0  ;;  %v9800_v34 = vor.u32 %v9799_v31, %v9796_v35  ;;  %v9803_v58 = vshrl.u32 %v14860_v39, 16  ;;  %v19172_v35 = vld [vmem:[%s25677_s3 + $0x208] sm:$0xff]  }
 0x4ef   : > { %17933 = vmatmul.mubr.bf16.gmra.mxu1 %v9792_v28  ;;  %v17654_v57 = vpop.f32.mrf.mxu1  ;;  %v9806_v28 = vshll.u32 %v14860_v39, 16 }
 0x4f0   : > { %17936 = vmatprep.mubr.msk.bf16.mxu1 %vm19459_vm0, %v25726_v62  ;;  %18069 = vmatpush3.bf16.msra.mxu1 %v19160_v9  ;;  %v8728_v1 = vpop.f32.mrf.mxu0  ;;  %v9364_v9 = vor.u32 %v9362_v20, %v9360_v51  ;;  %v9801_v57 = vsel %vm624_vm1, %v9791_v43, %v9800_v34  ;;  %v9805_v20 = vrot.slane %v9803_v58, 3  ;;  %v19178_v43 = vld [vmem:[%s25677_s3 + $0x200] sm:$0xff]  }
 0x4f1   : > { %18070 = vmatprep.subr.bf16.mxu1 %v25726_v62  ;;  %v8261_v15 = vpop.f32.mrf.mxu1  ;;  %v23823_v55 = vadd.f32 %v8728_v1, %v23635_v22  ;;  %v9374_v22 = vshll.u32 %v23819_v27, 16 }
 0x4f2   : > { %v23830_v12 = vadd.f32 %v8261_v15, %v23537_v16  ;;  %v17707_v24 = vpop.f32.mrf.mxu0  ;;  %v9369_v39 = vsel %vm1110_vm2, %v9364_v9, %v9368_v18  ;;  %v9808_v16 = vrot.slane %v9806_v28, 4 }
 0x4f3   : > { %25837 = vst [vmem:[#allocation3_spill] sm:$0xff] %v23823_v55  ;;  %v17655_v31 = vpop.f32.mrf.mxu1  ;;  %v9376_v28 = vrot.slane %v9374_v22, 1 }
 0x4f4   : > { %18071 = vmatpush3.bf16.msra.mxu1 %v19166_v52  ;;  %v8733_v51 = vpop.f32.mrf.mxu0  ;;  %17897 = vmatmul.mubr.bf16.gmra.mxu0 %v9369_v39  ;;  %v14861_v52 = vcombine.low %v23825_v50, %v23827_v59  ;;  %v19152_v31 = vld [vmem:[#allocation2 + $0x90] ss:$0 sps:$4 sm:$0x11]   ;;  %v23861_v59 = vld [vmem:[#allocation2 + $0x5c] sm:$0xf] }
 0x4f5   : > { %18072 = vmatprep.subr.bf16.mxu1 %v25726_v62  ;;  %v8266_v1 = vpop.f32.mrf.mxu1  ;;  %v23842_v15 = vadd.f32 %v8733_v51, %v23647_v19  ;;  %17900 = vmatprep.mubr.msk.bf16.mxu0 %vm19459_vm0, %v25726_v62  ;;  %v9370_v19 = vshrl.u32 %v23783_v49, 16  ;;  %v9809_v51 = vor.u32 %v9808_v16, %v9805_v20  ;;  %v9382_v20 = vshll.u32 %v19152_v31, 16 }
 0x4f6   : > { %v23847_v9 = vadd.f32 %v8266_v1, %v23558_v63  ;;  %v17710_v24 = vpop.f32.mrf.mxu0  ;;  %v9812_v63 = vshrl.u32 %v14861_v52, 16 }
 0x4f7   : > { %25839 = vst [vmem:[#allocation7_spill] sm:$0xff] %v23842_v15  ;;  %17937 = vmatmul.mubr.bf16.gmra.mxu1 %v9801_v57  ;;  %v17658_v58 = vpop.f32.mrf.mxu1  ;;  %v9815_v57 = vshll.u32 %v14861_v52, 16  ;;  %v23859_v15 = vld [vmem:[#allocation2 + $0x58] sm:$0xf] }
 0x4f8   : > { %17940 = vmatprep.mubr.msk.bf16.mxu1 %vm19459_vm0, %v25726_v62  ;;  %18073 = vmatpush3.bf16.msra.mxu1 %v19172_v35  ;;  %v8736_v39 = vpop.f32.mrf.mxu0  ;;  %v9372_v35 = vor.u32 %v9370_v19, %v9368_v18  ;;  %v9814_v18 = vrot.slane %v9812_v63, 3  ;;  %v14862_v19 = vcombine.low %v23859_v15, %v23861_v59  ;;  %v9384_v63 = vrot.slane %v9382_v20, 1 }
 0x4f9   : > { %18074 = vmatprep.subr.bf16.mxu1 %v25726_v62  ;;  %v8269_v1 = vpop.f32.mrf.mxu1  ;;  %v23857_v24 = vadd.f32 %v8736_v39, %v23661_v41  ;;  %v9810_v41 = vsel %vm624_vm1, %v9800_v34, %v9809_v51  ;;  %v9817_v52 = vrot.slane %v9815_v57, 4 }
 0x4fa   : > { %v23864_v58 = vadd.f32 %v8269_v1, %v23590_v23  ;;  %v17711_v49 = vpop.f32.mrf.mxu0  ;;  %v9377_v55 = vsel %vm1110_vm2, %v9372_v35, %v9376_v28  ;;  %v9821_v35 = vshrl.u32 %v14862_v19, 16 }
 0x4fb   : > { %v17659_v22 = vpop.f32.mrf.mxu1  ;;  %v9818_v1 = vor.u32 %v9817_v52, %v9814_v18 }
 0x4fc   : > { %18075 = vmatpush3.bf16.msra.mxu1 %v19178_v43  ;;  %v8741_v16 = vpop.f32.mrf.mxu0  ;;  %17901 = vmatmul.mubr.bf16.gmra.mxu0 %v9377_v55  ;;  %v9378_v55 = vshrl.u32 %v23819_v27, 16  ;;  %v9823_v52 = vrot.slane %v9821_v35, 3 }
 0x4fd   : > { %18240 = vmatprep.subr.bf16.mxu1 %v25726_v62  ;;  %v8274_v39 = vpop.f32.mrf.mxu1  ;;  %v23872_v23 = vadd.f32 %v8741_v16, %v23678_v8  ;;  %17904 = vmatprep.mubr.msk.bf16.mxu0 %vm19459_vm0, %v25726_v62  ;;  %v9824_v8 = vshll.u32 %v14862_v19, 16  ;;  %v9819_v18 = vsel %vm624_vm1, %v9809_v51, %v9818_v1 }
 0x4fe   : > { %v23877_v43 = vadd.f32 %v8274_v39, %v23598_v10  ;;  %v17714_v31 = vpop.f32.mrf.mxu0  ;;  %v9380_v16 = vor.u32 %v9378_v55, %v9376_v28  ;;  %v23887_v10 = vld [vmem:[#allocation2 + $0x64] sm:$0xf] }
 0x4ff   : > { %17941 = vmatmul.mubr.bf16.gmra.mxu1 %v9810_v41  ;;  %v17662_v34 = vpop.f32.mrf.mxu1  ;;  %v23885_v41 = vld [vmem:[#allocation2 + $0x60] sm:$0xf]  ;;  %v9826_v19 = vrot.slane %v9824_v8, 4 }
 0x500   : > { %17944 = vmatprep.mubr.msk.bf16.mxu1 %vm19459_vm0, %v25726_v62  ;;  %v8744_v57 = vpop.f32.mrf.mxu0  ;;  %v9385_v27 = vsel %vm1110_vm2, %v9380_v16, %v9384_v63 }
 0x501   : > { %v8277_v49 = vpop.f32.mrf.mxu1  ;;  %v23883_v22 = vadd.f32 %v8744_v57, %v23693_v36  ;;  %v14863_v36 = vcombine.low %v23885_v41, %v23887_v10  ;;  %v9827_v35 = vor.u32 %v9826_v19, %v9823_v52 }
 0x502   : > { %v23890_v39 = vadd.f32 %v8277_v49, %v23612_v3  ;;  %v17715_v31 = vpop.f32.mrf.mxu0 }
 0x503   : > { %v17663_v34 = vpop.f32.mrf.mxu1  ;;  %v9830_v8 = vshrl.u32 %v14863_v36, 16  ;;  %v9833_v49 = vshll.u32 %v14863_v36, 16  ;;  %v19157_v31 = vld [vmem:[%s25677_s3 + $0x78] sm:$0xff]  }
 0x504   : > { %v8749_v20 = vpop.f32.mrf.mxu0  ;;  %17905 = vmatmul.mubr.bf16.gmra.mxu0 %v9385_v27  ;;  %v23912_v34 = vld [vmem:[#allocation2 + $0x68] sm:$0xf] }
 0x505   : > { %v8282_v28 = vpop.f32.mrf.mxu1  ;;  %v23897_v55 = vadd.f32 %v8749_v20, %v23708_v0  ;;  %18000 = vmatprep.mubr.msk.bf16.mxu0 %vm19459_vm0, %v25726_v62  ;;  %v9832_v36 = vrot.slane %v9830_v8, 3 }
 0x506   : > { %v23902_v3 = vadd.f32 %v8282_v28, %v23619_v2  ;;  %v17718_v63 = vpop.f32.mrf.mxu0  ;;  %v23914_v2 = vld [vmem:[#allocation2 + $0x6c] sm:$0xf]  ;;  %v9835_v28 = vrot.slane %v9833_v49, 4 }
 0x507   : > { %17945 = vmatmul.mubr.bf16.gmra.mxu1 %v9819_v18  ;;  %v17666_v51 = vpop.f32.mrf.mxu1  ;;  %v14895_v18 = vcombine.low %v23665_v17, %v23656_v7  ;;  %v14864_v63 = vcombine.low %v23912_v34, %v23914_v2 }
 0x508   : > { %17948 = vmatprep.mubr.msk.bf16.mxu1 %vm19459_vm0, %v25726_v62  ;;  %v8752_v57 = vpop.f32.mrf.mxu0  ;;  %v9836_v8 = vor.u32 %v9835_v28, %v9832_v36  ;;  %v19167_v36 = vld [vmem:[%s25677_s3 + $0x68] sm:$0xff]  }
 0x509   : > { %v8285_v16 = vpop.f32.mrf.mxu1  ;;  %v23907_v0 = vadd.f32 %v8752_v57, %v23723_v14  ;;  %v9828_v14 = vsel %vm624_vm1, %v9818_v1, %v9827_v35  ;;  %v9839_v49 = vshrl.u32 %v14864_v63, 16 }
 0x50a   : > { %v23917_v27 = vadd.f32 %v8285_v16, %v23632_v40  ;;  %v17719_v20 = vpop.f32.mrf.mxu0  ;;  %v19163_v40 = vld [vmem:[%s25677_s3 + $0x70] sm:$0xff]   ;;  %v9842_v16 = vshll.u32 %v14864_v63, 16  ;;  %v9837_v63 = vsel %vm624_vm1, %v9827_v35, %v9836_v8  ;;  %v19173_v35 = vld [vmem:[%s25677_s3 + $0x60] sm:$0xff]  }
 0x50b   : > { %v17667_v52 = vpop.f32.mrf.mxu1 }
 0x50c   : > { %v8757_v19 = vpop.f32.mrf.mxu0  ;;  %18001 = vmatmul.mubr.bf16.vlgmr.msra.gmra.mxu0 %v14895_v18  ;;  %v23943_v18 = vld [vmem:[#allocation2 + $0x74] sm:$0xf] }
 0x50d   : > { %v8290_v51 = vpop.f32.mrf.mxu1  ;;  %v23925_v57 = vadd.f32 %v8757_v19, %v23739_v25  ;;  %18137 = vmatpush3.bf16.msra.mxu0 %v19157_v31  ;;  %18004 = vmatprep.mubr.msk.bf16.mxu0 %vm19459_vm0, %v25726_v62 }
 0x50e   : > { %v23931_v7 = vadd.f32 %v8290_v51, %v23639_v42  ;;  %v17722_v17 = vpop.f32.mrf.mxu0  ;;  %18138 = vmatprep.subr.bf16.mxu0 %v25726_v62  ;;  %v23941_v42 = vld [vmem:[#allocation2 + $0x70] sm:$0xf]  ;;  %v9841_v51 = vrot.slane %v9839_v49, 3 }
 0x50f   : > { %17949 = vmatmul.mubr.bf16.gmra.mxu1 %v9828_v14  ;;  %v17670_v1 = vpop.f32.mrf.mxu1  ;;  %v14896_v14 = vcombine.low %v23658_v56, %v23688_v33 }
 0x510   : > { %17952 = vmatprep.mubr.msk.bf16.mxu1 %vm19459_vm0, %v25726_v62  ;;  %v8760_v25 = vpop.f32.mrf.mxu0 }
 0x511   : > { %v8293_v31 = vpop.f32.mrf.mxu1  ;;  %v23939_v20 = vadd.f32 %v8760_v25, %v23758_v61  ;;  %18139 = vmatpush3.bf16.msra.mxu0 %v19163_v40  ;;  %v9844_v40 = vrot.slane %v9842_v16, 4 }
 0x512   : > { %v23946_v52 = vadd.f32 %v8293_v31, %v23654_v47  ;;  %v17723_v19 = vpop.f32.mrf.mxu0  ;;  %18140 = vmatprep.subr.bf16.mxu0 %v25726_v62  ;;  %v14865_v47 = vcombine.low %v23941_v42, %v23943_v18 }
 0x513   : > { %v17671_v61 = vpop.f32.mrf.mxu1  ;;  %v9845_v49 = vor.u32 %v9844_v40, %v9841_v51  ;;  %v19179_v51 = vld [vmem:[%s25677_s3 + $0x58] sm:$0xff]  }
 0x514   : > { %v8765_v28 = vpop.f32.mrf.mxu0  ;;  %18005 = vmatmul.mubr.bf16.gmra.mxu0 %v14896_v14  ;;  %v9848_v16 = vshrl.u32 %v14865_v47, 16  ;;  %v9851_v31 = vshll.u32 %v14865_v47, 16  ;;  %v23974_v14 = vld [vmem:[#allocation2 + $0x78] sm:$0xf]  ;;  %v23976_v61 = vld [vmem:[#allocation2 + $0x7c] sm:$0xf] }
 0x515   : > { %v8298_v17 = vpop.f32.mrf.mxu1  ;;  %v23958_v1 = vadd.f32 %v8765_v28, %v23775_v21  ;;  %18008 = vmatprep.mubr.msk.bf16.mxu0 %vm19459_vm0, %v25726_v62  ;;  %18141 = vmatpush3.bf16.msra.mxu0 %v19167_v36  ;;  %v9846_v47 = vsel %vm624_vm1, %v9836_v8, %v9845_v49  ;;  %v19186_v8 = vld [vmem:[%s25677_s3 + $0x50] sm:$0xff]  }
 0x516   : > { %v23963_v56 = vadd.f32 %v8298_v17, %v23670_v38  ;;  %v17726_v33 = vpop.f32.mrf.mxu0  ;;  %18142 = vmatprep.subr.bf16.mxu0 %v25726_v62  ;;  %v9850_v17 = vrot.slane %v9848_v16, 3 }
 0x517   : > { %17953 = vmatmul.mubr.bf16.gmra.mxu1 %v9837_v63  ;;  %v17674_v25 = vpop.f32.mrf.mxu1  ;;  %v14897_v63 = vcombine.low %v23690_v60, %v23718_v5  ;;  %v9853_v33 = vrot.slane %v9851_v31, 4 }
 0x518   : > { %17956 = vmatprep.mubr.msk.bf16.mxu1 %vm19459_vm0, %v25726_v62  ;;  %v8768_v21 = vpop.f32.mrf.mxu0 }
 0x519   : > { %v8301_v19 = vpop.f32.mrf.mxu1  ;;  %v23972_v38 = vadd.f32 %v8768_v21, %v23794_v48  ;;  %18143 = vmatpush3.bf16.msra.mxu0 %v19173_v35  ;;  %v9854_v16 = vor.u32 %v9853_v33, %v9850_v17  ;;  %v19192_v17 = vld [vmem:[%s25677_s3 + $0x48] sm:$0xff]  }
 0x51a   : > { %v23979_v36 = vadd.f32 %v8301_v19, %v23686_v13  ;;  %v17727_v28 = vpop.f32.mrf.mxu0  ;;  %18144 = vmatprep.subr.bf16.mxu0 %v25726_v62  ;;  %v14866_v13 = vcombine.low %v23974_v14, %v23976_v61 }
 0x51b   : > { %v17675_v40 = vpop.f32.mrf.mxu1 }
 0x51c   : > { %v8773_v48 = vpop.f32.mrf.mxu0  ;;  %18009 = vmatmul.mubr.bf16.gmra.mxu0 %v14897_v63  ;;  %v9857_v31 = vshrl.u32 %v14866_v13, 16  ;;  %v9860_v19 = vshll.u32 %v14866_v13, 16  ;;  %v24007_v63 = vld [vmem:[#allocation2 + $0x80] sm:$0xf]  ;;  %v24009_v40 = vld [vmem:[#allocation2 + $0x84] sm:$0xf]  ;;  %v9855_v13 = vsel %vm624_vm1, %v9845_v49, %v9854_v16 }
 0x51d   : > { %v8306_v25 = vpop.f32.mrf.mxu1  ;;  %v23991_v60 = vadd.f32 %v8773_v48, %v23811_v54  ;;  %18012 = vmatprep.mubr.msk.bf16.mxu0 %vm19459_vm0, %v25726_v62  ;;  %18145 = vmatpush3.bf16.msra.mxu0 %v19179_v51  ;;  %v19198_v49 = vld [vmem:[%s25677_s3 + $0x40] sm:$0xff]  }
 0x51e   : > { %v23996_v5 = vadd.f32 %v8306_v25, %v23700_v4  ;;  %v17730_v35 = vpop.f32.mrf.mxu0  ;;  %18146 = vmatprep.subr.bf16.mxu0 %v25726_v62  ;;  %v9859_v25 = vrot.slane %v9857_v31, 3 }
 0x51f   : > { %17957 = vmatmul.mubr.bf16.gmra.mxu1 %v9846_v47  ;;  %v17678_v21 = vpop.f32.mrf.mxu1  ;;  %v14898_v47 = vcombine.low %v23720_v46, %v23753_v30  ;;  %v9862_v35 = vrot.slane %v9860_v19, 4 }
 0x520   : > { %17960 = vmatprep.mubr.msk.bf16.mxu1 %vm19459_vm0, %v25726_v62  ;;  %v8776_v54 = vpop.f32.mrf.mxu0 }
 0x521   : > { %v8309_v28 = vpop.f32.mrf.mxu1  ;;  %v24005_v4 = vadd.f32 %v8776_v54, %v23830_v12  ;;  %18147 = vmatpush3.bf16.msra.mxu0 %v19186_v8  ;;  %v9863_v31 = vor.u32 %v9862_v35, %v9859_v25 }
 0x522   : > { %v24012_v51 = vadd.f32 %v8309_v28, %v23716_v26  ;;  %v17731_v48 = vpop.f32.mrf.mxu0  ;;  %18148 = vmatprep.subr.bf16.mxu0 %v25726_v62  ;;  %v14867_v26 = vcombine.low %v24007_v63, %v24009_v40 }
 0x523   : > { %v17679_v33 = vpop.f32.mrf.mxu1 }
 0x524   : > { %v8781_v12 = vpop.f32.mrf.mxu0  ;;  %18013 = vmatmul.mubr.bf16.gmra.mxu0 %v14898_v47  ;;  %v9866_v19 = vshrl.u32 %v14867_v26, 16  ;;  %v9869_v28 = vshll.u32 %v14867_v26, 16  ;;  %v24040_v47 = vld [vmem:[#allocation2 + $0x88] sm:$0xf]  ;;  %v24042_v33 = vld [vmem:[#allocation2 + $0x8c] sm:$0xf] }
 0x525   : > { %v24024_v21 = vadd.f32 %v8781_v12, %v23847_v9  ;;  %v8987_v46 = vpop.f32.mrf.mxu1  ;;  %18016 = vmatprep.mubr.msk.bf16.mxu0 %vm19459_vm0, %v25726_v62  ;;  %18149 = vmatpush3.bf16.msra.mxu0 %v19192_v17 }
 0x526   : > { %v24029_v30 = vadd.f32 %v8987_v46, %v23734_v53  ;;  %v17734_v8 = vpop.f32.mrf.mxu0  ;;  %18150 = vmatprep.subr.bf16.mxu0 %v25726_v62  ;;  %v9868_v35 = vrot.slane %v9866_v19, 3  ;;  %v9871_v26 = vrot.slane %v9869_v28, 4 }
 0x527   : > { %17961 = vmatmul.mubr.bf16.gmra.mxu1 %v9855_v13  ;;  %v17774_v54 = vpop.f32.mrf.mxu1  ;;  %v14899_v13 = vcombine.low %v23755_v32, %v23789_v45  ;;  %v14868_v8 = vcombine.low %v24040_v47, %v24042_v33 }
 0x528   : > { %17964 = vmatprep.mubr.msk.bf16.mxu1 %vm19459_vm0, %v25726_v62  ;;  %v8784_v9 = vpop.f32.mrf.mxu0 }
 0x529   : > { %v24038_v48 = vadd.f32 %v8784_v9, %v23864_v58  ;;  %v8990_v53 = vpop.f32.mrf.mxu1  ;;  %18151 = vmatpush3.bf16.msra.mxu0 %v19198_v49  ;;  %v9864_v58 = vsel %vm624_vm1, %v9854_v16, %v9863_v31  ;;  %v9872_v9 = vor.u32 %v9871_v26, %v9868_v35  ;;  %v9875_v19 = vshrl.u32 %v14868_v8, 16 }
 0x52a   : > { %v24045_v17 = vadd.f32 %v8990_v53, %v23751_v11  ;;  %v17735_v12 = vpop.f32.mrf.mxu0  ;;  %18188 = vmatprep.subr.bf16.mxu0 %v25726_v62  ;;  %v9878_v28 = vshll.u32 %v14868_v8, 16 }
 0x52b   : > { %v17775_v46 = vpop.f32.mrf.mxu1  ;;  %v24066_v12 = vld [vmem:[#allocation2 + $0x90] sm:$0xf]  ;;  %v9873_v35 = vsel %vm624_vm1, %v9863_v31, %v9872_v9  ;;  %v9877_v26 = vrot.slane %v9875_v19, 3 }
 0x52c   : > { %v8789_v25 = vpop.f32.mrf.mxu0  ;;  %18017 = vmatmul.mubr.bf16.gmra.mxu0 %v14899_v13  ;;  %v24068_v13 = vld [vmem:[#allocation2 + $0x94] sm:$0xf] }
 0x52d   : > { %v24054_v11 = vadd.f32 %v8789_v25, %v23877_v43  ;;  %v8995_v54 = vpop.f32.mrf.mxu1  ;;  %18020 = vmatprep.mubr.msk.bf16.mxu0 %vm19459_vm0, %v25726_v62  ;;  %v14900_v25 = vcombine.low %v23791_v6, %v23825_v50  ;;  %v14869_v8 = vcombine.low %v24066_v12, %v24068_v13 }
 0x52e   : > { %v24059_v45 = vadd.f32 %v8995_v54, %v23770_v44  ;;  %v17738_v32 = vpop.f32.mrf.mxu0 }
 0x52f   : > { %17965 = vmatmul.mubr.bf16.gmra.mxu1 %v9864_v58  ;;  %v17778_v16 = vpop.f32.mrf.mxu1  ;;  %v9884_v19 = vshrl.u32 %v14869_v8, 16 }
 0x530   : > { %17968 = vmatprep.mubr.msk.bf16.mxu1 %vm19459_vm0, %v25726_v62  ;;  %v8792_v49 = vpop.f32.mrf.mxu0 }
 0x531   : > { %v24064_v43 = vadd.f32 %v8792_v49, %v23890_v39  ;;  %v8998_v53 = vpop.f32.mrf.mxu1  ;;  %v9880_v39 = vrot.slane %v9878_v28, 4  ;;  %v9887_v28 = vshll.u32 %v14869_v8, 16 }
 0x532   : > { %v24071_v44 = vadd.f32 %v8998_v53, %v23787_v29  ;;  %v17739_v46 = vpop.f32.mrf.mxu0 }
 0x533   : > { %v17779_v58 = vpop.f32.mrf.mxu1  ;;  %v9881_v49 = vor.u32 %v9880_v39, %v9877_v26  ;;  %v24091_v46 = vld [vmem:[#allocation2 + $0x98] sm:$0xf]  ;;  %v9886_v26 = vrot.slane %v9884_v19, 3  ;;  %v9889_v39 = vrot.slane %v9887_v28, 4 }
 0x534   : > { %v8797_v54 = vpop.f32.mrf.mxu0  ;;  %18021 = vmatmul.mubr.bf16.gmra.mxu0 %v14900_v25  ;;  %v25840_v25 = vld [vmem:[#allocation3_spill] sm:$0xff] }
 0x535   : > { %v24079_v32 = vadd.f32 %v8797_v54, %v23902_v3  ;;  %v9003_v16 = vpop.f32.mrf.mxu1  ;;  %18024 = vmatprep.mubr.msk.bf16.mxu0 %vm19459_vm0, %v25726_v62  ;;  %v25841_v54 = vld [vmem:[#allocation6_spill] sm:$0xff]  ;;  %v9890_v28 = vor.u32 %v9889_v39, %v9886_v26 }
 0x536   : > { %v24084_v50 = vadd.f32 %v9003_v16, %v23806_v37  ;;  %v17742_v6 = vpop.f32.mrf.mxu0 }
 0x537   : > { %17969 = vmatmul.mubr.bf16.gmra.mxu1 %v9873_v35  ;;  %v17782_v29 = vpop.f32.mrf.mxu1  ;;  %v14901_v35 = vcombine.low %v25841_v54, %v23859_v15 }
 0x538   : > { %17972 = vmatprep.mubr.msk.bf16.mxu1 %vm19459_vm0, %v25726_v62  ;;  %v8800_v31 = vpop.f32.mrf.mxu0  ;;  %v9882_v29 = vsel %vm624_vm1, %v9872_v9, %v9881_v49 }
 0x539   : > { %v24089_v3 = vadd.f32 %v8800_v31, %v23917_v27  ;;  %v9006_v53 = vpop.f32.mrf.mxu1  ;;  %v14870_v27 = vcombine.low %v24091_v46, %v24091_v46 }
 0x53a   : > { %v24094_v58 = vadd.f32 %v9006_v53, %v25840_v25  ;;  %v17743_v37 = vpop.f32.mrf.mxu0  ;;  %v25842_v53 = vld [vmem:[#allocation7_spill] sm:$0xff] }
 0x53b   : > { %v17783_v16 = vpop.f32.mrf.mxu1  ;;  %v9893_v37 = vshrl.u32 %v14870_v27, 16  ;;  %v9896_v54 = vshll.u32 %v14870_v27, 16 }
 0x53c   : > { %v8805_v6 = vpop.f32.mrf.mxu0  ;;  %18025 = vmatmul.mubr.bf16.gmra.mxu0 %v14901_v35 }
 0x53d   : > { %v24102_v8 = vadd.f32 %v8805_v6, %v23931_v7  ;;  %v9011_v31 = vpop.f32.mrf.mxu1  ;;  %18028 = vmatprep.mubr.msk.bf16.mxu0 %vm19459_vm0, %v25726_v62  ;;  %v9898_v26 = vrot.slane %v9896_v54, 4 }
 0x53e   : > { %v24107_v15 = vadd.f32 %v9011_v31, %v25842_v53  ;;  %v17746_v25 = vpop.f32.mrf.mxu0 }
 0x53f   : > { %17973 = vmatmul.mubr.bf16.gmra.mxu1 %v9882_v29  ;;  %v17786_v9 = vpop.f32.mrf.mxu1  ;;  %v14902_v29 = vcombine.low %v23861_v59, %v23885_v41  ;;  %v9891_v25 = vsel %vm624_vm1, %v9881_v49, %v9890_v28  ;;  %v19183_v59 = vld [vmem:[#allocation2 + $0x24] sm:$0xff]  }
 0x540   : > { %17976 = vmatprep.mubr.msk.bf16.mxu1 %vm19459_vm0, %v25726_v62  ;;  %v8808_v19 = vpop.f32.mrf.mxu0  ;;  %v9895_v9 = vrot.slane %v9893_v37, 3  ;;  %v19184_v37 = vld [vmem:[#allocation2 + $0x2c] sm:$0xff]  }
 0x541   : > { %v24112_v7 = vadd.f32 %v8808_v19, %v23946_v52  ;;  %v9014_v35 = vpop.f32.mrf.mxu1 }
 0x542   : > { %v24115_v16 = vadd.f32 %v9014_v35, %v23857_v24  ;;  %v17747_v6 = vpop.f32.mrf.mxu0  ;;  %v9899_v19 = vor.u32 %v9898_v26, %v9895_v9 }
 0x543   : > { %v17787_v31 = vpop.f32.mrf.mxu1 }
 0x544   : > { %v8813_v53 = vpop.f32.mrf.mxu0  ;;  %18029 = vmatmul.mubr.bf16.gmra.mxu0 %v14902_v29  ;;  %v10554_v29 = vshll.u32 %v19183_v59, 16 }
 0x545   : > { %v24121_v39 = vadd.f32 %v8813_v53, %v23963_v56  ;;  %v9019_v52 = vpop.f32.mrf.mxu1  ;;  %18032 = vmatprep.mubr.msk.bf16.mxu0 %vm19459_vm0, %v25726_v62 }
 0x546   : > { %v24126_v24 = vadd.f32 %v9019_v52, %v23872_v23  ;;  %v17750_v27 = vpop.f32.mrf.mxu0  ;;  %v14903_v23 = vcombine.low %v23887_v10, %v23912_v34  ;;  %v10559_v52 = vshll.u32 %v19184_v37, 16  ;;  %v10556_v10 = vrot.slane %v10554_v29, 1  ;;  %v19185_v29 = vld [vmem:[%s25677_s3 + $0xb8] sm:$0xff]  }
 0x547   : > { %17977 = vmatmul.mubr.bf16.gmra.mxu1 %v9891_v25  ;;  %v17790_v41 = vpop.f32.mrf.mxu1  ;;  %v9900_v25 = vsel %vm624_vm1, %v9890_v28, %v9899_v19  ;;  %v10552_v27 = vshrl.u32 %v19183_v59, 16 }
 0x548   : > { %17980 = vmatprep.mubr.msk.bf16.mxu1 %vm19459_vm0, %v25726_v62  ;;  %v8816_v49 = vpop.f32.mrf.mxu0  ;;  %v10561_v41 = vrot.slane %v10559_v52, 1  ;;  %v19191_v52 = vld [vmem:[%s25677_s3 + $0xb0] sm:$0xff]  }
 0x549   : > { %v24131_v56 = vadd.f32 %v8816_v49, %v23979_v36  ;;  %v9022_v54 = vpop.f32.mrf.mxu1  ;;  %v24149_v49 = vld [vmem:[#allocation2 + $0x34] sm:$0xff]  }
 0x54a   : > { %v24134_v35 = vadd.f32 %v9022_v54, %v23883_v22  ;;  %v17751_v6 = vpop.f32.mrf.mxu0 }
 0x54b   : > { %v17791_v31 = vpop.f32.mrf.mxu1  ;;  %v14904_v6 = vcombine.low %v23914_v2, %v23941_v42 }
 0x54c   : > { %v8821_v53 = vpop.f32.mrf.mxu0  ;;  %18033 = vmatmul.mubr.bf16.gmra.mxu0 %v14903_v23  ;;  %v10557_v23 = vor.u32 %v10556_v10, %v10552_v27 }
 0x54d   : > { %v24140_v9 = vadd.f32 %v8821_v53, %v23996_v5  ;;  %v9027_v36 = vpop.f32.mrf.mxu1  ;;  %18036 = vmatprep.mubr.msk.bf16.mxu0 %vm19459_vm0, %v25726_v62 }
 0x54e   : > { %v24145_v22 = vadd.f32 %v9027_v36, %v23897_v55  ;;  %v17754_v26 = vpop.f32.mrf.mxu0  ;;  %v10562_v53 = vsel %vm1110_vm2, %v10557_v23, %v10561_v41 }
 0x54f   : > { %17981 = vmatmul.mubr.bf16.gmra.mxu1 %v9900_v25  ;;  %v17794_v34 = vpop.f32.mrf.mxu1  ;;  %v10563_v26 = vshrl.u32 %v19184_v37, 16  ;;  %v19197_v37 = vld [vmem:[%s25677_s3 + $0xa8] sm:$0xff]  }
 0x550   : > { %18076 = vmatprep.mubr.msk.bf16.mxu1 %vm19459_vm0, %v25726_v62  ;;  %v8824_v28 = vpop.f32.mrf.mxu0  ;;  %v24178_v34 = vld [vmem:[#allocation2 + $0x3c] sm:$0xff]  }
 0x551   : > { %v24152_v5 = vadd.f32 %v8824_v28, %v24012_v51  ;;  %v9030_v19 = vpop.f32.mrf.mxu1  ;;  %v10567_v51 = vshll.u32 %v24149_v49, 16 }
 0x552   : > { %v24155_v54 = vadd.f32 %v9030_v19, %v23907_v0  ;;  %v17755_v55 = vpop.f32.mrf.mxu0 }
 0x553   : > { %v17795_v59 = vpop.f32.mrf.mxu1  ;;  %v10569_v10 = vrot.slane %v10567_v51, 1  ;;  %v14905_v55 = vcombine.low %v23943_v18, %v23974_v14  ;;  %v10571_v51 = vshrl.u32 %v24149_v49, 16  ;;  %v19209_v49 = vld [vmem:[%s25677_s3 + $0x98] sm:$0xff]  }
 0x554   : > { %v9483_v31 = vpop.f32.mrf.mxu0  ;;  %18037 = vmatmul.mubr.bf16.gmra.mxu0 %v14904_v6  ;;  %v10565_v6 = vor.u32 %v10563_v26, %v10561_v41  ;;  %v19203_v41 = vld [vmem:[%s25677_s3 + $0xa0] sm:$0xff]   ;;  %v14906_v26 = vcombine.low %v23976_v61, %v24007_v63 }
 0x555   : > { %v9035_v25 = vpop.f32.mrf.mxu1  ;;  %v24165_v0 = vadd.f32 %v9483_v31, %v24029_v30  ;;  %18040 = vmatprep.mubr.msk.bf16.mxu0 %vm19459_vm0, %v25726_v62 }
 0x556   : > { %v24170_v2 = vadd.f32 %v9035_v25, %v23925_v57  ;;  %v17850_v42 = vpop.f32.mrf.mxu0 }
 0x557   : > { %18077 = vmatmul.mubr.bf16.vlgmr.msra.gmra.mxu1 %v10562_v53  ;;  %v17798_v36 = vpop.f32.mrf.mxu1  ;;  %v24209_v42 = vld [vmem:[#allocation2 + $0x44] sm:$0xff]  }
 0x558   : > { %18241 = vmatpush3.bf16.msra.mxu1 %v19185_v29  ;;  %18080 = vmatprep.mubr.msk.bf16.mxu1 %vm19459_vm0, %v25726_v62  ;;  %v9486_v30 = vpop.f32.mrf.mxu0 }
 0x559   : > { %18242 = vmatprep.subr.bf16.mxu1 %v25726_v62  ;;  %v9038_v28 = vpop.f32.mrf.mxu1  ;;  %v24181_v57 = vadd.f32 %v9486_v30, %v24045_v17  ;;  %v10570_v17 = vsel %vm1110_vm2, %v10565_v6, %v10569_v10 }
 0x55a   : > { %v24184_v27 = vadd.f32 %v9038_v28, %v23939_v20  ;;  %v17851_v19 = vpop.f32.mrf.mxu0  ;;  %v10575_v20 = vshll.u32 %v24178_v34, 16  ;;  %v10573_v28 = vor.u32 %v10571_v51, %v10569_v10  ;;  %v19218_v10 = vld [vmem:[%s25677_s3 + $0x90] sm:$0xff]   ;;  %v19226_v51 = vld [vmem:[%s25677_s3 + $0x88] sm:$0xff]  }
 0x55b   : > { %v17799_v23 = vpop.f32.mrf.mxu1 }
 0x55c   : > { %18243 = vmatpush3.bf16.msra.mxu1 %v19191_v52  ;;  %v9491_v29 = vpop.f32.mrf.mxu0  ;;  %18041 = vmatmul.mubr.bf16.gmra.mxu0 %v14905_v55  ;;  %v10577_v25 = vrot.slane %v10575_v20, 1  ;;  %v19196_v20 = vld [vmem:[#allocation2 + $0x4c] sm:$0xff]  }
 0x55d   : > { %18244 = vmatprep.subr.bf16.mxu1 %v25726_v62  ;;  %v9043_v59 = vpop.f32.mrf.mxu1  ;;  %v24195_v31 = vadd.f32 %v9491_v29, %v24059_v45  ;;  %18044 = vmatprep.mubr.msk.bf16.mxu0 %vm19459_vm0, %v25726_v62  ;;  %v10579_v29 = vshrl.u32 %v24178_v34, 16 }
 0x55e   : > { %v24200_v18 = vadd.f32 %v9043_v59, %v23958_v1  ;;  %v17854_v14 = vpop.f32.mrf.mxu0 }
 0x55f   : > { %18081 = vmatmul.mubr.bf16.gmra.mxu1 %v10570_v17  ;;  %v17802_v53 = vpop.f32.mrf.mxu1 }
 0x560   : > { %18084 = vmatprep.mubr.msk.bf16.mxu1 %vm19459_vm0, %v25726_v62  ;;  %18245 = vmatpush3.bf16.msra.mxu1 %v19197_v37  ;;  %v9494_v45 = vpop.f32.mrf.mxu0  ;;  %v14907_v53 = vcombine.low %v24009_v40, %v24040_v47 }
 0x561   : > { %18246 = vmatprep.subr.bf16.mxu1 %v25726_v62  ;;  %v9046_v1 = vpop.f32.mrf.mxu1  ;;  %v24212_v52 = vadd.f32 %v9494_v45, %v24071_v44  ;;  %v10578_v44 = vsel %vm1110_vm2, %v10573_v28, %v10577_v25  ;;  %v10581_v45 = vor.u32 %v10579_v29, %v10577_v25  ;;  %v19235_v25 = vld [vmem:[%s25677_s3 + $0x80] sm:$0xff]  }
 0x562   : > { %v24215_v36 = vadd.f32 %v9046_v1, %v23972_v38  ;;  %v17855_v30 = vpop.f32.mrf.mxu0  ;;  %v10583_v38 = vshll.u32 %v24209_v42, 16 }
 0x563   : > { %v17803_v19 = vpop.f32.mrf.mxu1  ;;  %v10591_v30 = vshll.u32 %v19196_v20, 16 }
 0x564   : > { %18247 = vmatpush3.bf16.msra.mxu1 %v19203_v41  ;;  %v9499_v55 = vpop.f32.mrf.mxu0  ;;  %18045 = vmatmul.mubr.bf16.gmra.mxu0 %v14906_v26  ;;  %v10585_v17 = vrot.slane %v10583_v38, 1 }
 0x565   : > { %18248 = vmatprep.subr.bf16.mxu1 %v25726_v62  ;;  %v9051_v6 = vpop.f32.mrf.mxu1  ;;  %v24226_v37 = vadd.f32 %v9499_v55, %v24084_v50  ;;  %18048 = vmatprep.mubr.msk.bf16.mxu0 %vm19459_vm0, %v25726_v62  ;;  %v10593_v19 = vrot.slane %v10591_v30, 1  ;;  %v19200_v55 = vld [vmem:[#allocation2 + $0x54] sm:$0xff]  }
 0x566   : > { %v24231_v61 = vadd.f32 %v9051_v6, %v23991_v60  ;;  %v17858_v63 = vpop.f32.mrf.mxu0  ;;  %v10599_v29 = vshll.u32 %v19200_v55, 16 }
 0x567   : > { %18085 = vmatmul.mubr.bf16.gmra.mxu1 %v10578_v44  ;;  %v17806_v23 = vpop.f32.mrf.mxu1  ;;  %v14908_v63 = vcombine.low %v24042_v33, %v24066_v12 }
 0x568   : > { %18088 = vmatprep.mubr.msk.bf16.mxu1 %vm19459_vm0, %v25726_v62  ;;  %18249 = vmatpush3.bf16.msra.mxu1 %v19209_v49  ;;  %v9502_v50 = vpop.f32.mrf.mxu0  ;;  %v10587_v49 = vshrl.u32 %v24209_v42, 16 }
 0x569   : > { %18250 = vmatprep.subr.bf16.mxu1 %v25726_v62  ;;  %v9054_v59 = vpop.f32.mrf.mxu1  ;;  %v24241_v60 = vadd.f32 %v9502_v50, %v24094_v58  ;;  %v10586_v58 = vsel %vm1110_vm2, %v10581_v45, %v10585_v17  ;;  %v19201_v45 = vld [vmem:[#allocation2 + $0x5c] sm:$0xff]  }
 0x56a   : > { %v24244_v14 = vadd.f32 %v9054_v59, %v24005_v4  ;;  %v17859_v41 = vpop.f32.mrf.mxu0 }
 0x56b   : > { %v17807_v34 = vpop.f32.mrf.mxu1  ;;  %v10595_v41 = vshrl.u32 %v19196_v20, 16  ;;  %v10607_v20 = vshll.u32 %v19201_v45, 16 }
 0x56c   : > { %18251 = vmatpush3.bf16.msra.mxu1 %v19218_v10  ;;  %v9507_v1 = vpop.f32.mrf.mxu0  ;;  %18049 = vmatmul.mubr.bf16.gmra.mxu0 %v14907_v53  ;;  %v10589_v10 = vor.u32 %v10587_v49, %v10585_v17  ;;  %v10601_v53 = vrot.slane %v10599_v29, 1 }
 0x56d   : > { %18252 = vmatprep.subr.bf16.mxu1 %v25726_v62  ;;  %v24254_v26 = vadd.f32 %v9507_v1, %v24107_v15  ;;  %18052 = vmatprep.mubr.msk.bf16.mxu0 %vm19459_vm0, %v25726_v62  ;;  %v10609_v49 = vrot.slane %v10607_v20, 1  ;;  %v19417_v20 = vld [vmem:[#allocation2 + $0x8c] sm:$0xf] }
 0x56e   : > { %v17862_v47 = vpop.f32.mrf.mxu0  ;;  %v10594_v42 = vsel %vm1110_vm2, %v10589_v10, %v10593_v19 }
 0x56f   : > { %v9059_v4 = vpop.f32.mrf.mxu1  ;;  %18089 = vmatmul.mubr.bf16.gmra.mxu1 %v10586_v58  ;;  %v10597_v58 = vor.u32 %v10595_v41, %v10593_v19  ;;  %v24307_v19 = vld [vmem:[#allocation2 + $0x64] sm:$0xff]  }
 0x570   : > { %v24259_v40 = vadd.f32 %v9059_v4, %v24024_v21  ;;  %18092 = vmatprep.mubr.msk.bf16.mxu1 %vm19459_vm0, %v25726_v62  ;;  %18253 = vmatpush3.bf16.msra.mxu1 %v19226_v51  ;;  %v9510_v15 = vpop.f32.mrf.mxu0 }
 0x571   : > { %v17810_v28 = vpop.f32.mrf.mxu1  ;;  %18254 = vmatprep.subr.bf16.mxu1 %v25726_v62  ;;  %v24269_v21 = vadd.f32 %v9510_v15, %v24115_v16  ;;  %v10602_v47 = vsel %vm1110_vm2, %v10597_v58, %v10601_v53  ;;  %v10603_v15 = vshrl.u32 %v19200_v55, 16 }
 0x572   : > { %v17863_v6 = vpop.f32.mrf.mxu0 }
 0x573   : > { %v9062_v44 = vpop.f32.mrf.mxu1  ;;  %v19204_v6 = vld [vmem:[%s25677_s3 + $0x38] sm:$0xff]   ;;  %v10605_v10 = vor.u32 %v10603_v15, %v10601_v53 }
 0x574   : > { %v24272_v38 = vadd.f32 %v9062_v44, %v24038_v48  ;;  %18255 = vmatpush3.bf16.msra.mxu1 %v19235_v25  ;;  %v9515_v50 = vpop.f32.mrf.mxu0  ;;  %18053 = vmatmul.mubr.bf16.gmra.mxu0 %v14908_v63 }
 0x575   : > { %v17811_v23 = vpop.f32.mrf.mxu1  ;;  %18344 = vmatprep.subr.bf16.mxu1 %v25726_v62  ;;  %v24279_v16 = vadd.f32 %v9515_v50, %v24126_v24  ;;  %18056 = vmatprep.mubr.msk.bf16.mxu0 %vm19459_vm0, %v25726_v62  ;;  %v19416_v50 = vld [vmem:[#allocation2 + $0x84] sm:$0xf] }
 0x576   : > { %v17866_v33 = vpop.f32.mrf.mxu0  ;;  %v19415_v23 = vld [vmem:[#allocation2 + $0x88] sm:$0xf] }
 0x577   : > { %v9067_v59 = vpop.f32.mrf.mxu1  ;;  %18093 = vmatmul.mubr.bf16.gmra.mxu1 %v10594_v42  ;;  %v14975_v42 = vcombine.low %v19416_v50, %v19415_v23  ;;  %v10619_v23 = vshrl.u32 %v24307_v19, 16 }
 0x578   : > { %v24284_v48 = vadd.f32 %v9067_v59, %v24054_v11  ;;  %18096 = vmatprep.mubr.msk.bf16.mxu1 %vm19459_vm0, %v25726_v62  ;;  %v9518_v17 = vpop.f32.mrf.mxu0  ;;  %v14909_v11 = vcombine.low %v24068_v13, %v24091_v46  ;;  %v10610_v59 = vsel %vm1110_vm2, %v10605_v10, %v10609_v49 }
 0x579   : > { %v17814_v12 = vpop.f32.mrf.mxu1  ;;  %v24289_v24 = vadd.f32 %v9518_v17, %v24134_v35 }
 0x57a   : > { %v17867_v1 = vpop.f32.mrf.mxu0 }
 0x57b   : > { %v9070_v51 = vpop.f32.mrf.mxu1 }
 0x57c   : > { %v24292_v34 = vadd.f32 %v9070_v51, %v24064_v43  ;;  %v9523_v4 = vpop.f32.mrf.mxu0  ;;  %18057 = vmatmul.mubr.bf16.gmra.mxu0 %v14909_v11  ;;  %v10611_v51 = vshrl.u32 %v19201_v45, 16  ;;  %v24334_v11 = vld [vmem:[#allocation2 + $0x6c] sm:$0xff]  }
 0x57d   : > { %v17815_v30 = vpop.f32.mrf.mxu1  ;;  %v24298_v28 = vadd.f32 %v9523_v4, %v24145_v22  ;;  %18152 = vmatprep.mubr.msk.bf16.mxu0 %vm19459_vm0, %v25726_v62  ;;  %v19213_v45 = vld [vmem:[%s25677_s3 + $0x28] sm:$0xff]   ;;  %v10623_v15 = vshll.u32 %v24334_v11, 16 }
 0x57e   : > { %v17870_v35 = vpop.f32.mrf.mxu0 }
 0x57f   : > { %v9075_v25 = vpop.f32.mrf.mxu1  ;;  %18097 = vmatmul.mubr.bf16.gmra.mxu1 %v10602_v47  ;;  %v10613_v47 = vor.u32 %v10611_v51, %v10609_v49  ;;  %v10625_v50 = vrot.slane %v10623_v15, 1 }
 0x580   : > { %v24303_v43 = vadd.f32 %v9075_v25, %v24079_v32  ;;  %18100 = vmatprep.mubr.msk.bf16.mxu1 %vm19459_vm0, %v25726_v62  ;;  %v9526_v46 = vpop.f32.mrf.mxu0  ;;  %v19418_v25 = vld [vmem:[#allocation2 + $0x90] sm:$0xf] }
 0x581   : > { %v17818_v13 = vpop.f32.mrf.mxu1  ;;  %v24310_v22 = vadd.f32 %v9526_v46, %v24155_v54  ;;  %v10615_v54 = vshll.u32 %v24307_v19, 16  ;;  %v14976_v35 = vcombine.low %v19417_v20, %v19418_v25  ;;  %v19222_v19 = vld [vmem:[%s25677_s3 + $0x18] sm:$0xff]   ;;  %v10627_v25 = vshrl.u32 %v24334_v11, 16  ;;  %v19231_v11 = vld [vmem:[%s25677_s3 + $0x8] sm:$0xff]  }
 0x582   : > { %v17871_v63 = vpop.f32.mrf.mxu0 }
 0x583   : > { %v9078_v44 = vpop.f32.mrf.mxu1  ;;  %v10617_v1 = vrot.slane %v10615_v54, 1  ;;  %v19217_v63 = vld [vmem:[%s25677_s3 + $0x20] sm:$0xff]   ;;  %v10629_v15 = vor.u32 %v10627_v25, %v10625_v50 }
 0x584   : > { %v24316_v32 = vadd.f32 %v9078_v44, %v24089_v3  ;;  %v9531_v29 = vpop.f32.mrf.mxu0  ;;  %18153 = vmatmul.mubr.bf16.vlgmr.msra.gmra.mxu0 %v14975_v42  ;;  %v19208_v3 = vld [vmem:[%s25677_s3 + $0x30] sm:$0xff]  }
 0x585   : > { %v17819_v55 = vpop.f32.mrf.mxu1  ;;  %v24321_v12 = vadd.f32 %v9531_v29, %v24170_v2  ;;  %18189 = vmatpush3.bf16.msra.mxu0 %v19204_v6  ;;  %18156 = vmatprep.mubr.msk.bf16.mxu0 %vm19459_vm0, %v25726_v62  ;;  %v24363_v42 = vld [vmem:[#allocation2 + $0x74] sm:$0xff]   ;;  %v10621_v54 = vor.u32 %v10619_v23, %v10617_v1 }
 0x586   : > { %v17874_v41 = vpop.f32.mrf.mxu0  ;;  %18190 = vmatprep.subr.bf16.mxu0 %v25726_v62 }
 0x587   : > { %v9083_v33 = vpop.f32.mrf.mxu1  ;;  %18101 = vmatmul.mubr.bf16.gmra.mxu1 %v10610_v59 }
 0x588   : > { %v24327_v17 = vadd.f32 %v9083_v33, %v24102_v8  ;;  %18104 = vmatprep.mubr.msk.bf16.mxu1 %vm19459_vm0, %v25726_v62  ;;  %v9534_v2 = vpop.f32.mrf.mxu0  ;;  %v19419_v33 = vld [vmem:[#allocation2 + $0x94] sm:$0xf] }
 0x589   : > { %v17822_v53 = vpop.f32.mrf.mxu1  ;;  %v24337_v30 = vadd.f32 %v9534_v2, %v24184_v27  ;;  %18191 = vmatpush3.bf16.msra.mxu0 %v19208_v3  ;;  %v10618_v27 = vsel %vm1110_vm2, %v10613_v47, %v10617_v1  ;;  %v19420_v3 = vld [vmem:[#allocation2 + $0x98] sm:$0xf]  ;;  %v19227_v47 = vld [vmem:[%s25677_s3 + $0x10] sm:$0xff]  }
 0x58a   : > { %v17875_v4 = vpop.f32.mrf.mxu0  ;;  %18192 = vmatprep.subr.bf16.mxu0 %v25726_v62  ;;  %v14977_v41 = vcombine.low %v19419_v33, %v19420_v3  ;;  %v10635_v3 = vshrl.u32 %v24363_v42, 16 }
 0x58b   : > { %v9086_v58 = vpop.f32.mrf.mxu1 }
 0x58c   : > { %v24340_v8 = vadd.f32 %v9086_v58, %v24112_v7  ;;  %v9539_v46 = vpop.f32.mrf.mxu0  ;;  %18157 = vmatmul.mubr.bf16.gmra.mxu0 %v14976_v35 }
 0x58d   : > { %v17823_v13 = vpop.f32.mrf.mxu1  ;;  %v24349_v44 = vadd.f32 %v9539_v46, %v24200_v18  ;;  %18160 = vmatprep.mubr.msk.bf16.mxu0 %vm19459_vm0, %v25726_v62  ;;  %18193 = vmatpush3.bf16.msra.mxu0 %v19213_v45  ;;  %v24392_v45 = vld [vmem:[#allocation2 + $0x7c] sm:$0xff]  }
 0x58e   : > { %v17878_v6 = vpop.f32.mrf.mxu0  ;;  %18194 = vmatprep.subr.bf16.mxu0 %v25726_v62 }
 0x58f   : > { %v9091_v7 = vpop.f32.mrf.mxu1  ;;  %18105 = vmatmul.mubr.bf16.gmra.mxu1 %v10618_v27  ;;  %v19422_v6 = vld [vmem:[#allocation2 + $0xa0] sm:$0xf] }
 0x590   : > { %v24354_v49 = vadd.f32 %v9091_v7, %v24121_v39  ;;  %18108 = vmatprep.mubr.msk.bf16.mxu1 %vm19459_vm0, %v25726_v62  ;;  %v9542_v18 = vpop.f32.mrf.mxu0  ;;  %v19421_v7 = vld [vmem:[#allocation2 + $0x9c] sm:$0xf] }
 0x591   : > { %v17826_v10 = vpop.f32.mrf.mxu1  ;;  %v24366_v55 = vadd.f32 %v9542_v18, %v24215_v36  ;;  %18195 = vmatpush3.bf16.msra.mxu0 %v19217_v63  ;;  %v10626_v36 = vsel %vm1110_vm2, %v10621_v54, %v10625_v50  ;;  %v14978_v63 = vcombine.low %v19421_v7, %v19422_v6  ;;  %v19240_v54 = vld [vmem:[%s25677_s3] sm:$0xff]   ;;  %v10643_v7 = vshrl.u32 %v24392_v45, 16 }
 0x592   : > { %v17879_v59 = vpop.f32.mrf.mxu0  ;;  %18196 = vmatprep.subr.bf16.mxu0 %v25726_v62 }
 0x593   : > { %v9094_v39 = vpop.f32.mrf.mxu1 }
 0x594   : > { %v24369_v29 = vadd.f32 %v9094_v39, %v24131_v56  ;;  %v9547_v2 = vpop.f32.mrf.mxu0  ;;  %18161 = vmatmul.mubr.bf16.gmra.mxu0 %v14977_v41  ;;  %v10631_v56 = vshll.u32 %v24363_v42, 16 }
 0x595   : > { %v17827_v53 = vpop.f32.mrf.mxu1  ;;  %v24378_v1 = vadd.f32 %v9547_v2, %v24231_v61  ;;  %18164 = vmatprep.mubr.msk.bf16.mxu0 %vm19459_vm0, %v25726_v62  ;;  %18197 = vmatpush3.bf16.msra.mxu0 %v19222_v19  ;;  %v19223_v19 = vld [vmem:[#allocation2 + $0x84] sm:$0xff]  }
 0x596   : > { %v17882_v4 = vpop.f32.mrf.mxu0  ;;  %18198 = vmatprep.subr.bf16.mxu0 %v25726_v62  ;;  %v10633_v35 = vrot.slane %v10631_v56, 1  ;;  %v10647_v25 = vshll.u32 %v19223_v19, 16 }
 0x597   : > { %v9099_v51 = vpop.f32.mrf.mxu1  ;;  %18109 = vmatmul.mubr.bf16.gmra.mxu1 %v10626_v36  ;;  %v19424_v4 = vld [vmem:[#allocation2 + $0xa8] sm:$0xf] }
 0x598   : > { %v24383_v58 = vadd.f32 %v9099_v51, %v24140_v9  ;;  %18112 = vmatprep.mubr.msk.bf16.mxu1 %vm19459_vm0, %v25726_v62  ;;  %v9550_v61 = vpop.f32.mrf.mxu0  ;;  %v10637_v56 = vor.u32 %v10635_v3, %v10633_v35  ;;  %v19423_v51 = vld [vmem:[#allocation2 + $0xa4] sm:$0xf]  ;;  %v10649_v6 = vrot.slane %v10647_v25, 1 }
 0x599   : > { %v17830_v20 = vpop.f32.mrf.mxu1  ;;  %v24395_v13 = vadd.f32 %v9550_v61, %v24244_v14  ;;  %18199 = vmatpush3.bf16.msra.mxu0 %v19227_v47  ;;  %v10634_v14 = vsel %vm1110_vm2, %v10629_v15, %v10633_v35  ;;  %v14979_v47 = vcombine.low %v19423_v51, %v19424_v4  ;;  %v19232_v51 = vld [vmem:[#allocation2 + $0x94] sm:$0xff]  }
 0x59a   : > { %v17883_v27 = vpop.f32.mrf.mxu0  ;;  %18200 = vmatprep.subr.bf16.mxu0 %v25726_v62 }
 0x59b   : > { %v9102_v9 = vpop.f32.mrf.mxu1 }
 0x59c   : > { %v24398_v46 = vadd.f32 %v9102_v9, %v24152_v5  ;;  %v9555_v18 = vpop.f32.mrf.mxu0  ;;  %18165 = vmatmul.mubr.bf16.gmra.mxu0 %v14978_v63  ;;  %v10639_v5 = vshll.u32 %v24392_v45, 16  ;;  %v19228_v63 = vld [vmem:[#allocation2 + $0x8c] sm:$0xff]  }
 0x59d   : > { %v17831_v10 = vpop.f32.mrf.mxu1  ;;  %v24407_v23 = vadd.f32 %v9555_v18, %v24259_v40  ;;  %18168 = vmatprep.mubr.msk.bf16.mxu0 %vm19459_vm0, %v25726_v62  ;;  %18201 = vmatpush3.bf16.msra.mxu0 %v19231_v11  ;;  %v10655_v45 = vshll.u32 %v19228_v63, 16 }
 0x59e   : > { %v17886_v59 = vpop.f32.mrf.mxu0  ;;  %18202 = vmatprep.subr.bf16.mxu0 %v25726_v62  ;;  %v10641_v41 = vrot.slane %v10639_v5, 1  ;;  %v19426_v5 = vld [vmem:[#allocation2 + $0xb0] sm:$0xf] }
 0x59f   : > { %v9998_v50 = vpop.f32.mrf.mxu1  ;;  %18113 = vmatmul.mubr.bf16.gmra.mxu1 %v10634_v14  ;;  %v19425_v14 = vld [vmem:[#allocation2 + $0xac] sm:$0xf] }
 0x5a0   : > { %v24412_v39 = vadd.f32 %v9998_v50, %v24165_v0  ;;  %18116 = vmatprep.mubr.msk.bf16.mxu1 %vm19459_vm0, %v25726_v62  ;;  %v9558_v40 = vpop.f32.mrf.mxu0  ;;  %v10642_v42 = vsel %vm1110_vm2, %v10637_v56, %v10641_v41  ;;  %v14980_v50 = vcombine.low %v19425_v14, %v19426_v5  ;;  %v10657_v56 = vrot.slane %v10655_v45, 1  ;;  %v19236_v45 = vld [vmem:[#allocation2 + $0x9c] ss:$0 sps:$4 sm:$0x11]  }
 0x5a1   : > { %v17926_v33 = vpop.f32.mrf.mxu1  ;;  %v24422_v0 = vadd.f32 %v9558_v40, %v24272_v38  ;;  %18203 = vmatpush3.bf16.msra.mxu0 %v19240_v54 }
 0x5a2   : > { %v17887_v36 = vpop.f32.mrf.mxu0  ;;  %18292 = vmatprep.subr.bf16.mxu0 %v25726_v62 }
 0x5a3   : > { %v10001_v53 = vpop.f32.mrf.mxu1  ;;  %v10651_v36 = vshrl.u32 %v19223_v19, 16  ;;  %v10663_v19 = vshll.u32 %v19232_v51, 16 }
 0x5a4   : > { %v24425_v2 = vadd.f32 %v10001_v53, %v24181_v57  ;;  %v9563_v61 = vpop.f32.mrf.mxu0  ;;  %18169 = vmatmul.mubr.bf16.gmra.mxu0 %v14979_v47 }
 0x5a5   : > { %v17927_v20 = vpop.f32.mrf.mxu1  ;;  %v24430_v38 = vadd.f32 %v9563_v61, %v24284_v48  ;;  %18172 = vmatprep.mubr.msk.bf16.mxu0 %vm19459_vm0, %v25726_v62  ;;  %v10653_v61 = vor.u32 %v10651_v36, %v10649_v6  ;;  %v10667_v36 = vshrl.u32 %v19232_v51, 16 }
 0x5a6   : > { %v17890_v35 = vpop.f32.mrf.mxu0 }
 0x5a7   : > { %v10006_v9 = vpop.f32.mrf.mxu1  ;;  %18117 = vmatmul.mubr.bf16.gmra.mxu1 %v10642_v42  ;;  %v19428_v42 = vld [vmem:[#allocation2 + $0xb8] sm:$0xf] }
 0x5a8   : > { %v24435_v57 = vadd.f32 %v10006_v9, %v24195_v31  ;;  %18120 = vmatprep.mubr.msk.bf16.mxu1 %vm19459_vm0, %v25726_v62  ;;  %v9566_v15 = vpop.f32.mrf.mxu0  ;;  %v10645_v31 = vor.u32 %v10643_v7, %v10641_v41 }
 0x5a9   : > { %v17930_v27 = vpop.f32.mrf.mxu1  ;;  %v24441_v48 = vadd.f32 %v9566_v15, %v24292_v34 }
 0x5aa   : > { %v17891_v18 = vpop.f32.mrf.mxu0  ;;  %v10650_v33 = vsel %vm1110_vm2, %v10645_v31, %v10649_v6  ;;  %v10658_v27 = vsel %vm1110_vm2, %v10653_v61, %v10657_v56  ;;  %v10665_v31 = vrot.slane %v10663_v19, 1  ;;  %v19432_v19 = vld [vmem:[#allocation2 + $0xc8] sm:$0xf] }
 0x5ab   : > { %v10009_v11 = vpop.f32.mrf.mxu1  ;;  %v10659_v18 = vshrl.u32 %v19228_v63, 16 }
 0x5ac   : > { %v24444_v10 = vadd.f32 %v10009_v11, %v24212_v52  ;;  %v9571_v54 = vpop.f32.mrf.mxu0  ;;  %18173 = vmatmul.mubr.bf16.gmra.mxu0 %v14980_v50 }
 0x5ad   : > { %v17931_v59 = vpop.f32.mrf.mxu1  ;;  %v24448_v40 = vadd.f32 %v9571_v54, %v24303_v43  ;;  %18176 = vmatprep.mubr.msk.bf16.mxu0 %vm19459_vm0, %v25726_v62  ;;  %v19429_v54 = vld [vmem:[#allocation2 + $0xbc] sm:$0xf] }
 0x5ae   : > { %v17894_v3 = vpop.f32.mrf.mxu0  ;;  %v10661_v59 = vor.u32 %v10659_v18, %v10657_v56  ;;  %v10671_v56 = vshll.u32 %v19236_v45, 16  ;;  %v24511_v45 = vld [vmem:[#allocation2 + $0x94] sm:$0xff]  }
 0x5af   : > { %v10014_v34 = vpop.f32.mrf.mxu1  ;;  %18121 = vmatmul.mubr.bf16.gmra.mxu1 %v10650_v33 }
 0x5b0   : > { %v24453_v52 = vadd.f32 %v10014_v34, %v24226_v37  ;;  %18124 = vmatprep.mubr.msk.bf16.mxu1 %vm19459_vm0, %v25726_v62  ;;  %v9574_v53 = vpop.f32.mrf.mxu0  ;;  %v19427_v37 = vld [vmem:[#allocation2 + $0xb4] sm:$0xf] }
 0x5b1   : > { %v17934_v41 = vpop.f32.mrf.mxu1  ;;  %v24458_v43 = vadd.f32 %v9574_v53, %v24316_v32  ;;  %v14981_v25 = vcombine.low %v19427_v37, %v19428_v42  ;;  %v10669_v37 = vor.u32 %v10667_v36, %v10665_v31 }
 0x5b2   : > { %v17895_v20 = vpop.f32.mrf.mxu0  ;;  %v10666_v41 = vsel %vm1110_vm2, %v10661_v59, %v10665_v31 }
 0x5b3   : > { %v10017_v4 = vpop.f32.mrf.mxu1 }
 0x5b4   : > { %v24461_v47 = vadd.f32 %v10017_v4, %v24241_v60  ;;  %v9579_v35 = vpop.f32.mrf.mxu0  ;;  %18177 = vmatmul.mubr.bf16.gmra.mxu0 %v14981_v25  ;;  %v19242_v4 = vld [vmem:[#allocation2 + $0x84] sm:$0xff]  }
 0x5b5   : > { %v17935_v9 = vpop.f32.mrf.mxu1  ;;  %v24465_v15 = vadd.f32 %v9579_v35, %v24327_v17  ;;  %18180 = vmatprep.mubr.msk.bf16.mxu0 %vm19459_vm0, %v25726_v62  ;;  %v10673_v35 = vrot.slane %v10671_v56, 1  ;;  %v11715_v51 = vshll.u32 %v19242_v4, 16 }
 0x5b6   : > { %v17898_v7 = vpop.f32.mrf.mxu0 }
 0x5b7   : > { %v10022_v32 = vpop.f32.mrf.mxu1  ;;  %18125 = vmatmul.mubr.bf16.gmra.mxu1 %v10658_v27  ;;  %v19431_v27 = vld [vmem:[#allocation2 + $0xc4] sm:$0xf] }
 0x5b8   : > { %v24470_v60 = vadd.f32 %v10022_v32, %v24254_v26  ;;  %18128 = vmatprep.mubr.msk.bf16.mxu1 %vm19459_vm0, %v25726_v62  ;;  %v9582_v11 = vpop.f32.mrf.mxu0  ;;  %v19430_v26 = vld [vmem:[#allocation2 + $0xc0] sm:$0xf]  ;;  %v14983_v32 = vcombine.low %v19431_v27, %v19432_v19 }
 0x5b9   : > { %v17938_v6 = vpop.f32.mrf.mxu1  ;;  %v24475_v14 = vadd.f32 %v9582_v11, %v24340_v8  ;;  %v14982_v33 = vcombine.low %v19429_v54, %v19430_v26  ;;  %v10674_v11 = vsel %vm1110_vm2, %v10669_v37, %v10673_v35  ;;  %v11713_v26 = vshrl.u32 %v19242_v4, 16  ;;  %v25843_v4 = vld [vmem:[#allocation12_spill] sm:$0xff]  ;;  %v19248_v35 = vld [vmem:[%s25677_s3 + $0x130] sm:$0xff]  }
 0x5ba   : > { %v17899_v50 = vpop.f32.mrf.mxu0 }
 0x5bb   : > { %v10025_v17 = vpop.f32.mrf.mxu1  ;;  %v11717_v50 = vrot.slane %v11715_v51, 1 }
 0x5bc   : > { %v24478_v5 = vadd.f32 %v10025_v17, %v24269_v21  ;;  %v9587_v3 = vpop.f32.mrf.mxu0  ;;  %18181 = vmatmul.mubr.bf16.gmra.mxu0 %v14982_v33 }
 0x5bd   : > { %v17939_v34 = vpop.f32.mrf.mxu1  ;;  %v24482_v63 = vadd.f32 %v9587_v3, %v24354_v49  ;;  %18184 = vmatprep.mubr.msk.bf16.mxu0 %vm19459_vm0, %v25726_v62  ;;  %v24491_v49 = vld [vmem:[#allocation2 + $0x8c] sm:$0xff]  }
 0x5be   : > { %v17902_v53 = vpop.f32.mrf.mxu0  ;;  %v11720_v18 = vshll.u32 %v24491_v49, 16  ;;  %v11724_v19 = vshrl.u32 %v24491_v49, 16  ;;  %v19250_v49 = vld [vmem:[%s25677_s3 + $0xe8] sm:$0xff]  }
 0x5bf   : > { %v10030_v8 = vpop.f32.mrf.mxu1  ;;  %18129 = vmatmul.mubr.bf16.gmra.mxu1 %v10666_v41  ;;  %v19245_v53 = vld [vmem:[%s25677_s3 + $0x138] sm:$0xff]  }
 0x5c0   : > { %v24487_v21 = vadd.f32 %v10030_v8, %v24279_v16  ;;  %18132 = vmatprep.mubr.msk.bf16.mxu1 %vm19459_vm0, %v25726_v62  ;;  %v9590_v61 = vpop.f32.mrf.mxu0  ;;  %v11722_v33 = vrot.slane %v11720_v18, 1  ;;  %v11718_v8 = vor.u32 %v11717_v50, %v11713_v26  ;;  %v25844_v50 = vld [vmem:[#allocation24_spill] sm:$0xff] }
 0x5c1   : > { %v17942_v20 = vpop.f32.mrf.mxu1  ;;  %v24494_v42 = vadd.f32 %v9590_v61, %v24369_v29 }
 0x5c2   : > { %v17903_v16 = vpop.f32.mrf.mxu0  ;;  %v11728_v20 = vshll.u32 %v24511_v45, 16  ;;  %v11726_v18 = vor.u32 %v11724_v19, %v11722_v33 }
 0x5c3   : > { %v10033_v25 = vpop.f32.mrf.mxu1 }
 0x5c4   : > { %v24497_v9 = vadd.f32 %v10033_v25, %v24289_v24  ;;  %v9595_v6 = vpop.f32.mrf.mxu0  ;;  %18185 = vmatmul.mubr.bf16.gmra.mxu0 %v14983_v32  ;;  %v24547_v32 = vld [vmem:[#allocation2 + $0x9c] sm:$0xff]  }
 0x5c5   : > { %v17943_v7 = vpop.f32.mrf.mxu1  ;;  %v24502_v29 = vadd.f32 %v9595_v6, %v24383_v58  ;;  %18204 = vmatprep.mubr.msk.bf16.mxu0 %vm19459_vm0, %v25726_v62 }
 0x5c6   : > { %v17906_v17 = vpop.f32.mrf.mxu0 }
 0x5c7   : > { %v10038_v31 = vpop.f32.mrf.mxu1  ;;  %18133 = vmatmul.mubr.bf16.gmra.mxu1 %v10674_v11 }
 0x5c8   : > { %v24507_v24 = vadd.f32 %v10038_v31, %v24298_v28  ;;  %18256 = vmatprep.mubr.msk.bf16.mxu1 %vm19459_vm0, %v25726_v62  ;;  %v9598_v54 = vpop.f32.mrf.mxu0  ;;  %v19244_v28 = vld [vmem:[%s25677_s3 + $0xf8] sm:$0xff]  }
 0x5c9   : > { %v17946_v59 = vpop.f32.mrf.mxu1  ;;  %v24514_v58 = vadd.f32 %v9598_v54, %v24398_v46  ;;  %v11723_v46 = vsel %vm1110_vm2, %v11718_v8, %v11722_v33 }
 0x5ca   : > { %v17907_v41 = vpop.f32.mrf.mxu0  ;;  %v11736_v59 = vshll.u32 %v24547_v32, 16 }
 0x5cb   : > { %v10041_v34 = vpop.f32.mrf.mxu1 }
 0x5cc   : > { %v24520_v3 = vadd.f32 %v10041_v34, %v24310_v22  ;;  %v10276_v56 = vpop.f32.mrf.mxu0  ;;  %18205 = vmatmul.mubr.bf16.vlgmr.msra.gmra.mxu0 %v25843_v4  ;;  %v19247_v22 = vld [vmem:[%s25677_s3 + $0xf0] sm:$0xff]  }
 0x5cd   : > { %v17947_v36 = vpop.f32.mrf.mxu1  ;;  %v24529_v37 = vadd.f32 %v10276_v56, %v24412_v39  ;;  %18293 = vmatpush3.bf16.msra.mxu0 %v19244_v28  ;;  %18208 = vmatprep.mubr.msk.bf16.mxu0 %vm19459_vm0, %v25726_v62  ;;  %v19253_v28 = vld [vmem:[%s25677_s3 + $0xe0] sm:$0xff]  }
 0x5ce   : > { %v18002_v16 = vpop.f32.mrf.mxu0  ;;  %18294 = vmatprep.subr.bf16.mxu0 %v25726_v62  ;;  %v24584_v36 = vld [vmem:[#allocation2 + $0xa4] sm:$0xff]  }
 0x5cf   : > { %v10046_v61 = vpop.f32.mrf.mxu1  ;;  %18257 = vmatmul.mubr.bf16.vlgmr.msra.gmra.mxu1 %v11723_v46  ;;  %v19257_v16 = vld [vmem:[%s25677_s3 + $0x118] sm:$0xff]  }
 0x5d0   : > { %v24535_v25 = vadd.f32 %v10046_v61, %v24321_v12  ;;  %18345 = vmatpush3.bf16.msra.mxu1 %v19245_v53  ;;  %18260 = vmatprep.mubr.msk.bf16.mxu1 %vm19459_vm0, %v25726_v62  ;;  %v10279_v27 = vpop.f32.mrf.mxu0  ;;  %v11730_v12 = vrot.slane %v11728_v20, 1  ;;  %v11738_v53 = vrot.slane %v11736_v59, 1 }
 0x5d1   : > { %v17950_v39 = vpop.f32.mrf.mxu1  ;;  %18346 = vmatprep.subr.bf16.mxu1 %v25726_v62  ;;  %v24550_v7 = vadd.f32 %v10279_v27, %v24425_v2  ;;  %18295 = vmatpush3.bf16.msra.mxu0 %v19247_v22  ;;  %v19251_v2 = vld [vmem:[%s25677_s3 + $0x128] sm:$0xff]   ;;  %v19256_v22 = vld [vmem:[%s25677_s3 + $0xd8] sm:$0xff]  }
 0x5d2   : > { %v18003_v11 = vpop.f32.mrf.mxu0  ;;  %18296 = vmatprep.subr.bf16.mxu0 %v25726_v62  ;;  %v11744_v39 = vshll.u32 %v24584_v36, 16 }
 0x5d3   : > { %v10049_v51 = vpop.f32.mrf.mxu1  ;;  %v19259_v11 = vld [vmem:[%s25677_s3 + $0xd0] sm:$0xff]  }
 0x5d4   : > { %v24553_v6 = vadd.f32 %v10049_v51, %v24337_v30  ;;  %18347 = vmatpush3.bf16.msra.mxu1 %v19248_v35  ;;  %v10284_v17 = vpop.f32.mrf.mxu0  ;;  %18209 = vmatmul.mubr.bf16.gmra.mxu0 %v25844_v50  ;;  %v11731_v30 = vsel %vm1110_vm2, %v11726_v18, %v11730_v12  ;;  %v25845_v35 = vld [vmem:[#allocation25_spill] sm:$0xff] }
 0x5d5   : > { %v17951_v31 = vpop.f32.mrf.mxu1  ;;  %18348 = vmatprep.subr.bf16.mxu1 %v25726_v62  ;;  %v24567_v26 = vadd.f32 %v10284_v17, %v24435_v57  ;;  %18212 = vmatprep.mubr.msk.bf16.mxu0 %vm19459_vm0, %v25726_v62  ;;  %v19254_v57 = vld [vmem:[%s25677_s3 + $0x120] sm:$0xff]  }
 0x5d6   : > { %v18006_v34 = vpop.f32.mrf.mxu0  ;;  %18297 = vmatpush3.bf16.msra.mxu0 %v19250_v49  ;;  %v11746_v31 = vrot.slane %v11744_v39, 1 }
 0x5d7   : > { %v10054_v54 = vpop.f32.mrf.mxu1  ;;  %18261 = vmatmul.mubr.bf16.gmra.mxu1 %v11731_v30  ;;  %18298 = vmatprep.subr.bf16.mxu0 %v25726_v62  ;;  %v19262_v34 = vld [vmem:[%s25677_s3 + $0xc8] sm:$0xff]  }
 0x5d8   : > { %v24572_v33 = vadd.f32 %v10054_v54, %v24349_v44  ;;  %18264 = vmatprep.mubr.msk.bf16.mxu1 %vm19459_vm0, %v25726_v62  ;;  %18349 = vmatpush3.bf16.msra.mxu1 %v19251_v2  ;;  %v10287_v8 = vpop.f32.mrf.mxu0  ;;  %v11732_v44 = vshrl.u32 %v24511_v45, 16  ;;  %v24622_v2 = vld [vmem:[#allocation2 + $0xac] sm:$0xff]  }
 0x5d9   : > { %v17954_v41 = vpop.f32.mrf.mxu1  ;;  %18350 = vmatprep.subr.bf16.mxu1 %v25726_v62  ;;  %v24588_v4 = vadd.f32 %v10287_v8, %v24444_v10 }
 0x5da   : > { %v18007_v20 = vpop.f32.mrf.mxu0  ;;  %v11734_v61 = vor.u32 %v11732_v44, %v11730_v12  ;;  %18299 = vmatpush3.bf16.msra.mxu0 %v19253_v28  ;;  %v19264_v28 = vld [vmem:[%s25677_s3 + $0x108] sm:$0xff]   ;;  %v25846_v41 = vld [vmem:[#allocation9_spill] sm:$0xff] }
 0x5db   : > { %v10057_v56 = vpop.f32.mrf.mxu1  ;;  %18300 = vmatprep.subr.bf16.mxu0 %v25726_v62  ;;  %v19266_v20 = vld [vmem:[%s25677_s3 + $0xc0] sm:$0xff]  }
 0x5dc   : > { %v24591_v46 = vadd.f32 %v10057_v56, %v24366_v55  ;;  %18351 = vmatpush3.bf16.msra.mxu1 %v19254_v57  ;;  %v10292_v10 = vpop.f32.mrf.mxu0  ;;  %18213 = vmatmul.mubr.bf16.gmra.mxu0 %v25845_v35  ;;  %v11739_v55 = vsel %vm1110_vm2, %v11734_v61, %v11738_v53  ;;  %v11752_v57 = vshll.u32 %v24622_v2, 16 }
 0x5dd   : > { %v17955_v45 = vpop.f32.mrf.mxu1  ;;  %18352 = vmatprep.subr.bf16.mxu1 %v25726_v62  ;;  %v24605_v19 = vadd.f32 %v10292_v10, %v24453_v52  ;;  %18216 = vmatprep.mubr.msk.bf16.mxu0 %vm19459_vm0, %v25726_v62  ;;  %v19261_v52 = vld [vmem:[%s25677_s3 + $0x110] sm:$0xff]  }
 0x5de   : > { %v18010_v51 = vpop.f32.mrf.mxu0  ;;  %18301 = vmatpush3.bf16.msra.mxu0 %v19256_v22  ;;  %v11754_v45 = vrot.slane %v11752_v57, 1  ;;  %v25848_v57 = vld [vmem:[#allocation8_spill] sm:$0xff] }
 0x5df   : > { %v10062_v27 = vpop.f32.mrf.mxu1  ;;  %18265 = vmatmul.mubr.bf16.gmra.mxu1 %v11739_v55  ;;  %18302 = vmatprep.subr.bf16.mxu0 %v25726_v62 }
 0x5e0   : > { %v24610_v12 = vadd.f32 %v10062_v27, %v24378_v1  ;;  %18268 = vmatprep.mubr.msk.bf16.mxu1 %vm19459_vm0, %v25726_v62  ;;  %18353 = vmatpush3.bf16.msra.mxu1 %v19257_v16  ;;  %v10295_v49 = vpop.f32.mrf.mxu0  ;;  %v11740_v1 = vshrl.u32 %v24547_v32, 16  ;;  %v19258_v16 = vld [vmem:[#allocation2 + $0xb4] sm:$0xff]  }
 0x5e1   : > { %v17958_v18 = vpop.f32.mrf.mxu1  ;;  %18354 = vmatprep.subr.bf16.mxu1 %v25726_v62  ;;  %v24626_v50 = vadd.f32 %v10295_v49, %v24461_v47 }
 0x5e2   : > { %v18011_v59 = vpop.f32.mrf.mxu0  ;;  %v11742_v54 = vor.u32 %v11740_v1, %v11738_v53  ;;  %18303 = vmatpush3.bf16.msra.mxu0 %v19259_v11 }
 0x5e3   : > { %v10065_v17 = vpop.f32.mrf.mxu1  ;;  %18304 = vmatprep.subr.bf16.mxu0 %v25726_v62  ;;  %v11756_v59 = vshrl.u32 %v24622_v2, 16 }
 0x5e4   : > { %v24629_v30 = vadd.f32 %v10065_v17, %v24395_v13  ;;  %18355 = vmatpush3.bf16.msra.mxu1 %v19261_v52  ;;  %v10300_v47 = vpop.f32.mrf.mxu0  ;;  %18217 = vmatmul.mubr.bf16.gmra.mxu0 %v25846_v41  ;;  %v11747_v13 = vsel %vm1110_vm2, %v11742_v54, %v11746_v31  ;;  %v11760_v52 = vshll.u32 %v19258_v16, 16 }
 0x5e5   : > { %v17959_v32 = vpop.f32.mrf.mxu1  ;;  %18356 = vmatprep.subr.bf16.mxu1 %v25726_v62  ;;  %v24643_v44 = vadd.f32 %v10300_v47, %v24470_v60  ;;  %18220 = vmatprep.mubr.msk.bf16.mxu0 %vm19459_vm0, %v25726_v62  ;;  %v19267_v60 = vld [vmem:[%s25677_s3 + $0x100] sm:$0xff]  }
 0x5e6   : > { %v18014_v56 = vpop.f32.mrf.mxu0  ;;  %18305 = vmatpush3.bf16.msra.mxu0 %v19262_v34  ;;  %v11762_v54 = vrot.slane %v11760_v52, 1  ;;  %v19260_v34 = vld [vmem:[#allocation2 + $0xbc] sm:$0xff]  }
 0x5e7   : > { %v10070_v8 = vpop.f32.mrf.mxu1  ;;  %18269 = vmatmul.mubr.bf16.gmra.mxu1 %v11747_v13  ;;  %18306 = vmatprep.subr.bf16.mxu0 %v25726_v62  ;;  %v11768_v56 = vshll.u32 %v19260_v34, 16 }
 0x5e8   : > { %v24648_v53 = vadd.f32 %v10070_v8, %v24407_v23  ;;  %18272 = vmatprep.mubr.msk.bf16.mxu1 %vm19459_vm0, %v25726_v62  ;;  %18357 = vmatpush3.bf16.msra.mxu1 %v19264_v28  ;;  %v10303_v22 = vpop.f32.mrf.mxu0  ;;  %v11748_v23 = vshrl.u32 %v24584_v36, 16  ;;  %v25847_v36 = vld [vmem:[#allocation5_spill] sm:$0xff] }
 0x5e9   : > { %v17962_v61 = vpop.f32.mrf.mxu1  ;;  %18358 = vmatprep.subr.bf16.mxu1 %v25726_v62  ;;  %v24662_v35 = vadd.f32 %v10303_v22, %v24478_v5  ;;  %v11764_v22 = vshrl.u32 %v19258_v16, 16 }
 0x5ea   : > { %v18015_v39 = vpop.f32.mrf.mxu0  ;;  %v11750_v27 = vor.u32 %v11748_v23, %v11746_v31  ;;  %18307 = vmatpush3.bf16.msra.mxu0 %v19266_v20  ;;  %v11770_v23 = vrot.slane %v11768_v56, 1 }
 0x5eb   : > { %v10073_v10 = vpop.f32.mrf.mxu1  ;;  %18396 = vmatprep.subr.bf16.mxu0 %v25726_v62 }
 0x5ec   : > { %v24665_v55 = vadd.f32 %v10073_v10, %v24422_v0  ;;  %18359 = vmatpush3.bf16.msra.mxu1 %v19267_v60  ;;  %v10308_v11 = vpop.f32.mrf.mxu0  ;;  %18221 = vmatmul.mubr.bf16.gmra.mxu0 %v25847_v36  ;;  %v11755_v18 = vsel %vm1110_vm2, %v11750_v27, %v11754_v45  ;;  %v25849_v36 = vld [vmem:[#allocation11_spill] sm:$0xff] }
 0x5ed   : > { %v17963_v51 = vpop.f32.mrf.mxu1  ;;  %18448 = vmatprep.subr.bf16.mxu1 %v25726_v62  ;;  %v24672_v49 = vadd.f32 %v10308_v11, %v24487_v21  ;;  %18224 = vmatprep.mubr.msk.bf16.mxu0 %vm19459_vm0, %v25726_v62 }
 0x5ee   : > { %v18018_v1 = vpop.f32.mrf.mxu0  ;;  %v11766_v51 = vor.u32 %v11764_v22, %v11762_v54 }
 0x5ef   : > { %v10078_v5 = vpop.f32.mrf.mxu1  ;;  %18273 = vmatmul.mubr.bf16.gmra.mxu1 %v11755_v18 }
 0x5f0   : > { %v24677_v0 = vadd.f32 %v10078_v5, %v24430_v38  ;;  %18276 = vmatprep.mubr.msk.bf16.mxu1 %vm19459_vm0, %v25726_v62  ;;  %v10311_v17 = vpop.f32.mrf.mxu0  ;;  %v11758_v38 = vor.u32 %v11756_v59, %v11754_v45  ;;  %v19263_v45 = vld [vmem:[#allocation2 + $0xc4] sm:$0xff]   ;;  %v11771_v18 = vsel %vm1110_vm2, %v11766_v51, %v11770_v23 }
 0x5f1   : > { %v17966_v31 = vpop.f32.mrf.mxu1  ;;  %v24683_v21 = vadd.f32 %v10311_v17, %v24497_v9  ;;  %v11776_v52 = vshll.u32 %v19263_v45, 16  ;;  %v11772_v17 = vshrl.u32 %v19260_v34, 16 }
 0x5f2   : > { %v18019_v47 = vpop.f32.mrf.mxu0  ;;  %v11763_v8 = vsel %vm1110_vm2, %v11758_v38, %v11762_v54  ;;  %v24718_v54 = vld [vmem:[#allocation2 + $0x98] sm:$0xf] }
 0x5f3   : > { %v10081_v32 = vpop.f32.mrf.mxu1  ;;  %v11778_v59 = vrot.slane %v11776_v52, 1  ;;  %v24723_v47 = vld [vmem:[#allocation2 + $0x90] sm:$0xf] }
 0x5f4   : > { %v24686_v28 = vadd.f32 %v10081_v32, %v24441_v48  ;;  %v10316_v13 = vpop.f32.mrf.mxu0  ;;  %18225 = vmatmul.mubr.bf16.gmra.mxu0 %v25848_v57  ;;  %v24728_v57 = vld [vmem:[#allocation2 + $0x94] sm:$0xf] }
 0x5f5   : > { %v17967_v41 = vpop.f32.mrf.mxu1  ;;  %v24691_v2 = vadd.f32 %v10316_v13, %v24507_v24  ;;  %18228 = vmatprep.mubr.msk.bf16.mxu0 %vm19459_vm0, %v25726_v62  ;;  %v19265_v13 = vld [vmem:[#allocation2 + $0xcc] ss:$0 sps:$4 sm:$0x11]   ;;  %v15061_v34 = vcombine.low %v24728_v57, %v24718_v54 }
 0x5f6   : > { %v18022_v9 = vpop.f32.mrf.mxu0  ;;  %v11774_v41 = vor.u32 %v11772_v17, %v11770_v23 }
 0x5f7   : > { %v10086_v20 = vpop.f32.mrf.mxu1  ;;  %18277 = vmatmul.mubr.bf16.gmra.mxu1 %v11763_v8  ;;  %v11968_v9 = vld [vmem:[#allocation2 + $0x8c] sm:$0x8] }
 0x5f8   : > { %v24696_v48 = vadd.f32 %v10086_v20, %v24448_v40  ;;  %18280 = vmatprep.mubr.msk.bf16.mxu1 %vm19459_vm0, %v25726_v62  ;;  %v10319_v60 = vpop.f32.mrf.mxu0  ;;  %v25850_v20 = vld [vmem:[#allocation10_spill] sm:$0xff] }
 0x5f9   : > { %v17970_v61 = vpop.f32.mrf.mxu1  ;;  %v24701_v24 = vadd.f32 %v10319_v60, %v24520_v3 }
 0x5fa   : > { %v18023_v27 = vpop.f32.mrf.mxu0 }
 0x5fb   : > { %v10089_v10 = vpop.f32.mrf.mxu1  ;;  %v11784_v27 = vshll.u32 %v19265_v13, 16 }
 0x5fc   : > { %v24704_v39 = vadd.f32 %v10089_v10, %v24458_v43  ;;  %v10324_v11 = vpop.f32.mrf.mxu0  ;;  %18229 = vmatmul.mubr.bf16.gmra.mxu0 %v25849_v36  ;;  %v11780_v10 = vshrl.u32 %v19263_v45, 16  ;;  %v24753_v45 = vld [vmem:[#allocation2 + $0x9c] sm:$0xf] }
 0x5fd   : > { %v17971_v40 = vpop.f32.mrf.mxu1  ;;  %v24709_v16 = vadd.f32 %v10324_v11, %v24535_v25  ;;  %18232 = vmatprep.mubr.msk.bf16.mxu0 %vm19459_vm0, %v25726_v62  ;;  %v12063_v11 = vshll.u32 %v15061_v34, 16  ;;  %v11786_v17 = vrot.slane %v11784_v27, 1  ;;  %v24769_v27 = vld [vmem:[#allocation2 + $0xa8] sm:$0xf] }
 0x5fe   : > { %v18026_v3 = vpop.f32.mrf.mxu0  ;;  %v12060_v40 = vshrl.u32 %v15061_v34, 16  ;;  %v11782_v36 = vor.u32 %v11780_v10, %v11778_v59 }
 0x5ff   : > { %v10094_v5 = vpop.f32.mrf.mxu1  ;;  %18281 = vmatmul.mubr.bf16.gmra.mxu1 %v11771_v18  ;;  %v24745_v18 = vld [vmem:[#allocation2 + $0xa0] sm:$0xf] }
 0x600   : > { %v24714_v43 = vadd.f32 %v10094_v5, %v24465_v15  ;;  %18284 = vmatprep.mubr.msk.bf16.mxu1 %vm19459_vm0, %v25726_v62  ;;  %v10327_v31 = vpop.f32.mrf.mxu0 }
 0x601   : > { %v17974_v1 = vpop.f32.mrf.mxu1  ;;  %v24721_v25 = vadd.f32 %v10327_v31, %v24553_v6  ;;  %v11779_v6 = vsel %vm1110_vm2, %v11774_v41, %v11778_v59  ;;  %v12065_v41 = vrot.slane %v12063_v11, 4  ;;  %v15062_v59 = vcombine.low %v24753_v45, %v24745_v18 }
 0x602   : > { %v18027_v15 = vpop.f32.mrf.mxu0 }
 0x603   : > { %v10097_v32 = vpop.f32.mrf.mxu1  ;;  %v12062_v15 = vrot.slane %v12060_v40, 3  ;;  %v12072_v10 = vshll.u32 %v15062_v59, 16 }
 0x604   : > { %v24726_v38 = vadd.f32 %v10097_v32, %v24475_v14  ;;  %v10332_v56 = vpop.f32.mrf.mxu0  ;;  %18233 = vmatmul.mubr.bf16.gmra.mxu0 %v25850_v20  ;;  %v15060_v14 = vcombine.low %v11968_v9, %v24723_v47 }
 0x605   : > { %v17975_v8 = vpop.f32.mrf.mxu1  ;;  %v24735_v60 = vadd.f32 %v10332_v56, %v24572_v33  ;;  %18236 = vmatprep.mubr.msk.bf16.mxu0 %vm19459_vm0, %v25726_v62 }
 0x606   : > { %v18030_v23 = vpop.f32.mrf.mxu0  ;;  %v12052_v3 = vshrl.u32 %v15060_v14, 16  ;;  %v25851_v8 = vld [vmem:[#allocation13_spill] sm:$0xff] }
 0x607   : > { %v10102_v61 = vpop.f32.mrf.mxu1  ;;  %18285 = vmatmul.mubr.bf16.gmra.mxu1 %v11779_v6  ;;  %v12069_v23 = vshrl.u32 %v15062_v59, 16 }
 0x608   : > { %v24741_v22 = vadd.f32 %v10102_v61, %v24482_v63  ;;  %18288 = vmatprep.mubr.msk.bf16.mxu1 %vm19459_vm0, %v25726_v62  ;;  %v10335_v33 = vpop.f32.mrf.mxu0  ;;  %v12055_v63 = vshll.u32 %v15060_v14, 16  ;;  %v12066_v14 = vor.u32 %v12065_v41, %v12062_v15  ;;  %v12074_v15 = vrot.slane %v12072_v10, 4  ;;  %v24816_v10 = vld [vmem:[#allocation2 + $0xb0] sm:$0xf] }
 0x609   : > { %v17978_v51 = vpop.f32.mrf.mxu1  ;;  %v24748_v5 = vadd.f32 %v10335_v33, %v24591_v46  ;;  %v11787_v46 = vsel %vm1110_vm2, %v11782_v36, %v11786_v17 }
 0x60a   : > { %v18031_v31 = vpop.f32.mrf.mxu0  ;;  %v12057_v20 = vrot.slane %v12055_v63, 4  ;;  %v24785_v63 = vld [vmem:[#allocation2 + $0xa4] sm:$0xf] }
 0x60b   : > { %v10105_v52 = vpop.f32.mrf.mxu1  ;;  %v15556_v31 = vld [vmem:[%s19541_s14 + $0x18] sm:$0xff]  }
 0x60c   : > { %v24751_v1 = vadd.f32 %v10105_v52, %v24494_v42  ;;  %v10340_v13 = vpop.f32.mrf.mxu0  ;;  %18237 = vmatmul.mubr.bf16.gmra.mxu0 %v25851_v8  ;;  %v12054_v42 = vrot.slane %v12052_v3, 3  ;;  %v15094_v52 = vcombine.low %v24723_v47, %v24728_v57  ;;  %v19272_v3 = vld [vmem:[%s25677_s3 + $0x1b8] sm:$0xff]   ;;  %v24797_v57 = vld [vmem:[%s25678_s4] ss:$0 sm:$0xff] }
 0x60d   : > { %v17979_v32 = vpop.f32.mrf.mxu1  ;;  %v24760_v56 = vadd.f32 %v10340_v13, %v24610_v12  ;;  %18308 = vmatprep.mubr.msk.bf16.mxu0 %vm19459_vm0, %v25726_v62  ;;  %v19275_v13 = vld [vmem:[%s25677_s3 + $0x170] sm:$0xff]  }
 0x60e   : > { %v18034_v9 = vpop.f32.mrf.mxu0  ;;  %v12058_v11 = vor.u32 %v12057_v20, %v12054_v42  ;;  %v12071_v32 = vrot.slane %v12069_v23, 3 }
 0x60f   : > { %v10110_v34 = vpop.f32.mrf.mxu1  ;;  %18289 = vmatmul.mubr.bf16.gmra.mxu1 %v11787_v46  ;;  %v15438_v46 = vunpack.c.l.bf16 %v15556_v31 }
 0x610   : > { %v24765_v6 = vadd.f32 %v10110_v34, %v24502_v29  ;;  %18360 = vmatprep.mubr.msk.bf16.mxu1 %vm19459_vm0, %v25726_v62  ;;  %v10343_v12 = vpop.f32.mrf.mxu0  ;;  %v19271_v29 = vld [vmem:[%s25677_s3 + $0x178] sm:$0xff]   ;;  %v12067_v17 = vsel %vm624_vm1, %v12058_v11, %v12066_v14  ;;  %v24810_v20 = vor.u32 %v12074_v15, %v12071_v32  ;;  %v19280_v32 = vld [vmem:[%s25677_s3 + $0x1a8] sm:$0xff]  }
 0x611   : > { %v17982_v61 = vpop.f32.mrf.mxu1  ;;  %v24772_v40 = vadd.f32 %v10343_v12, %v24629_v30 }
 0x612   : > { %v18035_v36 = vpop.f32.mrf.mxu0 }
 0x613   : > { %v10113_v51 = vpop.f32.mrf.mxu1  ;;  %v15439_v36 = vunpack.c.h.bf16 %v15556_v31 }
 0x614   : > { %v24778_v33 = vadd.f32 %v10113_v51, %v24514_v58  ;;  %v15063_v58 = vcombine.low %v24785_v63, %v24769_v27  ;;  %v10348_v41 = vpop.f32.mrf.mxu0  ;;  %18309 = vmatmul.mubr.bf16.vlgmr.msra.gmra.mxu0 %v12067_v17  ;;  %v24828_v17 = vld [vmem:[#allocation2 + $0xac] sm:$0xf] }
 0x615   : > { %v17983_v30 = vpop.f32.mrf.mxu1  ;;  %v24792_v59 = vadd.f32 %v10348_v41, %v24648_v53  ;;  %18397 = vmatpush3.bf16.msra.mxu0 %v19271_v29  ;;  %18312 = vmatprep.mubr.msk.bf16.mxu0 %vm19459_vm0, %v25726_v62  ;;  %v19276_v53 = vld [vmem:[%s25677_s3 + $0x1b0] sm:$0xff]   ;;  %v15064_v15 = vcombine.low %v24828_v17, %v24816_v10 }
 0x616   : > { %v18038_v34 = vpop.f32.mrf.mxu0  ;;  %18398 = vmatprep.subr.bf16.mxu0 %v25726_v62  ;;  %v12078_v9 = vshrl.u32 %v15063_v58, 16  ;;  %v19279_v30 = vld [vmem:[%s25677_s3 + $0x168] sm:$0xff]  }
 0x617   : > { %v10772_v47 = vpop.f32.mrf.mxu1  ;;  %18361 = vmatmul.mubr.bf16.vlgmr.msra.gmra.mxu1 %v15094_v52 }
 0x618   : > { %v10891_v8 = vadd.f32 %v10772_v47, %v24529_v37  ;;  %18449 = vmatpush3.bf16.msra.mxu1 %v19272_v3  ;;  %18364 = vmatprep.mubr.msk.bf16.mxu1 %vm19459_vm0, %v25726_v62  ;;  %v12081_v37 = vshll.u32 %v15063_v58, 16  ;;  %v10351_v23 = vpop.f32.mrf.mxu0  ;;  %v15095_v3 = vcombine.low %v24718_v54, %v24753_v45  ;;  %v12076_v54 = vsel %vm624_vm1, %v12066_v14, %v24810_v20 }
 0x619   : > { %v18078_v42 = vpop.f32.mrf.mxu1  ;;  %18450 = vmatprep.subr.bf16.mxu1 %v25726_v62  ;;  %v24819_v12 = vadd.f32 %v10351_v23, %v24665_v55  ;;  %18399 = vmatpush3.bf16.msra.mxu0 %v19275_v13  ;;  %v24836_v55 = vld [vmem:[%s19541_s14 + $0x20] sm:$0xff]   ;;  %v12080_v45 = vrot.slane %v12078_v9, 3 }
 0x61a   : > { %v10988_v61 = vadd.f32 %v24797_v57, %v10891_v8  ;;  %v18039_v52 = vpop.f32.mrf.mxu0  ;;  %18400 = vmatprep.subr.bf16.mxu0 %v25726_v62  ;;  %v12083_v31 = vrot.slane %v12081_v37, 4  ;;  %v15442_v34 = vunpack.c.l.bf16 %v24836_v55  ;;  %v12087_v37 = vshrl.u32 %v15064_v15, 16 }
 0x61b   : > { %v10775_v51 = vpop.f32.mrf.mxu1 }
 0x61c   : > { %v11018_v11 = vadd.f32 %v15438_v46, %v10988_v61  ;;  %v10892_v29 = vadd.f32 %v10775_v51, %v24550_v7  ;;  %18451 = vmatpush3.bf16.msra.mxu1 %v19276_v53  ;;  %v10356_v47 = vpop.f32.mrf.mxu0  ;;  %18313 = vmatmul.mubr.bf16.gmra.mxu0 %v12076_v54  ;;  %v24860_v9 = vor.u32 %v12083_v31, %v12080_v45  ;;  %v12090_v61 = vshll.u32 %v15064_v15, 16  ;;  %v24878_v31 = vld [vmem:[#allocation2 + $0xb4] sm:$0xf]  ;;  %v24884_v15 = vld [vmem:[%s19541_s14 + $0x28] sm:$0xff]  }
 0x61d   : > { %v18079_v7 = vpop.f32.mrf.mxu1  ;;  %18452 = vmatprep.subr.bf16.mxu1 %v25726_v62  ;;  %v24848_v13 = vadd.f32 %v10356_v47, %v24677_v0  ;;  %18316 = vmatprep.mubr.msk.bf16.mxu0 %vm19459_vm0, %v25726_v62  ;;  %v19283_v0 = vld [vmem:[%s25677_s3 + $0x160] sm:$0xff]   ;;  %v15096_v45 = vcombine.low %v24745_v18, %v24785_v63  ;;  %v19288_v63 = vld [vmem:[%s25677_s3 + $0x198] sm:$0xff]  }
 0x61e   : > { %v11048_v58 = vmax.f32 %v11018_v11, 0.0  ;;  %v10989_v41 = vadd.f32 %v24797_v57, %v10892_v29  ;;  %v18042_v53 = vpop.f32.mrf.mxu0  ;;  %18401 = vmatpush3.bf16.msra.mxu0 %v19279_v30  ;;  %v24868_v29 = vld [vmem:[#allocation2 + $0xb8] sm:$0xf]  ;;  %v15443_v7 = vunpack.c.h.bf16 %v24836_v55  ;;  %v12089_v55 = vrot.slane %v12087_v37, 3 }
 0x61f   : > { %v10780_v14 = vpop.f32.mrf.mxu1  ;;  %18365 = vmatmul.mubr.bf16.gmra.mxu1 %v15095_v3  ;;  %18402 = vmatprep.subr.bf16.mxu0 %v25726_v62  ;;  %v15065_v18 = vcombine.low %v24878_v31, %v24868_v29  ;;  %v15446_v53 = vunpack.c.l.bf16 %v24884_v15 }
 0x620   : > { %11078 = vst [vmem:[%s24833_s27 - $0x1] sm:$0xfe] %v11048_v58  ;;  %v11019_v8 = vadd.f32 %v15439_v36, %v10989_v41  ;;  %v10893_v46 = vadd.f32 %v10780_v14, %v24567_v26  ;;  %18368 = vmatprep.mubr.msk.bf16.mxu1 %vm19459_vm0, %v25726_v62  ;;  %18453 = vmatpush3.bf16.msra.mxu1 %v19280_v32  ;;  %v19284_v26 = vld [vmem:[%s25677_s3 + $0x1a0] sm:$0xff]   ;;  %v10359_v11 = vpop.f32.mrf.mxu0  ;;  %v19287_v32 = vld [vmem:[%s25677_s3 + $0x158] sm:$0xff]   ;;  %v12092_v58 = vrot.slane %v12090_v61, 4 }
 0x621   : > { %v18082_v42 = vpop.f32.mrf.mxu1  ;;  %18454 = vmatprep.subr.bf16.mxu1 %v25726_v62  ;;  %v24871_v36 = vadd.f32 %v10359_v11, %v24686_v28  ;;  %v12096_v61 = vshrl.u32 %v15065_v18, 16 }
 0x622   : > { %v11049_v23 = vmax.f32 %v11019_v8, 0.0  ;;  %v10990_v51 = vadd.f32 %v24797_v57, %v10893_v46  ;;  %v18043_v54 = vpop.f32.mrf.mxu0  ;;  %18403 = vmatpush3.bf16.msra.mxu0 %v19283_v0  ;;  %v24910_v37 = vor.u32 %v12092_v58, %v12089_v55  ;;  %v19295_v55 = vld [vmem:[%s25677_s3 + $0x148] sm:$0xff]   ;;  %v24934_v58 = vld [vmem:[%s19541_s14 + $0x30] sm:$0xff]  }
 0x623   : > { %v10783_v52 = vpop.f32.mrf.mxu1  ;;  %18404 = vmatprep.subr.bf16.mxu0 %v25726_v62 }
 0x624   : > { %11079 = vst [vmem:[%s24833_s27 + $0x7] sm:$0xff] %v11049_v23  ;;  %v11020_v3 = vadd.f32 %v15442_v34, %v10990_v51  ;;  %v10894_v30 = vadd.f32 %v10783_v52, %v24588_v4  ;;  %v12085_v4 = vsel %vm624_vm1, %v24810_v20, %v24860_v9  ;;  %18455 = vmatpush3.bf16.msra.mxu1 %v19284_v26  ;;  %v10364_v14 = vpop.f32.mrf.mxu0  ;;  %v12099_v26 = vshll.u32 %v15065_v18, 16  ;;  %v24917_v52 = vld [vmem:[#allocation2 + $0xc0] sm:$0xf] }
 0x625   : > { %v18083_v28 = vpop.f32.mrf.mxu1  ;;  %18317 = vmatmul.mubr.bf16.gmra.mxu0 %v12085_v4  ;;  %18456 = vmatprep.subr.bf16.mxu1 %v25726_v62  ;;  %v24898_v20 = vadd.f32 %v10364_v14, %v24696_v48  ;;  %v19291_v48 = vld [vmem:[%s25677_s3 + $0x150] sm:$0xff]   ;;  %v24928_v4 = vld [vmem:[#allocation2 + $0xbc] sm:$0xf] }
 0x626   : > { %v11050_v41 = vmax.f32 %v11020_v3, 0.0  ;;  %v10991_v47 = vadd.f32 %v24797_v57, %v10894_v30  ;;  %18320 = vmatprep.mubr.msk.bf16.mxu0 %vm19459_vm0, %v25726_v62  ;;  %v18046_v0 = vpop.f32.mrf.mxu0  ;;  %18405 = vmatpush3.bf16.msra.mxu0 %v19287_v32  ;;  %v15097_v28 = vcombine.low %v24769_v27, %v24828_v17  ;;  %v12101_v18 = vrot.slane %v12099_v26, 4  ;;  %v19298_v17 = vld [vmem:[%s25677_s3 + $0x188] sm:$0xff]  }
 0x627   : > { %v10788_v8 = vpop.f32.mrf.mxu1  ;;  %18369 = vmatmul.mubr.bf16.gmra.mxu1 %v15096_v45  ;;  %18406 = vmatprep.subr.bf16.mxu0 %v25726_v62  ;;  %v15447_v45 = vunpack.c.h.bf16 %v24884_v15  ;;  %v12098_v15 = vrot.slane %v12096_v61, 3  ;;  %v15066_v27 = vcombine.low %v24928_v4, %v24917_v52 }
 0x628   : > { %11080 = vst [vmem:[%s24833_s27 + $0xf] sm:$0x1] %v11050_v41  ;;  %v11021_v46 = vadd.f32 %v15443_v7, %v10991_v47  ;;  %v10895_v34 = vadd.f32 %v10788_v8, %v24605_v19  ;;  %18372 = vmatprep.mubr.msk.bf16.mxu1 %vm19459_vm0, %v25726_v62  ;;  %18457 = vmatpush3.bf16.msra.mxu1 %v19288_v63  ;;  %v19294_v19 = vld [vmem:[%s25677_s3 + $0x190] sm:$0xff]   ;;  %v10367_v11 = vpop.f32.mrf.mxu0 }
 0x629   : > { %v18086_v42 = vpop.f32.mrf.mxu1  ;;  %18458 = vmatprep.subr.bf16.mxu1 %v25726_v62  ;;  %v24921_v3 = vadd.f32 %v10367_v11, %v24704_v39  ;;  %v12108_v61 = vshll.u32 %v15066_v27, 16 }
 0x62a   : > { %v11051_v23 = vmax.f32 %v11021_v46, 0.0  ;;  %v10992_v51 = vadd.f32 %v24797_v57, %v10895_v34  ;;  %v18047_v32 = vpop.f32.mrf.mxu0  ;;  %18407 = vmatpush3.bf16.msra.mxu0 %v19291_v48  ;;  %v15450_v34 = vunpack.c.l.bf16 %v24934_v58  ;;  %v24960_v48 = vor.u32 %v12101_v18, %v12098_v15 }
 0x62b   : > { %v10791_v30 = vpop.f32.mrf.mxu1  ;;  %18408 = vmatprep.subr.bf16.mxu0 %v25726_v62  ;;  %v12105_v42 = vshrl.u32 %v15066_v27, 16  ;;  %v12110_v18 = vrot.slane %v12108_v61, 4 }
 0x62c   : > { %11081 = vst [vmem:[%s24833_s27 + $0xf] sm:$0xfe] %v11051_v23  ;;  %v11022_v7 = vadd.f32 %v15446_v53, %v10992_v51  ;;  %v10896_v54 = vadd.f32 %v10791_v30, %v24626_v50  ;;  %v12094_v50 = vsel %vm624_vm1, %v24860_v9, %v24910_v37  ;;  %18459 = vmatpush3.bf16.msra.mxu1 %v19294_v19  ;;  %v10372_v47 = vpop.f32.mrf.mxu0  ;;  %v24967_v51 = vld [vmem:[#allocation2 + $0xc8] sm:$0xf] }
 0x62d   : > { %v18087_v39 = vpop.f32.mrf.mxu1  ;;  %18321 = vmatmul.mubr.bf16.gmra.mxu0 %v12094_v50  ;;  %18460 = vmatprep.subr.bf16.mxu1 %v25726_v62  ;;  %v24948_v9 = vadd.f32 %v10372_v47, %v24714_v43  ;;  %v19301_v43 = vld [vmem:[%s25677_s3 + $0x140] sm:$0xff]   ;;  %v15560_v50 = vld [vmem:[%s19541_s14 + $0x38] sm:$0xff]   ;;  %v12107_v15 = vrot.slane %v12105_v42, 3 }
 0x62e   : > { %v11052_v63 = vmax.f32 %v11022_v7, 0.0  ;;  %v10993_v41 = vadd.f32 %v24797_v57, %v10896_v54  ;;  %18324 = vmatprep.mubr.msk.bf16.mxu0 %vm19459_vm0, %v25726_v62  ;;  %v18050_v53 = vpop.f32.mrf.mxu0  ;;  %18409 = vmatpush3.bf16.msra.mxu0 %v19295_v55  ;;  %v24978_v55 = vld [vmem:[#allocation2 + $0xc4] sm:$0xf] }
 0x62f   : > { %v10796_v14 = vpop.f32.mrf.mxu1  ;;  %18373 = vmatmul.mubr.bf16.gmra.mxu1 %v15097_v28  ;;  %18410 = vmatprep.subr.bf16.mxu0 %v25726_v62  ;;  %v15098_v28 = vcombine.low %v24816_v10, %v24878_v31 }
 0x630   : > { %11082 = vst [vmem:[%s24833_s27 + $0x17] sm:$0xff] %v11052_v63  ;;  %v11023_v8 = vadd.f32 %v15447_v45, %v10993_v41  ;;  %v10897_v46 = vadd.f32 %v10796_v14, %v24643_v44  ;;  %18376 = vmatprep.mubr.msk.bf16.mxu1 %vm19459_vm0, %v25726_v62  ;;  %18461 = vmatpush3.bf16.msra.mxu1 %v19298_v17  ;;  %v19302_v44 = vld [vmem:[%s25677_s3 + $0x180] sm:$0xff]   ;;  %v10375_v23 = vpop.f32.mrf.mxu0  ;;  %v15451_v45 = vunpack.c.h.bf16 %v24934_v58  ;;  %v15454_v41 = vunpack.c.l.bf16 %v15560_v50 }
 0x631   : > { %v18090_v0 = vpop.f32.mrf.mxu1  ;;  %18462 = vmatprep.subr.bf16.mxu1 %v25726_v62  ;;  %v24971_v11 = vadd.f32 %v10375_v23, %v24726_v38  ;;  %v12103_v38 = vsel %vm624_vm1, %v24910_v37, %v24960_v48  ;;  %v15099_v23 = vcombine.low %v24868_v29, %v24928_v4 }
 0x632   : > { %v11053_v26 = vmax.f32 %v11023_v8, 0.0  ;;  %v10994_v19 = vadd.f32 %v24797_v57, %v10897_v46  ;;  %v18051_v32 = vpop.f32.mrf.mxu0  ;;  %18411 = vmatpush3.bf16.msra.mxu0 %v19301_v43  ;;  %v12111_v8 = vor.u32 %v12110_v18, %v12107_v15  ;;  %v24999_v0 = vld [vmem:[#allocation2 + $0xd0] sm:$0xf] }
 0x633   : > { %v10799_v30 = vpop.f32.mrf.mxu1  ;;  %18500 = vmatprep.subr.bf16.mxu0 %v25726_v62 }
 0x634   : > { %11083 = vst [vmem:[%s24833_s27 + $0x1f] sm:$0x1] %v11053_v26  ;;  %v11024_v7 = vadd.f32 %v15450_v34, %v10994_v19  ;;  %v10898_v54 = vadd.f32 %v10799_v30, %v24662_v35  ;;  %v15067_v35 = vcombine.low %v24978_v55, %v24967_v51  ;;  %18463 = vmatpush3.bf16.msra.mxu1 %v19302_v44  ;;  %v10380_v31 = vpop.f32.mrf.mxu0  ;;  %v15455_v26 = vunpack.c.h.bf16 %v15560_v50  ;;  %v25008_v30 = vld [vmem:[#allocation2 + $0xcc] sm:$0xf] }
 0x635   : > { %v18091_v39 = vpop.f32.mrf.mxu1  ;;  %18325 = vmatmul.mubr.bf16.gmra.mxu0 %v12103_v38  ;;  %18552 = vmatprep.subr.bf16.mxu1 %v25726_v62  ;;  %v24990_v27 = vadd.f32 %v10380_v31, %v24741_v22 }
 0x636   : > { %v11054_v58 = vmax.f32 %v11024_v7, 0.0  ;;  %v10995_v10 = vadd.f32 %v24797_v57, %v10898_v54  ;;  %18328 = vmatprep.mubr.msk.bf16.mxu0 %vm19459_vm0, %v25726_v62  ;;  %v18054_v47 = vpop.f32.mrf.mxu0  ;;  %v12114_v46 = vshrl.u32 %v15067_v35, 16  ;;  %v12117_v22 = vshll.u32 %v15067_v35, 16  ;;  %v15561_v54 = vld [vmem:[%s19541_s14 + $0x40] sm:$0xff]  }
 0x637   : > { %v10804_v17 = vpop.f32.mrf.mxu1  ;;  %18377 = vmatmul.mubr.bf16.gmra.mxu1 %v15098_v28  ;;  %v15068_v28 = vcombine.low %v25008_v30, %v24999_v0  ;;  %v15458_v15 = vunpack.c.l.bf16 %v15561_v54 }
 0x638   : > { %11084 = vst [vmem:[%s24833_s27 + $0x1f] sm:$0xfe] %v11054_v58  ;;  %v11025_v37 = vadd.f32 %v15451_v45, %v10995_v10  ;;  %v10899_v63 = vadd.f32 %v10804_v17, %v24672_v49  ;;  %18380 = vmatprep.mubr.msk.bf16.mxu1 %vm19459_vm0, %v25726_v62  ;;  %v10383_v43 = vpop.f32.mrf.mxu0  ;;  %v12112_v45 = vsel %vm624_vm1, %v24960_v48, %v12111_v8  ;;  %v12119_v32 = vrot.slane %v12117_v22, 4 }
 0x639   : > { %v18094_v14 = vpop.f32.mrf.mxu1  ;;  %v25002_v42 = vadd.f32 %v10383_v43, %v24751_v1  ;;  %v12116_v1 = vrot.slane %v12114_v46, 3  ;;  %v12126_v10 = vshll.u32 %v15068_v28, 16  ;;  %v15459_v46 = vunpack.c.h.bf16 %v15561_v54  ;;  %v15562_v43 = vld [vmem:[%s19541_s14 + $0x48] sm:$0xff]  }
 0x63a   : > { %v11055_v34 = vmax.f32 %v11025_v37, 0.0  ;;  %v10996_v53 = vadd.f32 %v24797_v57, %v10899_v63  ;;  %v18055_v19 = vpop.f32.mrf.mxu0  ;;  %v25026_v63 = vld [vmem:[#allocation2 + $0xd4] sm:$0xf] }
 0x63b   : > { %v10807_v49 = vpop.f32.mrf.mxu1  ;;  %v12120_v58 = vor.u32 %v12119_v32, %v12116_v1 }
 0x63c   : > { %11085 = vst [vmem:[%s24833_s27 + $0x27] sm:$0xff] %v11055_v34  ;;  %v11026_v61 = vadd.f32 %v15454_v41, %v10996_v53  ;;  %v10900_v44 = vadd.f32 %v10807_v49, %v24683_v21  ;;  %v10388_v50 = vpop.f32.mrf.mxu0  ;;  %v15100_v34 = vcombine.low %v24917_v52, %v24978_v55 }
 0x63d   : > { %v18095_v7 = vpop.f32.mrf.mxu1  ;;  %18329 = vmatmul.mubr.bf16.gmra.mxu0 %v12112_v45  ;;  %v25017_v29 = vadd.f32 %v10388_v50, %v24765_v6  ;;  %v12123_v6 = vshrl.u32 %v15068_v28, 16  ;;  %v12121_v49 = vsel %vm624_vm1, %v12111_v8, %v12120_v58  ;;  %v15462_v8 = vunpack.c.l.bf16 %v15562_v43 }
 0x63e   : > { %v11056_v39 = vmax.f32 %v11026_v61, 0.0  ;;  %v10997_v21 = vadd.f32 %v24797_v57, %v10900_v44  ;;  %18332 = vmatprep.mubr.msk.bf16.mxu0 %vm19459_vm0, %v25726_v62  ;;  %v18058_v18 = vpop.f32.mrf.mxu0  ;;  %v12128_v44 = vrot.slane %v12126_v10, 4  ;;  %v15101_v10 = vcombine.low %v24967_v51, %v25008_v30  ;;  %v19435_v51 = vld [vmem:[#allocation2 + $0x9c] sm:$0xf] }
 0x63f   : > { %v10812_v4 = vpop.f32.mrf.mxu1  ;;  %18381 = vmatmul.mubr.bf16.gmra.mxu1 %v15099_v23  ;;  %v12125_v61 = vrot.slane %v12123_v6, 3 }
 0x640   : > { %11086 = vst [vmem:[%s24833_s27 + $0x2f] sm:$0x1] %v11056_v39  ;;  %v11027_v48 = vadd.f32 %v15455_v26, %v10997_v21  ;;  %v10901_v38 = vadd.f32 %v10812_v4, %v24691_v2  ;;  %18384 = vmatprep.mubr.msk.bf16.mxu1 %vm19459_vm0, %v25726_v62  ;;  %v10391_v37 = vpop.f32.mrf.mxu0 }
 0x641   : > { %v18098_v35 = vpop.f32.mrf.mxu1  ;;  %v25029_v41 = vadd.f32 %v10391_v37, %v24778_v33  ;;  %v15069_v33 = vcombine.low %v25026_v63, %v25026_v63  ;;  %v12129_v45 = vor.u32 %v12128_v44, %v12125_v61 }
 0x642   : > { %v11057_v31 = vmax.f32 %v11027_v48, 0.0  ;;  %v10998_v17 = vadd.f32 %v24797_v57, %v10901_v38  ;;  %v18059_v22 = vpop.f32.mrf.mxu0  ;;  %v15463_v48 = vunpack.c.h.bf16 %v15562_v43  ;;  %v15563_v35 = vld [vmem:[%s19541_s14 + $0x50] sm:$0xff]  }
 0x643   : > { %v10815_v2 = vpop.f32.mrf.mxu1  ;;  %v12132_v1 = vshrl.u32 %v15069_v33, 16  ;;  %v12135_v32 = vshll.u32 %v15069_v33, 16  ;;  %v12130_v6 = vsel %vm624_vm1, %v12120_v58, %v12129_v45  ;;  %v25062_v58 = vld [vmem:[#allocation2 + $0x90] sm:$0xff]   ;;  %v15466_v43 = vunpack.c.l.bf16 %v15563_v35  ;;  %v25068_v33 = vld [vmem:[#allocation2 + $0x98] sm:$0xff]  }
 0x644   : > { %11087 = vst [vmem:[%s24833_s27 + $0x2f] sm:$0xfe] %v11057_v31  ;;  %v11028_v47 = vadd.f32 %v15458_v15, %v10998_v17  ;;  %v10902_v14 = vadd.f32 %v10815_v2, %v24701_v24  ;;  %v25040_v23 = vpop.f32.mrf.mxu0  ;;  %v12864_v15 = vld [vmem:[#allocation2 + $0x98] sm:$0x8] }
 0x645   : > { %v18099_v53 = vpop.f32.mrf.mxu1  ;;  %18333 = vmatmul.mubr.bf16.gmra.mxu0 %v12121_v49  ;;  %v12134_v31 = vrot.slane %v12132_v1, 3  ;;  %v12137_v17 = vrot.slane %v12135_v32, 4  ;;  %v15161_v30 = vcombine.low %v12864_v15, %v19435_v51  ;;  %v15467_v32 = vunpack.c.h.bf16 %v15563_v35  ;;  %v19436_v15 = vld [vmem:[#allocation2 + $0xa8] sm:$0xf] }
 0x646   : > { %v11058_v26 = vmax.f32 %v11028_v47, 0.0  ;;  %v10999_v19 = vadd.f32 %v24797_v57, %v10902_v14  ;;  %18336 = vmatprep.mubr.msk.bf16.mxu0 %vm19459_vm0, %v25726_v62  ;;  %v18154_v7 = vpop.f32.mrf.mxu0  ;;  %v19434_v14 = vld [vmem:[#allocation2 + $0xa4] sm:$0xf]  ;;  %v12609_v51 = vshrl.u32 %v25062_v58, 16 }
 0x647   : > { %v10820_v24 = vpop.f32.mrf.mxu1  ;;  %18385 = vmatmul.mubr.bf16.gmra.mxu1 %v15100_v34  ;;  %v12138_v44 = vor.u32 %v12137_v17, %v12134_v31  ;;  %v12948_v7 = vshrl.u32 %v15161_v30, 16 }
 0x648   : > { %11088 = vst [vmem:[%s24833_s27 + $0x37] sm:$0xff] %v11058_v26  ;;  %v11029_v52 = vadd.f32 %v15459_v46, %v10999_v19  ;;  %v10903_v55 = vadd.f32 %v10820_v24, %v24709_v16  ;;  %18388 = vmatprep.mubr.msk.bf16.mxu1 %vm19459_vm0, %v25726_v62  ;;  %v25049_v21 = vpop.f32.mrf.mxu0 }
 0x649   : > { %v18102_v54 = vpop.f32.mrf.mxu1 }
 0x64a   : > { %v11059_v28 = vmax.f32 %v11029_v52, 0.0  ;;  %v11000_v39 = vadd.f32 %v24797_v57, %v10903_v55  ;;  %v18155_v38 = vpop.f32.mrf.mxu0 }
 0x64b   : > { %v10823_v50 = vpop.f32.mrf.mxu1  ;;  %v12616_v38 = vshll.u32 %v25068_v33, 16 }
 0x64c   : > { %11089 = vst [vmem:[%s24833_s27 + $0x3f] sm:$0x1] %v11059_v28  ;;  %v11030_v4 = vadd.f32 %v15462_v8, %v11000_v39  ;;  %v10904_v16 = vadd.f32 %v10823_v50, %v24721_v25  ;;  %v25058_v47 = vpop.f32.mrf.mxu0  ;;  %v19433_v25 = vld [vmem:[#allocation2 + $0xa0] sm:$0xf]  ;;  %v12951_v39 = vshll.u32 %v15161_v30, 16 }
 0x64d   : > { %v18103_v18 = vpop.f32.mrf.mxu1  ;;  %18337 = vmatmul.mubr.bf16.gmra.mxu0 %v12130_v6  ;;  %v15162_v46 = vcombine.low %v19433_v25, %v19434_v14  ;;  %v12618_v30 = vrot.slane %v12616_v38, 1 }
 0x64e   : > { %v11060_v37 = vmax.f32 %v11030_v4, 0.0  ;;  %v11001_v2 = vadd.f32 %v24797_v57, %v10904_v16  ;;  %18340 = vmatprep.mubr.msk.bf16.mxu0 %vm19459_vm0, %v25726_v62  ;;  %v18158_v49 = vpop.f32.mrf.mxu0  ;;  %v25077_v4 = vld [vmem:[%s19541_s14 + $0x58] sm:$0xff]   ;;  %v12139_v16 = vsel %vm624_vm1, %v12129_v45, %v12138_v44  ;;  %v19437_v18 = vld [vmem:[#allocation2 + $0xac] sm:$0xf] }
 0x64f   : > { %v10828_v22 = vpop.f32.mrf.mxu1  ;;  %18389 = vmatmul.mubr.bf16.gmra.mxu1 %v15101_v10  ;;  %v12956_v52 = vshrl.u32 %v15162_v46, 16  ;;  %v12959_v55 = vshll.u32 %v15162_v46, 16  ;;  %v15163_v6 = vcombine.low %v19436_v15, %v19437_v18  ;;  %v15470_v25 = vunpack.c.l.bf16 %v25077_v4  ;;  %v19438_v15 = vld [vmem:[#allocation2 + $0xb0] sm:$0xf]  ;;  %v19439_v18 = vld [vmem:[#allocation2 + $0xb4] sm:$0xf] }
 0x650   : > { %11090 = vst [vmem:[%s24833_s27 + $0x3f] sm:$0xfe] %v11060_v37  ;;  %v11031_v34 = vadd.f32 %v15463_v48, %v11001_v2  ;;  %v10905_v53 = vadd.f32 %v10828_v22, %v24735_v60  ;;  %18392 = vmatprep.mubr.msk.bf16.mxu1 %vm19459_vm0, %v25726_v62  ;;  %v25071_v24 = vpop.f32.mrf.mxu0  ;;  %v12611_v60 = vshll.u32 %v25062_v58, 16  ;;  %v15102_v48 = vcombine.low %v24999_v0, %v25026_v63 }
 0x651   : > { %v18106_v61 = vpop.f32.mrf.mxu1  ;;  %v12958_v31 = vrot.slane %v12956_v52, 3  ;;  %v12961_v17 = vrot.slane %v12959_v55, 4  ;;  %v12950_v63 = vrot.slane %v12948_v7, 3  ;;  %v12953_v46 = vrot.slane %v12951_v39, 4  ;;  %v19307_v52 = vld [vmem:[%s25677_s3 + $0x1f8] sm:$0xff]  }
 0x652   : > { %v11061_v26 = vmax.f32 %v11031_v34, 0.0  ;;  %v11002_v19 = vadd.f32 %v24797_v57, %v10905_v53  ;;  %v18159_v28 = vpop.f32.mrf.mxu0  ;;  %v12613_v0 = vrot.slane %v12611_v60, 1  ;;  %v25094_v34 = vld [vmem:[#allocation2 + $0xa0] sm:$0xff]   ;;  %v12965_v53 = vshrl.u32 %v15163_v6, 16 }
 0x653   : > { %v10831_v8 = vpop.f32.mrf.mxu1  ;;  %v25099_v44 = vor.u32 %v12961_v17, %v12958_v31  ;;  %v12954_v7 = vor.u32 %v12953_v46, %v12950_v63  ;;  %v12624_v39 = vshll.u32 %v25094_v34, 16  ;;  %v19312_v63 = vld [vmem:[%s25677_s3 + $0x230] sm:$0xff]  }
 0x654   : > { %11091 = vst [vmem:[%s24833_s27 + $0x47] sm:$0xff] %v11061_v26  ;;  %v11032_v54 = vadd.f32 %v15466_v43, %v11002_v19  ;;  %v10906_v1 = vadd.f32 %v10831_v8, %v24748_v5  ;;  %v25084_v35 = vpop.f32.mrf.mxu0  ;;  %v12968_v43 = vshll.u32 %v15163_v6, 16  ;;  %v12614_v19 = vor.u32 %v12613_v0, %v12609_v51 }
 0x655   : > { %v18107_v50 = vpop.f32.mrf.mxu1  ;;  %18341 = vmatmul.mubr.bf16.gmra.mxu0 %v12139_v16  ;;  %v15471_v8 = vunpack.c.h.bf16 %v25077_v4  ;;  %v12963_v38 = vsel %vm624_vm1, %v12954_v7, %v25099_v44  ;;  %v15164_v6 = vcombine.low %v19438_v15, %v19439_v18  ;;  %v19316_v7 = vld [vmem:[%s25677_s3 + $0x228] sm:$0xff]  }
 0x656   : > { %v11062_v10 = vmax.f32 %v11032_v54, 0.0  ;;  %v11003_v5 = vadd.f32 %v24797_v57, %v10906_v1  ;;  %18412 = vmatprep.mubr.msk.bf16.mxu0 %vm19459_vm0, %v25726_v62  ;;  %v18162_v14 = vpop.f32.mrf.mxu0  ;;  %v19308_v54 = vld [vmem:[%s25677_s3 + $0x238] sm:$0xff]   ;;  %v12619_v28 = vsel %vm1110_vm2, %v12614_v19, %v12618_v30  ;;  %v12967_v50 = vrot.slane %v12965_v53, 3 }
 0x657   : > { %v10836_v37 = vpop.f32.mrf.mxu1  ;;  %18393 = vmatmul.mubr.bf16.gmra.mxu1 %v15102_v48  ;;  %v12970_v16 = vrot.slane %v12968_v43, 4  ;;  %v25139_v14 = vld [vmem:[#allocation2 + $0xa8] sm:$0xff]   ;;  %v12974_v53 = vshrl.u32 %v15164_v6, 16  ;;  %v12977_v43 = vshll.u32 %v15164_v6, 16  ;;  %v19319_v6 = vld [vmem:[%s25677_s3 + $0x1e0] sm:$0xff]  }
 0x658   : > { %11092 = vst [vmem:[%s24833_s27 + $0x4f] sm:$0x1] %v11062_v10  ;;  %v11033_v45 = vadd.f32 %v15467_v32, %v11003_v5  ;;  %v10907_v2 = vadd.f32 %v10836_v37, %v24760_v56  ;;  %18464 = vmatprep.mubr.msk.bf16.mxu1 %vm19459_vm0, %v25726_v62  ;;  %v25097_v61 = vpop.f32.mrf.mxu0  ;;  %v25111_v32 = vld [vmem:[%s19541_s14 + $0x60] sm:$0xff]   ;;  %v19311_v5 = vld [vmem:[%s25677_s3 + $0x1f0] sm:$0xff]  }
 0x659   : > { %v18110_v22 = vpop.f32.mrf.mxu1  ;;  %v15474_v37 = vunpack.c.l.bf16 %v25111_v32  ;;  %v15475_v19 = vunpack.c.h.bf16 %v25111_v32 }
 0x65a   : > { %v11063_v49 = vmax.f32 %v11033_v45, 0.0  ;;  %v11004_v56 = vadd.f32 %v24797_v57, %v10907_v2  ;;  %v18163_v60 = vpop.f32.mrf.mxu0  ;;  %v12620_v2 = vshrl.u32 %v25068_v33, 16 }
 0x65b   : > { %v10839_v26 = vpop.f32.mrf.mxu1  ;;  %v12632_v60 = vshll.u32 %v25139_v14, 16 }
 0x65c   : > { %11093 = vst [vmem:[%s24833_s27 + $0x4f] sm:$0xfe] %v11063_v49  ;;  %v11034_v58 = vadd.f32 %v15470_v25, %v11004_v56  ;;  %v10908_v55 = vadd.f32 %v10839_v26, %v24772_v40  ;;  %v25116_v4 = vpop.f32.mrf.mxu0  ;;  %v25134_v25 = vrot.slane %v12624_v39, 1  ;;  %v12622_v33 = vor.u32 %v12620_v2, %v12618_v30 }
 0x65d   : > { %v18111_v1 = vpop.f32.mrf.mxu1  ;;  %18413 = vmatmul.mubr.bf16.vlgmr.msra.gmra.mxu0 %v12619_v28 }
 0x65e   : > { %v11064_v48 = vmax.f32 %v11034_v58, 0.0  ;;  %v11005_v40 = vadd.f32 %v24797_v57, %v10908_v55  ;;  %18501 = vmatpush3.bf16.msra.mxu0 %v19307_v52  ;;  %v18166_v0 = vpop.f32.mrf.mxu0  ;;  %18416 = vmatprep.mubr.msk.bf16.mxu0 %vm19459_vm0, %v25726_v62  ;;  %v19315_v58 = vld [vmem:[%s25677_s3 + $0x1e8] sm:$0xff]   ;;  %v12627_v30 = vsel %vm1110_vm2, %v12622_v33, %v25134_v25  ;;  %v19441_v1 = vld [vmem:[#allocation2 + $0xbc] sm:$0xf] }
 0x65f   : > { %v10844_v10 = vpop.f32.mrf.mxu1  ;;  %18465 = vmatmul.mubr.bf16.vlgmr.msra.gmra.mxu1 %v12963_v38  ;;  %18502 = vmatprep.subr.bf16.mxu0 %v25726_v62  ;;  %v19320_v0 = vld [vmem:[%s25677_s3 + $0x220] sm:$0xff]  }
 0x660   : > { %11094 = vst [vmem:[%s24833_s27 + $0x57] sm:$0xff] %v11064_v48  ;;  %v11035_v31 = vadd.f32 %v15471_v8, %v11005_v40  ;;  %v10909_v17 = vadd.f32 %v10844_v10, %v24792_v59  ;;  %18553 = vmatpush3.bf16.msra.mxu1 %v19308_v54  ;;  %18468 = vmatprep.mubr.msk.bf16.mxu1 %vm19459_vm0, %v25726_v62  ;;  %v25142_v51 = vpop.f32.mrf.mxu0  ;;  %v25153_v8 = vld [vmem:[%s19541_s14 + $0x68] sm:$0xff]   ;;  %v19440_v54 = vld [vmem:[#allocation2 + $0xb8] sm:$0xf] }
 0x661   : > { %v18114_v45 = vpop.f32.mrf.mxu1  ;;  %v25136_v59 = vor.u32 %v12970_v16, %v12967_v50  ;;  %18554 = vmatprep.subr.bf16.mxu1 %v25726_v62  ;;  %v15165_v32 = vcombine.low %v19440_v54, %v19441_v1  ;;  %v12976_v16 = vrot.slane %v12974_v53, 3  ;;  %v15478_v15 = vunpack.c.l.bf16 %v25153_v8  ;;  %v19443_v54 = vld [vmem:[#allocation2 + $0xc4] sm:$0xf] }
 0x662   : > { %v11065_v46 = vmax.f32 %v11035_v31, 0.0  ;;  %v11006_v22 = vadd.f32 %v24797_v57, %v10909_v17  ;;  %18503 = vmatpush3.bf16.msra.mxu0 %v19311_v5  ;;  %v18167_v52 = vpop.f32.mrf.mxu0  ;;  %v12628_v5 = vshrl.u32 %v25094_v34, 16  ;;  %v25179_v31 = vrot.slane %v12632_v60, 1  ;;  %v25181_v17 = vld [vmem:[#allocation2 + $0xb0] sm:$0xff]  }
 0x663   : > { %v10847_v49 = vpop.f32.mrf.mxu1  ;;  %18504 = vmatprep.subr.bf16.mxu0 %v25726_v62 }
 0x664   : > { %11095 = vst [vmem:[%s24833_s27 + $0x5f] sm:$0x1] %v11065_v46  ;;  %v11036_v56 = vadd.f32 %v15474_v37, %v11006_v22  ;;  %v10910_v26 = vadd.f32 %v10847_v49, %v24819_v12  ;;  %18555 = vmatpush3.bf16.msra.mxu1 %v19312_v63  ;;  %v12972_v12 = vsel %vm624_vm1, %v25099_v44, %v25136_v59  ;;  %v25166_v50 = vpop.f32.mrf.mxu0  ;;  %v12979_v44 = vrot.slane %v12977_v43, 4 }
 0x665   : > { %v18115_v55 = vpop.f32.mrf.mxu1  ;;  %18556 = vmatprep.subr.bf16.mxu1 %v25726_v62  ;;  %18417 = vmatmul.mubr.bf16.gmra.mxu0 %v12627_v30  ;;  %v12986_v37 = vshll.u32 %v15165_v32, 16  ;;  %v12630_v22 = vor.u32 %v12628_v5, %v25134_v25  ;;  %v15479_v49 = vunpack.c.h.bf16 %v25153_v8  ;;  %v12640_v25 = vshll.u32 %v25181_v17, 16 }
 0x666   : > { %v11066_v28 = vmax.f32 %v11036_v56, 0.0  ;;  %v11007_v39 = vadd.f32 %v24797_v57, %v10910_v26  ;;  %18420 = vmatprep.mubr.msk.bf16.mxu0 %vm19459_vm0, %v25726_v62  ;;  %v18170_v18 = vpop.f32.mrf.mxu0  ;;  %18505 = vmatpush3.bf16.msra.mxu0 %v19315_v58  ;;  %v25190_v34 = vor.u32 %v12979_v44, %v12976_v16  ;;  %v19323_v56 = vld [vmem:[%s25677_s3 + $0x1d8] sm:$0xff]  }
 0x667   : > { %v10852_v48 = vpop.f32.mrf.mxu1  ;;  %18469 = vmatmul.mubr.bf16.gmra.mxu1 %v12972_v12  ;;  %18506 = vmatprep.subr.bf16.mxu0 %v25726_v62  ;;  %v12635_v52 = vsel %vm1110_vm2, %v12630_v22, %v25179_v31  ;;  %v12988_v55 = vrot.slane %v12986_v37, 4  ;;  %v19330_v18 = vld [vmem:[%s25677_s3 + $0x210] sm:$0xff]  }
 0x668   : > { %11096 = vst [vmem:[%s24833_s27 + $0x5f] sm:$0xfe] %v11066_v28  ;;  %v11037_v40 = vadd.f32 %v15475_v19, %v11007_v39  ;;  %v10911_v38 = vadd.f32 %v10852_v48, %v24848_v13  ;;  %18472 = vmatprep.mubr.msk.bf16.mxu1 %vm19459_vm0, %v25726_v62  ;;  %18557 = vmatpush3.bf16.msra.mxu1 %v19316_v7  ;;  %v12983_v13 = vshrl.u32 %v15165_v32, 16  ;;  %v25188_v2 = vpop.f32.mrf.mxu0  ;;  %v25201_v19 = vld [vmem:[%s19541_s14 + $0x70] sm:$0xff]   ;;  %v19442_v7 = vld [vmem:[#allocation2 + $0xc0] sm:$0xf] }
 0x669   : > { %v18118_v10 = vpop.f32.mrf.mxu1  ;;  %18558 = vmatprep.subr.bf16.mxu1 %v25726_v62  ;;  %v12981_v60 = vsel %vm624_vm1, %v25136_v59, %v25190_v34  ;;  %v15166_v1 = vcombine.low %v19442_v7, %v19443_v54  ;;  %v15482_v16 = vunpack.c.l.bf16 %v25201_v19  ;;  %v19327_v59 = vld [vmem:[%s25677_s3 + $0x1d0] sm:$0xff]  }
 0x66a   : > { %v11067_v63 = vmax.f32 %v11037_v40, 0.0  ;;  %v11008_v45 = vadd.f32 %v24797_v57, %v10911_v38  ;;  %v18171_v33 = vpop.f32.mrf.mxu0  ;;  %18507 = vmatpush3.bf16.msra.mxu0 %v19319_v6  ;;  %v12985_v58 = vrot.slane %v12983_v13, 3  ;;  %v12636_v40 = vshrl.u32 %v25139_v14, 16 }
 0x66b   : > { %v10855_v46 = vpop.f32.mrf.mxu1  ;;  %18508 = vmatprep.subr.bf16.mxu0 %v25726_v62  ;;  %v25228_v38 = vrot.slane %v12640_v25, 1  ;;  %v12992_v14 = vshrl.u32 %v15166_v1, 16  ;;  %v12995_v13 = vshll.u32 %v15166_v1, 16  ;;  %v19444_v33 = vld [vmem:[#allocation2 + $0xc8] sm:$0xf]  ;;  %v19337_v1 = vld [vmem:[%s25677_s3 + $0x1c0] sm:$0xff]  }
 0x66c   : > { %11097 = vst [vmem:[%s24833_s27 + $0x67] sm:$0xff] %v11067_v63  ;;  %v11038_v53 = vadd.f32 %v15478_v15, %v11008_v45  ;;  %v10912_v43 = vadd.f32 %v10855_v46, %v24871_v36  ;;  %18559 = vmatpush3.bf16.msra.mxu1 %v19320_v0  ;;  %v19324_v36 = vld [vmem:[%s25677_s3 + $0x218] sm:$0xff]   ;;  %v25211_v12 = vpop.f32.mrf.mxu0  ;;  %v25230_v15 = vor.u32 %v12988_v55, %v12985_v58  ;;  %v15483_v46 = vunpack.c.h.bf16 %v25201_v19  ;;  %v19334_v19 = vld [vmem:[%s25677_s3 + $0x208] sm:$0xff]   ;;  %v25265_v25 = vld [vmem:[%s25678_s4] ss:$0 sm:$0xff] }
 0x66d   : > { %v18119_v26 = vpop.f32.mrf.mxu1  ;;  %18421 = vmatmul.mubr.bf16.gmra.mxu0 %v12635_v52  ;;  %18560 = vmatprep.subr.bf16.mxu1 %v25726_v62  ;;  %v12638_v0 = vor.u32 %v12636_v40, %v25179_v31  ;;  %v12994_v55 = vrot.slane %v12992_v14, 3 }
 0x66e   : > { %v11068_v8 = vmax.f32 %v11038_v53, 0.0  ;;  %v11009_v30 = vadd.f32 %v24797_v57, %v10912_v43  ;;  %18424 = vmatprep.mubr.msk.bf16.mxu0 %vm19459_vm0, %v25726_v62  ;;  %v18174_v44 = vpop.f32.mrf.mxu0  ;;  %18509 = vmatpush3.bf16.msra.mxu0 %v19323_v56  ;;  %v25250_v43 = vld [vmem:[%s19541_s14 + $0x78] sm:$0xff]   ;;  %v12990_v31 = vsel %vm624_vm1, %v25190_v34, %v25230_v15  ;;  %v19445_v56 = vld [vmem:[#allocation2 + $0xcc] sm:$0xf] }
 0x66f   : > { %v10860_v32 = vpop.f32.mrf.mxu1  ;;  %18473 = vmatmul.mubr.bf16.gmra.mxu1 %v12981_v60  ;;  %18510 = vmatprep.subr.bf16.mxu0 %v25726_v62  ;;  %v15167_v26 = vcombine.low %v19444_v33, %v19445_v56  ;;  %v15486_v7 = vunpack.c.l.bf16 %v25250_v43 }
 0x670   : > { %11098 = vst [vmem:[%s24833_s27 + $0x6f] sm:$0x1] %v11068_v8  ;;  %v11039_v28 = vadd.f32 %v15479_v49, %v11009_v30  ;;  %v10913_v39 = vadd.f32 %v10860_v32, %v24898_v20  ;;  %18476 = vmatprep.mubr.msk.bf16.mxu1 %vm19459_vm0, %v25726_v62  ;;  %v25232_v20 = vld [vmem:[#allocation2 + $0xb8] sm:$0xff]   ;;  %18561 = vmatpush3.bf16.msra.mxu1 %v19324_v36  ;;  %v25239_v5 = vpop.f32.mrf.mxu0  ;;  %v12997_v36 = vrot.slane %v12995_v13, 4 }
 0x671   : > { %v18122_v48 = vpop.f32.mrf.mxu1  ;;  %18562 = vmatprep.subr.bf16.mxu1 %v25726_v62  ;;  %v12643_v49 = vsel %vm1110_vm2, %v12638_v0, %v25228_v38  ;;  %v13001_v44 = vshrl.u32 %v15167_v26, 16 }
 0x672   : > { %v11069_v6 = vmax.f32 %v11039_v28, 0.0  ;;  %v11010_v10 = vadd.f32 %v24797_v57, %v10913_v39  ;;  %v18175_v22 = vpop.f32.mrf.mxu0  ;;  %18511 = vmatpush3.bf16.msra.mxu0 %v19327_v59  ;;  %v19331_v57 = vld [vmem:[%s25677_s3 + $0x1c8] sm:$0xff]   ;;  %v12644_v28 = vshrl.u32 %v25181_v17, 16  ;;  %v13004_v17 = vshll.u32 %v15167_v26, 16 }
 0x673   : > { %v10863_v37 = vpop.f32.mrf.mxu1  ;;  %18512 = vmatprep.subr.bf16.mxu0 %v25726_v62 }
 0x674   : > { %11099 = vst [vmem:[%s24833_s27 + $0x6f] sm:$0xfe] %v11069_v6  ;;  %v11040_v63 = vadd.f32 %v15482_v16, %v11010_v10  ;;  %v10914_v45 = vadd.f32 %v10863_v37, %v24921_v3  ;;  %v12648_v3 = vshll.u32 %v25232_v20, 16  ;;  %18563 = vmatpush3.bf16.msra.mxu1 %v19330_v18  ;;  %v25268_v58 = vpop.f32.mrf.mxu0  ;;  %v25282_v16 = vld [vmem:[#allocation2 + $0xc0] sm:$0xff]   ;;  %v25291_v18 = vor.u32 %v12997_v36, %v12994_v55 }
 0x675   : > { %v18123_v53 = vpop.f32.mrf.mxu1  ;;  %18425 = vmatmul.mubr.bf16.gmra.mxu0 %v12643_v49  ;;  %18564 = vmatprep.subr.bf16.mxu1 %v25726_v62  ;;  %v12646_v10 = vor.u32 %v12644_v28, %v25228_v38  ;;  %v15487_v37 = vunpack.c.h.bf16 %v25250_v43  ;;  %v12656_v22 = vshll.u32 %v25282_v16, 16  ;;  %v19448_v49 = vld [vmem:[#allocation2 + $0xd4] sm:$0xf]  ;;  %v13006_v33 = vrot.slane %v13004_v17, 4 }
 0x676   : > { %v11070_v52 = vmax.f32 %v11040_v63, 0.0  ;;  %v11011_v34 = vadd.f32 %v25265_v25, %v10914_v45  ;;  %18428 = vmatprep.mubr.msk.bf16.mxu0 %vm19459_vm0, %v25726_v62  ;;  %v18178_v54 = vpop.f32.mrf.mxu0  ;;  %18513 = vmatpush3.bf16.msra.mxu0 %v19331_v57  ;;  %v12650_v39 = vrot.slane %v12648_v3, 1  ;;  %v15569_v45 = vld [vmem:[%s19541_s14 + $0x80] sm:$0xff]   ;;  %v13003_v57 = vrot.slane %v13001_v44, 3  ;;  %v19447_v53 = vld [vmem:[#allocation2 + $0xd0] sm:$0xf] }
 0x677   : > { %v10868_v8 = vpop.f32.mrf.mxu1  ;;  %18477 = vmatmul.mubr.bf16.gmra.mxu1 %v12990_v31  ;;  %18514 = vmatprep.subr.bf16.mxu0 %v25726_v62  ;;  %v15168_v31 = vcombine.low %v19447_v53, %v19448_v49  ;;  %v12999_v43 = vsel %vm624_vm1, %v25230_v15, %v25291_v18  ;;  %v12652_v36 = vshrl.u32 %v25232_v20, 16  ;;  %v12658_v15 = vrot.slane %v12656_v22, 1 }
 0x678   : > { %11100 = vst [vmem:[%s24833_s27 + $0x77] sm:$0xff] %v11070_v52  ;;  %v11041_v30 = vadd.f32 %v15483_v46, %v11011_v34  ;;  %v10915_v60 = vadd.f32 %v10868_v8, %v24948_v9  ;;  %18480 = vmatprep.mubr.msk.bf16.mxu1 %vm19459_vm0, %v25726_v62  ;;  %18565 = vmatpush3.bf16.msra.mxu1 %v19334_v19  ;;  %v19338_v9 = vld [vmem:[%s25677_s3 + $0x200] sm:$0xff]   ;;  %v25289_v40 = vpop.f32.mrf.mxu0  ;;  %v15490_v52 = vunpack.c.l.bf16 %v15569_v45  ;;  %v25314_v8 = vld [vmem:[#allocation2 + $0xc8] sm:$0xff]  }
 0x679   : > { %v18126_v32 = vpop.f32.mrf.mxu1  ;;  %18566 = vmatprep.subr.bf16.mxu1 %v25726_v62  ;;  %v12651_v46 = vsel %vm1110_vm2, %v12646_v10, %v12650_v39  ;;  %v12654_v44 = vor.u32 %v12652_v36, %v12650_v39 }
 0x67a   : > { %v11071_v59 = vmax.f32 %v11041_v30, 0.0  ;;  %v11012_v48 = vadd.f32 %v25265_v25, %v10915_v60  ;;  %v18179_v0 = vpop.f32.mrf.mxu0  ;;  %18515 = vmatpush3.bf16.msra.mxu0 %v19337_v1  ;;  %v13010_v30 = vshrl.u32 %v15168_v31, 16  ;;  %v13013_v1 = vshll.u32 %v15168_v31, 16  ;;  %v25319_v32 = vld [vmem:[#allocation2 + $0xdc] sm:$0xf] }
 0x67b   : > { %v10871_v6 = vpop.f32.mrf.mxu1  ;;  %v12659_v10 = vsel %vm1110_vm2, %v12654_v44, %v12658_v15 }
 0x67c   : > { %11101 = vst [vmem:[%s24833_s27 + $0x7f] sm:$0x1] %v11071_v59  ;;  %v11042_v14 = vadd.f32 %v15486_v7, %v11012_v48  ;;  %v10916_v13 = vadd.f32 %v10871_v6, %v24971_v11  ;;  %18567 = vmatpush3.bf16.msra.mxu1 %v19338_v9  ;;  %v25302_v11 = vpop.f32.mrf.mxu0  ;;  %v15491_v59 = vunpack.c.h.bf16 %v15569_v45  ;;  %v15570_v6 = vld [vmem:[%s19541_s14 + $0x88] sm:$0xff]   ;;  %v13015_v45 = vrot.slane %v13013_v1, 4 }
 0x67d   : > { %v18127_v63 = vpop.f32.mrf.mxu1  ;;  %18429 = vmatmul.mubr.bf16.gmra.mxu0 %v12651_v46  ;;  %v15494_v49 = vunpack.c.l.bf16 %v15570_v6 }
 0x67e   : > { %v11072_v38 = vmax.f32 %v11042_v14, 0.0  ;;  %v11013_v3 = vadd.f32 %v25265_v25, %v10916_v13  ;;  %18432 = vmatprep.mubr.msk.bf16.mxu0 %vm19459_vm0, %v25726_v62  ;;  %v18182_v34 = vpop.f32.mrf.mxu0  ;;  %v12664_v14 = vshll.u32 %v25314_v8, 16  ;;  %v13012_v13 = vrot.slane %v13010_v30, 3 }
 0x67f   : > { %v10876_v56 = vpop.f32.mrf.mxu1  ;;  %18481 = vmatmul.mubr.bf16.gmra.mxu1 %v12999_v43  ;;  %v25339_v43 = vld [vmem:[#allocation2 + $0xd0] sm:$0xff]  }
 0x680   : > { %11102 = vst [vmem:[%s24833_s27 + $0x7f] sm:$0xfe] %v11072_v38  ;;  %v11043_v26 = vadd.f32 %v15487_v37, %v11013_v3  ;;  %v10917_v19 = vadd.f32 %v10876_v56, %v24990_v27  ;;  %18484 = vmatprep.mubr.msk.bf16.mxu1 %vm19459_vm0, %v25726_v62  ;;  %v25317_v54 = vpop.f32.mrf.mxu0  ;;  %v13007_v27 = vor.u32 %v13006_v33, %v13003_v57  ;;  %v19449_v37 = vld [vmem:[#allocation2 + $0xd8] sm:$0xf]  ;;  %v12660_v3 = vshrl.u32 %v25282_v16, 16 }
 0x681   : > { %v18130_v55 = vpop.f32.mrf.mxu1  ;;  %v15169_v0 = vcombine.low %v19449_v37, %v25319_v32  ;;  %v25341_v56 = vld [vmem:[#allocation2 + $0xe0] sm:$0xf]  ;;  %v15495_v16 = vunpack.c.h.bf16 %v15570_v6 }
 0x682   : > { %v11073_v60 = vmax.f32 %v11043_v26, 0.0  ;;  %v11014_v7 = vadd.f32 %v25265_v25, %v10917_v19  ;;  %v18183_v48 = vpop.f32.mrf.mxu0  ;;  %v12662_v36 = vor.u32 %v12660_v3, %v12658_v15  ;;  %v15170_v1 = vcombine.low %v25341_v56, %v25341_v56 }
 0x683   : > { %v10879_v28 = vpop.f32.mrf.mxu1  ;;  %v13019_v33 = vshrl.u32 %v15169_v0, 16  ;;  %v13022_v34 = vshll.u32 %v15169_v0, 16 }
 0x684   : > { %11103 = vst [vmem:[%s24833_s27 + $0x87] sm:$0xff] %v11073_v60  ;;  %v11044_v9 = vadd.f32 %v15490_v52, %v11014_v7  ;;  %v10918_v20 = vadd.f32 %v10879_v28, %v25002_v42  ;;  %v25328_v46 = vpop.f32.mrf.mxu0  ;;  %v13008_v42 = vsel %vm624_vm1, %v25291_v18, %v13007_v27  ;;  %v12666_v18 = vrot.slane %v12664_v14, 1 }
 0x685   : > { %v18131_v17 = vpop.f32.mrf.mxu1  ;;  %18433 = vmatmul.mubr.bf16.gmra.mxu0 %v12659_v10  ;;  %v13031_v37 = vshll.u32 %v15170_v1, 16 }
 0x686   : > { %v11074_v63 = vmax.f32 %v11044_v9, 0.0  ;;  %v11015_v39 = vadd.f32 %v25265_v25, %v10918_v20  ;;  %18436 = vmatprep.mubr.msk.bf16.mxu0 %vm19459_vm0, %v25726_v62  ;;  %v18186_v31 = vpop.f32.mrf.mxu0  ;;  %v12667_v44 = vsel %vm1110_vm2, %v12662_v36, %v12666_v18  ;;  %v12672_v9 = vshll.u32 %v25339_v43, 16 }
 0x687   : > { %v10884_v22 = vpop.f32.mrf.mxu1  ;;  %18485 = vmatmul.mubr.bf16.gmra.mxu1 %v13008_v42  ;;  %v13021_v20 = vrot.slane %v13019_v33, 3  ;;  %v13033_v3 = vrot.slane %v13031_v37, 4 }
 0x688   : > { %11104 = vst [vmem:[%s24833_s27 + $0x8f] sm:$0x1] %v11074_v63  ;;  %v11045_v57 = vadd.f32 %v15491_v59, %v11015_v39  ;;  %v10919_v53 = vadd.f32 %v10884_v22, %v25017_v29  ;;  %18488 = vmatprep.mubr.msk.bf16.mxu1 %vm19459_vm0, %v25726_v62  ;;  %v25344_v52 = vpop.f32.mrf.mxu0  ;;  %v13016_v29 = vor.u32 %v13015_v45, %v13012_v13  ;;  %v12668_v63 = vshrl.u32 %v25314_v8, 16  ;;  %v19335_v39 = vld [vmem:[#allocation2 + $0xd8] ss:$0 sps:$4 sm:$0x11]  }
 0x689   : > { %v18134_v38 = vpop.f32.mrf.mxu1 }
 0x68a   : > { %v11075_v26 = vmax.f32 %v11045_v57, 0.0  ;;  %v11016_v19 = vadd.f32 %v25265_v25, %v10919_v53  ;;  %v18187_v7 = vpop.f32.mrf.mxu0  ;;  %v13017_v17 = vsel %vm624_vm1, %v13007_v27, %v13016_v29 }
 0x68b   : > { %v10887_v55 = vpop.f32.mrf.mxu1 }
 0x68c   : > { %11105 = vst [vmem:[%s24833_s27 + $0x8f] sm:$0xfe] %v11075_v26  ;;  %v11046_v30 = vadd.f32 %v15494_v49, %v11016_v19  ;;  %v10920_v60 = vadd.f32 %v10887_v55, %v25029_v41  ;;  %v11558_v15 = vpop.f32.mrf.mxu0  ;;  %v13024_v41 = vrot.slane %v13022_v34, 4  ;;  %v12670_v49 = vor.u32 %v12668_v63, %v12666_v18 }
 0x68d   : > { %v18135_v28 = vpop.f32.mrf.mxu1  ;;  %18437 = vmatmul.mubr.bf16.gmra.mxu0 %v12667_v44  ;;  %v11559_v6 = vadd.f32 %v11558_v15, %v25040_v23  ;;  %v12674_v23 = vrot.slane %v12672_v9, 1  ;;  %v12680_v34 = vshll.u32 %v19335_v39, 16 }
 0x68e   : > { %v11076_v59 = vmax.f32 %v11046_v30, 0.0  ;;  %v11017_v48 = vadd.f32 %v25265_v25, %v10920_v60  ;;  %18440 = vmatprep.mubr.msk.bf16.mxu0 %vm19459_vm0, %v25726_v62  ;;  %v18206_v13 = vpop.f32.mrf.mxu0  ;;  %v13028_v25 = vshrl.u32 %v15170_v1, 16  ;;  %v13025_v22 = vor.u32 %v13024_v41, %v13021_v20 }
 0x68f   : > { %v11879_v10 = vpop.f32.mrf.mxu1  ;;  %18489 = vmatmul.mubr.bf16.gmra.mxu1 %v13017_v17  ;;  %v12675_v19 = vsel %vm1110_vm2, %v12670_v49, %v12674_v23 }
 0x690   : > { %11106 = vst [vmem:[%s24833_s27 + $0x97] sm:$0xff] %v11076_v59  ;;  %v11047_v14 = vadd.f32 %v15495_v16, %v11017_v48  ;;  %18492 = vmatprep.mubr.msk.bf16.mxu1 %vm19459_vm0, %v25726_v62  ;;  %v25360_v0 = vadd.f32 %v11879_v10, %v11559_v6  ;;  %v11561_v45 = vpop.f32.mrf.mxu0  ;;  %v13030_v38 = vrot.slane %v13028_v25, 3  ;;  %v13026_v55 = vsel %vm624_vm1, %v13016_v29, %v13025_v22  ;;  %v19340_v16 = vld [vmem:[#allocation2 + $0x9c] sm:$0xff]  }
 0x691   : > { %v18258_v27 = vpop.f32.mrf.mxu1  ;;  %v11562_v57 = vadd.f32 %v11561_v45, %v25049_v21  ;;  %v12676_v21 = vshrl.u32 %v25339_v43, 16  ;;  %v12682_v29 = vrot.slane %v12680_v34, 1  ;;  %v13507_v43 = vshll.u32 %v19340_v16, 16 }
 0x692   : > { %v11077_v42 = vmax.f32 %v11047_v14, 0.0  ;;  %v18207_v31 = vpop.f32.mrf.mxu0  ;;  %v13034_v60 = vor.u32 %v13033_v3, %v13030_v38  ;;  %v25852_v38 = vld [vmem:[#allocation27_spill] sm:$0xff]  ;;  %v25853_v3 = vld [vmem:[#allocation26_spill] sm:$0xff] }
 0x693   : > { %v11882_v53 = vpop.f32.mrf.mxu1  ;;  %v12678_v28 = vor.u32 %v12676_v21, %v12674_v23  ;;  %v13509_v25 = vrot.slane %v13507_v43, 1  ;;  %v13505_v23 = vshrl.u32 %v19340_v16, 16  ;;  %v19345_v16 = vld [vmem:[#allocation2 + $0xb4] sm:$0xff]  }
 0x694   : > { %11107 = vst [vmem:[%s24833_s27 + $0x9f] sm:$0x1] %v11077_v42  ;;  %v25365_v33 = vadd.f32 %v11882_v53, %v11562_v57  ;;  %v11566_v8 = vpop.f32.mrf.mxu0  ;;  %v13035_v48 = vsel %vm624_vm1, %v13025_v22, %v13034_v60  ;;  %v19343_v42 = vld [vmem:[#allocation2 + $0xac] sm:$0xff]  }
 0x695   : > { %v18259_v26 = vpop.f32.mrf.mxu1  ;;  %18441 = vmatmul.mubr.bf16.gmra.mxu0 %v12675_v19  ;;  %v11567_v36 = vadd.f32 %v11566_v8, %v25058_v47  ;;  %v19341_v47 = vld [vmem:[#allocation2 + $0xa4] sm:$0xff]   ;;  %v12683_v41 = vsel %vm1110_vm2, %v12678_v28, %v12682_v29  ;;  %v13510_v57 = vor.u32 %v13509_v25, %v13505_v23  ;;  %v13520_v34 = vshll.u32 %v19343_v42, 16 }
 0x696   : > { %18444 = vmatprep.mubr.msk.bf16.mxu0 %vm19459_vm0, %v25726_v62  ;;  %v18210_v18 = vpop.f32.mrf.mxu0  ;;  %v13512_v10 = vshll.u32 %v19341_v47, 16  ;;  %v25854_v26 = vcombine.low %v25852_v38, %v25853_v3 }
 0x697   : > { %v11887_v30 = vpop.f32.mrf.mxu1  ;;  %18493 = vmatmul.mubr.bf16.gmra.mxu1 %v13026_v55  ;;  %v13516_v18 = vshrl.u32 %v19341_v47, 16  ;;  %v13522_v60 = vrot.slane %v13520_v34, 1 }
 0x698   : > { %18496 = vmatprep.mubr.msk.bf16.mxu1 %vm19459_vm0, %v25726_v62  ;;  %v25375_v7 = vadd.f32 %v11887_v30, %v11567_v36  ;;  %v11569_v44 = vpop.f32.mrf.mxu0  ;;  %v13514_v39 = vrot.slane %v13512_v10, 1 }
 0x699   : > { %v18262_v1 = vpop.f32.mrf.mxu1  ;;  %v11570_v9 = vadd.f32 %v11569_v44, %v25071_v24 }
 0x69a   : > { %v18211_v59 = vpop.f32.mrf.mxu0  ;;  %v13515_v19 = vsel %vm1110_vm2, %v13510_v57, %v13514_v39  ;;  %v13518_v29 = vor.u32 %v13516_v18, %v13514_v39  ;;  %v25858_v57 = vld [vmem:[#allocation14_spill] sm:$0xff] }
 0x69b   : > { %v11890_v20 = vpop.f32.mrf.mxu1  ;;  %v25855_v59 = vld [vmem:[#allocation16_spill] sm:$0xff] }
 0x69c   : > { %v25379_v15 = vadd.f32 %v11890_v20, %v11570_v9  ;;  %v11574_v6 = vpop.f32.mrf.mxu0 }
 0x69d   : > { %v18263_v17 = vpop.f32.mrf.mxu1  ;;  %18445 = vmatmul.mubr.bf16.gmra.mxu0 %v12683_v41  ;;  %v11575_v14 = vadd.f32 %v11574_v6, %v25084_v35  ;;  %v13528_v41 = vshll.u32 %v19345_v16, 16 }
 0x69e   : > { %18516 = vmatprep.mubr.msk.bf16.mxu0 %vm19459_vm0, %v25726_v62  ;;  %v18214_v24 = vpop.f32.mrf.mxu0  ;;  %v13523_v17 = vsel %vm1110_vm2, %v13518_v29, %v13522_v60  ;;  %v25861_v29 = vld [vmem:[#allocation32_spill] sm:$0xff] }
 0x69f   : > { %v11895_v13 = vpop.f32.mrf.mxu1  ;;  %18497 = vmatmul.mubr.bf16.gmra.mxu1 %v13035_v48  ;;  %v25856_v48 = vld [vmem:[#allocation28_spill] sm:$0xff]  ;;  %v13524_v24 = vshrl.u32 %v19343_v42, 16  ;;  %v13530_v25 = vrot.slane %v13528_v41, 1 }
 0x6a0   : > { %18568 = vmatprep.mubr.msk.bf16.mxu1 %vm19459_vm0, %v25726_v62  ;;  %v25387_v37 = vadd.f32 %v11895_v13, %v11575_v14  ;;  %v11577_v63 = vpop.f32.mrf.mxu0  ;;  %v25857_v43 = vcombine.low %v25855_v59, %v25856_v48 }
 0x6a1   : > { %v18266_v27 = vpop.f32.mrf.mxu1  ;;  %v11578_v45 = vadd.f32 %v11577_v63, %v25097_v61  ;;  %v13526_v39 = vor.u32 %v13524_v24, %v13522_v60 }
 0x6a2   : > { %v18215_v22 = vpop.f32.mrf.mxu0  ;;  %v19347_v27 = vld [vmem:[#allocation2 + $0xbc] sm:$0xff]  }
 0x6a3   : > { %v11898_v35 = vpop.f32.mrf.mxu1  ;;  %v13531_v38 = vsel %vm1110_vm2, %v13526_v39, %v13530_v25  ;;  %v13536_v3 = vshll.u32 %v19347_v27, 16  ;;  %v25864_v39 = vld [vmem:[#allocation33_spill] sm:$0xff] }
 0x6a4   : > { %v25390_v53 = vadd.f32 %v11898_v35, %v11578_v45  ;;  %v11582_v31 = vpop.f32.mrf.mxu0 }
 0x6a5   : > { %v18267_v49 = vpop.f32.mrf.mxu1  ;;  %18517 = vmatmul.mubr.bf16.vlgmr.msra.gmra.mxu0 %v25854_v26  ;;  %v11583_v8 = vadd.f32 %v11582_v31, %v25116_v4 }
 0x6a6   : > { %18520 = vmatprep.mubr.msk.bf16.mxu0 %vm19459_vm0, %v25726_v62  ;;  %v18218_v61 = vpop.f32.mrf.mxu0  ;;  %v25859_v49 = vld [vmem:[#allocation29_spill] sm:$0xff] }
 0x6a7   : > { %v11903_v55 = vpop.f32.mrf.mxu1  ;;  %18569 = vmatmul.mubr.bf16.vlgmr.msra.gmra.mxu1 %v13515_v19  ;;  %v25860_v31 = vcombine.low %v25858_v57, %v25859_v49  ;;  %v13538_v61 = vrot.slane %v13536_v3, 1 }
 0x6a8   : > { %18572 = vmatprep.mubr.msk.bf16.mxu1 %vm19459_vm0, %v25726_v62  ;;  %v25401_v36 = vadd.f32 %v11903_v55, %v11583_v8  ;;  %v11585_v21 = vpop.f32.mrf.mxu0  ;;  %v13532_v55 = vshrl.u32 %v19345_v16, 16 }
 0x6a9   : > { %v18270_v30 = vpop.f32.mrf.mxu1  ;;  %v11586_v1 = vadd.f32 %v11585_v21, %v25142_v51 }
 0x6aa   : > { %v18219_v4 = vpop.f32.mrf.mxu0  ;;  %v19349_v30 = vld [vmem:[#allocation2 + $0xc4] sm:$0xff]   ;;  %v13534_v60 = vor.u32 %v13532_v55, %v13530_v25 }
 0x6ab   : > { %v11906_v28 = vpop.f32.mrf.mxu1  ;;  %v13544_v48 = vshll.u32 %v19349_v30, 16 }
 0x6ac   : > { %v25404_v44 = vadd.f32 %v11906_v28, %v11586_v1  ;;  %v11590_v20 = vpop.f32.mrf.mxu0  ;;  %v13539_v59 = vsel %vm1110_vm2, %v13534_v60, %v13538_v61  ;;  %v25867_v60 = vld [vmem:[#allocation15_spill] sm:$0xff] }
 0x6ad   : > { %v18271_v9 = vpop.f32.mrf.mxu1  ;;  %18521 = vmatmul.mubr.bf16.gmra.mxu0 %v25857_v43  ;;  %v11591_v47 = vadd.f32 %v11590_v20, %v25166_v50 }
 0x6ae   : > { %18524 = vmatprep.mubr.msk.bf16.mxu0 %vm19459_vm0, %v25726_v62  ;;  %v18222_v51 = vpop.f32.mrf.mxu0  ;;  %v25862_v9 = vld [vmem:[#allocation30_spill] sm:$0xff] }
 0x6af   : > { %v11911_v6 = vpop.f32.mrf.mxu1  ;;  %18573 = vmatmul.mubr.bf16.gmra.mxu1 %v13523_v17  ;;  %v25863_v20 = vcombine.low %v25861_v29, %v25862_v9  ;;  %v13546_v51 = vrot.slane %v13544_v48, 1 }
 0x6b0   : > { %18576 = vmatprep.mubr.msk.bf16.mxu1 %vm19459_vm0, %v25726_v62  ;;  %v25415_v10 = vadd.f32 %v11911_v6, %v11591_v47  ;;  %v11593_v13 = vpop.f32.mrf.mxu0  ;;  %v13540_v6 = vshrl.u32 %v19347_v27, 16 }
 0x6b1   : > { %v18274_v14 = vpop.f32.mrf.mxu1  ;;  %v11594_v63 = vadd.f32 %v11593_v13, %v25188_v2 }
 0x6b2   : > { %v18223_v50 = vpop.f32.mrf.mxu0  ;;  %v19351_v14 = vld [vmem:[#allocation2 + $0xcc] sm:$0xff]   ;;  %v13542_v25 = vor.u32 %v13540_v6, %v13538_v61  ;;  %v19353_v61 = vld [vmem:[#allocation2 + $0xd4] sm:$0xff]  }
 0x6b3   : > { %v11914_v23 = vpop.f32.mrf.mxu1  ;;  %v13552_v49 = vshll.u32 %v19351_v14, 16 }
 0x6b4   : > { %v25418_v45 = vadd.f32 %v11914_v23, %v11594_v63  ;;  %v11598_v22 = vpop.f32.mrf.mxu0  ;;  %v13547_v57 = vsel %vm1110_vm2, %v13542_v25, %v13546_v51  ;;  %v25870_v25 = vld [vmem:[#allocation37_spill] sm:$0xff] }
 0x6b5   : > { %v18275_v35 = vpop.f32.mrf.mxu1  ;;  %18525 = vmatmul.mubr.bf16.gmra.mxu0 %v25860_v31  ;;  %v11599_v42 = vadd.f32 %v11598_v22, %v25211_v12 }
 0x6b6   : > { %18528 = vmatprep.mubr.msk.bf16.mxu0 %vm19459_vm0, %v25726_v62  ;;  %v18226_v2 = vpop.f32.mrf.mxu0  ;;  %v25865_v35 = vld [vmem:[#allocation31_spill] sm:$0xff] }
 0x6b7   : > { %v11919_v26 = vpop.f32.mrf.mxu1  ;;  %18577 = vmatmul.mubr.bf16.gmra.mxu1 %v13531_v38  ;;  %v25866_v22 = vcombine.low %v25864_v39, %v25865_v35  ;;  %v13554_v2 = vrot.slane %v13552_v49, 1  ;;  %v19357_v49 = vld [vmem:[#allocation2 + $0xe4] ss:$0 sps:$4 sm:$0x11]  }
 0x6b8   : > { %18580 = vmatprep.mubr.msk.bf16.mxu1 %vm19459_vm0, %v25726_v62  ;;  %v25429_v19 = vadd.f32 %v11919_v26, %v11599_v42  ;;  %v11601_v8 = vpop.f32.mrf.mxu0  ;;  %v13548_v26 = vshrl.u32 %v19349_v30, 16 }
 0x6b9   : > { %v18278_v34 = vpop.f32.mrf.mxu1  ;;  %v11602_v21 = vadd.f32 %v11601_v8, %v25239_v5 }
 0x6ba   : > { %v18227_v12 = vpop.f32.mrf.mxu0 }
 0x6bb   : > { %v11922_v18 = vpop.f32.mrf.mxu1 }
 0x6bc   : > { %v25432_v1 = vadd.f32 %v11922_v18, %v11602_v21  ;;  %v11606_v4 = vpop.f32.mrf.mxu0 }
 0x6bd   : > { %v18279_v28 = vpop.f32.mrf.mxu1  ;;  %18529 = vmatmul.mubr.bf16.gmra.mxu0 %v25863_v20  ;;  %v11607_v16 = vadd.f32 %v11606_v4, %v25268_v58  ;;  %v13556_v20 = vshrl.u32 %v19351_v14, 16 }
 0x6be   : > { %18532 = vmatprep.mubr.msk.bf16.mxu0 %vm19459_vm0, %v25726_v62  ;;  %v18230_v5 = vpop.f32.mrf.mxu0  ;;  %v25868_v28 = vld [vmem:[#allocation34_spill] sm:$0xff] }
 0x6bf   : > { %v11927_v43 = vpop.f32.mrf.mxu1  ;;  %18581 = vmatmul.mubr.bf16.gmra.mxu1 %v13539_v59  ;;  %v25869_v4 = vcombine.low %v25867_v60, %v25868_v28  ;;  %v13560_v59 = vshll.u32 %v19353_v61, 16  ;;  %v13558_v5 = vor.u32 %v13556_v20, %v13554_v2  ;;  %v25874_v60 = vld [vmem:[#allocation36_spill] sm:$0xff] }
 0x6c0   : > { %18584 = vmatprep.mubr.msk.bf16.mxu1 %vm19459_vm0, %v25726_v62  ;;  %v25443_v17 = vadd.f32 %v11927_v43, %v11607_v16  ;;  %v11609_v47 = vpop.f32.mrf.mxu0 }
 0x6c1   : > { %v18282_v41 = vpop.f32.mrf.mxu1  ;;  %v11610_v13 = vadd.f32 %v11609_v47, %v25289_v40 }
 0x6c2   : > { %v18231_v58 = vpop.f32.mrf.mxu0  ;;  %v19355_v41 = vld [vmem:[#allocation2 + $0xdc] sm:$0xff]  }
 0x6c3   : > { %v11930_v24 = vpop.f32.mrf.mxu1  ;;  %v13568_v39 = vshll.u32 %v19355_v41, 16 }
 0x6c4   : > { %v25446_v63 = vadd.f32 %v11930_v24, %v11610_v13  ;;  %v11614_v50 = vpop.f32.mrf.mxu0 }
 0x6c5   : > { %v18283_v23 = vpop.f32.mrf.mxu1  ;;  %18533 = vmatmul.mubr.bf16.gmra.mxu0 %v25866_v22  ;;  %v11615_v27 = vadd.f32 %v11614_v50, %v25302_v11  ;;  %v13550_v11 = vor.u32 %v13548_v26, %v13546_v51  ;;  %v13562_v51 = vrot.slane %v13560_v59, 1 }
 0x6c6   : > { %18536 = vmatprep.mubr.msk.bf16.mxu0 %vm19459_vm0, %v25726_v62  ;;  %v18234_v40 = vpop.f32.mrf.mxu0  ;;  %v25871_v23 = vld [vmem:[#allocation35_spill] sm:$0xff] }
 0x6c7   : > { %v11935_v31 = vpop.f32.mrf.mxu1  ;;  %18585 = vmatmul.mubr.bf16.gmra.mxu1 %v13547_v57  ;;  %v13555_v29 = vsel %vm1110_vm2, %v13550_v11, %v13554_v2  ;;  %v25872_v50 = vcombine.low %v25870_v25, %v25871_v23  ;;  %v13563_v14 = vsel %vm1110_vm2, %v13558_v5, %v13562_v51  ;;  %v13564_v57 = vshrl.u32 %v19353_v61, 16 }
 0x6c8   : > { %18588 = vmatprep.mubr.msk.bf16.mxu1 %vm19459_vm0, %v25726_v62  ;;  %v25457_v38 = vadd.f32 %v11935_v31, %v11615_v27  ;;  %v11617_v42 = vpop.f32.mrf.mxu0 }
 0x6c9   : > { %v18286_v3 = vpop.f32.mrf.mxu1  ;;  %v11618_v34 = vadd.f32 %v11617_v42, %v25317_v54  ;;  %v13570_v42 = vrot.slane %v13568_v39, 1 }
 0x6ca   : > { %v18235_v55 = vpop.f32.mrf.mxu0  ;;  %v13566_v3 = vor.u32 %v13564_v57, %v13562_v51 }
 0x6cb   : > { %v11938_v8 = vpop.f32.mrf.mxu1 }
 0x6cc   : > { %v25460_v21 = vadd.f32 %v11938_v8, %v11618_v34  ;;  %v11622_v12 = vpop.f32.mrf.mxu0  ;;  %v13572_v34 = vshrl.u32 %v19355_v41, 16  ;;  %v13576_v8 = vshll.u32 %v19357_v49, 16  ;;  %v13571_v28 = vsel %vm1110_vm2, %v13566_v3, %v13570_v42 }
 0x6cd   : > { %v18287_v18 = vpop.f32.mrf.mxu1  ;;  %18537 = vmatmul.mubr.bf16.gmra.mxu0 %v25869_v4  ;;  %v11623_v9 = vadd.f32 %v11622_v12, %v25328_v46  ;;  %v25873_v12 = vld [vmem:[#allocation4_spill] sm:$0xff] }
 0x6ce   : > { %18540 = vmatprep.mubr.msk.bf16.mxu0 %vm19459_vm0, %v25726_v62  ;;  %v18238_v54 = vpop.f32.mrf.mxu0  ;;  %v25875_v61 = vcombine.low %v25873_v12, %v25874_v60 }
 0x6cf   : > { %v11943_v30 = vpop.f32.mrf.mxu1  ;;  %18589 = vmatmul.mubr.bf16.gmra.mxu1 %v13555_v29 }
 0x6d0   : > { %18592 = vmatprep.mubr.msk.bf16.mxu1 %vm19459_vm0, %v25726_v62  ;;  %v25471_v48 = vadd.f32 %v11943_v30, %v11623_v9  ;;  %v11625_v43 = vpop.f32.mrf.mxu0  ;;  %v13574_v9 = vor.u32 %v13572_v34, %v13570_v42  ;;  %v13578_v30 = vrot.slane %v13576_v8, 1 }
 0x6d1   : > { %v18290_v16 = vpop.f32.mrf.mxu1  ;;  %v11626_v47 = vadd.f32 %v11625_v43, %v25344_v52 }
 0x6d2   : > { %v18239_v6 = vpop.f32.mrf.mxu0  ;;  %v15203_v16 = vcombine.low %v25319_v32, %v25341_v56  ;;  %v13579_v41 = vsel %vm1110_vm2, %v13574_v9, %v13578_v30 }
 0x6d3   : > { %v11946_v46 = vpop.f32.mrf.mxu1 }
 0x6d4   : > { %v25474_v13 = vadd.f32 %v11946_v46, %v11626_v47  ;;  %v12231_v58 = vpop.f32.mrf.mxu0 }
 0x6d5   : > { %v18291_v24 = vpop.f32.mrf.mxu1  ;;  %18541 = vmatmul.mubr.bf16.gmra.mxu0 %v25872_v50  ;;  %v12302_v35 = vadd.f32 %v12231_v58, %v25360_v0 }
 0x6d6   : > { %18544 = vmatprep.mubr.msk.bf16.mxu0 %vm19459_vm0, %v25726_v62  ;;  %v18310_v52 = vpop.f32.mrf.mxu0 }
 0x6d7   : > { %v12436_v22 = vpop.f32.mrf.mxu1  ;;  %18593 = vmatmul.mubr.bf16.gmra.mxu1 %v13563_v14 }
 0x6d8   : > { %18596 = vmatprep.mubr.msk.bf16.mxu1 %vm19459_vm0, %v25726_v62  ;;  %v25485_v27 = vadd.f32 %v12436_v22, %v12302_v35  ;;  %v12234_v40 = vpop.f32.mrf.mxu0 }
 0x6d9   : > { %v18362_v31 = vpop.f32.mrf.mxu1  ;;  %v12303_v26 = vadd.f32 %v12234_v40, %v25365_v33 }
 0x6da   : > { %v18311_v2 = vpop.f32.mrf.mxu0 }
 0x6db   : > { %v12439_v0 = vpop.f32.mrf.mxu1 }
 0x6dc   : > { %v25488_v55 = vadd.f32 %v12439_v0, %v12303_v26  ;;  %v12239_v18 = vpop.f32.mrf.mxu0 }
 0x6dd   : > { %v18363_v11 = vpop.f32.mrf.mxu1  ;;  %18545 = vmatmul.mubr.bf16.gmra.mxu0 %v25875_v61  ;;  %v12304_v4 = vadd.f32 %v12239_v18, %v25375_v7 }
 0x6de   : > { %18548 = vmatprep.mubr.msk.bf16.mxu0 %vm19459_vm0, %v25726_v62  ;;  %v18314_v33 = vpop.f32.mrf.mxu0 }
 0x6df   : > { %v12444_v29 = vpop.f32.mrf.mxu1  ;;  %18597 = vmatmul.mubr.bf16.gmra.mxu1 %v13571_v28 }
 0x6e0   : > { %18600 = vmatprep.mubr.msk.bf16.mxu1 %vm19459_vm0, %v25726_v62  ;;  %v25499_v54 = vadd.f32 %v12444_v29, %v12304_v4  ;;  %v12242_v59 = vpop.f32.mrf.mxu0 }
 0x6e1   : > { %v18366_v20 = vpop.f32.mrf.mxu1  ;;  %v12305_v7 = vadd.f32 %v12242_v59, %v25379_v15 }
 0x6e2   : > { %v18315_v5 = vpop.f32.mrf.mxu0 }
 0x6e3   : > { %v12447_v43 = vpop.f32.mrf.mxu1 }
 0x6e4   : > { %v25505_v47 = vadd.f32 %v12447_v43, %v12305_v7 }
 0x6e5   : > { %v18367_v46 = vpop.f32.mrf.mxu1  ;;  %v12247_v6 = vpop.f32.mrf.mxu0  ;;  %18549 = vmatmul.mubr.bf16.gmra.mxu0 %v15203_v16 }
 0x6e6   : > { %v12306_v62 = vadd.f32 %v12247_v6, %v25387_v37 }
 0x6e7   : > { %v12452_v51 = vpop.f32.mrf.mxu1  ;;  %18601 = vmatmul.mubr.bf16.gmra.mxu1 %v13579_v41  ;;  %v18318_v24 = vpop.f32.mrf.mxu0 }
 0x6e8   : > { %v25508_v58 = vadd.f32 %v12452_v51, %v12306_v62 }
 0x6e9   : > { %v18370_v25 = vpop.f32.mrf.mxu1  ;;  %v12250_v32 = vpop.f32.mrf.mxu0 }
 0x6ea   : > { %v12307_v56 = vadd.f32 %v12250_v32, %v25390_v53 }
 0x6eb   : > { %v12455_v15 = vpop.f32.mrf.mxu1  ;;  %v18319_v23 = vpop.f32.mrf.mxu0 }
 0x6ec   : > { %v25511_v50 = vadd.f32 %v12455_v15, %v12307_v56 }
 0x6ed   : > { %v18371_v14 = vpop.f32.mrf.mxu1  ;;  %v12255_v39 = vpop.f32.mrf.mxu0 }
 0x6ee   : > { %v12308_v35 = vadd.f32 %v12255_v39, %v25401_v36 }
 0x6ef   : > { %v12460_v22 = vpop.f32.mrf.mxu1  ;;  %v18322_v52 = vpop.f32.mrf.mxu0 }
 0x6f0   : > { %v25514_v37 = vadd.f32 %v12460_v22, %v12308_v35 }
 0x6f1   : > { %v18374_v57 = vpop.f32.mrf.mxu1  ;;  %v12258_v49 = vpop.f32.mrf.mxu0 }
 0x6f2   : > { %v12309_v31 = vadd.f32 %v12258_v49, %v25404_v44 }
 0x6f3   : > { %v12463_v40 = vpop.f32.mrf.mxu1  ;;  %v18323_v3 = vpop.f32.mrf.mxu0 }
 0x6f4   : > { %v25517_v42 = vadd.f32 %v12463_v40, %v12309_v31 }
 0x6f5   : > { %v18375_v53 = vpop.f32.mrf.mxu1  ;;  %v12263_v26 = vpop.f32.mrf.mxu0 }
 0x6f6   : > { %v12310_v0 = vadd.f32 %v12263_v26, %v25415_v10 }
 0x6f7   : > { %v12468_v2 = vpop.f32.mrf.mxu1  ;;  %v18326_v34 = vpop.f32.mrf.mxu0 }
 0x6f8   : > { %v25520_v8 = vadd.f32 %v12468_v2, %v12310_v0 }
 0x6f9   : > { %v18378_v36 = vpop.f32.mrf.mxu1  ;;  %v12266_v11 = vpop.f32.mrf.mxu0 }
 0x6fa   : > { %v12311_v18 = vadd.f32 %v12266_v11, %v25418_v45 }
 0x6fb   : > { %v12471_v12 = vpop.f32.mrf.mxu1  ;;  %v18327_v60 = vpop.f32.mrf.mxu0 }
 0x6fc   : > { %v25523_v61 = vadd.f32 %v12471_v12, %v12311_v18 }
 0x6fd   : > { %v18379_v44 = vpop.f32.mrf.mxu1  ;;  %v12271_v28 = vpop.f32.mrf.mxu0 }
 0x6fe   : > { %v12312_v4 = vadd.f32 %v12271_v28, %v25429_v19 }
 0x6ff   : > { %v12476_v29 = vpop.f32.mrf.mxu1  ;;  %v18330_v33 = vpop.f32.mrf.mxu0 }
 0x700   : > { %v25526_v9 = vadd.f32 %v12476_v29, %v12312_v4 }
 0x701   : > { %v18382_v10 = vpop.f32.mrf.mxu1  ;;  %v12274_v30 = vpop.f32.mrf.mxu0 }
 0x702   : > { %v12313_v20 = vadd.f32 %v12274_v30, %v25432_v1 }
 0x703   : > { %v12479_v59 = vpop.f32.mrf.mxu1  ;;  %v18331_v16 = vpop.f32.mrf.mxu0 }
 0x704   : > { %v25529_v7 = vadd.f32 %v12479_v59, %v12313_v20 }
 0x705   : > { %v18383_v45 = vpop.f32.mrf.mxu1  ;;  %v12279_v43 = vpop.f32.mrf.mxu0 }
 0x706   : > { %v12314_v5 = vadd.f32 %v12279_v43, %v25443_v17 }
 0x707   : > { %v12484_v41 = vpop.f32.mrf.mxu1  ;;  %v18334_v46 = vpop.f32.mrf.mxu0 }
 0x708   : > { %v25532_v6 = vadd.f32 %v12484_v41, %v12314_v5 }
 0x709   : > { %v18386_v19 = vpop.f32.mrf.mxu1  ;;  %v12282_v62 = vpop.f32.mrf.mxu0 }
 0x70a   : > { %v12315_v51 = vadd.f32 %v12282_v62, %v25446_v63 }
 0x70b   : > { %v12487_v24 = vpop.f32.mrf.mxu1  ;;  %v18335_v25 = vpop.f32.mrf.mxu0 }
 0x70c   : > { %v25535_v32 = vadd.f32 %v12487_v24, %v12315_v51 }
 0x70d   : > { %v18387_v1 = vpop.f32.mrf.mxu1  ;;  %v12287_v56 = vpop.f32.mrf.mxu0 }
 0x70e   : > { %v12316_v15 = vadd.f32 %v12287_v56, %v25457_v38 }
 0x70f   : > { %v12492_v23 = vpop.f32.mrf.mxu1  ;;  %v18338_v14 = vpop.f32.mrf.mxu0 }
 0x710   : > { %v25538_v39 = vadd.f32 %v12492_v23, %v12316_v15 }
 0x711   : > { %v18390_v17 = vpop.f32.mrf.mxu1  ;;  %v12290_v35 = vpop.f32.mrf.mxu0 }
 0x712   : > { %v12317_v22 = vadd.f32 %v12290_v35, %v25460_v21 }
 0x713   : > { %v12495_v52 = vpop.f32.mrf.mxu1  ;;  %v18339_v57 = vpop.f32.mrf.mxu0 }
 0x714   : > { %v25541_v49 = vadd.f32 %v12495_v52, %v12317_v22 }
 0x715   : > { %v18391_v63 = vpop.f32.mrf.mxu1  ;;  %v12295_v31 = vpop.f32.mrf.mxu0 }
 0x716   : > { %v12318_v40 = vadd.f32 %v12295_v31, %v25471_v48 }
 0x717   : > { %v12500_v3 = vpop.f32.mrf.mxu1  ;;  %v18342_v53 = vpop.f32.mrf.mxu0 }
 0x718   : > { %v25544_v26 = vadd.f32 %v12500_v3, %v12318_v40 }
 0x719   : > { %v18394_v38 = vpop.f32.mrf.mxu1  ;;  %v12298_v0 = vpop.f32.mrf.mxu0 }
 0x71a   : > { %v12319_v2 = vadd.f32 %v12298_v0, %v25474_v13 }
 0x71b   : > { %v12503_v34 = vpop.f32.mrf.mxu1  ;;  %v18343_v36 = vpop.f32.mrf.mxu0 }
 0x71c   : > { %v25547_v11 = vadd.f32 %v12503_v34, %v12319_v2 }
 0x71d   : > { %v18395_v21 = vpop.f32.mrf.mxu1  ;;  %v12775_v18 = vpop.f32.mrf.mxu0 }
 0x71e   : > { %v12846_v12 = vadd.f32 %v12775_v18, %v25485_v27 }
 0x71f   : > { %v13127_v60 = vpop.f32.mrf.mxu1  ;;  %v18414_v44 = vpop.f32.mrf.mxu0 }
 0x720   : > { %v25550_v28 = vadd.f32 %v13127_v60, %v12846_v12 }
 0x721   : > { %v18466_v48 = vpop.f32.mrf.mxu1  ;;  %v12778_v4 = vpop.f32.mrf.mxu0 }
 0x722   : > { %v12847_v29 = vadd.f32 %v12778_v4, %v25488_v55 }
 0x723   : > { %v13130_v33 = vpop.f32.mrf.mxu1  ;;  %v18415_v10 = vpop.f32.mrf.mxu0 }
 0x724   : > { %v25553_v30 = vadd.f32 %v13130_v33, %v12847_v29 }
 0x725   : > { %v18467_v13 = vpop.f32.mrf.mxu1  ;;  %v12783_v20 = vpop.f32.mrf.mxu0 }
 0x726   : > { %v12848_v59 = vadd.f32 %v12783_v20, %v25499_v54 }
 0x727   : > { %v13135_v16 = vpop.f32.mrf.mxu1  ;;  %v18418_v45 = vpop.f32.mrf.mxu0 }
 0x728   : > { %v25556_v43 = vadd.f32 %v13135_v16, %v12848_v59 }
 0x729   : > { %v18470_v27 = vpop.f32.mrf.mxu1  ;;  %v12786_v5 = vpop.f32.mrf.mxu0 }
 0x72a   : > { %v12849_v41 = vadd.f32 %v12786_v5, %v25505_v47 }
 0x72b   : > { %v13138_v46 = vpop.f32.mrf.mxu1  ;;  %v18419_v19 = vpop.f32.mrf.mxu0 }
 0x72c   : > { %v25559_v62 = vadd.f32 %v13138_v46, %v12849_v41 }
 0x72d   : > { %v18471_v55 = vpop.f32.mrf.mxu1  ;;  %v12791_v51 = vpop.f32.mrf.mxu0 }
 0x72e   : > { %v12850_v24 = vadd.f32 %v12791_v51, %v25508_v58 }
 0x72f   : > { %v13143_v25 = vpop.f32.mrf.mxu1  ;;  %v18422_v1 = vpop.f32.mrf.mxu0 }
 0x730   : > { %v25562_v56 = vadd.f32 %v13143_v25, %v12850_v24 }
 0x731   : > { %v18474_v54 = vpop.f32.mrf.mxu1  ;;  %v12794_v15 = vpop.f32.mrf.mxu0 }
 0x732   : > { %v12851_v23 = vadd.f32 %v12794_v15, %v25511_v50 }
 0x733   : > { %v13146_v14 = vpop.f32.mrf.mxu1  ;;  %v18423_v17 = vpop.f32.mrf.mxu0 }
 0x734   : > { %v25565_v35 = vadd.f32 %v13146_v14, %v12851_v23 }
 0x735   : > { %v18475_v47 = vpop.f32.mrf.mxu1  ;;  %v12799_v22 = vpop.f32.mrf.mxu0 }
 0x736   : > { %v12852_v52 = vadd.f32 %v12799_v22, %v25514_v37 }
 0x737   : > { %v13151_v57 = vpop.f32.mrf.mxu1  ;;  %v18426_v63 = vpop.f32.mrf.mxu0 }
 0x738   : > { %v25568_v31 = vadd.f32 %v13151_v57, %v12852_v52 }
 0x739   : > { %v18478_v58 = vpop.f32.mrf.mxu1  ;;  %v12802_v40 = vpop.f32.mrf.mxu0 }
 0x73a   : > { %v12853_v3 = vadd.f32 %v12802_v40, %v25517_v42 }
 0x73b   : > { %v13154_v53 = vpop.f32.mrf.mxu1  ;;  %v18427_v38 = vpop.f32.mrf.mxu0 }
 0x73c   : > { %v25571_v0 = vadd.f32 %v13154_v53, %v12853_v3 }
 0x73d   : > { %v18479_v50 = vpop.f32.mrf.mxu1  ;;  %v12807_v2 = vpop.f32.mrf.mxu0 }
 0x73e   : > { %v12854_v34 = vadd.f32 %v12807_v2, %v25520_v8 }
 0x73f   : > { %v13159_v36 = vpop.f32.mrf.mxu1  ;;  %v18430_v21 = vpop.f32.mrf.mxu0 }
 0x740   : > { %v25574_v18 = vadd.f32 %v13159_v36, %v12854_v34 }
 0x741   : > { %v18482_v37 = vpop.f32.mrf.mxu1  ;;  %v12810_v12 = vpop.f32.mrf.mxu0 }
 0x742   : > { %v12855_v60 = vadd.f32 %v12810_v12, %v25523_v61 }
 0x743   : > { %v13162_v44 = vpop.f32.mrf.mxu1  ;;  %v18431_v48 = vpop.f32.mrf.mxu0 }
 0x744   : > { %v25577_v4 = vadd.f32 %v13162_v44, %v12855_v60  ;;  %v15571_v44 = vld [vmem:[%s19541_s14 + $0x90] sm:$0xff]  }
 0x745   : > { %v18483_v42 = vpop.f32.mrf.mxu1  ;;  %v12815_v29 = vpop.f32.mrf.mxu0 }
 0x746   : > { %v12856_v33 = vadd.f32 %v12815_v29, %v25526_v9 }
 0x747   : > { %v13167_v10 = vpop.f32.mrf.mxu1  ;;  %v18434_v13 = vpop.f32.mrf.mxu0 }
 0x748   : > { %v25580_v20 = vadd.f32 %v13167_v10, %v12856_v33  ;;  %v15498_v10 = vunpack.c.l.bf16 %v15571_v44 }
 0x749   : > { %v18486_v8 = vpop.f32.mrf.mxu1  ;;  %v12818_v59 = vpop.f32.mrf.mxu0 }
 0x74a   : > { %v12857_v16 = vadd.f32 %v12818_v59, %v25529_v7 }
 0x74b   : > { %v13170_v45 = vpop.f32.mrf.mxu1  ;;  %v18435_v27 = vpop.f32.mrf.mxu0 }
 0x74c   : > { %v25583_v5 = vadd.f32 %v13170_v45, %v12857_v16 }
 0x74d   : > { %v18487_v61 = vpop.f32.mrf.mxu1  ;;  %v12823_v41 = vpop.f32.mrf.mxu0 }
 0x74e   : > { %v12858_v46 = vadd.f32 %v12823_v41, %v25532_v6  ;;  %v15499_v61 = vunpack.c.h.bf16 %v15571_v44 }
 0x74f   : > { %v13175_v19 = vpop.f32.mrf.mxu1  ;;  %v18438_v55 = vpop.f32.mrf.mxu0 }
 0x750   : > { %v25586_v51 = vadd.f32 %v13175_v19, %v12858_v46  ;;  %v15572_v19 = vld [vmem:[%s19541_s14 + $0x98] sm:$0xff]  }
 0x751   : > { %v18490_v9 = vpop.f32.mrf.mxu1  ;;  %v12826_v24 = vpop.f32.mrf.mxu0 }
 0x752   : > { %v12859_v25 = vadd.f32 %v12826_v24, %v25535_v32 }
 0x753   : > { %v13178_v1 = vpop.f32.mrf.mxu1  ;;  %v18439_v54 = vpop.f32.mrf.mxu0 }
 0x754   : > { %v25589_v15 = vadd.f32 %v13178_v1, %v12859_v25 }
 0x755   : > { %v18491_v7 = vpop.f32.mrf.mxu1  ;;  %v12831_v23 = vpop.f32.mrf.mxu0 }
 0x756   : > { %v12860_v14 = vadd.f32 %v12831_v23, %v25538_v39  ;;  %v15502_v7 = vunpack.c.l.bf16 %v15572_v19 }
 0x757   : > { %v13183_v17 = vpop.f32.mrf.mxu1  ;;  %v18442_v47 = vpop.f32.mrf.mxu0 }
 0x758   : > { %v25592_v22 = vadd.f32 %v13183_v17, %v12860_v14 }
 0x759   : > { %v18494_v6 = vpop.f32.mrf.mxu1  ;;  %v12834_v52 = vpop.f32.mrf.mxu0 }
 0x75a   : > { %v12861_v57 = vadd.f32 %v12834_v52, %v25541_v49 }
 0x75b   : > { %v13186_v63 = vpop.f32.mrf.mxu1  ;;  %v18443_v58 = vpop.f32.mrf.mxu0 }
 0x75c   : > { %v25595_v32 = vadd.f32 %v13186_v63, %v12861_v57  ;;  %v15503_v58 = vunpack.c.h.bf16 %v15572_v19 }
 0x75d   : > { %v18495_v40 = vpop.f32.mrf.mxu1  ;;  %v12839_v3 = vpop.f32.mrf.mxu0 }
 0x75e   : > { %v12862_v53 = vadd.f32 %v12839_v3, %v25544_v26  ;;  %v25608_v26 = vld [vmem:[%s25678_s4] ss:$0 sm:$0xff] }
 0x75f   : > { %v13191_v38 = vpop.f32.mrf.mxu1  ;;  %v18446_v50 = vpop.f32.mrf.mxu0 }
 0x760   : > { %v25598_v39 = vadd.f32 %v13191_v38, %v12862_v53  ;;  %v15573_v53 = vld [vmem:[%s19541_s14 + $0xa0] sm:$0xff]  }
 0x761   : > { %v18498_v2 = vpop.f32.mrf.mxu1  ;;  %v12842_v34 = vpop.f32.mrf.mxu0 }
 0x762   : > { %v12863_v36 = vadd.f32 %v12842_v34, %v25547_v11 }
 0x763   : > { %v13194_v21 = vpop.f32.mrf.mxu1  ;;  %v18447_v37 = vpop.f32.mrf.mxu0 }
 0x764   : > { %v25601_v49 = vadd.f32 %v13194_v21, %v12863_v36  ;;  %v15506_v37 = vunpack.c.l.bf16 %v15573_v53 }
 0x765   : > { %v18499_v12 = vpop.f32.mrf.mxu1  ;;  %v13332_v60 = vpop.f32.mrf.mxu0 }
 0x766   : > { %v13403_v48 = vadd.f32 %v13332_v60, %v25550_v28 }
 0x767   : > { %v13671_v42 = vpop.f32.mrf.mxu1  ;;  %v18518_v29 = vpop.f32.mrf.mxu0 }
 0x768   : > { %v13742_v33 = vadd.f32 %v13671_v42, %v13403_v48 }
 0x769   : > { %v18570_v11 = vpop.f32.mrf.mxu1  ;;  %v13335_v13 = vpop.f32.mrf.mxu0 }
 0x76a   : > { %v13803_v8 = vadd.f32 %v25608_v26, %v13742_v33  ;;  %v13404_v59 = vadd.f32 %v13335_v13, %v25553_v30  ;;  %v15507_v11 = vunpack.c.h.bf16 %v15573_v53 }
 0x76b   : > { %v13674_v16 = vpop.f32.mrf.mxu1  ;;  %v18519_v45 = vpop.f32.mrf.mxu0 }
 0x76c   : > { %v13821_v28 = vadd.f32 %v15498_v10, %v13803_v8  ;;  %v13743_v27 = vadd.f32 %v13674_v16, %v13404_v59  ;;  %v15574_v59 = vld [vmem:[%s19541_s14 + $0xa8] sm:$0xff]  }
 0x76d   : > { %v18571_v41 = vpop.f32.mrf.mxu1  ;;  %v13340_v46 = vpop.f32.mrf.mxu0 }
 0x76e   : > { %v13839_v55 = vmax.f32 %v13821_v28, 0.0  ;;  %v13804_v9 = vadd.f32 %v25608_v26, %v13743_v27  ;;  %v13405_v24 = vadd.f32 %v13340_v46, %v25556_v43  ;;  %v15510_v46 = vunpack.c.l.bf16 %v15574_v59 }
 0x76f   : > { %v13679_v25 = vpop.f32.mrf.mxu1  ;;  %v18522_v1 = vpop.f32.mrf.mxu0 }
 0x770   : > { %15247 = vst [vmem:[%s24833_s27 + $0x9f] sm:$0xfe] %v13839_v55  ;;  %v13822_v54 = vadd.f32 %v15499_v61, %v13804_v9  ;;  %v13744_v30 = vadd.f32 %v13679_v25, %v13405_v24 }
 0x771   : > { %v18574_v23 = vpop.f32.mrf.mxu1  ;;  %v13343_v14 = vpop.f32.mrf.mxu0 }
 0x772   : > { %v13840_v17 = vmax.f32 %v13822_v54, 0.0  ;;  %v13805_v47 = vadd.f32 %v25608_v26, %v13744_v30  ;;  %v13406_v6 = vadd.f32 %v13343_v14, %v25559_v62 }
 0x773   : > { %v13682_v52 = vpop.f32.mrf.mxu1  ;;  %v18523_v57 = vpop.f32.mrf.mxu0 }
 0x774   : > { %15248 = vst [vmem:[%s24833_s27 + $0xa7] sm:$0xff] %v13840_v17  ;;  %v13823_v63 = vadd.f32 %v15502_v7, %v13805_v47  ;;  %v13745_v43 = vadd.f32 %v13682_v52, %v13406_v6  ;;  %v15511_v7 = vunpack.c.h.bf16 %v15574_v59  ;;  %v15575_v17 = vld [vmem:[%s19541_s14 + $0xb0] sm:$0xff]  }
 0x775   : > { %v18575_v40 = vpop.f32.mrf.mxu1  ;;  %v13348_v3 = vpop.f32.mrf.mxu0 }
 0x776   : > { %v13841_v38 = vmax.f32 %v13823_v63, 0.0  ;;  %v13806_v50 = vadd.f32 %v25608_v26, %v13745_v43  ;;  %v13407_v2 = vadd.f32 %v13348_v3, %v25562_v56 }
 0x777   : > { %v13687_v34 = vpop.f32.mrf.mxu1  ;;  %v18526_v36 = vpop.f32.mrf.mxu0 }
 0x778   : > { %15249 = vst [vmem:[%s24833_s27 + $0xaf] sm:$0x1] %v13841_v38  ;;  %v13824_v21 = vadd.f32 %v15503_v58, %v13806_v50  ;;  %v13746_v62 = vadd.f32 %v13687_v34, %v13407_v2  ;;  %v15514_v58 = vunpack.c.l.bf16 %v15575_v17 }
 0x779   : > { %v18578_v12 = vpop.f32.mrf.mxu1  ;;  %v13351_v60 = vpop.f32.mrf.mxu0 }
 0x77a   : > { %v13842_v44 = vmax.f32 %v13824_v21, 0.0  ;;  %v13807_v48 = vadd.f32 %v25608_v26, %v13746_v62  ;;  %v13408_v42 = vadd.f32 %v13351_v60, %v25565_v35  ;;  %v15515_v21 = vunpack.c.h.bf16 %v15575_v17  ;;  %v15576_v12 = vld [vmem:[%s19541_s14 + $0xb8] sm:$0xff]  }
 0x77b   : > { %v13690_v29 = vpop.f32.mrf.mxu1  ;;  %v18527_v33 = vpop.f32.mrf.mxu0 }
 0x77c   : > { %15250 = vst [vmem:[%s24833_s27 + $0xaf] sm:$0xfe] %v13842_v44  ;;  %v13825_v10 = vadd.f32 %v15506_v37, %v13807_v48  ;;  %v13747_v56 = vadd.f32 %v13690_v29, %v13408_v42 }
 0x77d   : > { %v18579_v13 = vpop.f32.mrf.mxu1  ;;  %v13356_v8 = vpop.f32.mrf.mxu0 }
 0x77e   : > { %v13843_v16 = vmax.f32 %v13825_v10, 0.0  ;;  %v13808_v45 = vadd.f32 %v25608_v26, %v13747_v56  ;;  %v13409_v28 = vadd.f32 %v13356_v8, %v25568_v31  ;;  %v15518_v10 = vunpack.c.l.bf16 %v15576_v12 }
 0x77f   : > { %v13695_v27 = vpop.f32.mrf.mxu1  ;;  %v18530_v61 = vpop.f32.mrf.mxu0 }
 0x780   : > { %15251 = vst [vmem:[%s24833_s27 + $0xb7] sm:$0xff] %v13843_v16  ;;  %v13826_v41 = vadd.f32 %v15507_v11, %v13808_v45  ;;  %v13748_v35 = vadd.f32 %v13695_v27, %v13409_v28  ;;  %v15519_v27 = vunpack.c.h.bf16 %v15576_v12 }
 0x781   : > { %v18582_v19 = vpop.f32.mrf.mxu1  ;;  %v13359_v55 = vpop.f32.mrf.mxu0 }
 0x782   : > { %v13844_v9 = vmax.f32 %v13826_v41, 0.0  ;;  %v13809_v24 = vadd.f32 %v25608_v26, %v13748_v35  ;;  %v13410_v25 = vadd.f32 %v13359_v55, %v25571_v0  ;;  %v15577_v35 = vld [vmem:[%s19541_s14 + $0xc0] sm:$0xff]  }
 0x783   : > { %v13698_v1 = vpop.f32.mrf.mxu1  ;;  %v18531_v54 = vpop.f32.mrf.mxu0 }
 0x784   : > { %15252 = vst [vmem:[%s24833_s27 + $0xbf] sm:$0x1] %v13844_v9  ;;  %v13827_v30 = vadd.f32 %v15510_v46, %v13809_v24  ;;  %v13749_v31 = vadd.f32 %v13698_v1, %v13410_v25  ;;  %v15522_v1 = vunpack.c.l.bf16 %v15577_v35 }
 0x785   : > { %v18583_v23 = vpop.f32.mrf.mxu1  ;;  %v13364_v14 = vpop.f32.mrf.mxu0 }
 0x786   : > { %v13845_v47 = vmax.f32 %v13827_v30, 0.0  ;;  %v13810_v6 = vadd.f32 %v25608_v26, %v13749_v31  ;;  %v13411_v52 = vadd.f32 %v13364_v14, %v25574_v18 }
 0x787   : > { %v13703_v57 = vpop.f32.mrf.mxu1  ;;  %v18534_v63 = vpop.f32.mrf.mxu0 }
 0x788   : > { %15253 = vst [vmem:[%s24833_s27 + $0xbf] sm:$0xfe] %v13845_v47  ;;  %v13828_v43 = vadd.f32 %v15511_v7, %v13810_v6  ;;  %v13750_v0 = vadd.f32 %v13703_v57, %v13411_v52  ;;  %v15523_v6 = vunpack.c.h.bf16 %v15577_v35  ;;  %v15578_v63 = vld [vmem:[%s19541_s14 + $0xc8] sm:$0xff]  }
 0x789   : > { %v18586_v40 = vpop.f32.mrf.mxu1  ;;  %v13367_v3 = vpop.f32.mrf.mxu0  ;;  %v15527_v12 = vunpack.c.h.bf16 %v15578_v63 }
 0x78a   : > { %v13846_v53 = vmax.f32 %v13828_v43, 0.0  ;;  %v13811_v38 = vadd.f32 %v25608_v26, %v13750_v0  ;;  %v13412_v50 = vadd.f32 %v13367_v3, %v25577_v4 }
 0x78b   : > { %v13706_v2 = vpop.f32.mrf.mxu1  ;;  %v18535_v34 = vpop.f32.mrf.mxu0 }
 0x78c   : > { %15254 = vst [vmem:[%s24833_s27 + $0xc7] sm:$0xff] %v13846_v53  ;;  %v13829_v36 = vadd.f32 %v15514_v58, %v13811_v38  ;;  %v13751_v18 = vadd.f32 %v13706_v2, %v13412_v50  ;;  %v15526_v38 = vunpack.c.l.bf16 %v15578_v63 }
 0x78d   : > { %v18587_v62 = vpop.f32.mrf.mxu1  ;;  %v13372_v37 = vpop.f32.mrf.mxu0 }
 0x78e   : > { %v13847_v60 = vmax.f32 %v13829_v36, 0.0  ;;  %v13812_v44 = vadd.f32 %v25608_v26, %v13751_v18  ;;  %v13413_v48 = vadd.f32 %v13372_v37, %v25580_v20 }
 0x78f   : > { %v13711_v42 = vpop.f32.mrf.mxu1  ;;  %v18538_v29 = vpop.f32.mrf.mxu0 }
 0x790   : > { %15255 = vst [vmem:[%s24833_s27 + $0xcf] sm:$0x1] %v13847_v60  ;;  %v13830_v33 = vadd.f32 %v15515_v21, %v13812_v44  ;;  %v13752_v4 = vadd.f32 %v13711_v42, %v13413_v48  ;;  %v15579_v48 = vld [vmem:[%s19541_s14 + $0xd0] sm:$0xff]  }
 0x791   : > { %v18590_v56 = vpop.f32.mrf.mxu1  ;;  %v13375_v11 = vpop.f32.mrf.mxu0 }
 0x792   : > { %v13848_v13 = vmax.f32 %v13830_v33, 0.0  ;;  %v13813_v8 = vadd.f32 %v25608_v26, %v13752_v4  ;;  %v13414_v59 = vadd.f32 %v13375_v11, %v25583_v5  ;;  %v15530_v11 = vunpack.c.l.bf16 %v15579_v48 }
 0x793   : > { %v13714_v16 = vpop.f32.mrf.mxu1  ;;  %v18539_v45 = vpop.f32.mrf.mxu0 }
 0x794   : > { %15256 = vst [vmem:[%s24833_s27 + $0xcf] sm:$0xfe] %v13848_v13  ;;  %v13831_v28 = vadd.f32 %v15518_v10, %v13813_v8  ;;  %v13753_v20 = vadd.f32 %v13714_v16, %v13414_v59 }
 0x795   : > { %v18591_v61 = vpop.f32.mrf.mxu1  ;;  %v13380_v41 = vpop.f32.mrf.mxu0 }
 0x796   : > { %v13849_v46 = vmax.f32 %v13831_v28, 0.0  ;;  %v13814_v19 = vadd.f32 %v25608_v26, %v13753_v20  ;;  %v13415_v55 = vadd.f32 %v13380_v41, %v25586_v51  ;;  %v15531_v61 = vunpack.c.h.bf16 %v15579_v48 }
 0x797   : > { %v13719_v9 = vpop.f32.mrf.mxu1  ;;  %v18542_v24 = vpop.f32.mrf.mxu0 }
 0x798   : > { %15257 = vst [vmem:[%s24833_s27 + $0xd7] sm:$0xff] %v13849_v46  ;;  %v13832_v25 = vadd.f32 %v15519_v27, %v13814_v19  ;;  %v13754_v5 = vadd.f32 %v13719_v9, %v13415_v55 }
 0x799   : > { %v18594_v54 = vpop.f32.mrf.mxu1  ;;  %v13383_v30 = vpop.f32.mrf.mxu0 }
 0x79a   : > { %v13850_v31 = vmax.f32 %v13832_v25, 0.0  ;;  %v13815_v7 = vadd.f32 %v25608_v26, %v13754_v5  ;;  %v13416_v23 = vadd.f32 %v13383_v30, %v25589_v15 }
 0x79b   : > { %v13722_v14 = vpop.f32.mrf.mxu1  ;;  %v18543_v17 = vpop.f32.mrf.mxu0 }
 0x79c   : > { %15258 = vst [vmem:[%s24833_s27 + $0xdf] sm:$0x1] %v13850_v31  ;;  %v13833_v47 = vadd.f32 %v15522_v1, %v13815_v7  ;;  %v13755_v51 = vadd.f32 %v13722_v14, %v13416_v23 }
 0x79d   : > { %v18595_v52 = vpop.f32.mrf.mxu1  ;;  %v13388_v57 = vpop.f32.mrf.mxu0 }
 0x79e   : > { %v13851_v43 = vmax.f32 %v13833_v47, 0.0  ;;  %v13816_v0 = vadd.f32 %v25608_v26, %v13755_v51  ;;  %v13417_v58 = vadd.f32 %v13388_v57, %v25592_v22 }
 0x79f   : > { %v13727_v40 = vpop.f32.mrf.mxu1  ;;  %v18546_v3 = vpop.f32.mrf.mxu0 }
 0x7a0   : > { %15259 = vst [vmem:[%s24833_s27 + $0xdf] sm:$0xfe] %v13851_v43  ;;  %v13834_v53 = vadd.f32 %v15523_v6, %v13816_v0  ;;  %v13756_v15 = vadd.f32 %v13727_v40, %v13417_v58 }
 0x7a1   : > { %v18598_v50 = vpop.f32.mrf.mxu1  ;;  %v13391_v2 = vpop.f32.mrf.mxu0 }
 0x7a2   : > { %v13852_v34 = vmax.f32 %v13834_v53, 0.0  ;;  %v13817_v36 = vadd.f32 %v25608_v26, %v13756_v15  ;;  %v13418_v18 = vadd.f32 %v13391_v2, %v25595_v32 }
 0x7a3   : > { %v13730_v21 = vpop.f32.mrf.mxu1  ;;  %v18547_v62 = vpop.f32.mrf.mxu0 }
 0x7a4   : > { %15260 = vst [vmem:[%s24833_s27 + $0xe7] sm:$0xff] %v13852_v34  ;;  %v13835_v37 = vadd.f32 %v15526_v38, %v13817_v36  ;;  %v13757_v22 = vadd.f32 %v13730_v21, %v13418_v18 }
 0x7a5   : > { %v18599_v60 = vpop.f32.mrf.mxu1  ;;  %v13396_v44 = vpop.f32.mrf.mxu0 }
 0x7a6   : > { %v13853_v42 = vmax.f32 %v13835_v37, 0.0  ;;  %v13818_v29 = vadd.f32 %v25608_v26, %v13757_v22  ;;  %v13419_v33 = vadd.f32 %v13396_v44, %v25598_v39 }
 0x7a7   : > { %v13735_v4 = vpop.f32.mrf.mxu1  ;;  %v18550_v10 = vpop.f32.mrf.mxu0 }
 0x7a8   : > { %15261 = vst [vmem:[%s24833_s27 + $0xef] sm:$0x1] %v13853_v42  ;;  %v13836_v56 = vadd.f32 %v15527_v12, %v13818_v29  ;;  %v13758_v32 = vadd.f32 %v13735_v4, %v13419_v33 }
 0x7a9   : > { %v18602_v13 = vpop.f32.mrf.mxu1  ;;  %v13399_v8 = vpop.f32.mrf.mxu0 }
 0x7aa   : > { %v13854_v59 = vmax.f32 %v13836_v56, 0.0  ;;  %v13819_v16 = vadd.f32 %v25608_v26, %v13758_v32  ;;  %v13420_v45 = vadd.f32 %v13399_v8, %v25601_v49 }
 0x7ab   : > { %v13738_v28 = vpop.f32.mrf.mxu1  ;;  %v18551_v20 = vpop.f32.mrf.mxu0 }
 0x7ac   : > { %15262 = vst [vmem:[%s24833_s27 + $0xef] sm:$0xfe] %v13854_v59  ;;  %v13837_v27 = vadd.f32 %v15530_v11, %v13819_v16  ;;  %v13759_v39 = vadd.f32 %v13738_v28, %v13420_v45 }
 0x7ad   : > { %v18603_v41 = vpop.f32.mrf.mxu1 }
 0x7ae   : > { %v13855_v35 = vmax.f32 %v13837_v27, 0.0  ;;  %v13820_v46 = vadd.f32 %v25608_v26, %v13759_v39 }
 0x7b0   : > { %15263 = vst [vmem:[%s24833_s27 + $0xf7] sm:$0xff] %v13855_v35  ;;  %v13838_v19 = vadd.f32 %v15531_v61, %v13820_v46 }
 0x7b2   : > { %v13856_v55 = vmax.f32 %v13838_v19, 0.0 }
 0x7b4   : > { %15264 = vst [vmem:[%s24833_s27 + $0xff] sm:$0x1] %v13856_v55 }
 0x7b5 PF: > { %s15_s18 = sadd.s32 1, %s19456_s18  }
 0x7b6   : > { %p12_p4 = scmp.ge.s32.totalorder %s15_s18, 4  }
 0x7b8   :  { %14 = sbr.rel (!%p12_p4) target bundleno = 1 (0x1), region = 87 }

</bundles_post_ra>
